<compile_context>
chip_gen: v6e
topology: v6e:2x2x1
jax: 0.10.0
libtpu: 0.0.40
codegen_flags: <defaults>
</compile_context>

<pallas_src>
import functools

import jax
import jax.numpy as jnp
from jax.experimental import pallas as pl
from jax.experimental.pallas import tpu as pltpu

EPS = 1e-5


# --------------------------- VMEM budgeting -------------------------------- #
@functools.lru_cache(maxsize=1)
def _vmem_budget_bytes():
    """(scoped vmem limit, tile-sizing budget) derived from the chip."""
    phys = 64 * 1024 * 1024  # conservative fallback (v7x per-core VMEM)
    try:
        info = pltpu.get_tpu_info()
        cap = getattr(info, "vmem_capacity_bytes", None)
        if cap:
            phys = int(cap)
    except Exception:
        pass
    limit = int(min(phys * 3 // 4, 100 * 1024 * 1024))  # 96 MiB v5e/v6e, 48 MiB v7x
    budget = int(limit * 0.8)                            # headroom for Mosaic scratch
    return limit, budget


# ----------------------------- Pallas kernel ------------------------------- #
def _fused_matmul_kernel(x_ref, w_ref, b_ref, o_ref, acc_ref, *, relu):
    """One (tm, tk) @ (tk, tn) MXU step of  out = act(x @ w + bias).

    Grid = (N-tiles, M-tiles, K-tiles), K innermost.  acc_ref is the f32 VMEM
    accumulator resident across the K axis: zeroed at k==0; bias add, optional
    ReLU and dtype cast at k==last."""
    k = pl.program_id(2)

    @pl.when(k == 0)
    def _():
        acc_ref[...] = jnp.zeros_like(acc_ref)

    acc_ref[...] += jnp.dot(x_ref[...], w_ref[...],
                            preferred_element_type=jnp.float32)

    @pl.when(k == pl.num_programs(2) - 1)
    def _():
        y = acc_ref[...] + b_ref[...]
        if relu:
            y = jnp.maximum(y, 0.0)
        o_ref[...] = y.astype(o_ref.dtype)


# --------------------------- tile-size selection --------------------------- #
def _pick_tn(N):
    if N % 128 != 0:
        return N                      # full-dim block (legal for any width)
    return 256 if N % 256 == 0 else 128


def _pick_tk(K, tn, budget):
    # Whole K if the double-buffered (K, tn) bf16 weight tile stays within
    # ~1/3 of the budget, or if K cannot be 128-tiled at all.
    if K % 128 != 0 or 2 * K * tn * 2 <= budget // 3:
        return K
    cap = max(128, (budget // 3) // (2 * tn * 2))
    q = K // 128
    tk = 128
    for d in range(1, q + 1):         # largest 128*d dividing K that fits
        if q % d == 0 and 128 * d <= cap:
            tk = 128 * d
    return tk


def _pick_tm(M, tk, tn, out_bytes, budget):
    fixed = 2 * tk * tn * 2 + 2 * tn * 4                   # weight dbuf + bias dbuf
    per_row = 2 * tk * 2 + 2 * tn * out_bytes + tn * 4     # x dbuf + out dbuf + acc
    cap = max(16, (budget - fixed) // per_row)
    cap = min(cap, 1024)
    if M <= cap:
        return M                      # single M tile (full-dim block is legal)
    return max(16, (cap // 16) * 16)  # bf16 sublane packing -> multiple of 16


# ----------------------------- fused matmul -------------------------------- #
def fused_matmul_bias(x, w, bias, *, relu, out_dtype=jnp.bfloat16):
    """out = act(x @ w + bias), one fused Pallas kernel (bf16 MXU, f32 acc)."""
    M, K = x.shape
    Kw, N = w.shape
    assert K == Kw

    x = x.astype(jnp.bfloat16)
    w = w.astype(jnp.bfloat16)
    bias2 = bias.reshape(1, N).astype(jnp.float32)

    vmem_limit, budget = _vmem_budget_bytes()
    out_bytes = jnp.dtype(out_dtype).itemsize
    tn = _pick_tn(N)
    tk = _pick_tk(K, tn, budget)
    tm = _pick_tm(M, tk, tn, out_bytes, budget)

    # Grid = (N-tiles, M-tiles, K-tiles).  With a single K tile the weight
    # block index (k=0, j) is constant over the inner M loop, so it is not
    # re-fetched per step; with K split the f32 scratch accumulates.
    grid = (pl.cdiv(N, tn), pl.cdiv(M, tm), pl.cdiv(K, tk))

    return pl.pallas_call(
        functools.partial(_fused_matmul_kernel, relu=relu),
        out_shape=jax.ShapeDtypeStruct((M, N), out_dtype),
        grid_spec=pltpu.PrefetchScalarGridSpec(
            num_scalar_prefetch=0,
            grid=grid,
            in_specs=[
                pl.BlockSpec((tm, tk), lambda j, i, k: (i, k)),
                pl.BlockSpec((tk, tn), lambda j, i, k: (k, j)),
                pl.BlockSpec((1, tn), lambda j, i, k: (0, j)),
            ],
            out_specs=pl.BlockSpec((tm, tn), lambda j, i, k: (i, j)),
            scratch_shapes=[pltpu.VMEM((tm, tn), jnp.float32)],
        ),
        compiler_params=pltpu.CompilerParams(
            dimension_semantics=("parallel", "parallel", "arbitrary"),
            vmem_limit_bytes=vmem_limit,
        ),
    )(x, w, bias2)


# ------------------------------ JAX glue ----------------------------------- #
def im2col(x_nhwc, stride):
    """3x3, padding=1 patches.  Returns (N*Ho*Wo, 9*C) in (ky, kx, c) order."""
    n, h, w, c = x_nhwc.shape
    ho = (h + 2 - 3) // stride + 1
    wo = (w + 2 - 3) // stride + 1
    xp = jnp.pad(x_nhwc, ((0, 0), (1, 1), (1, 1), (0, 0)))
    taps = []
    for ky in range(3):
        for kx in range(3):
            taps.append(
                xp[:,
                   ky: ky + (ho - 1) * stride + 1: stride,
                   kx: kx + (wo - 1) * stride + 1: stride,
                   :])
    cols = jnp.concatenate(taps, axis=-1)          # (n, ho, wo, 9*c), bf16
    return cols.reshape(n * ho * wo, 9 * c), ho, wo


def _fold_bn_into_conv(wconv, gamma, beta, mean, var):
    """Fold eval-mode BN into the conv weight/bias (no channel padding)."""
    s = gamma / jnp.sqrt(var + EPS)                # (cout,)
    b = beta - mean * s                            # (cout,)
    w = wconv * s[None, None, None, :]             # scale folded into columns
    k1, k2, cin, cout = wconv.shape
    return w.reshape(k1 * k2 * cin, cout), b


def init_params(key, c_in, h, w, out_dim):
    chans = [c_in, 32, 64, 128, 256, 256]
    keys = jax.random.split(key, 64)
    k = iter(range(64))

    def nk():
        return keys[next(k)]

    params = {}
    for i in range(5):
        cin, cout = chans[i], chans[i + 1]
        fan_in = 9 * cin
        params[f"conv{i}_w"] = (
            jax.random.normal(nk(), (3, 3, cin, cout), jnp.float32)
            * (2.0 / fan_in) ** 0.5)                        # HWIO
        params[f"bn{i}_gamma"] = 1.0 + 0.1 * jax.random.normal(nk(), (cout,), jnp.float32)
        params[f"bn{i}_beta"] = 0.1 * jax.random.normal(nk(), (cout,), jnp.float32)
        params[f"bn{i}_mean"] = 0.1 * jax.random.normal(nk(), (cout,), jnp.float32)
        params[f"bn{i}_var"] = jax.random.uniform(nk(), (cout,), jnp.float32, 0.5, 1.5)

    feat = 256 * (h // 16) * (w // 16)
    params["lin_w"] = jax.random.normal(nk(), (feat, out_dim), jnp.float32) / feat ** 0.5
    params["lin_b"] = 0.1 * jax.random.normal(nk(), (out_dim,), jnp.float32)
    params["lbn_gamma"] = 1.0 + 0.1 * jax.random.normal(nk(), (out_dim,), jnp.float32)
    params["lbn_beta"] = 0.1 * jax.random.normal(nk(), (out_dim,), jnp.float32)
    params["lbn_mean"] = 0.1 * jax.random.normal(nk(), (out_dim,), jnp.float32)
    params["lbn_var"] = jax.random.uniform(nk(), (out_dim,), jnp.float32, 0.5, 1.5)
    return params


def cnn_encoder_forward(x, params, output_activation="relu"):
    # x: (B, L, C, H, W)  ->  (B, L, out_dim)
    b, l, c, h, w = x.shape
    assert h % 16 == 0 and w % 16 == 0, "CnnEncoder assumes H, W divisible by 16"
    n = b * l
    x = x.reshape(n, c, h, w)                                # '(b l) c h w'
    x = jnp.transpose(x, (0, 2, 3, 1)).astype(jnp.bfloat16)  # NCHW -> NHWC, bf16

    chans = [c, 32, 64, 128, 256, 256]
    strides = (1, 2, 2, 2, 2)
    for i, s in enumerate(strides):
        cout = chans[i + 1]
        wflat, bvec = _fold_bn_into_conv(
            params[f"conv{i}_w"],
            params[f"bn{i}_gamma"], params[f"bn{i}_beta"],
            params[f"bn{i}_mean"], params[f"bn{i}_var"])
        cols, ho, wo = im2col(x, s)                # bf16, (n*ho*wo, 9*cin)
        y = fused_matmul_bias(cols, wflat, bvec, relu=True,
                              out_dtype=jnp.bfloat16)
        x = y.reshape(n, ho, wo, cout)

    # nn.Flatten on NCHW flattens in (C, H, W) order; instead of transposing
    # the activation, permute the Linear weight rows to (H, W, C) order once.
    feat = x.reshape(n, -1)                                  # NHWC-flat
    hf, wf, cf = h // 16, w // 16, chans[-1]
    w_lin = (params["lin_w"]
             .reshape(cf, hf, wf, -1)
             .transpose(1, 2, 0, 3)
             .reshape(cf * hf * wf, -1))                     # rows now (H,W,C)
    b_lin = params["lin_b"]
    out_dim = w_lin.shape[1]

    if output_activation == "relu":
        s = params["lbn_gamma"] / jnp.sqrt(params["lbn_var"] + EPS)
        t = params["lbn_beta"] - params["lbn_mean"] * s
        w_lin = w_lin * s[None, :]        # fold BN1d scale into the weight
        bias = b_lin * s + t              # BN1d(linear + bias) folded
        relu = True
    elif output_activation == "none":     # PyTorch: plain Linear, no BN/ReLU
        bias = b_lin
        relu = False
    else:
        raise NotImplementedError(output_activation)

    out = fused_matmul_bias(feat, w_lin, bias, relu=relu, out_dtype=jnp.float32)
    return out.reshape(b, l, out_dim)


if __name__ == "__main__":
    B, L, C, H, W = 2, 2, 4, 16, 16
    OUT_DIM = 32

    key = jax.random.PRNGKey(0)
    k_x, k_p = jax.random.split(key)
    x = jax.random.normal(k_x, (B, L, C, H, W), jnp.float32)
    params = init_params(k_p, C, H, W, OUT_DIM)

    fwd = jax.jit(functools.partial(cnn_encoder_forward, output_activation="relu"))
    out = jax.block_until_ready(fwd(x, params))
    assert out.shape == (B, L, OUT_DIM), out.shape
    assert bool(jnp.all(jnp.isfinite(out)))
    print("KERNEL_OK")
</pallas_src>

<mosaic_0001>
module attributes {stable_mosaic.version = 11 : i64} {
  func.func @_fused_matmul_kernel(%arg0: i32, %arg1: i32, %arg2: i32, %arg3: memref<1024x36xbf16, #tpu.memory_space<vmem>>, %arg4: memref<36x32xbf16, #tpu.memory_space<vmem>>, %arg5: memref<1x32xf32, #tpu.memory_space<vmem>>, %arg6: memref<1024x32xbf16, #tpu.memory_space<vmem>>, %arg7: memref<1024x32xf32, #tpu.memory_space<vmem>>) attributes {dimension_semantics = [#tpu.dimension_semantics<parallel>, #tpu.dimension_semantics<parallel>, #tpu.dimension_semantics<arbitrary>], iteration_bounds = array<i64: 1, 1, 1>, scalar_prefetch = 0 : i64, scratch_operands = 1 : i64, tpu.core_type = #tpu.core_type<tc>, window_params = [{transform_indices = @transform_0, window_bounds = array<i64: 1024, 36>}, {transform_indices = @transform_1, window_bounds = array<i64: 36, 32>}, {transform_indices = @transform_2, window_bounds = array<i64: 1, 32>}, {transform_indices = @transform_3, window_bounds = array<i64: 1024, 32>}]} {
    %c0_i32 = arith.constant 0 : i32
    %0 = arith.cmpi eq, %arg2, %c0_i32 : i32
    %1 = arith.extui %0 : i1 to i32
    %c0_i32_0 = arith.constant 0 : i32
    %2 = arith.cmpi ne, %1, %c0_i32_0 : i32
    scf.if %2 {
      %cst_10 = arith.constant 0.000000e+00 : f32
      %12 = vector.broadcast %cst_10 : f32 to vector<1024x32xf32>
      %c0_11 = arith.constant 0 : index
      %c0_12 = arith.constant 0 : index
      %13 = vector.load %arg7[%c0_11, %c0_12] : memref<1024x32xf32, #tpu.memory_space<vmem>>, vector<1024x32xf32>
      tpu.vector_store %arg7[%c0_11, %c0_12], %12 {strides = array<i32>} : memref<1024x32xf32, #tpu.memory_space<vmem>>, vector<1024x32xf32>,
    } else {
    }
    %c0 = arith.constant 0 : index
    %c0_1 = arith.constant 0 : index
    %3 = vector.load %arg7[%c0, %c0_1] : memref<1024x32xf32, #tpu.memory_space<vmem>>, vector<1024x32xf32>
    %c0_2 = arith.constant 0 : index
    %c0_3 = arith.constant 0 : index
    %4 = vector.load %arg3[%c0_2, %c0_3] : memref<1024x36xbf16, #tpu.memory_space<vmem>>, vector<1024x36xbf16>
    %c0_4 = arith.constant 0 : index
    %c0_5 = arith.constant 0 : index
    %5 = vector.load %arg4[%c0_4, %c0_5] : memref<36x32xbf16, #tpu.memory_space<vmem>>, vector<36x32xbf16>
    %cst = arith.constant dense<0.000000e+00> : vector<1024x32xf32>
    %6 = tpu.matmul %4, %5, %cst {dimension_numbers = #tpu.dot_dimension_numbers<[1], [0], [0], [1], [0, 0, 1, 1], [], []>} : vector<1024x36xbf16>, vector<36x32xbf16>, vector<1024x32xf32> -> vector<1024x32xf32>
    %7 = arith.addf %3, %6 : vector<1024x32xf32>
    %c0_6 = arith.constant 0 : index
    %c0_7 = arith.constant 0 : index
    %8 = vector.load %arg7[%c0_6, %c0_7] : memref<1024x32xf32, #tpu.memory_space<vmem>>, vector<1024x32xf32>
    tpu.vector_store %arg7[%c0_6, %c0_7], %7 {strides = array<i32>} : memref<1024x32xf32, #tpu.memory_space<vmem>>, vector<1024x32xf32>,
    %c0_i32_8 = arith.constant 0 : i32
    %9 = arith.cmpi eq, %arg2, %c0_i32_8 : i32
    %10 = arith.extui %9 : i1 to i32
    %c0_i32_9 = arith.constant 0 : i32
    %11 = arith.cmpi ne, %10, %c0_i32_9 : i32
    scf.if %11 {
      %c0_10 = arith.constant 0 : index
      %c0_11 = arith.constant 0 : index
      %12 = vector.load %arg7[%c0_10, %c0_11] : memref<1024x32xf32, #tpu.memory_space<vmem>>, vector<1024x32xf32>
      %c0_12 = arith.constant 0 : index
      %c0_13 = arith.constant 0 : index
      %13 = vector.load %arg5[%c0_12, %c0_13] : memref<1x32xf32, #tpu.memory_space<vmem>>, vector<1x32xf32>
      %14 = vector.broadcast %13 : vector<1x32xf32> to vector<1024x32xf32>
      %15 = arith.addf %12, %14 : vector<1024x32xf32>
      %cst_14 = arith.constant 0.000000e+00 : f32
      %16 = vector.broadcast %cst_14 : f32 to vector<1024x32xf32>
      %17 = arith.maximumf %15, %16 : vector<1024x32xf32>
      %18 = arith.truncf %17 : vector<1024x32xf32> to vector<1024x32xbf16>
      %c0_15 = arith.constant 0 : index
      %c0_16 = arith.constant 0 : index
      %19 = vector.load %arg6[%c0_15, %c0_16] : memref<1024x32xbf16, #tpu.memory_space<vmem>>, vector<1024x32xbf16>
      tpu.vector_store %arg6[%c0_15, %c0_16], %18 {strides = array<i32>} : memref<1024x32xbf16, #tpu.memory_space<vmem>>, vector<1024x32xbf16>,
    } else {
    }
    return
  }
  func.func @transform_0(%arg0: i32, %arg1: i32, %arg2: i32) -> (i32, i32) {
    %c0_i32 = arith.constant 0 : i32
    return %arg1, %arg2 : i32, i32
  }
  func.func @transform_1(%arg0: i32, %arg1: i32, %arg2: i32) -> (i32, i32) {
    %c0_i32 = arith.constant 0 : i32
    return %arg2, %arg0 : i32, i32
  }
  func.func @transform_2(%arg0: i32, %arg1: i32, %arg2: i32) -> (i32, i32) {
    %c0_i32 = arith.constant 0 : i32
    %c0_i32_0 = arith.constant 0 : i32
    return %c0_i32, %arg0 : i32, i32
  }
  func.func @transform_3(%arg0: i32, %arg1: i32, %arg2: i32) -> (i32, i32) {
    %c0_i32 = arith.constant 0 : i32
    return %arg1, %arg0 : i32, i32
  }
}

module attributes {stable_mosaic.version = 11 : i64} {
  func.func @_fused_matmul_kernel(%arg0: i32, %arg1: i32, %arg2: i32, %arg3: memref<256x288xbf16, #tpu.memory_space<vmem>>, %arg4: memref<288x64xbf16, #tpu.memory_space<vmem>>, %arg5: memref<1x64xf32, #tpu.memory_space<vmem>>, %arg6: memref<256x64xbf16, #tpu.memory_space<vmem>>, %arg7: memref<256x64xf32, #tpu.memory_space<vmem>>) attributes {dimension_semantics = [#tpu.dimension_semantics<parallel>, #tpu.dimension_semantics<parallel>, #tpu.dimension_semantics<arbitrary>], iteration_bounds = array<i64: 1, 1, 1>, scalar_prefetch = 0 : i64, scratch_operands = 1 : i64, tpu.core_type = #tpu.core_type<tc>, window_params = [{transform_indices = @transform_0, window_bounds = array<i64: 256, 288>}, {transform_indices = @transform_1, window_bounds = array<i64: 288, 64>}, {transform_indices = @transform_2, window_bounds = array<i64: 1, 64>}, {transform_indices = @transform_3, window_bounds = array<i64: 256, 64>}]} {
    %c0_i32 = arith.constant 0 : i32
    %0 = arith.cmpi eq, %arg2, %c0_i32 : i32
    %1 = arith.extui %0 : i1 to i32
    %c0_i32_0 = arith.constant 0 : i32
    %2 = arith.cmpi ne, %1, %c0_i32_0 : i32
    scf.if %2 {
      %cst_10 = arith.constant 0.000000e+00 : f32
      %12 = vector.broadcast %cst_10 : f32 to vector<256x64xf32>
      %c0_11 = arith.constant 0 : index
      %c0_12 = arith.constant 0 : index
      %13 = vector.load %arg7[%c0_11, %c0_12] : memref<256x64xf32, #tpu.memory_space<vmem>>, vector<256x64xf32>
      tpu.vector_store %arg7[%c0_11, %c0_12], %12 {strides = array<i32>} : memref<256x64xf32, #tpu.memory_space<vmem>>, vector<256x64xf32>,
    } else {
    }
    %c0 = arith.constant 0 : index
    %c0_1 = arith.constant 0 : index
    %3 = vector.load %arg7[%c0, %c0_1] : memref<256x64xf32, #tpu.memory_space<vmem>>, vector<256x64xf32>
    %c0_2 = arith.constant 0 : index
    %c0_3 = arith.constant 0 : index
    %4 = vector.load %arg3[%c0_2, %c0_3] : memref<256x288xbf16, #tpu.memory_space<vmem>>, vector<256x288xbf16>
    %c0_4 = arith.constant 0 : index
    %c0_5 = arith.constant 0 : index
    %5 = vector.load %arg4[%c0_4, %c0_5] : memref<288x64xbf16, #tpu.memory_space<vmem>>, vector<288x64xbf16>
    %cst = arith.constant dense<0.000000e+00> : vector<256x64xf32>
    %6 = tpu.matmul %4, %5, %cst {dimension_numbers = #tpu.dot_dimension_numbers<[1], [0], [0], [1], [0, 0, 1, 1], [], []>} : vector<256x288xbf16>, vector<288x64xbf16>, vector<256x64xf32> -> vector<256x64xf32>
    %7 = arith.addf %3, %6 : vector<256x64xf32>
    %c0_6 = arith.constant 0 : index
    %c0_7 = arith.constant 0 : index
    %8 = vector.load %arg7[%c0_6, %c0_7] : memref<256x64xf32, #tpu.memory_space<vmem>>, vector<256x64xf32>
    tpu.vector_store %arg7[%c0_6, %c0_7], %7 {strides = array<i32>} : memref<256x64xf32, #tpu.memory_space<vmem>>, vector<256x64xf32>,
    %c0_i32_8 = arith.constant 0 : i32
    %9 = arith.cmpi eq, %arg2, %c0_i32_8 : i32
    %10 = arith.extui %9 : i1 to i32
    %c0_i32_9 = arith.constant 0 : i32
    %11 = arith.cmpi ne, %10, %c0_i32_9 : i32
    scf.if %11 {
      %c0_10 = arith.constant 0 : index
      %c0_11 = arith.constant 0 : index
      %12 = vector.load %arg7[%c0_10, %c0_11] : memref<256x64xf32, #tpu.memory_space<vmem>>, vector<256x64xf32>
      %c0_12 = arith.constant 0 : index
      %c0_13 = arith.constant 0 : index
      %13 = vector.load %arg5[%c0_12, %c0_13] : memref<1x64xf32, #tpu.memory_space<vmem>>, vector<1x64xf32>
      %14 = vector.broadcast %13 : vector<1x64xf32> to vector<256x64xf32>
      %15 = arith.addf %12, %14 : vector<256x64xf32>
      %cst_14 = arith.constant 0.000000e+00 : f32
      %16 = vector.broadcast %cst_14 : f32 to vector<256x64xf32>
      %17 = arith.maximumf %15, %16 : vector<256x64xf32>
      %18 = arith.truncf %17 : vector<256x64xf32> to vector<256x64xbf16>
      %c0_15 = arith.constant 0 : index
      %c0_16 = arith.constant 0 : index
      %19 = vector.load %arg6[%c0_15, %c0_16] : memref<256x64xbf16, #tpu.memory_space<vmem>>, vector<256x64xbf16>
      tpu.vector_store %arg6[%c0_15, %c0_16], %18 {strides = array<i32>} : memref<256x64xbf16, #tpu.memory_space<vmem>>, vector<256x64xbf16>,
    } else {
    }
    return
  }
  func.func @transform_0(%arg0: i32, %arg1: i32, %arg2: i32) -> (i32, i32) {
    %c0_i32 = arith.constant 0 : i32
    return %arg1, %arg2 : i32, i32
  }
  func.func @transform_1(%arg0: i32, %arg1: i32, %arg2: i32) -> (i32, i32) {
    %c0_i32 = arith.constant 0 : i32
    return %arg2, %arg0 : i32, i32
  }
  func.func @transform_2(%arg0: i32, %arg1: i32, %arg2: i32) -> (i32, i32) {
    %c0_i32 = arith.constant 0 : i32
    %c0_i32_0 = arith.constant 0 : i32
    return %c0_i32, %arg0 : i32, i32
  }
  func.func @transform_3(%arg0: i32, %arg1: i32, %arg2: i32) -> (i32, i32) {
    %c0_i32 = arith.constant 0 : i32
    return %arg1, %arg0 : i32, i32
  }
}

module attributes {stable_mosaic.version = 11 : i64} {
  func.func @_fused_matmul_kernel(%arg0: i32, %arg1: i32, %arg2: i32, %arg3: memref<64x576xbf16, #tpu.memory_space<vmem>>, %arg4: memref<576x128xbf16, #tpu.memory_space<vmem>>, %arg5: memref<1x128xf32, #tpu.memory_space<vmem>>, %arg6: memref<64x128xbf16, #tpu.memory_space<vmem>>, %arg7: memref<64x128xf32, #tpu.memory_space<vmem>>) attributes {dimension_semantics = [#tpu.dimension_semantics<parallel>, #tpu.dimension_semantics<parallel>, #tpu.dimension_semantics<arbitrary>], iteration_bounds = array<i64: 1, 1, 1>, scalar_prefetch = 0 : i64, scratch_operands = 1 : i64, tpu.core_type = #tpu.core_type<tc>, window_params = [{transform_indices = @transform_0, window_bounds = array<i64: 64, 576>}, {transform_indices = @transform_1, window_bounds = array<i64: 576, 128>}, {transform_indices = @transform_2, window_bounds = array<i64: 1, 128>}, {transform_indices = @transform_3, window_bounds = array<i64: 64, 128>}]} {
    %c0_i32 = arith.constant 0 : i32
    %0 = arith.cmpi eq, %arg2, %c0_i32 : i32
    %1 = arith.extui %0 : i1 to i32
    %c0_i32_0 = arith.constant 0 : i32
    %2 = arith.cmpi ne, %1, %c0_i32_0 : i32
    scf.if %2 {
      %cst_10 = arith.constant 0.000000e+00 : f32
      %12 = vector.broadcast %cst_10 : f32 to vector<64x128xf32>
      %c0_11 = arith.constant 0 : index
      %c0_12 = arith.constant 0 : index
      %13 = vector.load %arg7[%c0_11, %c0_12] : memref<64x128xf32, #tpu.memory_space<vmem>>, vector<64x128xf32>
      tpu.vector_store %arg7[%c0_11, %c0_12], %12 {strides = array<i32>} : memref<64x128xf32, #tpu.memory_space<vmem>>, vector<64x128xf32>,
    } else {
    }
    %c0 = arith.constant 0 : index
    %c0_1 = arith.constant 0 : index
    %3 = vector.load %arg7[%c0, %c0_1] : memref<64x128xf32, #tpu.memory_space<vmem>>, vector<64x128xf32>
    %c0_2 = arith.constant 0 : index
    %c0_3 = arith.constant 0 : index
    %4 = vector.load %arg3[%c0_2, %c0_3] : memref<64x576xbf16, #tpu.memory_space<vmem>>, vector<64x576xbf16>
    %c0_4 = arith.constant 0 : index
    %c0_5 = arith.constant 0 : index
    %5 = vector.load %arg4[%c0_4, %c0_5] : memref<576x128xbf16, #tpu.memory_space<vmem>>, vector<576x128xbf16>
    %cst = arith.constant dense<0.000000e+00> : vector<64x128xf32>
    %6 = tpu.matmul %4, %5, %cst {dimension_numbers = #tpu.dot_dimension_numbers<[1], [0], [0], [1], [0, 0, 1, 1], [], []>} : vector<64x576xbf16>, vector<576x128xbf16>, vector<64x128xf32> -> vector<64x128xf32>
    %7 = arith.addf %3, %6 : vector<64x128xf32>
    %c0_6 = arith.constant 0 : index
    %c0_7 = arith.constant 0 : index
    %8 = vector.load %arg7[%c0_6, %c0_7] : memref<64x128xf32, #tpu.memory_space<vmem>>, vector<64x128xf32>
    tpu.vector_store %arg7[%c0_6, %c0_7], %7 {strides = array<i32>} : memref<64x128xf32, #tpu.memory_space<vmem>>, vector<64x128xf32>,
    %c0_i32_8 = arith.constant 0 : i32
    %9 = arith.cmpi eq, %arg2, %c0_i32_8 : i32
    %10 = arith.extui %9 : i1 to i32
    %c0_i32_9 = arith.constant 0 : i32
    %11 = arith.cmpi ne, %10, %c0_i32_9 : i32
    scf.if %11 {
      %c0_10 = arith.constant 0 : index
      %c0_11 = arith.constant 0 : index
      %12 = vector.load %arg7[%c0_10, %c0_11] : memref<64x128xf32, #tpu.memory_space<vmem>>, vector<64x128xf32>
      %c0_12 = arith.constant 0 : index
      %c0_13 = arith.constant 0 : index
      %13 = vector.load %arg5[%c0_12, %c0_13] : memref<1x128xf32, #tpu.memory_space<vmem>>, vector<1x128xf32>
      %14 = vector.broadcast %13 : vector<1x128xf32> to vector<64x128xf32>
      %15 = arith.addf %12, %14 : vector<64x128xf32>
      %cst_14 = arith.constant 0.000000e+00 : f32
      %16 = vector.broadcast %cst_14 : f32 to vector<64x128xf32>
      %17 = arith.maximumf %15, %16 : vector<64x128xf32>
      %18 = arith.truncf %17 : vector<64x128xf32> to vector<64x128xbf16>
      %c0_15 = arith.constant 0 : index
      %c0_16 = arith.constant 0 : index
      %19 = vector.load %arg6[%c0_15, %c0_16] : memref<64x128xbf16, #tpu.memory_space<vmem>>, vector<64x128xbf16>
      tpu.vector_store %arg6[%c0_15, %c0_16], %18 {strides = array<i32>} : memref<64x128xbf16, #tpu.memory_space<vmem>>, vector<64x128xbf16>,
    } else {
    }
    return
  }
  func.func @transform_0(%arg0: i32, %arg1: i32, %arg2: i32) -> (i32, i32) {
    %c0_i32 = arith.constant 0 : i32
    return %arg1, %arg2 : i32, i32
  }
  func.func @transform_1(%arg0: i32, %arg1: i32, %arg2: i32) -> (i32, i32) {
    %c0_i32 = arith.constant 0 : i32
    return %arg2, %arg0 : i32, i32
  }
  func.func @transform_2(%arg0: i32, %arg1: i32, %arg2: i32) -> (i32, i32) {
    %c0_i32 = arith.constant 0 : i32
    %c0_i32_0 = arith.constant 0 : i32
    return %c0_i32, %arg0 : i32, i32
  }
  func.func @transform_3(%arg0: i32, %arg1: i32, %arg2: i32) -> (i32, i32) {
    %c0_i32 = arith.constant 0 : i32
    return %arg1, %arg0 : i32, i32
  }
}

module attributes {stable_mosaic.version = 11 : i64} {
  func.func @_fused_matmul_kernel(%arg0: i32, %arg1: i32, %arg2: i32, %arg3: memref<16x1152xbf16, #tpu.memory_space<vmem>>, %arg4: memref<1152x256xbf16, #tpu.memory_space<vmem>>, %arg5: memref<1x256xf32, #tpu.memory_space<vmem>>, %arg6: memref<16x256xbf16, #tpu.memory_space<vmem>>, %arg7: memref<16x256xf32, #tpu.memory_space<vmem>>) attributes {dimension_semantics = [#tpu.dimension_semantics<parallel>, #tpu.dimension_semantics<parallel>, #tpu.dimension_semantics<arbitrary>], iteration_bounds = array<i64: 1, 1, 1>, scalar_prefetch = 0 : i64, scratch_operands = 1 : i64, tpu.core_type = #tpu.core_type<tc>, window_params = [{transform_indices = @transform_0, window_bounds = array<i64: 16, 1152>}, {transform_indices = @transform_1, window_bounds = array<i64: 1152, 256>}, {transform_indices = @transform_2, window_bounds = array<i64: 1, 256>}, {transform_indices = @transform_3, window_bounds = array<i64: 16, 256>}]} {
    %c0_i32 = arith.constant 0 : i32
    %0 = arith.cmpi eq, %arg2, %c0_i32 : i32
    %1 = arith.extui %0 : i1 to i32
    %c0_i32_0 = arith.constant 0 : i32
    %2 = arith.cmpi ne, %1, %c0_i32_0 : i32
    scf.if %2 {
      %cst_10 = arith.constant 0.000000e+00 : f32
      %12 = vector.broadcast %cst_10 : f32 to vector<16x256xf32>
      %c0_11 = arith.constant 0 : index
      %c0_12 = arith.constant 0 : index
      %13 = vector.load %arg7[%c0_11, %c0_12] : memref<16x256xf32, #tpu.memory_space<vmem>>, vector<16x256xf32>
      tpu.vector_store %arg7[%c0_11, %c0_12], %12 {strides = array<i32>} : memref<16x256xf32, #tpu.memory_space<vmem>>, vector<16x256xf32>,
    } else {
    }
    %c0 = arith.constant 0 : index
    %c0_1 = arith.constant 0 : index
    %3 = vector.load %arg7[%c0, %c0_1] : memref<16x256xf32, #tpu.memory_space<vmem>>, vector<16x256xf32>
    %c0_2 = arith.constant 0 : index
    %c0_3 = arith.constant 0 : index
    %4 = vector.load %arg3[%c0_2, %c0_3] : memref<16x1152xbf16, #tpu.memory_space<vmem>>, vector<16x1152xbf16>
    %c0_4 = arith.constant 0 : index
    %c0_5 = arith.constant 0 : index
    %5 = vector.load %arg4[%c0_4, %c0_5] : memref<1152x256xbf16, #tpu.memory_space<vmem>>, vector<1152x256xbf16>
    %cst = arith.constant dense<0.000000e+00> : vector<16x256xf32>
    %6 = tpu.matmul %4, %5, %cst {dimension_numbers = #tpu.dot_dimension_numbers<[1], [0], [0], [1], [0, 0, 1, 1], [], []>} : vector<16x1152xbf16>, vector<1152x256xbf16>, vector<16x256xf32> -> vector<16x256xf32>
    %7 = arith.addf %3, %6 : vector<16x256xf32>
    %c0_6 = arith.constant 0 : index
    %c0_7 = arith.constant 0 : index
    %8 = vector.load %arg7[%c0_6, %c0_7] : memref<16x256xf32, #tpu.memory_space<vmem>>, vector<16x256xf32>
    tpu.vector_store %arg7[%c0_6, %c0_7], %7 {strides = array<i32>} : memref<16x256xf32, #tpu.memory_space<vmem>>, vector<16x256xf32>,
    %c0_i32_8 = arith.constant 0 : i32
    %9 = arith.cmpi eq, %arg2, %c0_i32_8 : i32
    %10 = arith.extui %9 : i1 to i32
    %c0_i32_9 = arith.constant 0 : i32
    %11 = arith.cmpi ne, %10, %c0_i32_9 : i32
    scf.if %11 {
      %c0_10 = arith.constant 0 : index
      %c0_11 = arith.constant 0 : index
      %12 = vector.load %arg7[%c0_10, %c0_11] : memref<16x256xf32, #tpu.memory_space<vmem>>, vector<16x256xf32>
      %c0_12 = arith.constant 0 : index
      %c0_13 = arith.constant 0 : index
      %13 = vector.load %arg5[%c0_12, %c0_13] : memref<1x256xf32, #tpu.memory_space<vmem>>, vector<1x256xf32>
      %14 = vector.broadcast %13 : vector<1x256xf32> to vector<16x256xf32>
      %15 = arith.addf %12, %14 : vector<16x256xf32>
      %cst_14 = arith.constant 0.000000e+00 : f32
      %16 = vector.broadcast %cst_14 : f32 to vector<16x256xf32>
      %17 = arith.maximumf %15, %16 : vector<16x256xf32>
      %18 = arith.truncf %17 : vector<16x256xf32> to vector<16x256xbf16>
      %c0_15 = arith.constant 0 : index
      %c0_16 = arith.constant 0 : index
      %19 = vector.load %arg6[%c0_15, %c0_16] : memref<16x256xbf16, #tpu.memory_space<vmem>>, vector<16x256xbf16>
      tpu.vector_store %arg6[%c0_15, %c0_16], %18 {strides = array<i32>} : memref<16x256xbf16, #tpu.memory_space<vmem>>, vector<16x256xbf16>,
    } else {
    }
    return
  }
  func.func @transform_0(%arg0: i32, %arg1: i32, %arg2: i32) -> (i32, i32) {
    %c0_i32 = arith.constant 0 : i32
    return %arg1, %arg2 : i32, i32
  }
  func.func @transform_1(%arg0: i32, %arg1: i32, %arg2: i32) -> (i32, i32) {
    %c0_i32 = arith.constant 0 : i32
    return %arg2, %arg0 : i32, i32
  }
  func.func @transform_2(%arg0: i32, %arg1: i32, %arg2: i32) -> (i32, i32) {
    %c0_i32 = arith.constant 0 : i32
    %c0_i32_0 = arith.constant 0 : i32
    return %c0_i32, %arg0 : i32, i32
  }
  func.func @transform_3(%arg0: i32, %arg1: i32, %arg2: i32) -> (i32, i32) {
    %c0_i32 = arith.constant 0 : i32
    return %arg1, %arg0 : i32, i32
  }
}

module attributes {stable_mosaic.version = 11 : i64} {
  func.func @_fused_matmul_kernel(%arg0: i32, %arg1: i32, %arg2: i32, %arg3: memref<4x2304xbf16, #tpu.memory_space<vmem>>, %arg4: memref<2304x256xbf16, #tpu.memory_space<vmem>>, %arg5: memref<1x256xf32, #tpu.memory_space<vmem>>, %arg6: memref<4x256xbf16, #tpu.memory_space<vmem>>, %arg7: memref<4x256xf32, #tpu.memory_space<vmem>>) attributes {dimension_semantics = [#tpu.dimension_semantics<parallel>, #tpu.dimension_semantics<parallel>, #tpu.dimension_semantics<arbitrary>], iteration_bounds = array<i64: 1, 1, 1>, scalar_prefetch = 0 : i64, scratch_operands = 1 : i64, tpu.core_type = #tpu.core_type<tc>, window_params = [{transform_indices = @transform_0, window_bounds = array<i64: 4, 2304>}, {transform_indices = @transform_1, window_bounds = array<i64: 2304, 256>}, {transform_indices = @transform_2, window_bounds = array<i64: 1, 256>}, {transform_indices = @transform_3, window_bounds = array<i64: 4, 256>}]} {
    %c0_i32 = arith.constant 0 : i32
    %0 = arith.cmpi eq, %arg2, %c0_i32 : i32
    %1 = arith.extui %0 : i1 to i32
    %c0_i32_0 = arith.constant 0 : i32
    %2 = arith.cmpi ne, %1, %c0_i32_0 : i32
    scf.if %2 {
      %cst_10 = arith.constant 0.000000e+00 : f32
      %12 = vector.broadcast %cst_10 : f32 to vector<4x256xf32>
      %c0_11 = arith.constant 0 : index
      %c0_12 = arith.constant 0 : index
      %13 = vector.load %arg7[%c0_11, %c0_12] : memref<4x256xf32, #tpu.memory_space<vmem>>, vector<4x256xf32>
      tpu.vector_store %arg7[%c0_11, %c0_12], %12 {strides = array<i32>} : memref<4x256xf32, #tpu.memory_space<vmem>>, vector<4x256xf32>,
    } else {
    }
    %c0 = arith.constant 0 : index
    %c0_1 = arith.constant 0 : index
    %3 = vector.load %arg7[%c0, %c0_1] : memref<4x256xf32, #tpu.memory_space<vmem>>, vector<4x256xf32>
    %c0_2 = arith.constant 0 : index
    %c0_3 = arith.constant 0 : index
    %4 = vector.load %arg3[%c0_2, %c0_3] : memref<4x2304xbf16, #tpu.memory_space<vmem>>, vector<4x2304xbf16>
    %c0_4 = arith.constant 0 : index
    %c0_5 = arith.constant 0 : index
    %5 = vector.load %arg4[%c0_4, %c0_5] : memref<2304x256xbf16, #tpu.memory_space<vmem>>, vector<2304x256xbf16>
    %cst = arith.constant dense<0.000000e+00> : vector<4x256xf32>
    %6 = tpu.matmul %4, %5, %cst {dimension_numbers = #tpu.dot_dimension_numbers<[1], [0], [0], [1], [0, 0, 1, 1], [], []>} : vector<4x2304xbf16>, vector<2304x256xbf16>, vector<4x256xf32> -> vector<4x256xf32>
    %7 = arith.addf %3, %6 : vector<4x256xf32>
    %c0_6 = arith.constant 0 : index
    %c0_7 = arith.constant 0 : index
    %8 = vector.load %arg7[%c0_6, %c0_7] : memref<4x256xf32, #tpu.memory_space<vmem>>, vector<4x256xf32>
    tpu.vector_store %arg7[%c0_6, %c0_7], %7 {strides = array<i32>} : memref<4x256xf32, #tpu.memory_space<vmem>>, vector<4x256xf32>,
    %c0_i32_8 = arith.constant 0 : i32
    %9 = arith.cmpi eq, %arg2, %c0_i32_8 : i32
    %10 = arith.extui %9 : i1 to i32
    %c0_i32_9 = arith.constant 0 : i32
    %11 = arith.cmpi ne, %10, %c0_i32_9 : i32
    scf.if %11 {
      %c0_10 = arith.constant 0 : index
      %c0_11 = arith.constant 0 : index
      %12 = vector.load %arg7[%c0_10, %c0_11] : memref<4x256xf32, #tpu.memory_space<vmem>>, vector<4x256xf32>
      %c0_12 = arith.constant 0 : index
      %c0_13 = arith.constant 0 : index
      %13 = vector.load %arg5[%c0_12, %c0_13] : memref<1x256xf32, #tpu.memory_space<vmem>>, vector<1x256xf32>
      %14 = vector.broadcast %13 : vector<1x256xf32> to vector<4x256xf32>
      %15 = arith.addf %12, %14 : vector<4x256xf32>
      %cst_14 = arith.constant 0.000000e+00 : f32
      %16 = vector.broadcast %cst_14 : f32 to vector<4x256xf32>
      %17 = arith.maximumf %15, %16 : vector<4x256xf32>
      %18 = arith.truncf %17 : vector<4x256xf32> to vector<4x256xbf16>
      %c0_15 = arith.constant 0 : index
      %c0_16 = arith.constant 0 : index
      %19 = vector.load %arg6[%c0_15, %c0_16] : memref<4x256xbf16, #tpu.memory_space<vmem>>, vector<4x256xbf16>
      tpu.vector_store %arg6[%c0_15, %c0_16], %18 {strides = array<i32>} : memref<4x256xbf16, #tpu.memory_space<vmem>>, vector<4x256xbf16>,
    } else {
    }
    return
  }
  func.func @transform_0(%arg0: i32, %arg1: i32, %arg2: i32) -> (i32, i32) {
    %c0_i32 = arith.constant 0 : i32
    return %arg1, %arg2 : i32, i32
  }
  func.func @transform_1(%arg0: i32, %arg1: i32, %arg2: i32) -> (i32, i32) {
    %c0_i32 = arith.constant 0 : i32
    return %arg2, %arg0 : i32, i32
  }
  func.func @transform_2(%arg0: i32, %arg1: i32, %arg2: i32) -> (i32, i32) {
    %c0_i32 = arith.constant 0 : i32
    %c0_i32_0 = arith.constant 0 : i32
    return %c0_i32, %arg0 : i32, i32
  }
  func.func @transform_3(%arg0: i32, %arg1: i32, %arg2: i32) -> (i32, i32) {
    %c0_i32 = arith.constant 0 : i32
    return %arg1, %arg0 : i32, i32
  }
}

module attributes {stable_mosaic.version = 11 : i64} {
  func.func @_fused_matmul_kernel(%arg0: i32, %arg1: i32, %arg2: i32, %arg3: memref<4x256xbf16, #tpu.memory_space<vmem>>, %arg4: memref<256x32xbf16, #tpu.memory_space<vmem>>, %arg5: memref<1x32xf32, #tpu.memory_space<vmem>>, %arg6: memref<4x32xf32, #tpu.memory_space<vmem>>, %arg7: memref<4x32xf32, #tpu.memory_space<vmem>>) attributes {dimension_semantics = [#tpu.dimension_semantics<parallel>, #tpu.dimension_semantics<parallel>, #tpu.dimension_semantics<arbitrary>], iteration_bounds = array<i64: 1, 1, 1>, scalar_prefetch = 0 : i64, scratch_operands = 1 : i64, tpu.core_type = #tpu.core_type<tc>, window_params = [{transform_indices = @transform_0, window_bounds = array<i64: 4, 256>}, {transform_indices = @transform_1, window_bounds = array<i64: 256, 32>}, {transform_indices = @transform_2, window_bounds = array<i64: 1, 32>}, {transform_indices = @transform_3, window_bounds = array<i64: 4, 32>}]} {
    %c0_i32 = arith.constant 0 : i32
    %0 = arith.cmpi eq, %arg2, %c0_i32 : i32
    %1 = arith.extui %0 : i1 to i32
    %c0_i32_0 = arith.constant 0 : i32
    %2 = arith.cmpi ne, %1, %c0_i32_0 : i32
    scf.if %2 {
      %cst_10 = arith.constant 0.000000e+00 : f32
      %12 = vector.broadcast %cst_10 : f32 to vector<4x32xf32>
      %c0_11 = arith.constant 0 : index
      %c0_12 = arith.constant 0 : index
      %13 = vector.load %arg7[%c0_11, %c0_12] : memref<4x32xf32, #tpu.memory_space<vmem>>, vector<4x32xf32>
      tpu.vector_store %arg7[%c0_11, %c0_12], %12 {strides = array<i32>} : memref<4x32xf32, #tpu.memory_space<vmem>>, vector<4x32xf32>,
    } else {
    }
    %c0 = arith.constant 0 : index
    %c0_1 = arith.constant 0 : index
    %3 = vector.load %arg7[%c0, %c0_1] : memref<4x32xf32, #tpu.memory_space<vmem>>, vector<4x32xf32>
    %c0_2 = arith.constant 0 : index
    %c0_3 = arith.constant 0 : index
    %4 = vector.load %arg3[%c0_2, %c0_3] : memref<4x256xbf16, #tpu.memory_space<vmem>>, vector<4x256xbf16>
    %c0_4 = arith.constant 0 : index
    %c0_5 = arith.constant 0 : index
    %5 = vector.load %arg4[%c0_4, %c0_5] : memref<256x32xbf16, #tpu.memory_space<vmem>>, vector<256x32xbf16>
    %cst = arith.constant dense<0.000000e+00> : vector<4x32xf32>
    %6 = tpu.matmul %4, %5, %cst {dimension_numbers = #tpu.dot_dimension_numbers<[1], [0], [0], [1], [0, 0, 1, 1], [], []>} : vector<4x256xbf16>, vector<256x32xbf16>, vector<4x32xf32> -> vector<4x32xf32>
    %7 = arith.addf %3, %6 : vector<4x32xf32>
    %c0_6 = arith.constant 0 : index
    %c0_7 = arith.constant 0 : index
    %8 = vector.load %arg7[%c0_6, %c0_7] : memref<4x32xf32, #tpu.memory_space<vmem>>, vector<4x32xf32>
    tpu.vector_store %arg7[%c0_6, %c0_7], %7 {strides = array<i32>} : memref<4x32xf32, #tpu.memory_space<vmem>>, vector<4x32xf32>,
    %c0_i32_8 = arith.constant 0 : i32
    %9 = arith.cmpi eq, %arg2, %c0_i32_8 : i32
    %10 = arith.extui %9 : i1 to i32
    %c0_i32_9 = arith.constant 0 : i32
    %11 = arith.cmpi ne, %10, %c0_i32_9 : i32
    scf.if %11 {
      %c0_10 = arith.constant 0 : index
      %c0_11 = arith.constant 0 : index
      %12 = vector.load %arg7[%c0_10, %c0_11] : memref<4x32xf32, #tpu.memory_space<vmem>>, vector<4x32xf32>
      %c0_12 = arith.constant 0 : index
      %c0_13 = arith.constant 0 : index
      %13 = vector.load %arg5[%c0_12, %c0_13] : memref<1x32xf32, #tpu.memory_space<vmem>>, vector<1x32xf32>
      %14 = vector.broadcast %13 : vector<1x32xf32> to vector<4x32xf32>
      %15 = arith.addf %12, %14 : vector<4x32xf32>
      %cst_14 = arith.constant 0.000000e+00 : f32
      %16 = vector.broadcast %cst_14 : f32 to vector<4x32xf32>
      %17 = arith.maximumf %15, %16 : vector<4x32xf32>
      %c0_15 = arith.constant 0 : index
      %c0_16 = arith.constant 0 : index
      %18 = vector.load %arg6[%c0_15, %c0_16] : memref<4x32xf32, #tpu.memory_space<vmem>>, vector<4x32xf32>
      tpu.vector_store %arg6[%c0_15, %c0_16], %17 {strides = array<i32>} : memref<4x32xf32, #tpu.memory_space<vmem>>, vector<4x32xf32>,
    } else {
    }
    return
  }
  func.func @transform_0(%arg0: i32, %arg1: i32, %arg2: i32) -> (i32, i32) {
    %c0_i32 = arith.constant 0 : i32
    return %arg1, %arg2 : i32, i32
  }
  func.func @transform_1(%arg0: i32, %arg1: i32, %arg2: i32) -> (i32, i32) {
    %c0_i32 = arith.constant 0 : i32
    return %arg2, %arg0 : i32, i32
  }
  func.func @transform_2(%arg0: i32, %arg1: i32, %arg2: i32) -> (i32, i32) {
    %c0_i32 = arith.constant 0 : i32
    %c0_i32_0 = arith.constant 0 : i32
    return %c0_i32, %arg0 : i32, i32
  }
  func.func @transform_3(%arg0: i32, %arg1: i32, %arg2: i32) -> (i32, i32) {
    %c0_i32 = arith.constant 0 : i32
    return %arg1, %arg0 : i32, i32
  }
}

</mosaic_0001>

<bundles_post_ra>
// kernel: cnn_encoder_forward.6
= control target key start
LH: loop header
LB: loop body
LE: loop exit
PB: predicated region body
PF: predicated region fallthrough
CT: control target
= control target key end

     0   :  { %vm937_vm0 = vcmask 1041408   ;;  %vm744_vm1 = vcmask 293888   ;;  %vm19_vm2 = vcmask 261120   ;;  %v3449_v7 = vmov 0.0   ;;  %s4867_s1 = inlined_call_operand.vmem [shape: bf16[36,32], index: 1, kind: input, shape index: {}]   ;;  %s4868_s0 = inlined_call_operand.vmem [shape: bf16[1024,36], index: 0, kind: input, shape index: {}]   ;;  %s4869_s2 = inlined_call_operand.vmem [shape: f32[1,32], index: 2, kind: input, shape index: {}]   ;;  %s4870_s3 = inlined_call_operand.vmem [shape: bf16[1024,32], index: 3, kind: output, shape index: {}]  }
   0x1   :  { %v3380_v0 = vld [vmem:[%s4867_s1 + $0x10] ss:$0 sps:$4 sm:$0x33]   ;;  %v3381_v1 = vld [vmem:[%s4867_s1 + $0x8] sm:$0xff]   ;;  %v3479_v3 = vld [vmem:[%s4867_s1] sm:$0xff]   ;;  %22 = vst.msk [vmem:[#allocation2 + $0x10] sm:$0xff] %vm19_vm2, %v3449_v7 }
   0x2   :  { %3377 = vmatprep.subr.msk.bf16.mxu0 %vm937_vm0, %v3380_v0  ;;  %3378 = vmatprep.subr.msk.bf16.mxu1 %vm937_vm0, %v3380_v0  ;;  %v939_v2 = vsel %vm937_vm0, %v3380_v0, 0  ;;  %v3383_v4 = vld [vmem:[%s4868_s0] sm:$0xff]   ;;  %v3494_v6 = vld [vmem:[%s4868_s0 + $0x8] sm:$0xff]   ;;  %20 = vst.msk [vmem:[#allocation2] sm:$0xff] %vm19_vm2, %v3449_v7  ;;  %21 = vst.msk [vmem:[#allocation2 + $0x8] sm:$0xff] %vm19_vm2, %v3449_v7  ;;  %vm2649_vm3 = vcmask 257024  }
   0x3   :  { %3238 = vmatpush3.bf16.msra.mxu0 %v939_v2  ;;  %3374 = vmatpush3.bf16.msra.mxu1 %v939_v2  ;;  %v3384_v5 = vld [vmem:[%s4868_s0 + $0x100] sm:$0xff]   ;;  %23 = vst.msk [vmem:[#allocation2 + $0x18] sm:$0xff] %vm19_vm2, %v3449_v7  ;;  %24 = vst.msk [vmem:[#allocation2 + $0x20] sm:$0xff] %vm19_vm2, %v3449_v7  ;;  %v3386_v8 = vld [vmem:[%s4868_s0 + $0x108] sm:$0xff]  }
   0x4   :  { %3239 = vmatprep.subr.bf16.mxu0 %v3381_v1  ;;  %3372 = vmatprep.subr.bf16.mxu1 %v3381_v1  ;;  %25 = vst.msk [vmem:[#allocation2 + $0x28] sm:$0xff] %vm19_vm2, %v3449_v7  ;;  %26 = vst.msk [vmem:[#allocation2 + $0x30] sm:$0xff] %vm19_vm2, %v3449_v7  ;;  %v3387_v9 = vld [vmem:[%s4868_s0 + $0x10] sm:$0xff]   ;;  %v3389_v11 = vld [vmem:[%s4868_s0 + $0x18] sm:$0xff]  }
   0x5   :  { %3243 = vmatprep.mubr.msk.bf16.mxu0 %vm744_vm1, %v3383_v4  ;;  %3307 = vmatprep.mubr.msk.bf16.mxu1 %vm744_vm1, %v3384_v5  ;;  %27 = vst.msk [vmem:[#allocation2 + $0x38] sm:$0xff] %vm19_vm2, %v3449_v7  ;;  %28 = vst.msk [vmem:[#allocation2 + $0x40] sm:$0xff] %vm19_vm2, %v3449_v7  ;;  %v3388_v10 = vld [vmem:[%s4868_s0 + $0x110] sm:$0xff]   ;;  %v3390_v12 = vld [vmem:[%s4868_s0 + $0x118] sm:$0xff]  }
   0x6   :  { %29 = vst.msk [vmem:[#allocation2 + $0x48] sm:$0xff] %vm19_vm2, %v3449_v7  ;;  %30 = vst.msk [vmem:[#allocation2 + $0x50] sm:$0xff] %vm19_vm2, %v3449_v7  ;;  %v3391_v13 = vld [vmem:[%s4868_s0 + $0x20] sm:$0xff]   ;;  %v3393_v15 = vld [vmem:[%s4868_s0 + $0x28] sm:$0xff]  }
   0x7   :  { %3240 = vmatpush3.bf16.msra.mxu0 %v3381_v1  ;;  %3375 = vmatpush3.bf16.msra.mxu1 %v3381_v1  ;;  %31 = vst.msk [vmem:[#allocation2 + $0x58] sm:$0xff] %vm19_vm2, %v3449_v7  ;;  %32 = vst.msk [vmem:[#allocation2 + $0x60] sm:$0xff] %vm19_vm2, %v3449_v7  ;;  %v3392_v14 = vld [vmem:[%s4868_s0 + $0x120] sm:$0xff]   ;;  %v3394_v16 = vld [vmem:[%s4868_s0 + $0x128] sm:$0xff]  }
   0x8   :  { %3241 = vmatprep.subr.bf16.mxu0 %v3479_v3  ;;  %3373 = vmatprep.subr.bf16.mxu1 %v3479_v3  ;;  %33 = vst.msk [vmem:[#allocation2 + $0x68] sm:$0xff] %vm19_vm2, %v3449_v7  ;;  %34 = vst.msk [vmem:[#allocation2 + $0x70] sm:$0xff] %vm19_vm2, %v3449_v7  ;;  %v3395_v17 = vld [vmem:[%s4868_s0 + $0x30] sm:$0xff]   ;;  %v3397_v19 = vld [vmem:[%s4868_s0 + $0x38] sm:$0xff]  }
   0x9   :  { %35 = vst.msk [vmem:[#allocation2 + $0x78] sm:$0xff] %vm19_vm2, %v3449_v7  ;;  %36 = vst.msk [vmem:[#allocation2 + $0x80] sm:$0xff] %vm19_vm2, %v3449_v7  ;;  %v3396_v18 = vld [vmem:[%s4868_s0 + $0x130] sm:$0xff]   ;;  %v3398_v20 = vld [vmem:[%s4868_s0 + $0x138] sm:$0xff]  }
   0xa   :  { %37 = vst.msk [vmem:[#allocation2 + $0x88] sm:$0xff] %vm19_vm2, %v3449_v7  ;;  %38 = vst.msk [vmem:[#allocation2 + $0x90] sm:$0xff] %vm19_vm2, %v3449_v7  ;;  %v3399_v21 = vld [vmem:[%s4868_s0 + $0x40] sm:$0xff]   ;;  %v3401_v23 = vld [vmem:[%s4868_s0 + $0x48] sm:$0xff]  }
   0xb   :  { %39 = vst.msk [vmem:[#allocation2 + $0x98] sm:$0xff] %vm19_vm2, %v3449_v7  ;;  %40 = vst.msk [vmem:[#allocation2 + $0xa0] sm:$0xff] %vm19_vm2, %v3449_v7  ;;  %3242 = vmatpush3.bf16.msra.mxu0 %v3479_v3  ;;  %3376 = vmatpush3.bf16.msra.mxu1 %v3479_v3  ;;  %v3400_v22 = vld [vmem:[%s4868_s0 + $0x140] sm:$0xff]   ;;  %v3402_v24 = vld [vmem:[%s4868_s0 + $0x148] sm:$0xff]  }
   0xc   :  { %41 = vst.msk [vmem:[#allocation2 + $0xa8] sm:$0xff] %vm19_vm2, %v3449_v7  ;;  %42 = vst.msk [vmem:[#allocation2 + $0xb0] sm:$0xff] %vm19_vm2, %v3449_v7  ;;  %v3403_v25 = vld [vmem:[%s4868_s0 + $0x50] sm:$0xff]   ;;  %v3405_v27 = vld [vmem:[%s4868_s0 + $0x58] sm:$0xff]  }
   0xd   :  { %43 = vst.msk [vmem:[#allocation2 + $0xb8] sm:$0xff] %vm19_vm2, %v3449_v7  ;;  %44 = vst.msk [vmem:[#allocation2 + $0xc0] sm:$0xff] %vm19_vm2, %v3449_v7  ;;  %v3404_v26 = vld [vmem:[%s4868_s0 + $0x150] sm:$0xff]   ;;  %v3406_v28 = vld [vmem:[%s4868_s0 + $0x158] sm:$0xff]  }
   0xe   :  { %45 = vst.msk [vmem:[#allocation2 + $0xc8] sm:$0xff] %vm19_vm2, %v3449_v7  ;;  %46 = vst.msk [vmem:[#allocation2 + $0xd0] sm:$0xff] %vm19_vm2, %v3449_v7  ;;  %3244 = vmatmul.mubr.msk.bf16.vlgmr.msra.gmra.mxu0 %vm744_vm1, %v3494_v6  ;;  %3308 = vmatmul.mubr.msk.bf16.vlgmr.msra.gmra.mxu1 %vm744_vm1, %v3386_v8  ;;  %v3407_v29 = vld [vmem:[%s4868_s0 + $0x60] sm:$0xff]   ;;  %v3409_v31 = vld [vmem:[%s4868_s0 + $0x68] sm:$0xff]  }
   0xf   :  { %47 = vst.msk [vmem:[#allocation2 + $0xd8] sm:$0xff] %vm19_vm2, %v3449_v7  ;;  %48 = vst.msk [vmem:[#allocation2 + $0xe0] sm:$0xff] %vm19_vm2, %v3449_v7  ;;  %3247 = vmatprep.mubr.msk.bf16.mxu0 %vm744_vm1, %v3387_v9  ;;  %3311 = vmatprep.mubr.msk.bf16.mxu1 %vm744_vm1, %v3388_v10  ;;  %v3408_v30 = vld [vmem:[%s4868_s0 + $0x160] sm:$0xff]   ;;  %v3410_v32 = vld [vmem:[%s4868_s0 + $0x168] sm:$0xff]  }
  0x10   :  { %49 = vst.msk [vmem:[#allocation2 + $0xe8] sm:$0xff] %vm19_vm2, %v3449_v7  ;;  %50 = vst.msk [vmem:[#allocation2 + $0xf0] sm:$0xff] %vm19_vm2, %v3449_v7  ;;  %v3411_v33 = vld [vmem:[%s4868_s0 + $0x70] sm:$0xff]   ;;  %v3413_v35 = vld [vmem:[%s4868_s0 + $0x78] sm:$0xff]  }
  0x11   :  { %51 = vst.msk [vmem:[#allocation2 + $0xf8] sm:$0xff] %vm19_vm2, %v3449_v7  ;;  %52 = vst.msk [vmem:[#allocation2 + $0x100] sm:$0xff] %vm19_vm2, %v3449_v7  ;;  %v3412_v34 = vld [vmem:[%s4868_s0 + $0x170] sm:$0xff]   ;;  %v3414_v36 = vld [vmem:[%s4868_s0 + $0x178] sm:$0xff]  }
  0x12   :  { %53 = vst.msk [vmem:[#allocation2 + $0x108] sm:$0xff] %vm19_vm2, %v3449_v7  ;;  %54 = vst.msk [vmem:[#allocation2 + $0x110] sm:$0xff] %vm19_vm2, %v3449_v7  ;;  %v3415_v37 = vld [vmem:[%s4868_s0 + $0x80] sm:$0xff]   ;;  %v3417_v39 = vld [vmem:[%s4868_s0 + $0x88] sm:$0xff]  }
  0x13   :  { %55 = vst.msk [vmem:[#allocation2 + $0x118] sm:$0xff] %vm19_vm2, %v3449_v7  ;;  %56 = vst.msk [vmem:[#allocation2 + $0x120] sm:$0xff] %vm19_vm2, %v3449_v7  ;;  %v3416_v38 = vld [vmem:[%s4868_s0 + $0x180] sm:$0xff]   ;;  %v3418_v40 = vld [vmem:[%s4868_s0 + $0x188] sm:$0xff]  }
  0x14   :  { %57 = vst.msk [vmem:[#allocation2 + $0x128] sm:$0xff] %vm19_vm2, %v3449_v7  ;;  %58 = vst.msk [vmem:[#allocation2 + $0x130] sm:$0xff] %vm19_vm2, %v3449_v7  ;;  %v3419_v41 = vld [vmem:[%s4868_s0 + $0x90] sm:$0xff]   ;;  %v3421_v43 = vld [vmem:[%s4868_s0 + $0x98] sm:$0xff]  }
  0x15   :  { %59 = vst.msk [vmem:[#allocation2 + $0x138] sm:$0xff] %vm19_vm2, %v3449_v7  ;;  %60 = vst.msk [vmem:[#allocation2 + $0x140] sm:$0xff] %vm19_vm2, %v3449_v7  ;;  %v3420_v42 = vld [vmem:[%s4868_s0 + $0x190] sm:$0xff]   ;;  %v3422_v44 = vld [vmem:[%s4868_s0 + $0x198] sm:$0xff]  }
  0x16   :  { %61 = vst.msk [vmem:[#allocation2 + $0x148] sm:$0xff] %vm19_vm2, %v3449_v7  ;;  %62 = vst.msk [vmem:[#allocation2 + $0x150] sm:$0xff] %vm19_vm2, %v3449_v7  ;;  %3248 = vmatmul.mubr.msk.bf16.gmra.mxu0 %vm744_vm1, %v3389_v11  ;;  %3312 = vmatmul.mubr.msk.bf16.gmra.mxu1 %vm744_vm1, %v3390_v12  ;;  %v3423_v45 = vld [vmem:[%s4868_s0 + $0xa0] sm:$0xff]   ;;  %v3425_v47 = vld [vmem:[%s4868_s0 + $0xa8] sm:$0xff]  }
  0x17   :  { %63 = vst.msk [vmem:[#allocation2 + $0x158] sm:$0xff] %vm19_vm2, %v3449_v7  ;;  %64 = vst.msk [vmem:[#allocation2 + $0x160] sm:$0xff] %vm19_vm2, %v3449_v7  ;;  %3251 = vmatprep.mubr.msk.bf16.mxu0 %vm744_vm1, %v3391_v13  ;;  %3315 = vmatprep.mubr.msk.bf16.mxu1 %vm744_vm1, %v3392_v14  ;;  %v3424_v46 = vld [vmem:[%s4868_s0 + $0x1a0] sm:$0xff]   ;;  %v3426_v48 = vld [vmem:[%s4868_s0 + $0x1a8] sm:$0xff]  }
  0x18   :  { %65 = vst.msk [vmem:[#allocation2 + $0x168] sm:$0xff] %vm19_vm2, %v3449_v7  ;;  %66 = vst.msk [vmem:[#allocation2 + $0x170] sm:$0xff] %vm19_vm2, %v3449_v7  ;;  %v3427_v49 = vld [vmem:[%s4868_s0 + $0xb0] sm:$0xff]   ;;  %v3429_v51 = vld [vmem:[%s4868_s0 + $0xb8] sm:$0xff]  }
  0x19   :  { %67 = vst.msk [vmem:[#allocation2 + $0x178] sm:$0xff] %vm19_vm2, %v3449_v7  ;;  %68 = vst.msk [vmem:[#allocation2 + $0x180] sm:$0xff] %vm19_vm2, %v3449_v7  ;;  %v3428_v50 = vld [vmem:[%s4868_s0 + $0x1b0] sm:$0xff]   ;;  %v3430_v52 = vld [vmem:[%s4868_s0 + $0x1b8] sm:$0xff]  }
  0x1a   :  { %69 = vst.msk [vmem:[#allocation2 + $0x188] sm:$0xff] %vm19_vm2, %v3449_v7  ;;  %70 = vst.msk [vmem:[#allocation2 + $0x190] sm:$0xff] %vm19_vm2, %v3449_v7  ;;  %v3431_v53 = vld [vmem:[%s4868_s0 + $0xc0] sm:$0xff]   ;;  %v3433_v55 = vld [vmem:[%s4868_s0 + $0xc8] sm:$0xff]  }
  0x1b   :  { %71 = vst.msk [vmem:[#allocation2 + $0x198] sm:$0xff] %vm19_vm2, %v3449_v7  ;;  %72 = vst.msk [vmem:[#allocation2 + $0x1a0] sm:$0xff] %vm19_vm2, %v3449_v7  ;;  %v3432_v54 = vld [vmem:[%s4868_s0 + $0x1c0] sm:$0xff]   ;;  %v3434_v56 = vld [vmem:[%s4868_s0 + $0x1c8] sm:$0xff]  }
  0x1c   :  { %73 = vst.msk [vmem:[#allocation2 + $0x1a8] sm:$0xff] %vm19_vm2, %v3449_v7  ;;  %74 = vst.msk [vmem:[#allocation2 + $0x1b0] sm:$0xff] %vm19_vm2, %v3449_v7  ;;  %v3435_v57 = vld [vmem:[%s4868_s0 + $0xd0] sm:$0xff]   ;;  %v3437_v59 = vld [vmem:[%s4868_s0 + $0xd8] sm:$0xff]  }
  0x1d   :  { %75 = vst.msk [vmem:[#allocation2 + $0x1b8] sm:$0xff] %vm19_vm2, %v3449_v7  ;;  %76 = vst.msk [vmem:[#allocation2 + $0x1c0] sm:$0xff] %vm19_vm2, %v3449_v7  ;;  %v3436_v58 = vld [vmem:[%s4868_s0 + $0x1d0] sm:$0xff]   ;;  %v3438_v60 = vld [vmem:[%s4868_s0 + $0x1d8] sm:$0xff]  }
  0x1e   :  { %77 = vst.msk [vmem:[#allocation2 + $0x1c8] sm:$0xff] %vm19_vm2, %v3449_v7  ;;  %78 = vst.msk [vmem:[#allocation2 + $0x1d0] sm:$0xff] %vm19_vm2, %v3449_v7  ;;  %3252 = vmatmul.mubr.msk.bf16.gmra.mxu0 %vm744_vm1, %v3393_v15  ;;  %3316 = vmatmul.mubr.msk.bf16.gmra.mxu1 %vm744_vm1, %v3394_v16  ;;  %v3439_v61 = vld [vmem:[%s4868_s0 + $0xe0] sm:$0xff]   ;;  %v3441_v63 = vld [vmem:[%s4868_s0 + $0xe8] sm:$0xff]  }
  0x1f   :  { %79 = vst.msk [vmem:[#allocation2 + $0x1d8] sm:$0xff] %vm19_vm2, %v3449_v7  ;;  %80 = vst.msk [vmem:[#allocation2 + $0x1e0] sm:$0xff] %vm19_vm2, %v3449_v7  ;;  %3255 = vmatprep.mubr.msk.bf16.mxu0 %vm744_vm1, %v3395_v17  ;;  %3319 = vmatprep.mubr.msk.bf16.mxu1 %vm744_vm1, %v3396_v18  ;;  %v3440_v62 = vld [vmem:[%s4868_s0 + $0x1e0] sm:$0xff]   ;;  %v3442_v0 = vld [vmem:[%s4868_s0 + $0x1e8] sm:$0xff]  }
  0x20   :  { %81 = vst.msk [vmem:[#allocation2 + $0x1e8] sm:$0xff] %vm19_vm2, %v3449_v7  ;;  %82 = vst.msk [vmem:[#allocation2 + $0x1f0] sm:$0xff] %vm19_vm2, %v3449_v7  ;;  %v3443_v1 = vld [vmem:[%s4868_s0 + $0xf0] sm:$0xff]   ;;  %v3445_v3 = vld [vmem:[%s4868_s0 + $0xf8] sm:$0xff]  }
  0x21   :  { %83 = vst.msk [vmem:[#allocation2 + $0x1f8] sm:$0xff] %vm19_vm2, %v3449_v7  ;;  %84 = vst.msk [vmem:[#allocation2 + $0x200] sm:$0xff] %vm19_vm2, %v3449_v7  ;;  %v3444_v2 = vld [vmem:[%s4868_s0 + $0x1f0] sm:$0xff]   ;;  %v3446_v4 = vld [vmem:[%s4868_s0 + $0x1f8] sm:$0xff]  }
  0x22   :  { %85 = vst.msk [vmem:[#allocation2 + $0x208] sm:$0xff] %vm19_vm2, %v3449_v7  ;;  %86 = vst.msk [vmem:[#allocation2 + $0x210] sm:$0xff] %vm19_vm2, %v3449_v7  ;;  %v150_v5 = vld [vmem:[#allocation2 + $0x10] sm:$0xff]  ;;  %v148_v9 = vld [vmem:[#allocation2] sm:$0xff] }
  0x23   :  { %87 = vst.msk [vmem:[#allocation2 + $0x218] sm:$0xff] %vm19_vm2, %v3449_v7  ;;  %88 = vst.msk [vmem:[#allocation2 + $0x220] sm:$0xff] %vm19_vm2, %v3449_v7  ;;  %v151_v15 = vld [vmem:[#allocation2 + $0x18] sm:$0xff] }
  0x24   :  { %89 = vst.msk [vmem:[#allocation2 + $0x228] sm:$0xff] %vm19_vm2, %v3449_v7  ;;  %90 = vst.msk [vmem:[#allocation2 + $0x230] sm:$0xff] %vm19_vm2, %v3449_v7 }
  0x25   :  { %91 = vst.msk [vmem:[#allocation2 + $0x238] sm:$0xff] %vm19_vm2, %v3449_v7  ;;  %92 = vst.msk [vmem:[#allocation2 + $0x240] sm:$0xff] %vm19_vm2, %v3449_v7 }
  0x26   :  { %93 = vst.msk [vmem:[#allocation2 + $0x248] sm:$0xff] %vm19_vm2, %v3449_v7  ;;  %94 = vst.msk [vmem:[#allocation2 + $0x250] sm:$0xff] %vm19_vm2, %v3449_v7  ;;  %3256 = vmatmul.mubr.msk.bf16.gmra.mxu0 %vm744_vm1, %v3397_v19  ;;  %3320 = vmatmul.mubr.msk.bf16.gmra.mxu1 %vm744_vm1, %v3398_v20 }
  0x27   :  { %95 = vst.msk [vmem:[#allocation2 + $0x258] sm:$0xff] %vm19_vm2, %v3449_v7  ;;  %96 = vst.msk [vmem:[#allocation2 + $0x260] sm:$0xff] %vm19_vm2, %v3449_v7  ;;  %3259 = vmatprep.mubr.msk.bf16.mxu0 %vm744_vm1, %v3399_v21  ;;  %3323 = vmatprep.mubr.msk.bf16.mxu1 %vm744_vm1, %v3400_v22  ;;  %v149_v21 = vld [vmem:[#allocation2 + $0x8] sm:$0xff] }
  0x28   :  { %97 = vst.msk [vmem:[#allocation2 + $0x268] sm:$0xff] %vm19_vm2, %v3449_v7  ;;  %98 = vst.msk [vmem:[#allocation2 + $0x270] sm:$0xff] %vm19_vm2, %v3449_v7  ;;  %v212_v10 = vld [vmem:[#allocation2 + $0x200] sm:$0xff] }
  0x29   :  { %99 = vst.msk [vmem:[#allocation2 + $0x278] sm:$0xff] %vm19_vm2, %v3449_v7  ;;  %100 = vst.msk [vmem:[#allocation2 + $0x280] sm:$0xff] %vm19_vm2, %v3449_v7  ;;  %v214_v6 = vld [vmem:[#allocation2 + $0x210] sm:$0xff]  ;;  %v213_v22 = vld [vmem:[#allocation2 + $0x208] sm:$0xff] }
  0x2a   :  { %101 = vst.msk [vmem:[#allocation2 + $0x288] sm:$0xff] %vm19_vm2, %v3449_v7  ;;  %102 = vst.msk [vmem:[#allocation2 + $0x290] sm:$0xff] %vm19_vm2, %v3449_v7  ;;  %v215_v16 = vld [vmem:[#allocation2 + $0x218] sm:$0xff] }
  0x2b   :  { %103 = vst.msk [vmem:[#allocation2 + $0x298] sm:$0xff] %vm19_vm2, %v3449_v7  ;;  %104 = vst.msk [vmem:[#allocation2 + $0x2a0] sm:$0xff] %vm19_vm2, %v3449_v7 }
  0x2c   :  { %105 = vst.msk [vmem:[#allocation2 + $0x2a8] sm:$0xff] %vm19_vm2, %v3449_v7  ;;  %106 = vst.msk [vmem:[#allocation2 + $0x2b0] sm:$0xff] %vm19_vm2, %v3449_v7 }
  0x2d   :  { %107 = vst.msk [vmem:[#allocation2 + $0x2b8] sm:$0xff] %vm19_vm2, %v3449_v7  ;;  %108 = vst.msk [vmem:[#allocation2 + $0x2c0] sm:$0xff] %vm19_vm2, %v3449_v7 }
  0x2e   :  { %109 = vst.msk [vmem:[#allocation2 + $0x2c8] sm:$0xff] %vm19_vm2, %v3449_v7  ;;  %110 = vst.msk [vmem:[#allocation2 + $0x2d0] sm:$0xff] %vm19_vm2, %v3449_v7  ;;  %3260 = vmatmul.mubr.msk.bf16.gmra.mxu0 %vm744_vm1, %v3401_v23  ;;  %3324 = vmatmul.mubr.msk.bf16.gmra.mxu1 %vm744_vm1, %v3402_v24 }
  0x2f   :  { %111 = vst.msk [vmem:[#allocation2 + $0x2d8] sm:$0xff] %vm19_vm2, %v3449_v7  ;;  %112 = vst.msk [vmem:[#allocation2 + $0x2e0] sm:$0xff] %vm19_vm2, %v3449_v7  ;;  %3263 = vmatprep.mubr.msk.bf16.mxu0 %vm744_vm1, %v3403_v25  ;;  %3327 = vmatprep.mubr.msk.bf16.mxu1 %vm744_vm1, %v3404_v26 }
  0x30   :  { %113 = vst.msk [vmem:[#allocation2 + $0x2e8] sm:$0xff] %vm19_vm2, %v3449_v7  ;;  %114 = vst.msk [vmem:[#allocation2 + $0x2f0] sm:$0xff] %vm19_vm2, %v3449_v7 }
  0x31   :  { %115 = vst.msk [vmem:[#allocation2 + $0x2f8] sm:$0xff] %vm19_vm2, %v3449_v7  ;;  %116 = vst.msk [vmem:[#allocation2 + $0x300] sm:$0xff] %vm19_vm2, %v3449_v7 }
  0x32   :  { %117 = vst.msk [vmem:[#allocation2 + $0x308] sm:$0xff] %vm19_vm2, %v3449_v7  ;;  %118 = vst.msk [vmem:[#allocation2 + $0x310] sm:$0xff] %vm19_vm2, %v3449_v7 }
  0x33   :  { %119 = vst.msk [vmem:[#allocation2 + $0x318] sm:$0xff] %vm19_vm2, %v3449_v7  ;;  %120 = vst.msk [vmem:[#allocation2 + $0x320] sm:$0xff] %vm19_vm2, %v3449_v7 }
  0x34   :  { %121 = vst.msk [vmem:[#allocation2 + $0x328] sm:$0xff] %vm19_vm2, %v3449_v7  ;;  %122 = vst.msk [vmem:[#allocation2 + $0x330] sm:$0xff] %vm19_vm2, %v3449_v7 }
  0x35   :  { %123 = vst.msk [vmem:[#allocation2 + $0x338] sm:$0xff] %vm19_vm2, %v3449_v7  ;;  %124 = vst.msk [vmem:[#allocation2 + $0x340] sm:$0xff] %vm19_vm2, %v3449_v7 }
  0x36   :  { %125 = vst.msk [vmem:[#allocation2 + $0x348] sm:$0xff] %vm19_vm2, %v3449_v7  ;;  %126 = vst.msk [vmem:[#allocation2 + $0x350] sm:$0xff] %vm19_vm2, %v3449_v7  ;;  %3264 = vmatmul.mubr.msk.bf16.gmra.mxu0 %vm744_vm1, %v3405_v27  ;;  %3328 = vmatmul.mubr.msk.bf16.gmra.mxu1 %vm744_vm1, %v3406_v28  ;;  %v154_v27 = vld [vmem:[#allocation2 + $0x30] sm:$0xff] }
  0x37   :  { %127 = vst.msk [vmem:[#allocation2 + $0x358] sm:$0xff] %vm19_vm2, %v3449_v7  ;;  %128 = vst.msk [vmem:[#allocation2 + $0x360] sm:$0xff] %vm19_vm2, %v3449_v7  ;;  %3267 = vmatprep.mubr.msk.bf16.mxu0 %vm744_vm1, %v3407_v29  ;;  %3331 = vmatprep.mubr.msk.bf16.mxu1 %vm744_vm1, %v3408_v30  ;;  %v218_v28 = vld [vmem:[#allocation2 + $0x230] sm:$0xff] }
  0x38   :  { %129 = vst.msk [vmem:[#allocation2 + $0x368] sm:$0xff] %vm19_vm2, %v3449_v7  ;;  %130 = vst.msk [vmem:[#allocation2 + $0x370] sm:$0xff] %vm19_vm2, %v3449_v7 }
  0x39   :  { %131 = vst.msk [vmem:[#allocation2 + $0x378] sm:$0xff] %vm19_vm2, %v3449_v7  ;;  %132 = vst.msk [vmem:[#allocation2 + $0x380] sm:$0xff] %vm19_vm2, %v3449_v7 }
  0x3a   :  { %133 = vst.msk [vmem:[#allocation2 + $0x388] sm:$0xff] %vm19_vm2, %v3449_v7  ;;  %134 = vst.msk [vmem:[#allocation2 + $0x390] sm:$0xff] %vm19_vm2, %v3449_v7 }
  0x3b   :  { %135 = vst.msk [vmem:[#allocation2 + $0x398] sm:$0xff] %vm19_vm2, %v3449_v7  ;;  %136 = vst.msk [vmem:[#allocation2 + $0x3a0] sm:$0xff] %vm19_vm2, %v3449_v7 }
  0x3c   :  { %137 = vst.msk [vmem:[#allocation2 + $0x3a8] sm:$0xff] %vm19_vm2, %v3449_v7  ;;  %138 = vst.msk [vmem:[#allocation2 + $0x3b0] sm:$0xff] %vm19_vm2, %v3449_v7 }
  0x3d   :  { %139 = vst.msk [vmem:[#allocation2 + $0x3b8] sm:$0xff] %vm19_vm2, %v3449_v7  ;;  %140 = vst.msk [vmem:[#allocation2 + $0x3c0] sm:$0xff] %vm19_vm2, %v3449_v7 }
  0x3e   :  { %141 = vst.msk [vmem:[#allocation2 + $0x3c8] sm:$0xff] %vm19_vm2, %v3449_v7  ;;  %142 = vst.msk [vmem:[#allocation2 + $0x3d0] sm:$0xff] %vm19_vm2, %v3449_v7  ;;  %3268 = vmatmul.mubr.msk.bf16.gmra.mxu0 %vm744_vm1, %v3409_v31  ;;  %3332 = vmatmul.mubr.msk.bf16.gmra.mxu1 %vm744_vm1, %v3410_v32  ;;  %v4009_v31 = vld [vmem:[%s4869_s2] ss:$0 sm:$0xff] }
  0x3f   :  { %143 = vst.msk [vmem:[#allocation2 + $0x3d8] sm:$0xff] %vm19_vm2, %v3449_v7  ;;  %144 = vst.msk [vmem:[#allocation2 + $0x3e0] sm:$0xff] %vm19_vm2, %v3449_v7  ;;  %3271 = vmatprep.mubr.msk.bf16.mxu0 %vm744_vm1, %v3411_v33  ;;  %3335 = vmatprep.mubr.msk.bf16.mxu1 %vm744_vm1, %v3412_v34  ;;  %v152_v34 = vld [vmem:[#allocation2 + $0x20] sm:$0xff] }
  0x40   :  { %145 = vst.msk [vmem:[#allocation2 + $0x3e8] sm:$0xff] %vm19_vm2, %v3449_v7  ;;  %146 = vst.msk [vmem:[#allocation2 + $0x3f0] sm:$0xff] %vm19_vm2, %v3449_v7 }
  0x41   :  { %147 = vst.msk [vmem:[#allocation2 + $0x3f8] sm:$0xff] %vm19_vm2, %v3449_v7 }
  0x46   :  { %3272 = vmatmul.mubr.msk.bf16.gmra.mxu0 %vm744_vm1, %v3413_v35  ;;  %3336 = vmatmul.mubr.msk.bf16.gmra.mxu1 %vm744_vm1, %v3414_v36  ;;  %v216_v35 = vld [vmem:[#allocation2 + $0x220] sm:$0xff] }
  0x47   :  { %3275 = vmatprep.mubr.msk.bf16.mxu0 %vm744_vm1, %v3415_v37  ;;  %3339 = vmatprep.mubr.msk.bf16.mxu1 %vm744_vm1, %v3416_v38 }
  0x4e   :  { %3276 = vmatmul.mubr.msk.bf16.gmra.mxu0 %vm744_vm1, %v3417_v39  ;;  %3340 = vmatmul.mubr.msk.bf16.gmra.mxu1 %vm744_vm1, %v3418_v40 }
  0x4f   :  { %3279 = vmatprep.mubr.msk.bf16.mxu0 %vm744_vm1, %v3419_v41  ;;  %3343 = vmatprep.mubr.msk.bf16.mxu1 %vm744_vm1, %v3420_v42 }
  0x56   :  { %3280 = vmatmul.mubr.msk.bf16.gmra.mxu0 %vm744_vm1, %v3421_v43  ;;  %3344 = vmatmul.mubr.msk.bf16.gmra.mxu1 %vm744_vm1, %v3422_v44 }
  0x57   :  { %3283 = vmatprep.mubr.msk.bf16.mxu0 %vm744_vm1, %v3423_v45  ;;  %3347 = vmatprep.mubr.msk.bf16.mxu1 %vm744_vm1, %v3424_v46  ;;  %v155_v46 = vld [vmem:[#allocation2 + $0x38] sm:$0xff] }
  0x5e   :  { %3284 = vmatmul.mubr.msk.bf16.gmra.mxu0 %vm744_vm1, %v3425_v47  ;;  %3348 = vmatmul.mubr.msk.bf16.gmra.mxu1 %vm744_vm1, %v3426_v48  ;;  %v219_v47 = vld [vmem:[#allocation2 + $0x238] sm:$0xff] }
  0x5f   :  { %3287 = vmatprep.mubr.msk.bf16.mxu0 %vm744_vm1, %v3427_v49  ;;  %3351 = vmatprep.mubr.msk.bf16.mxu1 %vm744_vm1, %v3428_v50 }
  0x66   :  { %3288 = vmatmul.mubr.msk.bf16.gmra.mxu0 %vm744_vm1, %v3429_v51  ;;  %3352 = vmatmul.mubr.msk.bf16.gmra.mxu1 %vm744_vm1, %v3430_v52 }
  0x67   :  { %3291 = vmatprep.mubr.msk.bf16.mxu0 %vm744_vm1, %v3431_v53  ;;  %3355 = vmatprep.mubr.msk.bf16.mxu1 %vm744_vm1, %v3432_v54 }
  0x6e   :  { %3292 = vmatmul.mubr.msk.bf16.gmra.mxu0 %vm744_vm1, %v3433_v55  ;;  %3356 = vmatmul.mubr.msk.bf16.gmra.mxu1 %vm744_vm1, %v3434_v56  ;;  %v153_v56 = vld [vmem:[#allocation2 + $0x28] sm:$0xff] }
  0x6f   :  { %3295 = vmatprep.mubr.msk.bf16.mxu0 %vm744_vm1, %v3435_v57  ;;  %3359 = vmatprep.mubr.msk.bf16.mxu1 %vm744_vm1, %v3436_v58  ;;  %v217_v57 = vld [vmem:[#allocation2 + $0x228] sm:$0xff] }
  0x76   :  { %3296 = vmatmul.mubr.msk.bf16.gmra.mxu0 %vm744_vm1, %v3437_v59  ;;  %3360 = vmatmul.mubr.msk.bf16.gmra.mxu1 %vm744_vm1, %v3438_v60 }
  0x77   :  { %3299 = vmatprep.mubr.msk.bf16.mxu0 %vm744_vm1, %v3439_v61  ;;  %3363 = vmatprep.mubr.msk.bf16.mxu1 %vm744_vm1, %v3440_v62 }
  0x7e   :  { %3300 = vmatmul.mubr.msk.bf16.gmra.mxu0 %vm744_vm1, %v3441_v63  ;;  %3364 = vmatmul.mubr.msk.bf16.gmra.mxu1 %vm744_vm1, %v3442_v0 }
  0x7f   :  { %3303 = vmatprep.mubr.msk.bf16.mxu0 %vm744_vm1, %v3443_v1  ;;  %3367 = vmatprep.mubr.msk.bf16.mxu1 %vm744_vm1, %v3444_v2 }
  0x86   :  { %3304 = vmatmul.mubr.msk.bf16.gmra.mxu0 %vm744_vm1, %v3445_v3  ;;  %3368 = vmatmul.mubr.msk.bf16.gmra.mxu1 %vm744_vm1, %v3446_v4  ;;  %v158_v4 = vld [vmem:[#allocation2 + $0x50] sm:$0xff] }
  0xce   :  { %v3245_v7 = vpop.f32.mrf.mxu0  ;;  %v3309_v8 = vpop.f32.mrf.mxu1 }
  0xcf   :  { %v1488_v11 = vadd.f32 %v3245_v7, %v150_v5  ;;  %v1552_v12 = vadd.f32 %v3309_v8, %v214_v6  ;;  %v222_v5 = vld [vmem:[#allocation2 + $0x250] sm:$0xff] }
  0xd0   :  { %v975_v13 = vpop.f32.mrf.mxu0  ;;  %v1231_v14 = vpop.f32.mrf.mxu1 }
  0xd1   :  { %1617 = vst.msk [vmem:[#allocation2 + $0x10] sm:$0xff] %vm19_vm2, %v1488_v11  ;;  %1681 = vst.msk [vmem:[#allocation2 + $0x210] sm:$0xff] %vm19_vm2, %v1552_v12  ;;  %v1486_v17 = vadd.f32 %v975_v13, %v148_v9  ;;  %v1550_v18 = vadd.f32 %v1231_v14, %v212_v10 }
  0xd2   :  { %v3246_v19 = vpop.f32.mrf.mxu0  ;;  %v3310_v20 = vpop.f32.mrf.mxu1 }
  0xd3   :  { %1615 = vst.msk [vmem:[#allocation2] sm:$0xff] %vm19_vm2, %v1486_v17  ;;  %1679 = vst.msk [vmem:[#allocation2 + $0x200] sm:$0xff] %vm19_vm2, %v1550_v18  ;;  %v1489_v23 = vadd.f32 %v3246_v19, %v151_v15  ;;  %v1553_v24 = vadd.f32 %v3310_v20, %v215_v16  ;;  %v156_v18 = vld [vmem:[#allocation2 + $0x40] sm:$0xff] }
  0xd4   :  { %v978_v25 = vpop.f32.mrf.mxu0  ;;  %v1234_v26 = vpop.f32.mrf.mxu1  ;;  %v220_v19 = vld [vmem:[#allocation2 + $0x240] sm:$0xff] }
  0xd5   :  { %1618 = vst.msk [vmem:[#allocation2 + $0x18] sm:$0xff] %vm19_vm2, %v1489_v23  ;;  %1682 = vst.msk [vmem:[#allocation2 + $0x218] sm:$0xff] %vm19_vm2, %v1553_v24  ;;  %v1487_v29 = vadd.f32 %v978_v25, %v149_v21  ;;  %v1551_v30 = vadd.f32 %v1234_v26, %v213_v22 }
  0xd6   :  { %v3249_v32 = vpop.f32.mrf.mxu0  ;;  %v3313_v33 = vpop.f32.mrf.mxu1 }
  0xd7   :  { %1616 = vst.msk [vmem:[#allocation2 + $0x8] sm:$0xff] %vm19_vm2, %v1487_v29  ;;  %1680 = vst.msk [vmem:[#allocation2 + $0x208] sm:$0xff] %vm19_vm2, %v1551_v30  ;;  %v1492_v36 = vadd.f32 %v3249_v32, %v154_v27  ;;  %v1556_v37 = vadd.f32 %v3313_v33, %v218_v28  ;;  %v159_v33 = vld [vmem:[#allocation2 + $0x58] sm:$0xff] }
  0xd8   :  { %v1748_v38 = vld [vmem:[#allocation2 + $0x10] sm:$0xff]  ;;  %v991_v40 = vpop.f32.mrf.mxu0  ;;  %v1247_v41 = vpop.f32.mrf.mxu1 }
  0xd9   :  { %v1812_v39 = vld [vmem:[#allocation2 + $0x210] sm:$0xff]  ;;  %v1883_v42 = vadd.f32 %v4009_v31, %v1748_v38  ;;  %1621 = vst.msk [vmem:[#allocation2 + $0x30] sm:$0xff] %vm19_vm2, %v1492_v36  ;;  %1685 = vst.msk [vmem:[#allocation2 + $0x230] sm:$0xff] %vm19_vm2, %v1556_v37  ;;  %v1490_v44 = vadd.f32 %v991_v40, %v152_v34  ;;  %v1554_v45 = vadd.f32 %v1247_v41, %v216_v35  ;;  %v223_v34 = vld [vmem:[#allocation2 + $0x258] sm:$0xff] }
  0xda   :  { %v1947_v43 = vadd.f32 %v4009_v31, %v1812_v39  ;;  %v1746_v48 = vld [vmem:[#allocation2] sm:$0xff]  ;;  %v3250_v50 = vpop.f32.mrf.mxu0  ;;  %v3314_v51 = vpop.f32.mrf.mxu1  ;;  %v157_v35 = vld [vmem:[#allocation2 + $0x48] sm:$0xff] }
  0xdb   :  { %v1810_v49 = vld [vmem:[#allocation2 + $0x200] sm:$0xff]  ;;  %v2011_v52 = vmax.f32 %v1883_v42, 0.0  ;;  %v1881_v54 = vadd.f32 %v4009_v31, %v1746_v48  ;;  %1619 = vst.msk [vmem:[#allocation2 + $0x20] sm:$0xff] %vm19_vm2, %v1490_v44  ;;  %1683 = vst.msk [vmem:[#allocation2 + $0x220] sm:$0xff] %vm19_vm2, %v1554_v45  ;;  %v1493_v60 = vadd.f32 %v3250_v50, %v155_v46  ;;  %v1557_v61 = vadd.f32 %v3314_v51, %v219_v47  ;;  %v221_v44 = vld [vmem:[#allocation2 + $0x248] sm:$0xff] }
  0xdc   :  { %v2075_v53 = vmax.f32 %v1947_v43, 0.0  ;;  %v1945_v55 = vadd.f32 %v4009_v31, %v1810_v49  ;;  %v1749_v58 = vld [vmem:[#allocation2 + $0x18] sm:$0xff]  ;;  %v994_v62 = vpop.f32.mrf.mxu0  ;;  %v1250_v63 = vpop.f32.mrf.mxu1 }
  0xdd   :  { %v1813_v59 = vld [vmem:[#allocation2 + $0x218] sm:$0xff]  ;;  %v3044_v0 = vpack.c.bf16 %v2011_v52, %v2011_v52  ;;  %v2009_v2 = vmax.f32 %v1881_v54, 0.0  ;;  %v1884_v6 = vadd.f32 %v4009_v31, %v1749_v58  ;;  %1622 = vst.msk [vmem:[#allocation2 + $0x38] sm:$0xff] %vm19_vm2, %v1493_v60  ;;  %1686 = vst.msk [vmem:[#allocation2 + $0x238] sm:$0xff] %vm19_vm2, %v1557_v61  ;;  %v1491_v10 = vadd.f32 %v994_v62, %v153_v56  ;;  %v226_v56 = vld [vmem:[#allocation2 + $0x270] sm:$0xff] }
  0xde   :  { %v3108_v1 = vpack.c.bf16 %v2075_v53, %v2075_v53  ;;  %v2073_v3 = vmax.f32 %v1945_v55, 0.0  ;;  %v1948_v7 = vadd.f32 %v4009_v31, %v1813_v59  ;;  %v1747_v8 = vld [vmem:[#allocation2 + $0x8] sm:$0xff]  ;;  %v1555_v11 = vadd.f32 %v1250_v63, %v217_v57  ;;  %v3253_v12 = vpop.f32.mrf.mxu0  ;;  %v3317_v13 = vpop.f32.mrf.mxu1  ;;  %v162_v55 = vld [vmem:[#allocation2 + $0x70] sm:$0xff] }
  0xdf   :  { %v1811_v9 = vld [vmem:[#allocation2 + $0x208] sm:$0xff]  ;;  %2652 = vst.msk [vmem:[%s4870_s3 + $0x8] sm:$0xf] %vm2649_vm3, %v3044_v0  ;;  %v3042_v14 = vpack.c.bf16 %v2009_v2, %v2009_v2  ;;  %v1882_v16 = vadd.f32 %v4009_v31, %v1747_v8  ;;  %v2012_v20 = vmax.f32 %v1884_v6, 0.0  ;;  %v1496_v24 = vadd.f32 %v3253_v12, %v158_v4  ;;  %v224_v6 = vld [vmem:[#allocation2 + $0x260] sm:$0xff] }
  0xe0   :  { %2716 = vst.msk [vmem:[%s4870_s3 + $0x108] sm:$0xf] %vm2649_vm3, %v3108_v1  ;;  %v3106_v15 = vpack.c.bf16 %v2073_v3, %v2073_v3  ;;  %v1946_v17 = vadd.f32 %v4009_v31, %v1811_v9  ;;  %v2076_v21 = vmax.f32 %v1948_v7, 0.0  ;;  %v1752_v22 = vld [vmem:[#allocation2 + $0x30] sm:$0xff]  ;;  %v1560_v25 = vadd.f32 %v3317_v13, %v222_v5  ;;  %v1007_v26 = vpop.f32.mrf.mxu0  ;;  %v1263_v27 = vpop.f32.mrf.mxu1  ;;  %v160_v5 = vld [vmem:[#allocation2 + $0x60] sm:$0xff] }
  0xe1   :  { %v1816_v23 = vld [vmem:[#allocation2 + $0x230] sm:$0xff]  ;;  %1620 = vst.msk [vmem:[#allocation2 + $0x28] sm:$0xff] %vm19_vm2, %v1491_v10  ;;  %1684 = vst.msk [vmem:[#allocation2 + $0x228] sm:$0xff] %vm19_vm2, %v1555_v11  ;;  %v2010_v28 = vmax.f32 %v1882_v16, 0.0  ;;  %v1887_v30 = vadd.f32 %v4009_v31, %v1752_v22  ;;  %v3045_v36 = vpack.c.bf16 %v2012_v20, %v2012_v20  ;;  %v1494_v40 = vadd.f32 %v1007_v26, %v156_v18  ;;  %v227_v18 = vld [vmem:[#allocation2 + $0x278] sm:$0xff] }
  0xe2   :  { %2650 = vst.msk [vmem:[%s4870_s3] sm:$0xf] %vm2649_vm3, %v3042_v14  ;;  %2714 = vst.msk [vmem:[%s4870_s3 + $0x100] sm:$0xf] %vm2649_vm3, %v3106_v15  ;;  %v2074_v29 = vmax.f32 %v1946_v17, 0.0  ;;  %v1951_v32 = vadd.f32 %v4009_v31, %v1816_v23  ;;  %v3109_v37 = vpack.c.bf16 %v2076_v21, %v2076_v21  ;;  %v1750_v38 = vld [vmem:[#allocation2 + $0x20] sm:$0xff]  ;;  %v1558_v41 = vadd.f32 %v1263_v27, %v220_v19  ;;  %v3254_v42 = vpop.f32.mrf.mxu0  ;;  %v3318_v43 = vpop.f32.mrf.mxu1 }
  0xe3   :  { %v1814_v39 = vld [vmem:[#allocation2 + $0x220] sm:$0xff]  ;;  %1625 = vst.msk [vmem:[#allocation2 + $0x50] sm:$0xff] %vm19_vm2, %v1496_v24  ;;  %1689 = vst.msk [vmem:[#allocation2 + $0x250] sm:$0xff] %vm19_vm2, %v1560_v25  ;;  %v3043_v45 = vpack.c.bf16 %v2010_v28, %v2010_v28  ;;  %v2015_v47 = vmax.f32 %v1887_v30, 0.0  ;;  %v1885_v49 = vadd.f32 %v4009_v31, %v1750_v38  ;;  %v1497_v51 = vadd.f32 %v3254_v42, %v159_v33  ;;  %v163_v17 = vld [vmem:[#allocation2 + $0x78] sm:$0xff] }
  0xe4   :  { %v3107_v46 = vpack.c.bf16 %v2074_v29, %v2074_v29  ;;  %v2079_v48 = vmax.f32 %v1951_v32, 0.0  ;;  %2653 = vst.msk [vmem:[%s4870_s3 + $0xc] sm:$0xf] %vm2649_vm3, %v3045_v36  ;;  %2717 = vst.msk [vmem:[%s4870_s3 + $0x10c] sm:$0xf] %vm2649_vm3, %v3109_v37  ;;  %v1949_v50 = vadd.f32 %v4009_v31, %v1814_v39  ;;  %v1561_v52 = vadd.f32 %v3318_v43, %v223_v34  ;;  %v1010_v53 = vpop.f32.mrf.mxu0  ;;  %v1266_v54 = vpop.f32.mrf.mxu1  ;;  %v1753_v59 = vld [vmem:[#allocation2 + $0x38] sm:$0xff] }
  0xe5   :  { %1623 = vst.msk [vmem:[#allocation2 + $0x40] sm:$0xff] %vm19_vm2, %v1494_v40  ;;  %1687 = vst.msk [vmem:[#allocation2 + $0x240] sm:$0xff] %vm19_vm2, %v1558_v41  ;;  %v3048_v57 = vpack.c.bf16 %v2015_v47, %v2015_v47  ;;  %v1817_v60 = vld [vmem:[#allocation2 + $0x238] sm:$0xff]  ;;  %v1495_v61 = vadd.f32 %v1010_v53, %v157_v35  ;;  %v1559_v62 = vadd.f32 %v1266_v54, %v221_v44  ;;  %v2013_v63 = vmax.f32 %v1885_v49, 0.0  ;;  %v161_v32 = vld [vmem:[#allocation2 + $0x68] sm:$0xff] }
  0xe6   :  { %2651 = vst.msk [vmem:[%s4870_s3 + $0x4] sm:$0xf] %vm2649_vm3, %v3043_v45  ;;  %2715 = vst.msk [vmem:[%s4870_s3 + $0x104] sm:$0xf] %vm2649_vm3, %v3107_v46  ;;  %v3112_v58 = vpack.c.bf16 %v2079_v48, %v2079_v48  ;;  %v2077_v0 = vmax.f32 %v1949_v50, 0.0  ;;  %v1888_v1 = vadd.f32 %v4009_v31, %v1753_v59  ;;  %v1952_v2 = vadd.f32 %v4009_v31, %v1817_v60  ;;  %v3257_v3 = vpop.f32.mrf.mxu0  ;;  %v3321_v4 = vpop.f32.mrf.mxu1  ;;  %v225_v33 = vld [vmem:[#allocation2 + $0x268] sm:$0xff] }
  0xe7   :  { %1626 = vst.msk [vmem:[#allocation2 + $0x58] sm:$0xff] %vm19_vm2, %v1497_v51  ;;  %1690 = vst.msk [vmem:[#allocation2 + $0x258] sm:$0xff] %vm19_vm2, %v1561_v52  ;;  %v1500_v9 = vadd.f32 %v3257_v3, %v162_v55  ;;  %v1564_v10 = vadd.f32 %v3321_v4, %v226_v56  ;;  %v3046_v11 = vpack.c.bf16 %v2013_v63, %v2013_v63  ;;  %v166_v46 = vld [vmem:[#allocation2 + $0x90] sm:$0xff]  ;;  %v228_v3 = vld [vmem:[#allocation2 + $0x280] sm:$0xff] }
  0xe8   :  { %2656 = vst.msk [vmem:[%s4870_s3 + $0x18] sm:$0xf] %vm2649_vm3, %v3048_v57  ;;  %2720 = vst.msk [vmem:[%s4870_s3 + $0x118] sm:$0xf] %vm2649_vm3, %v3112_v58  ;;  %v1751_v7 = vld [vmem:[#allocation2 + $0x28] sm:$0xff]  ;;  %v3110_v12 = vpack.c.bf16 %v2077_v0, %v2077_v0  ;;  %v2016_v13 = vmax.f32 %v1888_v1, 0.0  ;;  %v1023_v15 = vpop.f32.mrf.mxu0  ;;  %v1279_v16 = vpop.f32.mrf.mxu1 }
  0xe9   :  { %v1815_v8 = vld [vmem:[#allocation2 + $0x228] sm:$0xff]  ;;  %1624 = vst.msk [vmem:[#allocation2 + $0x48] sm:$0xff] %vm19_vm2, %v1495_v61  ;;  %1688 = vst.msk [vmem:[#allocation2 + $0x248] sm:$0xff] %vm19_vm2, %v1559_v62  ;;  %v2080_v14 = vmax.f32 %v1952_v2, 0.0  ;;  %v1886_v19 = vadd.f32 %v4009_v31, %v1751_v7  ;;  %v1498_v23 = vadd.f32 %v1023_v15, %v160_v5  ;;  %v1562_v24 = vadd.f32 %v1279_v16, %v224_v6  ;;  %v230_v53 = vld [vmem:[#allocation2 + $0x290] sm:$0xff] }
  0xea   :  { %v1950_v20 = vadd.f32 %v4009_v31, %v1815_v8  ;;  %v1756_v21 = vld [vmem:[#allocation2 + $0x50] sm:$0xff]  ;;  %1629 = vst.msk [vmem:[#allocation2 + $0x70] sm:$0xff] %vm19_vm2, %v1500_v9  ;;  %1693 = vst.msk [vmem:[#allocation2 + $0x270] sm:$0xff] %vm19_vm2, %v1564_v10  ;;  %v3049_v25 = vpack.c.bf16 %v2016_v13, %v2016_v13  ;;  %v3258_v29 = vpop.f32.mrf.mxu0  ;;  %v3322_v30 = vpop.f32.mrf.mxu1  ;;  %v164_v2 = vld [vmem:[#allocation2 + $0x80] sm:$0xff] }
  0xeb   :  { %v1820_v22 = vld [vmem:[#allocation2 + $0x250] sm:$0xff]  ;;  %2654 = vst.msk [vmem:[%s4870_s3 + $0x10] sm:$0xf] %vm2649_vm3, %v3046_v11  ;;  %2718 = vst.msk [vmem:[%s4870_s3 + $0x110] sm:$0xf] %vm2649_vm3, %v3110_v12  ;;  %v3113_v26 = vpack.c.bf16 %v2080_v14, %v2080_v14  ;;  %v1891_v27 = vadd.f32 %v4009_v31, %v1756_v21  ;;  %v2014_v34 = vmax.f32 %v1886_v19, 0.0  ;;  %v1501_v38 = vadd.f32 %v3258_v29, %v163_v17 }
  0xec   :  { %v1955_v28 = vadd.f32 %v4009_v31, %v1820_v22  ;;  %v2078_v35 = vmax.f32 %v1950_v20, 0.0  ;;  %v1754_v36 = vld [vmem:[#allocation2 + $0x40] sm:$0xff]  ;;  %1627 = vst.msk [vmem:[#allocation2 + $0x60] sm:$0xff] %vm19_vm2, %v1498_v23  ;;  %1691 = vst.msk [vmem:[#allocation2 + $0x260] sm:$0xff] %vm19_vm2, %v1562_v24  ;;  %v1565_v39 = vadd.f32 %v3322_v30, %v227_v18  ;;  %v1026_v44 = vpop.f32.mrf.mxu0  ;;  %v1282_v45 = vpop.f32.mrf.mxu1  ;;  %v167_v16 = vld [vmem:[#allocation2 + $0x98] sm:$0xff] }
  0xed   :  { %v1818_v37 = vld [vmem:[#allocation2 + $0x240] sm:$0xff]  ;;  %2657 = vst.msk [vmem:[%s4870_s3 + $0x1c] sm:$0xf] %vm2649_vm3, %v3049_v25  ;;  %2721 = vst.msk [vmem:[%s4870_s3 + $0x11c] sm:$0xf] %vm2649_vm3, %v3113_v26  ;;  %v2019_v40 = vmax.f32 %v1891_v27, 0.0  ;;  %v1889_v42 = vadd.f32 %v4009_v31, %v1754_v36  ;;  %v3047_v47 = vpack.c.bf16 %v2014_v34, %v2014_v34  ;;  %v1499_v51 = vadd.f32 %v1026_v44, %v161_v32 }
  0xee   :  { %v2083_v41 = vmax.f32 %v1955_v28, 0.0  ;;  %v1953_v43 = vadd.f32 %v4009_v31, %v1818_v37  ;;  %v3111_v48 = vpack.c.bf16 %v2078_v35, %v2078_v35  ;;  %v1757_v49 = vld [vmem:[#allocation2 + $0x58] sm:$0xff]  ;;  %1630 = vst.msk [vmem:[#allocation2 + $0x78] sm:$0xff] %vm19_vm2, %v1501_v38  ;;  %1694 = vst.msk [vmem:[#allocation2 + $0x278] sm:$0xff] %vm19_vm2, %v1565_v39  ;;  %v1563_v52 = vadd.f32 %v1282_v45, %v225_v33  ;;  %v3261_v60 = vpop.f32.mrf.mxu0  ;;  %v3325_v61 = vpop.f32.mrf.mxu1  ;;  %v229_v44 = vld [vmem:[#allocation2 + $0x288] sm:$0xff] }
  0xef   :  { %v1821_v50 = vld [vmem:[#allocation2 + $0x258] sm:$0xff]  ;;  %v3052_v54 = vpack.c.bf16 %v2019_v40, %v2019_v40  ;;  %v2017_v56 = vmax.f32 %v1889_v42, 0.0  ;;  %2655 = vst.msk [vmem:[%s4870_s3 + $0x14] sm:$0xf] %vm2649_vm3, %v3047_v47  ;;  %v1892_v62 = vadd.f32 %v4009_v31, %v1757_v49  ;;  %v1504_v8 = vadd.f32 %v3261_v60, %v166_v46 }
  0xf0   :  { %v3116_v55 = vpack.c.bf16 %v2083_v41, %v2083_v41  ;;  %v2081_v57 = vmax.f32 %v1953_v43, 0.0  ;;  %v1755_v58 = vld [vmem:[#allocation2 + $0x48] sm:$0xff]  ;;  %2719 = vst.msk [vmem:[%s4870_s3 + $0x114] sm:$0xf] %vm2649_vm3, %v3111_v48  ;;  %v1956_v63 = vadd.f32 %v4009_v31, %v1821_v50  ;;  %v1568_v9 = vadd.f32 %v3325_v61, %v230_v53  ;;  %v1039_v10 = vpop.f32.mrf.mxu0  ;;  %v1295_v11 = vpop.f32.mrf.mxu1  ;;  %v231_v24 = vld [vmem:[#allocation2 + $0x298] sm:$0xff] }
  0xf1   :  { %v1819_v59 = vld [vmem:[#allocation2 + $0x248] sm:$0xff]  ;;  %v1890_v0 = vadd.f32 %v4009_v31, %v1755_v58  ;;  %1628 = vst.msk [vmem:[#allocation2 + $0x68] sm:$0xff] %vm19_vm2, %v1499_v51  ;;  %1692 = vst.msk [vmem:[#allocation2 + $0x268] sm:$0xff] %vm19_vm2, %v1563_v52  ;;  %v3050_v4 = vpack.c.bf16 %v2017_v56, %v2017_v56  ;;  %v1760_v6 = vld [vmem:[#allocation2 + $0x70] sm:$0xff]  ;;  %v2020_v12 = vmax.f32 %v1892_v62, 0.0  ;;  %v1502_v21 = vadd.f32 %v1039_v10, %v164_v2 }
  0xf2   :  { %v1954_v1 = vadd.f32 %v4009_v31, %v1819_v59  ;;  %2660 = vst.msk [vmem:[%s4870_s3 + $0x28] sm:$0xf] %vm2649_vm3, %v3052_v54  ;;  %2724 = vst.msk [vmem:[%s4870_s3 + $0x128] sm:$0xf] %vm2649_vm3, %v3116_v55  ;;  %v3114_v5 = vpack.c.bf16 %v2081_v57, %v2081_v57  ;;  %v1824_v7 = vld [vmem:[#allocation2 + $0x270] sm:$0xff]  ;;  %v2084_v13 = vmax.f32 %v1956_v63, 0.0  ;;  %v1895_v17 = vadd.f32 %v4009_v31, %v1760_v6  ;;  %v3262_v23 = vpop.f32.mrf.mxu0  ;;  %v3326_v25 = vpop.f32.mrf.mxu1 }
  0xf3   :  { %v2018_v14 = vmax.f32 %v1890_v0, 0.0  ;;  %2658 = vst.msk [vmem:[%s4870_s3 + $0x20] sm:$0xf] %vm2649_vm3, %v3050_v4  ;;  %v1959_v18 = vadd.f32 %v4009_v31, %v1824_v7  ;;  %v1758_v19 = vld [vmem:[#allocation2 + $0x60] sm:$0xff]  ;;  %v1566_v22 = vadd.f32 %v1295_v11, %v228_v3  ;;  %v3053_v26 = vpack.c.bf16 %v2020_v12, %v2020_v12  ;;  %v165_v43 = vld [vmem:[#allocation2 + $0x88] sm:$0xff]  ;;  %v170_v57 = vld [vmem:[#allocation2 + $0xb0] sm:$0xff] }
  0xf4   :  { %v2082_v15 = vmax.f32 %v1954_v1, 0.0  ;;  %2722 = vst.msk [vmem:[%s4870_s3 + $0x120] sm:$0xf] %vm2649_vm3, %v3114_v5  ;;  %v1822_v20 = vld [vmem:[#allocation2 + $0x260] sm:$0xff]  ;;  %v3117_v27 = vpack.c.bf16 %v2084_v13, %v2084_v13  ;;  %v2023_v30 = vmax.f32 %v1895_v17, 0.0  ;;  %v1893_v33 = vadd.f32 %v4009_v31, %v1758_v19  ;;  %v1042_v37 = vpop.f32.mrf.mxu0  ;;  %v1298_v38 = vpop.f32.mrf.mxu1  ;;  %v234_v58 = vld [vmem:[#allocation2 + $0x2b0] sm:$0xff] }
  0xf5   :  { %1633 = vst.msk [vmem:[#allocation2 + $0x90] sm:$0xff] %vm19_vm2, %v1504_v8  ;;  %1697 = vst.msk [vmem:[#allocation2 + $0x290] sm:$0xff] %vm19_vm2, %v1568_v9  ;;  %v3051_v28 = vpack.c.bf16 %v2018_v14, %v2018_v14  ;;  %v2087_v32 = vmax.f32 %v1959_v18, 0.0  ;;  %v1957_v34 = vadd.f32 %v4009_v31, %v1822_v20  ;;  %v1761_v35 = vld [vmem:[#allocation2 + $0x78] sm:$0xff]  ;;  %v1505_v41 = vadd.f32 %v3262_v23, %v167_v16  ;;  %v168_v63 = vld [vmem:[#allocation2 + $0xa0] sm:$0xff] }
  0xf6   :  { %v3115_v29 = vpack.c.bf16 %v2082_v15, %v2082_v15  ;;  %v1825_v36 = vld [vmem:[#allocation2 + $0x278] sm:$0xff]  ;;  %1631 = vst.msk [vmem:[#allocation2 + $0x80] sm:$0xff] %vm19_vm2, %v1502_v21  ;;  %1695 = vst.msk [vmem:[#allocation2 + $0x280] sm:$0xff] %vm19_vm2, %v1566_v22  ;;  %v1896_v39 = vadd.f32 %v4009_v31, %v1761_v35  ;;  %v1569_v42 = vadd.f32 %v3326_v25, %v231_v24  ;;  %v2021_v47 = vmax.f32 %v1893_v33, 0.0  ;;  %v3265_v51 = vpop.f32.mrf.mxu0  ;;  %v3329_v52 = vpop.f32.mrf.mxu1  ;;  %v232_v1 = vld [vmem:[#allocation2 + $0x2a0] sm:$0xff] }
  0xf7   :  { %2661 = vst.msk [vmem:[%s4870_s3 + $0x2c] sm:$0xf] %vm2649_vm3, %v3053_v26  ;;  %2725 = vst.msk [vmem:[%s4870_s3 + $0x12c] sm:$0xf] %vm2649_vm3, %v3117_v27  ;;  %v1960_v40 = vadd.f32 %v4009_v31, %v1825_v36  ;;  %v3056_v45 = vpack.c.bf16 %v2023_v30, %v2023_v30  ;;  %v3120_v46 = vpack.c.bf16 %v2087_v32, %v2087_v32  ;;  %v2085_v48 = vmax.f32 %v1957_v34, 0.0  ;;  %v171_v9 = vld [vmem:[#allocation2 + $0xb8] sm:$0xff] }
  0xf8   :  { %2659 = vst.msk [vmem:[%s4870_s3 + $0x24] sm:$0xf] %vm2649_vm3, %v3051_v28  ;;  %2723 = vst.msk [vmem:[%s4870_s3 + $0x124] sm:$0xf] %vm2649_vm3, %v3115_v29  ;;  %v1759_v49 = vld [vmem:[#allocation2 + $0x68] sm:$0xff]  ;;  %v2024_v53 = vmax.f32 %v1896_v39, 0.0  ;;  %v3054_v59 = vpack.c.bf16 %v2021_v47, %v2021_v47  ;;  %v1503_v61 = vadd.f32 %v1042_v37, %v165_v43  ;;  %v1567_v62 = vadd.f32 %v1298_v38, %v229_v44  ;;  %v1055_v0 = vpop.f32.mrf.mxu0  ;;  %v1311_v2 = vpop.f32.mrf.mxu1 }
  0xf9   :  { %v1823_v50 = vld [vmem:[#allocation2 + $0x268] sm:$0xff]  ;;  %v2088_v54 = vmax.f32 %v1960_v40, 0.0  ;;  %v1894_v55 = vadd.f32 %v4009_v31, %v1759_v49  ;;  %1634 = vst.msk [vmem:[#allocation2 + $0x98] sm:$0xff] %vm19_vm2, %v1505_v41  ;;  %1698 = vst.msk [vmem:[#allocation2 + $0x298] sm:$0xff] %vm19_vm2, %v1569_v42  ;;  %v3118_v60 = vpack.c.bf16 %v2085_v48, %v2085_v48  ;;  %v1508_v12 = vadd.f32 %v3265_v51, %v170_v57  ;;  %v235_v15 = vld [vmem:[#allocation2 + $0x2b8] sm:$0xff] }
  0xfa   :  { %v1958_v56 = vadd.f32 %v4009_v31, %v1823_v50  ;;  %2664 = vst.msk [vmem:[%s4870_s3 + $0x38] sm:$0xf] %vm2649_vm3, %v3056_v45  ;;  %2728 = vst.msk [vmem:[%s4870_s3 + $0x138] sm:$0xf] %vm2649_vm3, %v3120_v46  ;;  %v3057_v3 = vpack.c.bf16 %v2024_v53, %v2024_v53  ;;  %v1572_v13 = vadd.f32 %v3329_v52, %v234_v58  ;;  %v3266_v14 = vpop.f32.mrf.mxu0  ;;  %v3330_v16 = vpop.f32.mrf.mxu1  ;;  %v169_v17 = vld [vmem:[#allocation2 + $0xa8] sm:$0xff]  ;;  %v174_v32 = vld [vmem:[#allocation2 + $0xd0] sm:$0xff] }
  0xfb   :  { %v3121_v4 = vpack.c.bf16 %v2088_v54, %v2088_v54  ;;  %v2022_v5 = vmax.f32 %v1894_v55, 0.0  ;;  %2662 = vst.msk [vmem:[%s4870_s3 + $0x30] sm:$0xf] %vm2649_vm3, %v3054_v59  ;;  %2726 = vst.msk [vmem:[%s4870_s3 + $0x130] sm:$0xf] %vm2649_vm3, %v3118_v60  ;;  %v233_v18 = vld [vmem:[#allocation2 + $0x2a8] sm:$0xff]  ;;  %v1506_v23 = vadd.f32 %v1055_v0, %v168_v63  ;;  %v1570_v24 = vadd.f32 %v1311_v2, %v232_v1 }
  0xfc   :  { %v2086_v6 = vmax.f32 %v1958_v56, 0.0  ;;  %v1764_v7 = vld [vmem:[#allocation2 + $0x90] sm:$0xff]  ;;  %1632 = vst.msk [vmem:[#allocation2 + $0x88] sm:$0xff] %vm19_vm2, %v1503_v61  ;;  %1696 = vst.msk [vmem:[#allocation2 + $0x288] sm:$0xff] %vm19_vm2, %v1567_v62  ;;  %v1058_v29 = vpop.f32.mrf.mxu0  ;;  %v1314_v30 = vpop.f32.mrf.mxu1  ;;  %v1509_v34 = vadd.f32 %v3266_v14, %v171_v9  ;;  %v1573_v35 = vadd.f32 %v3330_v16, %v235_v15  ;;  %v172_v38 = vld [vmem:[#allocation2 + $0xc0] sm:$0xff] }
  0xfd   :  { %v1828_v8 = vld [vmem:[#allocation2 + $0x290] sm:$0xff]  ;;  %v1899_v10 = vadd.f32 %v4009_v31, %v1764_v7  ;;  %2665 = vst.msk [vmem:[%s4870_s3 + $0x3c] sm:$0xf] %vm2649_vm3, %v3057_v3  ;;  %2729 = vst.msk [vmem:[%s4870_s3 + $0x13c] sm:$0xf] %vm2649_vm3, %v3121_v4  ;;  %v3055_v19 = vpack.c.bf16 %v2022_v5, %v2022_v5  ;;  %v1762_v21 = vld [vmem:[#allocation2 + $0x80] sm:$0xff]  ;;  %v1507_v36 = vadd.f32 %v1058_v29, %v169_v17 }
  0xfe   :  { %v1963_v11 = vadd.f32 %v4009_v31, %v1828_v8  ;;  %v3119_v20 = vpack.c.bf16 %v2086_v6, %v2086_v6  ;;  %v1826_v22 = vld [vmem:[#allocation2 + $0x280] sm:$0xff]  ;;  %v1897_v27 = vadd.f32 %v4009_v31, %v1762_v21  ;;  %1637 = vst.msk [vmem:[#allocation2 + $0xb0] sm:$0xff] %vm19_vm2, %v1508_v12  ;;  %1701 = vst.msk [vmem:[#allocation2 + $0x2b0] sm:$0xff] %vm19_vm2, %v1572_v13  ;;  %v238_v33 = vld [vmem:[#allocation2 + $0x2d0] sm:$0xff]  ;;  %v3269_v45 = vpop.f32.mrf.mxu0  ;;  %v3333_v46 = vpop.f32.mrf.mxu1 }
  0xff   :  { %v2027_v25 = vmax.f32 %v1899_v10, 0.0  ;;  %v1961_v28 = vadd.f32 %v4009_v31, %v1826_v22  ;;  %2663 = vst.msk [vmem:[%s4870_s3 + $0x34] sm:$0xf] %vm2649_vm3, %v3055_v19  ;;  %v1571_v37 = vadd.f32 %v1314_v30, %v233_v18  ;;  %v236_v47 = vld [vmem:[#allocation2 + $0x2c0] sm:$0xff]  ;;  %v1512_v50 = vadd.f32 %v3269_v45, %v174_v32  ;;  %v175_v56 = vld [vmem:[#allocation2 + $0xd8] sm:$0xff]  ;;  %v173_v4 = vld [vmem:[#allocation2 + $0xc8] sm:$0xff] }
 0x100   :  { %v2091_v26 = vmax.f32 %v1963_v11, 0.0  ;;  %2727 = vst.msk [vmem:[%s4870_s3 + $0x134] sm:$0xf] %vm2649_vm3, %v3119_v20  ;;  %v2025_v41 = vmax.f32 %v1897_v27, 0.0  ;;  %v1765_v43 = vld [vmem:[#allocation2 + $0x98] sm:$0xff]  ;;  %v1576_v51 = vadd.f32 %v3333_v46, %v238_v33  ;;  %v1071_v54 = vpop.f32.mrf.mxu0  ;;  %v1327_v55 = vpop.f32.mrf.mxu1  ;;  %v237_v5 = vld [vmem:[#allocation2 + $0x2c8] sm:$0xff] }
 0x101   :  { %1635 = vst.msk [vmem:[#allocation2 + $0xa0] sm:$0xff] %vm19_vm2, %v1506_v23  ;;  %1699 = vst.msk [vmem:[#allocation2 + $0x2a0] sm:$0xff] %vm19_vm2, %v1570_v24  ;;  %v3060_v39 = vpack.c.bf16 %v2027_v25, %v2027_v25  ;;  %v2089_v42 = vmax.f32 %v1961_v28, 0.0  ;;  %v1829_v44 = vld [vmem:[#allocation2 + $0x298] sm:$0xff]  ;;  %v1900_v48 = vadd.f32 %v4009_v31, %v1765_v43  ;;  %v1510_v62 = vadd.f32 %v1071_v54, %v172_v38 }
 0x102   :  { %v3124_v40 = vpack.c.bf16 %v2091_v26, %v2091_v26  ;;  %v1964_v49 = vadd.f32 %v4009_v31, %v1829_v44  ;;  %1638 = vst.msk [vmem:[#allocation2 + $0xb8] sm:$0xff] %vm19_vm2, %v1509_v34  ;;  %1702 = vst.msk [vmem:[#allocation2 + $0x2b8] sm:$0xff] %vm19_vm2, %v1573_v35  ;;  %v3058_v52 = vpack.c.bf16 %v2025_v41, %v2025_v41  ;;  %v239_v57 = vld [vmem:[#allocation2 + $0x2d8] sm:$0xff]  ;;  %v3270_v2 = vpop.f32.mrf.mxu0  ;;  %v3334_v3 = vpop.f32.mrf.mxu1 }
 0x103   :  { %1636 = vst.msk [vmem:[#allocation2 + $0xa8] sm:$0xff] %vm19_vm2, %v1507_v36  ;;  %1700 = vst.msk [vmem:[#allocation2 + $0x2a8] sm:$0xff] %vm19_vm2, %v1571_v37  ;;  %v3122_v53 = vpack.c.bf16 %v2089_v42, %v2089_v42  ;;  %v2028_v58 = vmax.f32 %v1900_v48, 0.0  ;;  %v1763_v60 = vld [vmem:[#allocation2 + $0x88] sm:$0xff]  ;;  %v1574_v63 = vadd.f32 %v1327_v55, %v236_v47  ;;  %v1513_v10 = vadd.f32 %v3270_v2, %v175_v56 }
 0x104   :  { %2668 = vst.msk [vmem:[%s4870_s3 + $0x48] sm:$0xf] %vm2649_vm3, %v3060_v39  ;;  %2732 = vst.msk [vmem:[%s4870_s3 + $0x148] sm:$0xf] %vm2649_vm3, %v3124_v40  ;;  %v2092_v59 = vmax.f32 %v1964_v49, 0.0  ;;  %v1827_v61 = vld [vmem:[#allocation2 + $0x288] sm:$0xff]  ;;  %v1898_v0 = vadd.f32 %v4009_v31, %v1763_v60  ;;  %v1577_v11 = vadd.f32 %v3334_v3, %v239_v57  ;;  %v1074_v18 = vpop.f32.mrf.mxu0  ;;  %v1330_v19 = vpop.f32.mrf.mxu1 }
 0x105   :  { %1641 = vst.msk [vmem:[#allocation2 + $0xd0] sm:$0xff] %vm19_vm2, %v1512_v50  ;;  %1705 = vst.msk [vmem:[#allocation2 + $0x2d0] sm:$0xff] %vm19_vm2, %v1576_v51  ;;  %v1962_v1 = vadd.f32 %v4009_v31, %v1827_v61  ;;  %v3061_v6 = vpack.c.bf16 %v2028_v58, %v2028_v58  ;;  %v1768_v8 = vld [vmem:[#allocation2 + $0xb0] sm:$0xff]  ;;  %v1511_v22 = vadd.f32 %v1074_v18, %v173_v4 }
 0x106   :  { %2666 = vst.msk [vmem:[%s4870_s3 + $0x40] sm:$0xf] %vm2649_vm3, %v3058_v52  ;;  %2730 = vst.msk [vmem:[%s4870_s3 + $0x140] sm:$0xf] %vm2649_vm3, %v3122_v53  ;;  %v3125_v7 = vpack.c.bf16 %v2092_v59, %v2092_v59  ;;  %v1832_v9 = vld [vmem:[#allocation2 + $0x2b0] sm:$0xff]  ;;  %v2026_v12 = vmax.f32 %v1898_v0, 0.0  ;;  %v1903_v14 = vadd.f32 %v4009_v31, %v1768_v8  ;;  %v1575_v23 = vadd.f32 %v1330_v19, %v237_v5  ;;  %v4255_v32 = vpop.f32.mrf.mxu0  ;;  %v4257_v33 = vpop.f32.mrf.mxu1 }
 0x107   :  { %1639 = vst.msk [vmem:[#allocation2 + $0xc0] sm:$0xff] %vm19_vm2, %v1510_v62  ;;  %1703 = vst.msk [vmem:[#allocation2 + $0x2c0] sm:$0xff] %vm19_vm2, %v1574_v63  ;;  %v2090_v13 = vmax.f32 %v1962_v1, 0.0  ;;  %v1967_v15 = vadd.f32 %v4009_v31, %v1832_v9  ;;  %v178_v63 = vld [vmem:[#allocation2 + $0xf0] sm:$0xff] }
 0x108   :  { %v1766_v16 = vld [vmem:[#allocation2 + $0xa0] sm:$0xff]  ;;  %2669 = vst.msk [vmem:[%s4870_s3 + $0x4c] sm:$0xf] %vm2649_vm3, %v3061_v6  ;;  %2733 = vst.msk [vmem:[%s4870_s3 + $0x14c] sm:$0xf] %vm2649_vm3, %v3125_v7  ;;  %v3059_v24 = vpack.c.bf16 %v2026_v12, %v2026_v12  ;;  %v2031_v26 = vmax.f32 %v1903_v14, 0.0  ;;  %v4273_v45 = vpop.f32.mrf.mxu0  ;;  %v4275_v46 = vpop.f32.mrf.mxu1 }
 0x109   :  { %v1830_v17 = vld [vmem:[#allocation2 + $0x2a0] sm:$0xff]  ;;  %v1901_v20 = vadd.f32 %v4009_v31, %v1766_v16  ;;  %1642 = vst.msk [vmem:[#allocation2 + $0xd8] sm:$0xff] %vm19_vm2, %v1513_v10  ;;  %1706 = vst.msk [vmem:[#allocation2 + $0x2d8] sm:$0xff] %vm19_vm2, %v1577_v11  ;;  %v3123_v25 = vpack.c.bf16 %v2090_v13, %v2090_v13  ;;  %v2095_v27 = vmax.f32 %v1967_v15, 0.0  ;;  %v1769_v28 = vld [vmem:[#allocation2 + $0xb8] sm:$0xff] }
 0x10a   :  { %v1965_v21 = vadd.f32 %v4009_v31, %v1830_v17  ;;  %v1833_v29 = vld [vmem:[#allocation2 + $0x2b8] sm:$0xff]  ;;  %v1767_v30 = vld [vmem:[#allocation2 + $0xa8] sm:$0xff]  ;;  %v1904_v36 = vadd.f32 %v4009_v31, %v1769_v28  ;;  %1640 = vst.msk [vmem:[#allocation2 + $0xc8] sm:$0xff] %vm19_vm2, %v1511_v22  ;;  %1704 = vst.msk [vmem:[#allocation2 + $0x2c8] sm:$0xff] %vm19_vm2, %v1575_v23  ;;  %v3064_v39 = vpack.c.bf16 %v2031_v26, %v2031_v26  ;;  %v3274_v57 = vpop.f32.mrf.mxu0  ;;  %v3338_v58 = vpop.f32.mrf.mxu1 }
 0x10b   :  { %v2029_v34 = vmax.f32 %v1901_v20, 0.0  ;;  %v1968_v37 = vadd.f32 %v4009_v31, %v1833_v29  ;;  %v1831_v38 = vld [vmem:[#allocation2 + $0x2a8] sm:$0xff]  ;;  %2667 = vst.msk [vmem:[%s4870_s3 + $0x44] sm:$0xf] %vm2649_vm3, %v3059_v24  ;;  %2731 = vst.msk [vmem:[%s4870_s3 + $0x144] sm:$0xf] %vm2649_vm3, %v3123_v25  ;;  %v3128_v40 = vpack.c.bf16 %v2095_v27, %v2095_v27  ;;  %v1902_v41 = vadd.f32 %v4009_v31, %v1767_v30 }
 0x10c   :  { %v2093_v35 = vmax.f32 %v1965_v21, 0.0  ;;  %v1966_v42 = vadd.f32 %v4009_v31, %v1831_v38  ;;  %v1772_v43 = vld [vmem:[#allocation2 + $0xd0] sm:$0xff]  ;;  %v2032_v49 = vmax.f32 %v1904_v36, 0.0  ;;  %2672 = vst.msk [vmem:[%s4870_s3 + $0x58] sm:$0xf] %vm2649_vm3, %v3064_v39  ;;  %v1090_v7 = vpop.f32.mrf.mxu0  ;;  %v1346_v8 = vpop.f32.mrf.mxu1  ;;  %v176_v13 = vld [vmem:[#allocation2 + $0xe0] sm:$0xff]  ;;  %v1516_v20 = vadd.f32 %v4255_v32, %v178_v63 }
 0x10d   :  { %v1836_v44 = vld [vmem:[#allocation2 + $0x2d0] sm:$0xff]  ;;  %v3062_v47 = vpack.c.bf16 %v2029_v34, %v2029_v34  ;;  %v2096_v50 = vmax.f32 %v1968_v37, 0.0  ;;  %2736 = vst.msk [vmem:[%s4870_s3 + $0x158] sm:$0xf] %vm2649_vm3, %v3128_v40  ;;  %v2030_v51 = vmax.f32 %v1902_v41, 0.0  ;;  %v1907_v53 = vadd.f32 %v4009_v31, %v1772_v43  ;;  %v240_v14 = vld [vmem:[#allocation2 + $0x2e0] sm:$0xff] }
 0x10e   :  { %v3126_v48 = vpack.c.bf16 %v2093_v35, %v2093_v35  ;;  %v2094_v52 = vmax.f32 %v1966_v42, 0.0  ;;  %v1971_v54 = vadd.f32 %v4009_v31, %v1836_v44  ;;  %v1770_v55 = vld [vmem:[#allocation2 + $0xc0] sm:$0xff]  ;;  %v3065_v59 = vpack.c.bf16 %v2032_v49, %v2032_v49  ;;  %v242_v0 = vld [vmem:[#allocation2 + $0x2f0] sm:$0xff]  ;;  %v179_v15 = vld [vmem:[#allocation2 + $0xf8] sm:$0xff]  ;;  %v3277_v23 = vpop.f32.mrf.mxu0  ;;  %v3341_v24 = vpop.f32.mrf.mxu1  ;;  %1645 = vst.msk [vmem:[#allocation2 + $0xf0] sm:$0xff] %vm19_vm2, %v1516_v20 }
 0x10f   :  { %v1834_v56 = vld [vmem:[#allocation2 + $0x2c0] sm:$0xff]  ;;  %2670 = vst.msk [vmem:[%s4870_s3 + $0x50] sm:$0xf] %vm2649_vm3, %v3062_v47  ;;  %v3129_v60 = vpack.c.bf16 %v2096_v50, %v2096_v50  ;;  %v1905_v61 = vadd.f32 %v4009_v31, %v1770_v55  ;;  %v3063_v1 = vpack.c.bf16 %v2030_v51, %v2030_v51  ;;  %v2035_v3 = vmax.f32 %v1907_v53, 0.0  ;;  %v243_v22 = vld [vmem:[#allocation2 + $0x2f8] sm:$0xff]  ;;  %v177_v29 = vld [vmem:[#allocation2 + $0xe8] sm:$0xff] }
 0x110   :  { %2734 = vst.msk [vmem:[%s4870_s3 + $0x150] sm:$0xf] %vm2649_vm3, %v3126_v48  ;;  %v1969_v62 = vadd.f32 %v4009_v31, %v1834_v56  ;;  %v3127_v2 = vpack.c.bf16 %v2094_v52, %v2094_v52  ;;  %v2099_v4 = vmax.f32 %v1971_v54, 0.0  ;;  %v1773_v5 = vld [vmem:[#allocation2 + $0xd8] sm:$0xff]  ;;  %2673 = vst.msk [vmem:[%s4870_s3 + $0x5c] sm:$0xf] %vm2649_vm3, %v3065_v59  ;;  %v1580_v21 = vadd.f32 %v4257_v33, %v242_v0  ;;  %v1103_v39 = vpop.f32.mrf.mxu0  ;;  %v1359_v41 = vpop.f32.mrf.mxu1 }
 0x111   :  { %v1837_v6 = vld [vmem:[#allocation2 + $0x2d8] sm:$0xff]  ;;  %2737 = vst.msk [vmem:[%s4870_s3 + $0x15c] sm:$0xf] %vm2649_vm3, %v3129_v60  ;;  %v2033_v9 = vmax.f32 %v1905_v61, 0.0  ;;  %v1908_v11 = vadd.f32 %v4009_v31, %v1773_v5  ;;  %2671 = vst.msk [vmem:[%s4870_s3 + $0x54] sm:$0xf] %vm2649_vm3, %v3063_v1  ;;  %v3068_v16 = vpack.c.bf16 %v2035_v3, %v2035_v3  ;;  %v1514_v35 = vadd.f32 %v4273_v45, %v176_v13 }
 0x112   :  { %v2097_v10 = vmax.f32 %v1969_v62, 0.0  ;;  %v1972_v12 = vadd.f32 %v4009_v31, %v1837_v6  ;;  %2735 = vst.msk [vmem:[%s4870_s3 + $0x154] sm:$0xf] %vm2649_vm3, %v3127_v2  ;;  %v3132_v17 = vpack.c.bf16 %v2099_v4, %v2099_v4  ;;  %v1771_v18 = vld [vmem:[#allocation2 + $0xc8] sm:$0xff]  ;;  %v182_v34 = vld [vmem:[#allocation2 + $0x110] sm:$0xff]  ;;  %v1578_v36 = vadd.f32 %v4275_v46, %v240_v14  ;;  %v180_v38 = vld [vmem:[#allocation2 + $0x100] sm:$0xff]  ;;  %v3278_v51 = vpop.f32.mrf.mxu0  ;;  %v3342_v52 = vpop.f32.mrf.mxu1 }
 0x113   :  { %v1835_v19 = vld [vmem:[#allocation2 + $0x2c8] sm:$0xff]  ;;  %v3066_v25 = vpack.c.bf16 %v2033_v9, %v2033_v9  ;;  %v2036_v27 = vmax.f32 %v1908_v11, 0.0  ;;  %2676 = vst.msk [vmem:[%s4870_s3 + $0x68] sm:$0xf] %vm2649_vm3, %v3068_v16  ;;  %v1906_v32 = vadd.f32 %v4009_v31, %v1771_v18  ;;  %v246_v37 = vld [vmem:[#allocation2 + $0x310] sm:$0xff]  ;;  %v244_v40 = vld [vmem:[#allocation2 + $0x300] sm:$0xff]  ;;  %v1517_v43 = vadd.f32 %v3274_v57, %v179_v15 }
 0x114   :  { %v3130_v26 = vpack.c.bf16 %v2097_v10, %v2097_v10  ;;  %v2100_v28 = vmax.f32 %v1972_v12, 0.0  ;;  %v241_v30 = vld [vmem:[#allocation2 + $0x2e8] sm:$0xff]  ;;  %2740 = vst.msk [vmem:[%s4870_s3 + $0x168] sm:$0xf] %vm2649_vm3, %v3132_v17  ;;  %v1970_v33 = vadd.f32 %v4009_v31, %v1835_v19  ;;  %v1581_v44 = vadd.f32 %v3338_v58, %v243_v22  ;;  %v183_v45 = vld [vmem:[#allocation2 + $0x118] sm:$0xff]  ;;  %v1106_v63 = vpop.f32.mrf.mxu0  ;;  %v1362_v0 = vpop.f32.mrf.mxu1  ;;  %v186_v1 = vld [vmem:[#allocation2 + $0x130] sm:$0xff] }
 0x115   :  { %1709 = vst.msk [vmem:[#allocation2 + $0x2f0] sm:$0xff] %vm19_vm2, %v1580_v21  ;;  %v3069_v31 = vpack.c.bf16 %v2036_v27, %v2036_v27  ;;  %v247_v46 = vld [vmem:[#allocation2 + $0x318] sm:$0xff]  ;;  %v2034_v47 = vmax.f32 %v1906_v32, 0.0  ;;  %1643 = vst.msk [vmem:[#allocation2 + $0xe0] sm:$0xff] %vm19_vm2, %v1514_v35  ;;  %v1515_v49 = vadd.f32 %v1090_v7, %v177_v29  ;;  %v1579_v50 = vadd.f32 %v1346_v8, %v241_v30  ;;  %v181_v53 = vld [vmem:[#allocation2 + $0x108] sm:$0xff] }
 0x116   :  { %2674 = vst.msk [vmem:[%s4870_s3 + $0x60] sm:$0xf] %vm2649_vm3, %v3066_v25  ;;  %2738 = vst.msk [vmem:[%s4870_s3 + $0x160] sm:$0xf] %vm2649_vm3, %v3130_v26  ;;  %v3133_v42 = vpack.c.bf16 %v2100_v28, %v2100_v28  ;;  %v2098_v48 = vmax.f32 %v1970_v33, 0.0  ;;  %v245_v54 = vld [vmem:[#allocation2 + $0x308] sm:$0xff]  ;;  %v1520_v55 = vadd.f32 %v3277_v23, %v182_v34  ;;  %v1584_v56 = vadd.f32 %v3341_v24, %v246_v37  ;;  %v3281_v5 = vpop.f32.mrf.mxu0  ;;  %v3345_v6 = vpop.f32.mrf.mxu1 }
 0x117   :  { %1707 = vst.msk [vmem:[#allocation2 + $0x2e0] sm:$0xff] %vm19_vm2, %v1578_v36  ;;  %1646 = vst.msk [vmem:[#allocation2 + $0xf8] sm:$0xff] %vm19_vm2, %v1517_v43  ;;  %v1518_v57 = vadd.f32 %v1103_v39, %v180_v38  ;;  %v1582_v58 = vadd.f32 %v1359_v41, %v244_v40  ;;  %v3067_v59 = vpack.c.bf16 %v2034_v47, %v2034_v47  ;;  %v250_v2 = vld [vmem:[#allocation2 + $0x330] sm:$0xff]  ;;  %v184_v7 = vld [vmem:[#allocation2 + $0x120] sm:$0xff] }
 0x118   :  { %2677 = vst.msk [vmem:[%s4870_s3 + $0x6c] sm:$0xf] %vm2649_vm3, %v3069_v31  ;;  %2741 = vst.msk [vmem:[%s4870_s3 + $0x16c] sm:$0xf] %vm2649_vm3, %v3133_v42  ;;  %v3131_v60 = vpack.c.bf16 %v2098_v48, %v2098_v48  ;;  %v1521_v61 = vadd.f32 %v3278_v51, %v183_v45  ;;  %v1585_v62 = vadd.f32 %v3342_v52, %v247_v46  ;;  %v248_v8 = vld [vmem:[#allocation2 + $0x320] sm:$0xff]  ;;  %v1776_v9 = vld [vmem:[#allocation2 + $0xf0] sm:$0xff]  ;;  %v1119_v16 = vpop.f32.mrf.mxu0  ;;  %v1375_v17 = vpop.f32.mrf.mxu1 }
 0x119   :  { %1710 = vst.msk [vmem:[#allocation2 + $0x2f8] sm:$0xff] %vm19_vm2, %v1581_v44  ;;  %1644 = vst.msk [vmem:[#allocation2 + $0xe8] sm:$0xff] %vm19_vm2, %v1515_v49  ;;  %v1519_v3 = vadd.f32 %v1106_v63, %v181_v53  ;;  %v1583_v4 = vadd.f32 %v1362_v0, %v245_v54  ;;  %v1524_v11 = vadd.f32 %v3281_v5, %v186_v1  ;;  %v4372_v13 = vld [vmem:[%s4869_s2] ss:$0 sm:$0xff]  ;;  %v187_v18 = vld [vmem:[#allocation2 + $0x138] sm:$0xff] }
 0x11a   :  { %1708 = vst.msk [vmem:[#allocation2 + $0x2e8] sm:$0xff] %vm19_vm2, %v1579_v50  ;;  %1649 = vst.msk [vmem:[#allocation2 + $0x110] sm:$0xff] %vm19_vm2, %v1520_v55  ;;  %v1588_v12 = vadd.f32 %v3345_v6, %v250_v2  ;;  %v1911_v14 = vadd.f32 %v4372_v13, %v1776_v9  ;;  %v251_v19 = vld [vmem:[#allocation2 + $0x338] sm:$0xff]  ;;  %v1522_v22 = vadd.f32 %v1119_v16, %v184_v7  ;;  %v3282_v30 = vpop.f32.mrf.mxu0  ;;  %v3346_v34 = vpop.f32.mrf.mxu1 }
 0x11b   :  { %1713 = vst.msk [vmem:[#allocation2 + $0x310] sm:$0xff] %vm19_vm2, %v1584_v56  ;;  %1647 = vst.msk [vmem:[#allocation2 + $0x100] sm:$0xff] %vm19_vm2, %v1518_v57  ;;  %v1586_v23 = vadd.f32 %v1375_v17, %v248_v8  ;;  %v1525_v37 = vadd.f32 %v3282_v30, %v187_v18  ;;  %v1589_v38 = vadd.f32 %v3346_v34, %v251_v19 }
 0x11c   :  { %1711 = vst.msk [vmem:[#allocation2 + $0x300] sm:$0xff] %vm19_vm2, %v1582_v58  ;;  %1650 = vst.msk [vmem:[#allocation2 + $0x118] sm:$0xff] %vm19_vm2, %v1521_v61  ;;  %v1840_v10 = vld [vmem:[#allocation2 + $0x2f0] sm:$0xff]  ;;  %v1774_v20 = vld [vmem:[#allocation2 + $0xe0] sm:$0xff]  ;;  %v2039_v24 = vmax.f32 %v1911_v14, 0.0  ;;  %v4384_v44 = vpop.f32.mrf.mxu0  ;;  %v4386_v45 = vpop.f32.mrf.mxu1 }
 0x11d   :  { %2675 = vst.msk [vmem:[%s4870_s3 + $0x64] sm:$0xf] %vm2649_vm3, %v3067_v59  ;;  %2739 = vst.msk [vmem:[%s4870_s3 + $0x164] sm:$0xf] %vm2649_vm3, %v3131_v60  ;;  %v1975_v15 = vadd.f32 %v4372_v13, %v1840_v10  ;;  %v1909_v26 = vadd.f32 %v4372_v13, %v1774_v20 }
 0x11e   :  { %1714 = vst.msk [vmem:[#allocation2 + $0x318] sm:$0xff] %vm19_vm2, %v1585_v62  ;;  %1648 = vst.msk [vmem:[#allocation2 + $0x108] sm:$0xff] %vm19_vm2, %v1519_v3  ;;  %v1838_v21 = vld [vmem:[#allocation2 + $0x2e0] sm:$0xff]  ;;  %v1777_v28 = vld [vmem:[#allocation2 + $0xf8] sm:$0xff]  ;;  %v3072_v39 = vpack.c.bf16 %v2039_v24, %v2039_v24  ;;  %v4402_v58 = vpop.f32.mrf.mxu0  ;;  %v4404_v59 = vpop.f32.mrf.mxu1 }
 0x11f   :  { %1712 = vst.msk [vmem:[#allocation2 + $0x308] sm:$0xff] %vm19_vm2, %v1583_v4  ;;  %1653 = vst.msk [vmem:[#allocation2 + $0x130] sm:$0xff] %vm19_vm2, %v1524_v11  ;;  %v2103_v25 = vmax.f32 %v1975_v15, 0.0  ;;  %v1973_v27 = vadd.f32 %v4372_v13, %v1838_v21  ;;  %v1912_v32 = vadd.f32 %v4372_v13, %v1777_v28  ;;  %v2037_v41 = vmax.f32 %v1909_v26, 0.0 }
 0x120   :  { %1717 = vst.msk [vmem:[#allocation2 + $0x330] sm:$0xff] %vm19_vm2, %v1588_v12  ;;  %v1841_v29 = vld [vmem:[#allocation2 + $0x2f8] sm:$0xff]  ;;  %v1775_v35 = vld [vmem:[#allocation2 + $0xe8] sm:$0xff]  ;;  %1651 = vst.msk [vmem:[#allocation2 + $0x120] sm:$0xff] %vm19_vm2, %v1522_v22  ;;  %v4416_v6 = vpop.f32.mrf.mxu0  ;;  %v4418_v7 = vpop.f32.mrf.mxu1 }
 0x121   :  { %v1976_v33 = vadd.f32 %v4372_v13, %v1841_v29  ;;  %v1839_v36 = vld [vmem:[#allocation2 + $0x2e8] sm:$0xff]  ;;  %1715 = vst.msk [vmem:[#allocation2 + $0x320] sm:$0xff] %vm19_vm2, %v1586_v23  ;;  %v3136_v40 = vpack.c.bf16 %v2103_v25, %v2103_v25  ;;  %v2101_v31 = vmax.f32 %v1973_v27, 0.0  ;;  %v1780_v42 = vld [vmem:[#allocation2 + $0x110] sm:$0xff]  ;;  %v2040_v46 = vmax.f32 %v1912_v32, 0.0  ;;  %1654 = vst.msk [vmem:[#allocation2 + $0x138] sm:$0xff] %vm19_vm2, %v1525_v37 }
 0x122   :  { %v1844_v43 = vld [vmem:[#allocation2 + $0x310] sm:$0xff]  ;;  %v1910_v48 = vadd.f32 %v4372_v13, %v1775_v35  ;;  %v1974_v49 = vadd.f32 %v4372_v13, %v1839_v36  ;;  %v1778_v50 = vld [vmem:[#allocation2 + $0x100] sm:$0xff]  ;;  %1718 = vst.msk [vmem:[#allocation2 + $0x338] sm:$0xff] %vm19_vm2, %v1589_v38  ;;  %v3070_v52 = vpack.c.bf16 %v2037_v41, %v2037_v41  ;;  %v1915_v54 = vadd.f32 %v4372_v13, %v1780_v42  ;;  %v4430_v19 = vpop.f32.mrf.mxu0  ;;  %v4432_v20 = vpop.f32.mrf.mxu1 }
 0x123   :  { %v2104_v47 = vmax.f32 %v1976_v33, 0.0  ;;  %v1842_v51 = vld [vmem:[#allocation2 + $0x300] sm:$0xff]  ;;  %2680 = vst.msk [vmem:[%s4870_s3 + $0x78] sm:$0xf] %vm2649_vm3, %v3072_v39  ;;  %2744 = vst.msk [vmem:[%s4870_s3 + $0x178] sm:$0xf] %vm2649_vm3, %v3136_v40  ;;  %v3134_v53 = vpack.c.bf16 %v2101_v31, %v2101_v31  ;;  %v1979_v55 = vadd.f32 %v4372_v13, %v1844_v43  ;;  %v3073_v60 = vpack.c.bf16 %v2040_v46, %v2040_v46 }
 0x124   :  { %v1781_v56 = vld [vmem:[#allocation2 + $0x118] sm:$0xff]  ;;  %v2038_v62 = vmax.f32 %v1910_v48, 0.0  ;;  %v2102_v63 = vmax.f32 %v1974_v49, 0.0  ;;  %2678 = vst.msk [vmem:[%s4870_s3 + $0x70] sm:$0xf] %vm2649_vm3, %v3070_v52  ;;  %v2043_v0 = vmax.f32 %v1915_v54, 0.0  ;;  %v1913_v2 = vadd.f32 %v4372_v13, %v1778_v50  ;;  %v4454_v33 = vpop.f32.mrf.mxu0  ;;  %v4456_v35 = vpop.f32.mrf.mxu1 }
 0x125   :  { %v1845_v57 = vld [vmem:[#allocation2 + $0x318] sm:$0xff]  ;;  %v3137_v61 = vpack.c.bf16 %v2104_v47, %v2104_v47  ;;  %2742 = vst.msk [vmem:[%s4870_s3 + $0x170] sm:$0xf] %vm2649_vm3, %v3134_v53  ;;  %v2107_v1 = vmax.f32 %v1979_v55, 0.0  ;;  %v1977_v3 = vadd.f32 %v4372_v13, %v1842_v51  ;;  %v1779_v4 = vld [vmem:[#allocation2 + $0x108] sm:$0xff]  ;;  %v1916_v10 = vadd.f32 %v4372_v13, %v1781_v56  ;;  %v190_v47 = vld [vmem:[#allocation2 + $0x150] sm:$0xff] }
 0x126   :  { %v1843_v5 = vld [vmem:[#allocation2 + $0x308] sm:$0xff]  ;;  %2681 = vst.msk [vmem:[%s4870_s3 + $0x7c] sm:$0xf] %vm2649_vm3, %v3073_v60  ;;  %v3071_v8 = vpack.c.bf16 %v2038_v62, %v2038_v62  ;;  %v3135_v9 = vpack.c.bf16 %v2102_v63, %v2102_v63  ;;  %v1980_v11 = vadd.f32 %v4372_v13, %v1845_v57  ;;  %v1784_v12 = vld [vmem:[#allocation2 + $0x130] sm:$0xff]  ;;  %v3076_v15 = vpack.c.bf16 %v2043_v0, %v2043_v0  ;;  %v4468_v48 = vpop.f32.mrf.mxu0  ;;  %v4470_v49 = vpop.f32.mrf.mxu1  ;;  %v188_v55 = vld [vmem:[#allocation2 + $0x140] sm:$0xff] }
 0x127   :  { %2745 = vst.msk [vmem:[%s4870_s3 + $0x17c] sm:$0xf] %vm2649_vm3, %v3137_v61  ;;  %v1848_v14 = vld [vmem:[#allocation2 + $0x330] sm:$0xff]  ;;  %v3140_v16 = vpack.c.bf16 %v2107_v1, %v2107_v1  ;;  %v2041_v17 = vmax.f32 %v1913_v2, 0.0  ;;  %v2105_v18 = vmax.f32 %v1977_v3, 0.0  ;;  %v2044_v21 = vmax.f32 %v1916_v10, 0.0 }
 0x128   :  { %2679 = vst.msk [vmem:[%s4870_s3 + $0x74] sm:$0xf] %vm2649_vm3, %v3071_v8  ;;  %2743 = vst.msk [vmem:[%s4870_s3 + $0x174] sm:$0xf] %vm2649_vm3, %v3135_v9  ;;  %v2108_v22 = vmax.f32 %v1980_v11, 0.0  ;;  %v1914_v23 = vadd.f32 %v4372_v13, %v1779_v4  ;;  %v1978_v24 = vadd.f32 %v4372_v13, %v1843_v5  ;;  %v1782_v25 = vld [vmem:[#allocation2 + $0x120] sm:$0xff]  ;;  %v1919_v29 = vadd.f32 %v4372_v13, %v1784_v12  ;;  %v1151_v2 = vpop.f32.mrf.mxu0  ;;  %v1407_v3 = vpop.f32.mrf.mxu1 }
 0x129   :  { %v1846_v26 = vld [vmem:[#allocation2 + $0x320] sm:$0xff]  ;;  %2684 = vst.msk [vmem:[%s4870_s3 + $0x88] sm:$0xf] %vm2649_vm3, %v3076_v15  ;;  %2748 = vst.msk [vmem:[%s4870_s3 + $0x188] sm:$0xf] %vm2649_vm3, %v3140_v16  ;;  %v3074_v27 = vpack.c.bf16 %v2041_v17, %v2041_v17  ;;  %v3138_v28 = vpack.c.bf16 %v2105_v18, %v2105_v18  ;;  %v1983_v30 = vadd.f32 %v4372_v13, %v1848_v14  ;;  %v1785_v34 = vld [vmem:[#allocation2 + $0x138] sm:$0xff] }
 0x12a   :  { %v1849_v32 = vld [vmem:[#allocation2 + $0x338] sm:$0xff]  ;;  %v3077_v36 = vpack.c.bf16 %v2044_v21, %v2044_v21  ;;  %v3141_v37 = vpack.c.bf16 %v2108_v22, %v2108_v22  ;;  %v2042_v38 = vmax.f32 %v1914_v23, 0.0  ;;  %v2106_v39 = vmax.f32 %v1978_v24, 0.0  ;;  %v185_v43 = vld [vmem:[#allocation2 + $0x128] sm:$0xff]  ;;  %v254_v54 = vld [vmem:[#allocation2 + $0x350] sm:$0xff]  ;;  %v3290_v21 = vpop.f32.mrf.mxu0  ;;  %v3354_v22 = vpop.f32.mrf.mxu1 }
 0x12b   :  { %2682 = vst.msk [vmem:[%s4870_s3 + $0x80] sm:$0xf] %vm2649_vm3, %v3074_v27  ;;  %2746 = vst.msk [vmem:[%s4870_s3 + $0x180] sm:$0xf] %vm2649_vm3, %v3138_v28  ;;  %v2047_v40 = vmax.f32 %v1919_v29, 0.0  ;;  %v2111_v41 = vmax.f32 %v1983_v30, 0.0  ;;  %v1917_v31 = vadd.f32 %v4372_v13, %v1782_v25  ;;  %v1981_v42 = vadd.f32 %v4372_v13, %v1846_v26 }
 0x12c   :  { %v249_v46 = vld [vmem:[#allocation2 + $0x328] sm:$0xff]  ;;  %2685 = vst.msk [vmem:[%s4870_s3 + $0x8c] sm:$0xf] %vm2649_vm3, %v3077_v36  ;;  %2749 = vst.msk [vmem:[%s4870_s3 + $0x18c] sm:$0xf] %vm2649_vm3, %v3141_v37  ;;  %v3075_v50 = vpack.c.bf16 %v2042_v38, %v2042_v38  ;;  %v3139_v51 = vpack.c.bf16 %v2106_v39, %v2106_v39  ;;  %v1920_v52 = vadd.f32 %v4372_v13, %v1785_v34  ;;  %v252_v56 = vld [vmem:[#allocation2 + $0x340] sm:$0xff]  ;;  %v1154_v30 = vpop.f32.mrf.mxu0  ;;  %v1410_v34 = vpop.f32.mrf.mxu1 }
 0x12d   :  { %v1984_v53 = vadd.f32 %v4372_v13, %v1849_v32  ;;  %v3080_v57 = vpack.c.bf16 %v2047_v40, %v2047_v40  ;;  %v3144_v60 = vpack.c.bf16 %v2111_v41, %v2111_v41  ;;  %v2045_v61 = vmax.f32 %v1917_v31, 0.0  ;;  %v191_v63 = vld [vmem:[#allocation2 + $0x158] sm:$0xff]  ;;  %v189_v1 = vld [vmem:[#allocation2 + $0x148] sm:$0xff]  ;;  %v194_v11 = vld [vmem:[#allocation2 + $0x170] sm:$0xff] }
 0x12e   :  { %v2109_v62 = vmax.f32 %v1981_v42, 0.0  ;;  %v255_v0 = vld [vmem:[#allocation2 + $0x358] sm:$0xff]  ;;  %2683 = vst.msk [vmem:[%s4870_s3 + $0x84] sm:$0xf] %vm2649_vm3, %v3075_v50  ;;  %2747 = vst.msk [vmem:[%s4870_s3 + $0x184] sm:$0xf] %vm2649_vm3, %v3139_v51  ;;  %v1523_v8 = vadd.f32 %v4384_v44, %v185_v43  ;;  %v1587_v9 = vadd.f32 %v4386_v45, %v249_v46  ;;  %v1528_v16 = vadd.f32 %v4402_v58, %v190_v47  ;;  %v3293_v41 = vpop.f32.mrf.mxu0  ;;  %v3357_v31 = vpop.f32.mrf.mxu1 }
 0x12f   :  { %v2048_v4 = vmax.f32 %v1920_v52, 0.0  ;;  %v2112_v5 = vmax.f32 %v1984_v53, 0.0  ;;  %v253_v10 = vld [vmem:[#allocation2 + $0x348] sm:$0xff]  ;;  %v258_v12 = vld [vmem:[#allocation2 + $0x370] sm:$0xff]  ;;  %2688 = vst.msk [vmem:[%s4870_s3 + $0x98] sm:$0xf] %vm2649_vm3, %v3080_v57  ;;  %v3078_v14 = vpack.c.bf16 %v2045_v61, %v2045_v61  ;;  %v1592_v44 = vadd.f32 %v4404_v59, %v254_v54 }
 0x130   :  { %2752 = vst.msk [vmem:[%s4870_s3 + $0x198] sm:$0xf] %vm2649_vm3, %v3144_v60  ;;  %v3142_v15 = vpack.c.bf16 %v2109_v62, %v2109_v62  ;;  %v192_v45 = vld [vmem:[#allocation2 + $0x160] sm:$0xff]  ;;  %v195_v18 = vld [vmem:[#allocation2 + $0x178] sm:$0xff]  ;;  %v1526_v25 = vadd.f32 %v4416_v6, %v188_v55  ;;  %v1590_v26 = vadd.f32 %v4418_v7, %v252_v56  ;;  %v193_v28 = vld [vmem:[#allocation2 + $0x168] sm:$0xff]  ;;  %v1529_v59 = vadd.f32 %v4430_v19, %v191_v63 }
 0x131   :  { %v256_v17 = vld [vmem:[#allocation2 + $0x360] sm:$0xff]  ;;  %v3081_v23 = vpack.c.bf16 %v2048_v4, %v2048_v4  ;;  %v3145_v24 = vpack.c.bf16 %v2112_v5, %v2112_v5  ;;  %1652 = vst.msk [vmem:[#allocation2 + $0x128] sm:$0xff] %vm19_vm2, %v1523_v8  ;;  %1716 = vst.msk [vmem:[#allocation2 + $0x328] sm:$0xff] %vm19_vm2, %v1587_v9  ;;  %v259_v27 = vld [vmem:[#allocation2 + $0x378] sm:$0xff]  ;;  %v1593_v6 = vadd.f32 %v4432_v20, %v255_v0 }
 0x132   :  { %v257_v58 = vld [vmem:[#allocation2 + $0x368] sm:$0xff]  ;;  %2686 = vst.msk [vmem:[%s4870_s3 + $0x90] sm:$0xf] %vm2649_vm3, %v3078_v14  ;;  %2750 = vst.msk [vmem:[%s4870_s3 + $0x190] sm:$0xf] %vm2649_vm3, %v3142_v15  ;;  %v1527_v7 = vadd.f32 %v4454_v33, %v189_v1  ;;  %v1591_v29 = vadd.f32 %v4456_v35, %v253_v10  ;;  %v198_v32 = vld [vmem:[#allocation2 + $0x190] sm:$0xff]  ;;  %v1532_v19 = vadd.f32 %v4468_v48, %v194_v11  ;;  %v1167_v48 = vpop.f32.mrf.mxu0 }
 0x133   :  { %1657 = vst.msk [vmem:[#allocation2 + $0x150] sm:$0xff] %vm19_vm2, %v1528_v16  ;;  %1721 = vst.msk [vmem:[#allocation2 + $0x350] sm:$0xff] %vm19_vm2, %v1592_v44  ;;  %v262_v36 = vld [vmem:[#allocation2 + $0x390] sm:$0xff]  ;;  %v1596_v20 = vadd.f32 %v4470_v49, %v258_v12  ;;  %v1530_v33 = vadd.f32 %v1151_v2, %v192_v45  ;;  %v1594_v35 = vadd.f32 %v1407_v3, %v256_v17  ;;  %v196_v42 = vld [vmem:[#allocation2 + $0x180] sm:$0xff]  ;;  %v1423_v49 = vpop.f32.mrf.mxu1 }
 0x134   :  { %2689 = vst.msk [vmem:[%s4870_s3 + $0x9c] sm:$0xf] %vm2649_vm3, %v3081_v23  ;;  %2753 = vst.msk [vmem:[%s4870_s3 + $0x19c] sm:$0xf] %vm2649_vm3, %v3145_v24  ;;  %v1533_v37 = vadd.f32 %v3290_v21, %v195_v18  ;;  %v1597_v38 = vadd.f32 %v3354_v22, %v259_v27  ;;  %v1531_v39 = vadd.f32 %v1154_v30, %v193_v28  ;;  %v260_v43 = vld [vmem:[#allocation2 + $0x380] sm:$0xff]  ;;  %v199_v50 = vld [vmem:[#allocation2 + $0x198] sm:$0xff]  ;;  %v3294_v56 = vpop.f32.mrf.mxu0 }
 0x135   :  { %1655 = vst.msk [vmem:[#allocation2 + $0x140] sm:$0xff] %vm19_vm2, %v1526_v25  ;;  %1719 = vst.msk [vmem:[#allocation2 + $0x340] sm:$0xff] %vm19_vm2, %v1590_v26  ;;  %v1595_v40 = vadd.f32 %v1410_v34, %v257_v58  ;;  %v1536_v46 = vadd.f32 %v3293_v41, %v198_v32  ;;  %v1600_v47 = vadd.f32 %v3357_v31, %v262_v36  ;;  %v263_v51 = vld [vmem:[#allocation2 + $0x398] sm:$0xff]  ;;  %v3358_v57 = vpop.f32.mrf.mxu1 }
 0x136   :  { %1658 = vst.msk [vmem:[#allocation2 + $0x158] sm:$0xff] %vm19_vm2, %v1529_v59  ;;  %1722 = vst.msk [vmem:[#allocation2 + $0x358] sm:$0xff] %vm19_vm2, %v1593_v6  ;;  %v1534_v52 = vadd.f32 %v1167_v48, %v196_v42  ;;  %v1598_v53 = vadd.f32 %v1423_v49, %v260_v43  ;;  %v1537_v0 = vadd.f32 %v3294_v56, %v199_v50  ;;  %v4552_v8 = vpop.f32.mrf.mxu0 }
 0x137   :  { %1656 = vst.msk [vmem:[#allocation2 + $0x148] sm:$0xff] %vm19_vm2, %v1527_v7  ;;  %1720 = vst.msk [vmem:[#allocation2 + $0x348] sm:$0xff] %vm19_vm2, %v1591_v29  ;;  %v1601_v1 = vadd.f32 %v3358_v57, %v263_v51  ;;  %v4554_v9 = vpop.f32.mrf.mxu1 }
 0x138   :  { %1661 = vst.msk [vmem:[#allocation2 + $0x170] sm:$0xff] %vm19_vm2, %v1532_v19  ;;  %1725 = vst.msk [vmem:[#allocation2 + $0x370] sm:$0xff] %vm19_vm2, %v1596_v20  ;;  %v1783_v54 = vld [vmem:[#allocation2 + $0x128] sm:$0xff]  ;;  %v4562_v23 = vpop.f32.mrf.mxu0 }
 0x139   :  { %1659 = vst.msk [vmem:[#allocation2 + $0x160] sm:$0xff] %vm19_vm2, %v1530_v33  ;;  %1723 = vst.msk [vmem:[#allocation2 + $0x360] sm:$0xff] %vm19_vm2, %v1594_v35  ;;  %v1847_v55 = vld [vmem:[#allocation2 + $0x328] sm:$0xff]  ;;  %v1918_v60 = vadd.f32 %v4372_v13, %v1783_v54  ;;  %v4564_v24 = vpop.f32.mrf.mxu1 }
 0x13a   :  { %1662 = vst.msk [vmem:[#allocation2 + $0x178] sm:$0xff] %vm19_vm2, %v1533_v37  ;;  %1726 = vst.msk [vmem:[#allocation2 + $0x378] sm:$0xff] %vm19_vm2, %v1597_v38  ;;  %v1982_v61 = vadd.f32 %v4372_v13, %v1847_v55  ;;  %v1788_v62 = vld [vmem:[#allocation2 + $0x150] sm:$0xff]  ;;  %v4566_v36 = vpop.f32.mrf.mxu0 }
 0x13b   :  { %1660 = vst.msk [vmem:[#allocation2 + $0x168] sm:$0xff] %vm19_vm2, %v1531_v39  ;;  %1724 = vst.msk [vmem:[#allocation2 + $0x368] sm:$0xff] %vm19_vm2, %v1595_v40  ;;  %v1852_v63 = vld [vmem:[#allocation2 + $0x350] sm:$0xff]  ;;  %v1923_v2 = vadd.f32 %v4372_v13, %v1788_v62  ;;  %v2046_v10 = vmax.f32 %v1918_v60, 0.0  ;;  %v4568_v19 = vpop.f32.mrf.mxu1 }
 0x13c   :  { %1665 = vst.msk [vmem:[#allocation2 + $0x190] sm:$0xff] %vm19_vm2, %v1536_v46  ;;  %1729 = vst.msk [vmem:[#allocation2 + $0x390] sm:$0xff] %vm19_vm2, %v1600_v47  ;;  %v1987_v3 = vadd.f32 %v4372_v13, %v1852_v63  ;;  %v1786_v4 = vld [vmem:[#allocation2 + $0x140] sm:$0xff]  ;;  %v2110_v11 = vmax.f32 %v1982_v61, 0.0  ;;  %v4590_v43 = vpop.f32.mrf.mxu0 }
 0x13d   :  { %1663 = vst.msk [vmem:[#allocation2 + $0x180] sm:$0xff] %vm19_vm2, %v1534_v52  ;;  %1727 = vst.msk [vmem:[#allocation2 + $0x380] sm:$0xff] %vm19_vm2, %v1598_v53  ;;  %v1850_v5 = vld [vmem:[#allocation2 + $0x340] sm:$0xff]  ;;  %v1921_v12 = vadd.f32 %v4372_v13, %v1786_v4  ;;  %v1789_v15 = vld [vmem:[#allocation2 + $0x158] sm:$0xff]  ;;  %v2051_v44 = vmax.f32 %v1923_v2, 0.0  ;;  %v3079_v25 = vpack.c.bf16 %v2046_v10, %v2046_v10  ;;  %v4592_v46 = vpop.f32.mrf.mxu1 }
 0x13e   :  { %v1985_v14 = vadd.f32 %v4372_v13, %v1850_v5  ;;  %v1853_v16 = vld [vmem:[#allocation2 + $0x358] sm:$0xff]  ;;  %1666 = vst.msk [vmem:[#allocation2 + $0x198] sm:$0xff] %vm19_vm2, %v1537_v0  ;;  %1730 = vst.msk [vmem:[#allocation2 + $0x398] sm:$0xff] %vm19_vm2, %v1601_v1  ;;  %v2115_v45 = vmax.f32 %v1987_v3, 0.0  ;;  %v1924_v17 = vadd.f32 %v4372_v13, %v1789_v15  ;;  %v1787_v21 = vld [vmem:[#allocation2 + $0x148] sm:$0xff]  ;;  %v3143_v26 = vpack.c.bf16 %v2110_v11, %v2110_v11  ;;  %v4614_v57 = vpop.f32.mrf.mxu0 }
 0x13f   :  { %v1988_v18 = vadd.f32 %v4372_v13, %v1853_v16  ;;  %v1851_v22 = vld [vmem:[#allocation2 + $0x348] sm:$0xff]  ;;  %v2049_v27 = vmax.f32 %v1921_v12, 0.0  ;;  %v1792_v58 = vld [vmem:[#allocation2 + $0x170] sm:$0xff]  ;;  %v3084_v6 = vpack.c.bf16 %v2051_v44, %v2051_v44  ;;  %2687 = vst.msk [vmem:[%s4870_s3 + $0x94] sm:$0xf] %vm2649_vm3, %v3079_v25  ;;  %v1922_v35 = vadd.f32 %v4372_v13, %v1787_v21  ;;  %v4616_v60 = vpop.f32.mrf.mxu1 }
 0x140   :  { %v2113_v28 = vmax.f32 %v1985_v14, 0.0  ;;  %v1856_v59 = vld [vmem:[#allocation2 + $0x370] sm:$0xff]  ;;  %v3148_v7 = vpack.c.bf16 %v2115_v45, %v2115_v45  ;;  %v2052_v29 = vmax.f32 %v1924_v17, 0.0  ;;  %v1790_v34 = vld [vmem:[#allocation2 + $0x160] sm:$0xff]  ;;  %2751 = vst.msk [vmem:[%s4870_s3 + $0x194] sm:$0xf] %vm2649_vm3, %v3143_v26  ;;  %v1986_v37 = vadd.f32 %v4372_v13, %v1851_v22  ;;  %v4618_v14 = vpop.f32.mrf.mxu0 }
 0x141   :  { %v2116_v30 = vmax.f32 %v1988_v18, 0.0  ;;  %v1854_v32 = vld [vmem:[#allocation2 + $0x360] sm:$0xff]  ;;  %v3082_v20 = vpack.c.bf16 %v2049_v27, %v2049_v27  ;;  %v1793_v38 = vld [vmem:[#allocation2 + $0x178] sm:$0xff]  ;;  %2692 = vst.msk [vmem:[%s4870_s3 + $0xa8] sm:$0xf] %vm2649_vm3, %v3084_v6  ;;  %v1927_v31 = vadd.f32 %v4372_v13, %v1792_v58  ;;  %v1991_v42 = vadd.f32 %v4372_v13, %v1856_v59  ;;  %v4620_v15 = vpop.f32.mrf.mxu1 }
 0x142   :  { %v3146_v33 = vpack.c.bf16 %v2113_v28, %v2113_v28  ;;  %v1857_v39 = vld [vmem:[#allocation2 + $0x378] sm:$0xff]  ;;  %2756 = vst.msk [vmem:[%s4870_s3 + $0x1a8] sm:$0xf] %vm2649_vm3, %v3148_v7  ;;  %v3085_v40 = vpack.c.bf16 %v2052_v29, %v2052_v29  ;;  %v2050_v47 = vmax.f32 %v1922_v35, 0.0  ;;  %v2114_v48 = vmax.f32 %v1986_v37, 0.0  ;;  %v1791_v55 = vld [vmem:[#allocation2 + $0x168] sm:$0xff]  ;;  %v4642_v28 = vpop.f32.mrf.mxu0 }
 0x143   :  { %v3149_v41 = vpack.c.bf16 %v2116_v30, %v2116_v30  ;;  %2690 = vst.msk [vmem:[%s4870_s3 + $0xa0] sm:$0xf] %vm2649_vm3, %v3082_v20  ;;  %v1925_v49 = vadd.f32 %v4372_v13, %v1790_v34  ;;  %v1989_v50 = vadd.f32 %v4372_v13, %v1854_v32  ;;  %v2055_v51 = vmax.f32 %v1927_v31, 0.0  ;;  %v1855_v56 = vld [vmem:[#allocation2 + $0x368] sm:$0xff]  ;;  %v1796_v1 = vld [vmem:[#allocation2 + $0x190] sm:$0xff]  ;;  %v4644_v58 = vpop.f32.mrf.mxu1 }
 0x144   :  { %2754 = vst.msk [vmem:[%s4870_s3 + $0x1a0] sm:$0xf] %vm2649_vm3, %v3146_v33  ;;  %2693 = vst.msk [vmem:[%s4870_s3 + $0xac] sm:$0xf] %vm2649_vm3, %v3085_v40  ;;  %v2119_v52 = vmax.f32 %v1991_v42, 0.0  ;;  %v1928_v53 = vadd.f32 %v4372_v13, %v1793_v38  ;;  %v1992_v54 = vadd.f32 %v4372_v13, %v1857_v39  ;;  %v3083_v61 = vpack.c.bf16 %v2050_v47, %v2050_v47  ;;  %v1860_v2 = vld [vmem:[#allocation2 + $0x390] sm:$0xff] }
 0x145   :  { %2757 = vst.msk [vmem:[%s4870_s3 + $0x1ac] sm:$0xf] %vm2649_vm3, %v3149_v41  ;;  %v3147_v62 = vpack.c.bf16 %v2114_v48, %v2114_v48  ;;  %v2053_v63 = vmax.f32 %v1925_v49, 0.0  ;;  %v2117_v0 = vmax.f32 %v1989_v50, 0.0  ;;  %v3088_v3 = vpack.c.bf16 %v2055_v51, %v2055_v51  ;;  %v1794_v11 = vld [vmem:[#allocation2 + $0x180] sm:$0xff]  ;;  %v1797_v18 = vld [vmem:[#allocation2 + $0x198] sm:$0xff]  ;;  %v4666_v41 = vpop.f32.mrf.mxu0  ;;  %v4668_v31 = vpop.f32.mrf.mxu1 }
 0x146   :  { %v3152_v4 = vpack.c.bf16 %v2119_v52, %v2119_v52  ;;  %v2056_v5 = vmax.f32 %v1928_v53, 0.0  ;;  %v2120_v10 = vmax.f32 %v1992_v54, 0.0  ;;  %v1858_v12 = vld [vmem:[#allocation2 + $0x380] sm:$0xff]  ;;  %2691 = vst.msk [vmem:[%s4870_s3 + $0xa4] sm:$0xf] %vm2649_vm3, %v3083_v61  ;;  %v1926_v45 = vadd.f32 %v4372_v13, %v1791_v55  ;;  %v1861_v21 = vld [vmem:[#allocation2 + $0x398] sm:$0xff] }
 0x147   :  { %2755 = vst.msk [vmem:[%s4870_s3 + $0x1a4] sm:$0xf] %vm2649_vm3, %v3147_v62  ;;  %v3086_v16 = vpack.c.bf16 %v2053_v63, %v2053_v63  ;;  %v3150_v44 = vpack.c.bf16 %v2117_v0, %v2117_v0  ;;  %v1990_v17 = vadd.f32 %v4372_v13, %v1855_v56  ;;  %2696 = vst.msk [vmem:[%s4870_s3 + $0xb8] sm:$0xf] %vm2649_vm3, %v3088_v3  ;;  %v197_v30 = vld [vmem:[#allocation2 + $0x188] sm:$0xff]  ;;  %v202_v32 = vld [vmem:[#allocation2 + $0x1b0] sm:$0xff]  ;;  %v1202_v0 = vpop.f32.mrf.mxu0 }
 0x148   :  { %2760 = vst.msk [vmem:[%s4870_s3 + $0x1b8] sm:$0xf] %vm2649_vm3, %v3152_v4  ;;  %v3089_v22 = vpack.c.bf16 %v2056_v5, %v2056_v5  ;;  %v3153_v25 = vpack.c.bf16 %v2120_v10, %v2120_v10  ;;  %v1931_v26 = vadd.f32 %v4372_v13, %v1796_v1  ;;  %v1995_v27 = vadd.f32 %v4372_v13, %v1860_v2  ;;  %v261_v34 = vld [vmem:[#allocation2 + $0x388] sm:$0xff]  ;;  %v266_v38 = vld [vmem:[#allocation2 + $0x3b0] sm:$0xff]  ;;  %v200_v39 = vld [vmem:[#allocation2 + $0x1a0] sm:$0xff]  ;;  %v1458_v1 = vpop.f32.mrf.mxu1 }
 0x149   :  { %2694 = vst.msk [vmem:[%s4870_s3 + $0xb0] sm:$0xf] %vm2649_vm3, %v3086_v16  ;;  %2758 = vst.msk [vmem:[%s4870_s3 + $0x1b0] sm:$0xf] %vm2649_vm3, %v3150_v44  ;;  %v2054_v59 = vmax.f32 %v1926_v45, 0.0  ;;  %v2118_v6 = vmax.f32 %v1990_v17, 0.0  ;;  %v1929_v7 = vadd.f32 %v4372_v13, %v1794_v11  ;;  %v1993_v29 = vadd.f32 %v4372_v13, %v1858_v12 }
 0x14a   :  { %2697 = vst.msk [vmem:[%s4870_s3 + $0xbc] sm:$0xf] %vm2649_vm3, %v3089_v22  ;;  %2761 = vst.msk [vmem:[%s4870_s3 + $0x1bc] sm:$0xf] %vm2649_vm3, %v3153_v25  ;;  %v2059_v20 = vmax.f32 %v1931_v26, 0.0  ;;  %v2123_v33 = vmax.f32 %v1995_v27, 0.0  ;;  %v1932_v35 = vadd.f32 %v4372_v13, %v1797_v18  ;;  %v1996_v37 = vadd.f32 %v4372_v13, %v1861_v21  ;;  %v3305_v21 = vpop.f32.mrf.mxu0  ;;  %v3369_v22 = vpop.f32.mrf.mxu1 }
 0x14b   :  { %v264_v40 = vld [vmem:[#allocation2 + $0x3a0] sm:$0xff]  ;;  %v3087_v42 = vpack.c.bf16 %v2054_v59, %v2054_v59  ;;  %v3151_v47 = vpack.c.bf16 %v2118_v6, %v2118_v6  ;;  %v2057_v48 = vmax.f32 %v1929_v7, 0.0  ;;  %v2121_v49 = vmax.f32 %v1993_v29, 0.0  ;;  %v203_v50 = vld [vmem:[#allocation2 + $0x1b8] sm:$0xff]  ;;  %v201_v52 = vld [vmem:[#allocation2 + $0x1a8] sm:$0xff] }
 0x14c   :  { %v267_v51 = vld [vmem:[#allocation2 + $0x3b8] sm:$0xff]  ;;  %v3092_v53 = vpack.c.bf16 %v2059_v20, %v2059_v20  ;;  %v3156_v54 = vpack.c.bf16 %v2123_v33, %v2123_v33  ;;  %v2060_v55 = vmax.f32 %v1932_v35, 0.0  ;;  %v2124_v56 = vmax.f32 %v1996_v37, 0.0  ;;  %v265_v61 = vld [vmem:[#allocation2 + $0x3a8] sm:$0xff]  ;;  %v206_v62 = vld [vmem:[#allocation2 + $0x1d0] sm:$0xff]  ;;  %v1215_v7 = vpop.f32.mrf.mxu0 }
 0x14d   :  { %v270_v63 = vld [vmem:[#allocation2 + $0x3d0] sm:$0xff]  ;;  %2695 = vst.msk [vmem:[%s4870_s3 + $0xb4] sm:$0xf] %vm2649_vm3, %v3087_v42  ;;  %2759 = vst.msk [vmem:[%s4870_s3 + $0x1b4] sm:$0xf] %vm2649_vm3, %v3151_v47  ;;  %v3090_v2 = vpack.c.bf16 %v2057_v48, %v2057_v48  ;;  %v3154_v3 = vpack.c.bf16 %v2121_v49, %v2121_v49  ;;  %v1535_v4 = vadd.f32 %v4552_v8, %v197_v30  ;;  %v204_v10 = vld [vmem:[#allocation2 + $0x1c0] sm:$0xff]  ;;  %v1471_v30 = vpop.f32.mrf.mxu1 }
 0x14e   :  { %v1599_v5 = vadd.f32 %v4554_v9, %v261_v34  ;;  %v268_v11 = vld [vmem:[#allocation2 + $0x3c0] sm:$0xff]  ;;  %v207_v12 = vld [vmem:[#allocation2 + $0x1d8] sm:$0xff]  ;;  %2700 = vst.msk [vmem:[%s4870_s3 + $0xc8] sm:$0xf] %vm2649_vm3, %v3092_v53  ;;  %2764 = vst.msk [vmem:[%s4870_s3 + $0x1c8] sm:$0xf] %vm2649_vm3, %v3156_v54  ;;  %v3093_v16 = vpack.c.bf16 %v2060_v55, %v2060_v55  ;;  %v3157_v44 = vpack.c.bf16 %v2124_v56, %v2124_v56 }
 0x14f   :  { %v1540_v45 = vadd.f32 %v4562_v23, %v202_v32  ;;  %v1604_v8 = vadd.f32 %v4564_v24, %v266_v38  ;;  %v271_v9 = vld [vmem:[#allocation2 + $0x3d8] sm:$0xff]  ;;  %v205_v17 = vld [vmem:[#allocation2 + $0x1c8] sm:$0xff]  ;;  %2698 = vst.msk [vmem:[%s4870_s3 + $0xc0] sm:$0xf] %vm2649_vm3, %v3090_v2  ;;  %2762 = vst.msk [vmem:[%s4870_s3 + $0x1c0] sm:$0xf] %vm2649_vm3, %v3154_v3  ;;  %v1538_v23 = vadd.f32 %v4566_v36, %v200_v39  ;;  %v3306_v38 = vpop.f32.mrf.mxu0 }
 0x150   :  { %v269_v18 = vld [vmem:[#allocation2 + $0x3c8] sm:$0xff]  ;;  %1664 = vst.msk [vmem:[#allocation2 + $0x188] sm:$0xff] %vm19_vm2, %v1535_v4  ;;  %1728 = vst.msk [vmem:[#allocation2 + $0x388] sm:$0xff] %vm19_vm2, %v1599_v5  ;;  %v1602_v24 = vadd.f32 %v4568_v19, %v264_v40  ;;  %v1541_v25 = vadd.f32 %v4590_v43, %v203_v50  ;;  %v1605_v26 = vadd.f32 %v4592_v46, %v267_v51  ;;  %v210_v27 = vld [vmem:[#allocation2 + $0x1f0] sm:$0xff] }
 0x151   :  { %v274_v59 = vld [vmem:[#allocation2 + $0x3f0] sm:$0xff]  ;;  %v208_v6 = vld [vmem:[#allocation2 + $0x1e0] sm:$0xff]  ;;  %2701 = vst.msk [vmem:[%s4870_s3 + $0xcc] sm:$0xf] %vm2649_vm3, %v3093_v16  ;;  %2765 = vst.msk [vmem:[%s4870_s3 + $0x1cc] sm:$0xf] %vm2649_vm3, %v3157_v44  ;;  %v1539_v36 = vadd.f32 %v4614_v57, %v201_v52  ;;  %v1603_v19 = vadd.f32 %v4616_v60, %v265_v61  ;;  %v1544_v43 = vadd.f32 %v4618_v14, %v206_v62  ;;  %v1218_v47 = vpop.f32.mrf.mxu0 }
 0x152   :  { %1669 = vst.msk [vmem:[#allocation2 + $0x1b0] sm:$0xff] %vm19_vm2, %v1540_v45  ;;  %1733 = vst.msk [vmem:[#allocation2 + $0x3b0] sm:$0xff] %vm19_vm2, %v1604_v8  ;;  %v1608_v46 = vadd.f32 %v4620_v15, %v270_v63  ;;  %v272_v29 = vld [vmem:[#allocation2 + $0x3e0] sm:$0xff]  ;;  %v211_v34 = vld [vmem:[#allocation2 + $0x1f8] sm:$0xff]  ;;  %v1542_v57 = vadd.f32 %v4642_v28, %v204_v10  ;;  %v1606_v60 = vadd.f32 %v4644_v58, %v268_v11  ;;  %v3370_v28 = vpop.f32.mrf.mxu1 }
 0x153   :  { %v275_v32 = vld [vmem:[#allocation2 + $0x3f8] sm:$0xff]  ;;  %1667 = vst.msk [vmem:[#allocation2 + $0x1a0] sm:$0xff] %vm19_vm2, %v1538_v23  ;;  %1731 = vst.msk [vmem:[#allocation2 + $0x3a0] sm:$0xff] %vm19_vm2, %v1602_v24  ;;  %v1545_v14 = vadd.f32 %v4666_v41, %v207_v12  ;;  %v1609_v15 = vadd.f32 %v4668_v31, %v271_v9  ;;  %v1543_v20 = vadd.f32 %v1202_v0, %v205_v17  ;;  %v209_v39 = vld [vmem:[#allocation2 + $0x1e8] sm:$0xff] }
 0x154   :  { %1670 = vst.msk [vmem:[#allocation2 + $0x1b8] sm:$0xff] %vm19_vm2, %v1541_v25  ;;  %1734 = vst.msk [vmem:[#allocation2 + $0x3b8] sm:$0xff] %vm19_vm2, %v1605_v26  ;;  %v1607_v33 = vadd.f32 %v1458_v1, %v269_v18  ;;  %v1548_v35 = vadd.f32 %v3305_v21, %v210_v27  ;;  %v1612_v37 = vadd.f32 %v3369_v22, %v274_v59  ;;  %v273_v58 = vld [vmem:[#allocation2 + $0x3e8] sm:$0xff]  ;;  %v1474_v48 = vpop.f32.mrf.mxu1 }
 0x155   :  { %1668 = vst.msk [vmem:[#allocation2 + $0x1a8] sm:$0xff] %vm19_vm2, %v1539_v36  ;;  %1732 = vst.msk [vmem:[#allocation2 + $0x3a8] sm:$0xff] %vm19_vm2, %v1603_v19  ;;  %v1546_v40 = vadd.f32 %v1215_v7, %v208_v6  ;;  %v1610_v41 = vadd.f32 %v1471_v30, %v272_v29  ;;  %v1549_v31 = vadd.f32 %v3306_v38, %v211_v34 }
 0x156   :  { %1673 = vst.msk [vmem:[#allocation2 + $0x1d0] sm:$0xff] %vm19_vm2, %v1544_v43  ;;  %1737 = vst.msk [vmem:[#allocation2 + $0x3d0] sm:$0xff] %vm19_vm2, %v1608_v46  ;;  %v1613_v42 = vadd.f32 %v3370_v28, %v275_v32  ;;  %v1547_v49 = vadd.f32 %v1218_v47, %v209_v39  ;;  %v1611_v50 = vadd.f32 %v1474_v48, %v273_v58 }
 0x157   :  { %1671 = vst.msk [vmem:[#allocation2 + $0x1c0] sm:$0xff] %vm19_vm2, %v1542_v57  ;;  %1735 = vst.msk [vmem:[#allocation2 + $0x3c0] sm:$0xff] %vm19_vm2, %v1606_v60  ;;  %v1795_v51 = vld [vmem:[#allocation2 + $0x188] sm:$0xff] }
 0x158   :  { %1674 = vst.msk [vmem:[#allocation2 + $0x1d8] sm:$0xff] %vm19_vm2, %v1545_v14  ;;  %1738 = vst.msk [vmem:[#allocation2 + $0x3d8] sm:$0xff] %vm19_vm2, %v1609_v15  ;;  %v1859_v52 = vld [vmem:[#allocation2 + $0x388] sm:$0xff]  ;;  %v1930_v53 = vadd.f32 %v4372_v13, %v1795_v51 }
 0x159   :  { %1672 = vst.msk [vmem:[#allocation2 + $0x1c8] sm:$0xff] %vm19_vm2, %v1543_v20  ;;  %1736 = vst.msk [vmem:[#allocation2 + $0x3c8] sm:$0xff] %vm19_vm2, %v1607_v33  ;;  %v1994_v54 = vadd.f32 %v4372_v13, %v1859_v52  ;;  %v1800_v55 = vld [vmem:[#allocation2 + $0x1b0] sm:$0xff] }
 0x15a   :  { %1677 = vst.msk [vmem:[#allocation2 + $0x1f0] sm:$0xff] %vm19_vm2, %v1548_v35  ;;  %1741 = vst.msk [vmem:[#allocation2 + $0x3f0] sm:$0xff] %vm19_vm2, %v1612_v37  ;;  %v1864_v56 = vld [vmem:[#allocation2 + $0x3b0] sm:$0xff]  ;;  %v1935_v61 = vadd.f32 %v4372_v13, %v1800_v55  ;;  %v1798_v63 = vld [vmem:[#allocation2 + $0x1a0] sm:$0xff]  ;;  %v2058_v2 = vmax.f32 %v1930_v53, 0.0 }
 0x15b   :  { %1675 = vst.msk [vmem:[#allocation2 + $0x1e0] sm:$0xff] %vm19_vm2, %v1546_v40  ;;  %1739 = vst.msk [vmem:[#allocation2 + $0x3e0] sm:$0xff] %vm19_vm2, %v1610_v41  ;;  %v1999_v62 = vadd.f32 %v4372_v13, %v1864_v56  ;;  %v1862_v0 = vld [vmem:[#allocation2 + $0x3a0] sm:$0xff]  ;;  %v1801_v1 = vld [vmem:[#allocation2 + $0x1b8] sm:$0xff]  ;;  %v2122_v3 = vmax.f32 %v1994_v54, 0.0  ;;  %v1933_v4 = vadd.f32 %v4372_v13, %v1798_v63 }
 0x15c   :  { %1678 = vst.msk [vmem:[#allocation2 + $0x1f8] sm:$0xff] %vm19_vm2, %v1549_v31  ;;  %1742 = vst.msk [vmem:[#allocation2 + $0x3f8] sm:$0xff] %vm19_vm2, %v1613_v42  ;;  %v1997_v5 = vadd.f32 %v4372_v13, %v1862_v0  ;;  %v1865_v10 = vld [vmem:[#allocation2 + $0x3b8] sm:$0xff]  ;;  %v2063_v11 = vmax.f32 %v1935_v61, 0.0  ;;  %v1936_v16 = vadd.f32 %v4372_v13, %v1801_v1  ;;  %v1799_v45 = vld [vmem:[#allocation2 + $0x1a8] sm:$0xff]  ;;  %v3091_v9 = vpack.c.bf16 %v2058_v2, %v2058_v2 }
 0x15d   :  { %1676 = vst.msk [vmem:[#allocation2 + $0x1e8] sm:$0xff] %vm19_vm2, %v1547_v49  ;;  %1740 = vst.msk [vmem:[#allocation2 + $0x3e8] sm:$0xff] %vm19_vm2, %v1611_v50  ;;  %v2127_v12 = vmax.f32 %v1999_v62, 0.0  ;;  %v2000_v44 = vadd.f32 %v4372_v13, %v1865_v10  ;;  %v1863_v8 = vld [vmem:[#allocation2 + $0x3a8] sm:$0xff]  ;;  %v3155_v17 = vpack.c.bf16 %v2122_v3, %v2122_v3  ;;  %v2061_v18 = vmax.f32 %v1933_v4, 0.0  ;;  %v1804_v22 = vld [vmem:[#allocation2 + $0x1d0] sm:$0xff] }
 0x15e   :  { %v2125_v21 = vmax.f32 %v1997_v5, 0.0  ;;  %v1868_v23 = vld [vmem:[#allocation2 + $0x3d0] sm:$0xff]  ;;  %v3096_v24 = vpack.c.bf16 %v2063_v11, %v2063_v11  ;;  %v2064_v26 = vmax.f32 %v1936_v16, 0.0  ;;  %v1802_v59 = vld [vmem:[#allocation2 + $0x1c0] sm:$0xff]  ;;  %2699 = vst.msk [vmem:[%s4870_s3 + $0xc4] sm:$0xf] %vm2649_vm3, %v3091_v9  ;;  %v1934_v43 = vadd.f32 %v4372_v13, %v1799_v45 }
 0x15f   :  { %v3160_v25 = vpack.c.bf16 %v2127_v12, %v2127_v12  ;;  %v2128_v27 = vmax.f32 %v2000_v44, 0.0  ;;  %v1866_v6 = vld [vmem:[#allocation2 + $0x3c0] sm:$0xff]  ;;  %2763 = vst.msk [vmem:[%s4870_s3 + $0x1c4] sm:$0xf] %vm2649_vm3, %v3155_v17  ;;  %v3094_v36 = vpack.c.bf16 %v2061_v18, %v2061_v18  ;;  %v1998_v46 = vadd.f32 %v4372_v13, %v1863_v8  ;;  %v1805_v7 = vld [vmem:[#allocation2 + $0x1d8] sm:$0xff] }
 0x160   :  { %v3158_v19 = vpack.c.bf16 %v2125_v21, %v2125_v21  ;;  %v1869_v29 = vld [vmem:[#allocation2 + $0x3d8] sm:$0xff]  ;;  %2704 = vst.msk [vmem:[%s4870_s3 + $0xd8] sm:$0xf] %vm2649_vm3, %v3096_v24  ;;  %v3097_v30 = vpack.c.bf16 %v2064_v26, %v2064_v26  ;;  %v1939_v32 = vadd.f32 %v4372_v13, %v1804_v22  ;;  %v2003_v57 = vadd.f32 %v4372_v13, %v1868_v23  ;;  %v1803_v28 = vld [vmem:[#allocation2 + $0x1c8] sm:$0xff]  ;;  %v3448_v55 = vld [vmem:[%s4869_s2] ss:$0 sm:$0xff] }
 0x161   :  { %2768 = vst.msk [vmem:[%s4870_s3 + $0x1d8] sm:$0xf] %vm2649_vm3, %v3160_v25  ;;  %v3161_v34 = vpack.c.bf16 %v2128_v27, %v2128_v27  ;;  %2702 = vst.msk [vmem:[%s4870_s3 + $0xd0] sm:$0xf] %vm2649_vm3, %v3094_v36  ;;  %v2062_v60 = vmax.f32 %v1934_v43, 0.0  ;;  %v2126_v14 = vmax.f32 %v1998_v46, 0.0  ;;  %v1937_v15 = vadd.f32 %v4372_v13, %v1802_v59 }
 0x162   :  { %2766 = vst.msk [vmem:[%s4870_s3 + $0x1d0] sm:$0xf] %vm2649_vm3, %v3158_v19  ;;  %v2001_v20 = vadd.f32 %v4372_v13, %v1866_v6  ;;  %2705 = vst.msk [vmem:[%s4870_s3 + $0xdc] sm:$0xf] %vm2649_vm3, %v3097_v30  ;;  %v2067_v33 = vmax.f32 %v1939_v32, 0.0  ;;  %v2131_v35 = vmax.f32 %v2003_v57, 0.0  ;;  %v1940_v37 = vadd.f32 %v4372_v13, %v1805_v7 }
 0x163   :  { %2769 = vst.msk [vmem:[%s4870_s3 + $0x1dc] sm:$0xf] %vm2649_vm3, %v3161_v34  ;;  %v2004_v38 = vadd.f32 %v4372_v13, %v1869_v29  ;;  %v1867_v39 = vld [vmem:[#allocation2 + $0x3c8] sm:$0xff]  ;;  %v3095_v58 = vpack.c.bf16 %v2062_v60, %v2062_v60  ;;  %v3159_v40 = vpack.c.bf16 %v2126_v14, %v2126_v14  ;;  %v2065_v41 = vmax.f32 %v1937_v15, 0.0  ;;  %v1808_v42 = vld [vmem:[#allocation2 + $0x1f0] sm:$0xff]  ;;  %v1806_v52 = vld [vmem:[#allocation2 + $0x1e0] sm:$0xff] }
 0x164   :  { %v2129_v31 = vmax.f32 %v2001_v20, 0.0  ;;  %v1872_v47 = vld [vmem:[#allocation2 + $0x3f0] sm:$0xff]  ;;  %v3100_v48 = vpack.c.bf16 %v2067_v33, %v2067_v33  ;;  %v3164_v49 = vpack.c.bf16 %v2131_v35, %v2131_v35  ;;  %v2068_v50 = vmax.f32 %v1940_v37, 0.0  ;;  %v1870_v53 = vld [vmem:[#allocation2 + $0x3e0] sm:$0xff]  ;;  %v1809_v62 = vld [vmem:[#allocation2 + $0x1f8] sm:$0xff] }
 0x165   :  { %v2132_v51 = vmax.f32 %v2004_v38, 0.0  ;;  %2703 = vst.msk [vmem:[%s4870_s3 + $0xd4] sm:$0xf] %vm2649_vm3, %v3095_v58  ;;  %2767 = vst.msk [vmem:[%s4870_s3 + $0x1d4] sm:$0xf] %vm2649_vm3, %v3159_v40  ;;  %v3098_v13 = vpack.c.bf16 %v2065_v41, %v2065_v41  ;;  %v1938_v56 = vadd.f32 %v3448_v55, %v1803_v28  ;;  %v2002_v61 = vadd.f32 %v3448_v55, %v1867_v39  ;;  %v1873_v63 = vld [vmem:[#allocation2 + $0x3f8] sm:$0xff] }
 0x166   :  { %v3162_v54 = vpack.c.bf16 %v2129_v31, %v2129_v31  ;;  %2708 = vst.msk [vmem:[%s4870_s3 + $0xe8] sm:$0xf] %vm2649_vm3, %v3100_v48  ;;  %2772 = vst.msk [vmem:[%s4870_s3 + $0x1e8] sm:$0xf] %vm2649_vm3, %v3164_v49  ;;  %v3101_v0 = vpack.c.bf16 %v2068_v50, %v2068_v50  ;;  %v1943_v2 = vadd.f32 %v3448_v55, %v1808_v42  ;;  %v1807_v8 = vld [vmem:[#allocation2 + $0x1e8] sm:$0xff] }
 0x167   :  { %v3165_v1 = vpack.c.bf16 %v2132_v51, %v2132_v51  ;;  %v2007_v3 = vadd.f32 %v3448_v55, %v1872_v47  ;;  %2706 = vst.msk [vmem:[%s4870_s3 + $0xe0] sm:$0xf] %vm2649_vm3, %v3098_v13  ;;  %v2066_v4 = vmax.f32 %v1938_v56, 0.0  ;;  %v2130_v5 = vmax.f32 %v2002_v61, 0.0  ;;  %v1871_v9 = vld [vmem:[#allocation2 + $0x3e8] sm:$0xff] }
 0x168   :  { %2770 = vst.msk [vmem:[%s4870_s3 + $0x1e0] sm:$0xf] %vm2649_vm3, %v3162_v54  ;;  %v1941_v10 = vadd.f32 %v3448_v55, %v1806_v52  ;;  %v2005_v11 = vadd.f32 %v3448_v55, %v1870_v53  ;;  %2709 = vst.msk [vmem:[%s4870_s3 + $0xec] sm:$0xf] %vm2649_vm3, %v3101_v0  ;;  %v2071_v12 = vmax.f32 %v1943_v2, 0.0  ;;  %v1944_v44 = vadd.f32 %v3448_v55, %v1809_v62 }
 0x169   :  { %2773 = vst.msk [vmem:[%s4870_s3 + $0x1ec] sm:$0xf] %vm2649_vm3, %v3165_v1  ;;  %v2135_v16 = vmax.f32 %v2007_v3, 0.0  ;;  %v2008_v45 = vadd.f32 %v3448_v55, %v1873_v63  ;;  %v3099_v17 = vpack.c.bf16 %v2066_v4, %v2066_v4  ;;  %v3163_v18 = vpack.c.bf16 %v2130_v5, %v2130_v5 }
 0x16a   :  { %v2069_v21 = vmax.f32 %v1941_v10, 0.0  ;;  %v2133_v22 = vmax.f32 %v2005_v11, 0.0  ;;  %v3104_v23 = vpack.c.bf16 %v2071_v12, %v2071_v12  ;;  %v2072_v25 = vmax.f32 %v1944_v44, 0.0 }
 0x16b   :  { %v3168_v24 = vpack.c.bf16 %v2135_v16, %v2135_v16  ;;  %v2136_v26 = vmax.f32 %v2008_v45, 0.0  ;;  %2707 = vst.msk [vmem:[%s4870_s3 + $0xe4] sm:$0xf] %vm2649_vm3, %v3099_v17  ;;  %2771 = vst.msk [vmem:[%s4870_s3 + $0x1e4] sm:$0xf] %vm2649_vm3, %v3163_v18  ;;  %v1942_v6 = vadd.f32 %v3448_v55, %v1807_v8  ;;  %v2006_v36 = vadd.f32 %v3448_v55, %v1871_v9 }
 0x16c   :  { %v3102_v27 = vpack.c.bf16 %v2069_v21, %v2069_v21  ;;  %v3166_v59 = vpack.c.bf16 %v2133_v22, %v2133_v22  ;;  %2712 = vst.msk [vmem:[%s4870_s3 + $0xf8] sm:$0xf] %vm2649_vm3, %v3104_v23  ;;  %v3105_v19 = vpack.c.bf16 %v2072_v25, %v2072_v25 }
 0x16d   :  { %2776 = vst.msk [vmem:[%s4870_s3 + $0x1f8] sm:$0xf] %vm2649_vm3, %v3168_v24  ;;  %v3169_v43 = vpack.c.bf16 %v2136_v26, %v2136_v26  ;;  %v2070_v46 = vmax.f32 %v1942_v6, 0.0  ;;  %v2134_v7 = vmax.f32 %v2006_v36, 0.0 }
 0x16e   :  { %2710 = vst.msk [vmem:[%s4870_s3 + $0xf0] sm:$0xf] %vm2649_vm3, %v3102_v27  ;;  %2774 = vst.msk [vmem:[%s4870_s3 + $0x1f0] sm:$0xf] %vm2649_vm3, %v3166_v59 }
 0x16f   :  { %2713 = vst.msk [vmem:[%s4870_s3 + $0xfc] sm:$0xf] %vm2649_vm3, %v3105_v19  ;;  %2777 = vst.msk [vmem:[%s4870_s3 + $0x1fc] sm:$0xf] %vm2649_vm3, %v3169_v43  ;;  %v3103_v29 = vpack.c.bf16 %v2070_v46, %v2070_v46  ;;  %v3167_v30 = vpack.c.bf16 %v2134_v7, %v2134_v7 }
 0x171   :  { %2711 = vst.msk [vmem:[%s4870_s3 + $0xf4] sm:$0xf] %vm2649_vm3, %v3103_v29  ;;  %2775 = vst.msk [vmem:[%s4870_s3 + $0x1f4] sm:$0xf] %vm2649_vm3, %v3167_v30 }

// kernel: cnn_encoder_forward.7
= control target key start
LH: loop header
LB: loop body
LE: loop exit
PB: predicated region body
PF: predicated region fallthrough
CT: control target
= control target key end

     0   :  { %vm532_vm0 = vcmask 261120   ;;  %vm19_vm1 = vcmask 523264   ;;  %vm1202_vm2 = vcmask 519168   ;;  %s2166_s1 = inlined_call_operand.vmem [shape: bf16[288,64], index: 1, kind: input, shape index: {}]   ;;  %s2167_s0 = inlined_call_operand.vmem [shape: bf16[256,288], index: 0, kind: input, shape index: {}]   ;;  %s2168_s2 = inlined_call_operand.vmem [shape: f32[1,64], index: 2, kind: input, shape index: {}]   ;;  %s2169_s3 = inlined_call_operand.vmem [shape: bf16[256,64], index: 3, kind: output, shape index: {}]  }
   0x1   :  { %v1569_v0 = vld [vmem:[%s2166_s1 + $0x78] sm:$0xff]   ;;  %v1571_v2 = vld [vmem:[%s2166_s1 + $0x70] sm:$0xff]   ;;  %v1573_v4 = vld [vmem:[%s2166_s1 + $0x68] sm:$0xff]  }
   0x2   :  { %v1570_v1 = vld [vmem:[%s2166_s1 + $0x38] sm:$0xff]   ;;  %1386 = vmatprep.subr.bf16.mxu0 %v1569_v0  ;;  %1552 = vmatprep.subr.bf16.mxu1 %v1569_v0  ;;  %v1572_v3 = vld [vmem:[%s2166_s1 + $0x30] sm:$0xff]   ;;  %v1574_v5 = vld [vmem:[%s2166_s1 + $0x28] sm:$0xff]  }
   0x3   :  { %1387 = vmatpush3.bf16.msra.mxu0 %v1570_v1  ;;  %1560 = vmatpush3.bf16.msra.mxu1 %v1570_v1  ;;  %v1575_v6 = vld [vmem:[%s2166_s1 + $0x60] sm:$0xff]   ;;  %v1577_v8 = vld [vmem:[%s2166_s1 + $0x58] sm:$0xff]   ;;  %v1579_v10 = vld [vmem:[%s2166_s1 + $0x50] sm:$0xff]  }
   0x4   :  { %1388 = vmatprep.subr.bf16.mxu0 %v1571_v2  ;;  %1553 = vmatprep.subr.bf16.mxu1 %v1571_v2  ;;  %v1576_v7 = vld [vmem:[%s2166_s1 + $0x20] sm:$0xff]   ;;  %v1578_v9 = vld [vmem:[%s2166_s1 + $0x18] sm:$0xff]   ;;  %v1580_v13 = vld [vmem:[%s2166_s1 + $0x10] sm:$0xff]   ;;  %v1651_v2 = vmov 0.0  }
   0x5   :  { %v1587_v11 = vld [vmem:[%s2167_s0 + $0x4] ss:$12 sps:$4 sm:$0xff]   ;;  %v1581_v14 = vld [vmem:[%s2166_s1 + $0x48] sm:$0xff]   ;;  %v1598_v26 = vld [vmem:[%s2167_s0 + $0x34] ss:$12 sps:$4 sm:$0xff]   ;;  %22 = vst.msk [vmem:[#allocation2 + $0x10] sm:$0xff] %vm19_vm1, %v1651_v2 }
   0x6   :  { %v1590_v12 = vld [vmem:[%s2167_s0 + $0x124] ss:$12 sps:$4 sm:$0xff]   ;;  %613 = vmatprep.mubr.bf16.mxu0 %v1587_v11  ;;  %v1582_v15 = vld [vmem:[%s2166_s1 + $0x8] sm:$0xff]   ;;  %v1600_v27 = vld [vmem:[%s2167_s0 + $0x154] ss:$12 sps:$4 sm:$0xff]   ;;  %20 = vst.msk [vmem:[#allocation2] sm:$0xff] %vm19_vm1, %v1651_v2 }
   0x7   :  { %1389 = vmatpush3.bf16.msra.mxu0 %v1572_v3  ;;  %1561 = vmatpush3.bf16.msra.mxu1 %v1572_v3  ;;  %v1583_v16 = vld [vmem:[%s2166_s1 + $0x40] sm:$0xff]   ;;  %v1591_v18 = vld [vmem:[%s2166_s1 + $0x88] sm:$0xff]   ;;  %v1602_v28 = vld [vmem:[%s2167_s0 + $0x30] ss:$12 sps:$4 sm:$0xff]   ;;  %21 = vst.msk [vmem:[#allocation2 + $0x8] sm:$0xff] %vm19_vm1, %v1651_v2 }
   0x8   :  { %1390 = vmatprep.subr.bf16.mxu0 %v1573_v4  ;;  %1554 = vmatprep.subr.bf16.mxu1 %v1573_v4  ;;  %v1584_v17 = vld [vmem:[%s2166_s1] sm:$0xff]   ;;  %v1592_v21 = vld [vmem:[%s2167_s0 + $0x1c] ss:$12 sps:$4 sm:$0xff]   ;;  %v1605_v30 = vld [vmem:[%s2167_s0 + $0x4c] ss:$12 sps:$4 sm:$0xff]   ;;  %23 = vst.msk [vmem:[#allocation2 + $0x18] sm:$0xff] %vm19_vm1, %v1651_v2 }
   0x9   :  { %709 = vmatprep.mubr.bf16.mxu1 %v1590_v12  ;;  %v1585_v19 = vld [vmem:[%s2167_s0] ss:$12 sps:$4 sm:$0xff]   ;;  %v1594_v22 = vld [vmem:[%s2167_s0 + $0x13c] ss:$12 sps:$4 sm:$0xff]   ;;  %v1596_v24 = vld [vmem:[%s2167_s0 + $0x18] ss:$12 sps:$4 sm:$0xff]  }
   0xa   :  { %v1588_v20 = vld [vmem:[%s2167_s0 + $0x120] ss:$12 sps:$4 sm:$0xff]   ;;  %v1597_v25 = vld [vmem:[%s2167_s0 + $0x138] ss:$12 sps:$4 sm:$0xff]   ;;  %v1603_v29 = vld [vmem:[%s2167_s0 + $0x150] ss:$12 sps:$4 sm:$0xff]  }
   0xb   :  { %1391 = vmatpush3.bf16.msra.mxu0 %v1574_v5  ;;  %1562 = vmatpush3.bf16.msra.mxu1 %v1574_v5  ;;  %v1604_v23 = vld [vmem:[%s2166_s1 + $0x80] sm:$0xff]   ;;  %v1607_v31 = vld [vmem:[%s2167_s0 + $0x16c] ss:$12 sps:$4 sm:$0xff]   ;;  %v1609_v32 = vld [vmem:[%s2167_s0 + $0x48] ss:$12 sps:$4 sm:$0xff]   ;;  %24 = vst.msk [vmem:[#allocation2 + $0x20] sm:$0xff] %vm19_vm1, %v1651_v2 }
   0xc   :  { %1392 = vmatprep.subr.bf16.mxu0 %v1575_v6  ;;  %1555 = vmatprep.subr.bf16.mxu1 %v1575_v6  ;;  %v1610_v33 = vld [vmem:[%s2167_s0 + $0x168] ss:$12 sps:$4 sm:$0xff]   ;;  %v1611_v34 = vld [vmem:[%s2167_s0 + $0x64] ss:$12 sps:$4 sm:$0xff]   ;;  %v1614_v36 = vld [vmem:[%s2167_s0 + $0x60] ss:$12 sps:$4 sm:$0xff]  }
   0xd   :  { %v1613_v35 = vld [vmem:[%s2167_s0 + $0x8] ss:$12 sps:$4 sm:$0xff]   ;;  %v1615_v37 = vld [vmem:[%s2167_s0 + $0x20] ss:$12 sps:$4 sm:$0xff]   ;;  %v1618_v39 = vld [vmem:[%s2167_s0 + $0x38] ss:$12 sps:$4 sm:$0xff]  }
   0xe   :  { %v1616_v38 = vld [vmem:[%s2167_s0 + $0x7c] ss:$12 sps:$4 sm:$0xff]   ;;  %v1619_v40 = vld [vmem:[%s2167_s0 + $0x78] ss:$12 sps:$4 sm:$0xff]   ;;  %v1621_v42 = vld [vmem:[%s2167_s0 + $0x94] ss:$12 sps:$4 sm:$0xff]  }
   0xf   :  { %1393 = vmatpush3.bf16.msra.mxu0 %v1576_v7  ;;  %1563 = vmatpush3.bf16.msra.mxu1 %v1576_v7  ;;  %v1620_v41 = vld [vmem:[%s2167_s0 + $0x50] ss:$12 sps:$4 sm:$0xff]   ;;  %v1623_v43 = vld [vmem:[%s2167_s0 + $0x68] ss:$12 sps:$4 sm:$0xff]   ;;  %v1625_v45 = vld [vmem:[%s2167_s0 + $0x80] ss:$12 sps:$4 sm:$0xff]  }
  0x10   :  { %1394 = vmatprep.subr.bf16.mxu0 %v1577_v8  ;;  %1556 = vmatprep.subr.bf16.mxu1 %v1577_v8  ;;  %v1624_v44 = vld [vmem:[%s2167_s0 + $0x90] ss:$12 sps:$4 sm:$0xff]   ;;  %v1626_v46 = vld [vmem:[%s2167_s0 + $0xac] ss:$12 sps:$4 sm:$0xff]   ;;  %v1629_v48 = vld [vmem:[%s2167_s0 + $0xa8] ss:$12 sps:$4 sm:$0xff]  }
  0x11   :  { %v1628_v47 = vld [vmem:[%s2167_s0 + $0x98] ss:$12 sps:$4 sm:$0xff]   ;;  %v1630_v49 = vld [vmem:[%s2167_s0 + $0xb0] ss:$12 sps:$4 sm:$0xff]   ;;  %v1633_v51 = vld [vmem:[%s2167_s0 + $0xc8] ss:$12 sps:$4 sm:$0xff]  }
  0x12   :  { %v1631_v50 = vld [vmem:[%s2167_s0 + $0xc4] ss:$12 sps:$4 sm:$0xff]   ;;  %v1634_v52 = vld [vmem:[%s2167_s0 + $0xc0] ss:$12 sps:$4 sm:$0xff]   ;;  %v1636_v54 = vld [vmem:[%s2167_s0 + $0xdc] ss:$12 sps:$4 sm:$0xff]  }
  0x13   :  { %1395 = vmatpush3.bf16.msra.mxu0 %v1578_v9  ;;  %1564 = vmatpush3.bf16.msra.mxu1 %v1578_v9  ;;  %v1635_v53 = vld [vmem:[%s2167_s0 + $0xe0] ss:$12 sps:$4 sm:$0xff]   ;;  %v1638_v55 = vld [vmem:[%s2167_s0 + $0xf8] ss:$12 sps:$4 sm:$0xff]   ;;  %v1640_v57 = vld [vmem:[%s2167_s0 + $0x110] ss:$12 sps:$4 sm:$0xff]  }
  0x14   :  { %1396 = vmatprep.subr.bf16.mxu0 %v1579_v10  ;;  %1557 = vmatprep.subr.bf16.mxu1 %v1579_v10  ;;  %v1639_v56 = vld [vmem:[%s2167_s0 + $0xd8] ss:$12 sps:$4 sm:$0xff]   ;;  %v1641_v58 = vld [vmem:[%s2167_s0 + $0xf4] ss:$12 sps:$4 sm:$0xff]   ;;  %v1644_v60 = vld [vmem:[%s2167_s0 + $0xf0] ss:$12 sps:$4 sm:$0xff]  }
  0x15   :  { %v1643_v59 = vld [vmem:[%s2167_s0 + $0x128] ss:$12 sps:$4 sm:$0xff]   ;;  %v1645_v61 = vld [vmem:[%s2167_s0 + $0x140] ss:$12 sps:$4 sm:$0xff]   ;;  %v1648_v63 = vld [vmem:[%s2167_s0 + $0x158] ss:$12 sps:$4 sm:$0xff]  }
  0x16   :  { %v1646_v62 = vld [vmem:[%s2167_s0 + $0x10c] ss:$12 sps:$4 sm:$0xff]   ;;  %v1649_v0 = vld [vmem:[%s2167_s0 + $0x108] ss:$12 sps:$4 sm:$0xff]   ;;  %v1650_v1 = vld [vmem:[%s2167_s0 + $0x170] ss:$12 sps:$4 sm:$0xff]  }
  0x17   :  { %1397 = vmatpush3.bf16.msra.mxu0 %v1580_v13  ;;  %1565 = vmatpush3.bf16.msra.mxu1 %v1580_v13  ;;  %25 = vst.msk [vmem:[#allocation2 + $0x28] sm:$0xff] %vm19_vm1, %v1651_v2  ;;  %26 = vst.msk [vmem:[#allocation2 + $0x30] sm:$0xff] %vm19_vm1, %v1651_v2 }
  0x18   :  { %1398 = vmatprep.subr.bf16.mxu0 %v1581_v14  ;;  %1558 = vmatprep.subr.bf16.mxu1 %v1581_v14  ;;  %27 = vst.msk [vmem:[#allocation2 + $0x38] sm:$0xff] %vm19_vm1, %v1651_v2  ;;  %28 = vst.msk [vmem:[#allocation2 + $0x40] sm:$0xff] %vm19_vm1, %v1651_v2 }
  0x19   :  { %29 = vst.msk [vmem:[#allocation2 + $0x48] sm:$0xff] %vm19_vm1, %v1651_v2  ;;  %30 = vst.msk [vmem:[#allocation2 + $0x50] sm:$0xff] %vm19_vm1, %v1651_v2 }
  0x1a   :  { %31 = vst.msk [vmem:[#allocation2 + $0x58] sm:$0xff] %vm19_vm1, %v1651_v2  ;;  %32 = vst.msk [vmem:[#allocation2 + $0x60] sm:$0xff] %vm19_vm1, %v1651_v2 }
  0x1b   :  { %1399 = vmatpush3.bf16.msra.mxu0 %v1582_v15  ;;  %1566 = vmatpush3.bf16.msra.mxu1 %v1582_v15  ;;  %33 = vst.msk [vmem:[#allocation2 + $0x68] sm:$0xff] %vm19_vm1, %v1651_v2  ;;  %34 = vst.msk [vmem:[#allocation2 + $0x70] sm:$0xff] %vm19_vm1, %v1651_v2 }
  0x1c   :  { %1400 = vmatprep.subr.bf16.mxu0 %v1583_v16  ;;  %1559 = vmatprep.subr.bf16.mxu1 %v1583_v16  ;;  %35 = vst.msk [vmem:[#allocation2 + $0x78] sm:$0xff] %vm19_vm1, %v1651_v2  ;;  %36 = vst.msk [vmem:[#allocation2 + $0x80] sm:$0xff] %vm19_vm1, %v1651_v2 }
  0x1d   :  { %37 = vst.msk [vmem:[#allocation2 + $0x88] sm:$0xff] %vm19_vm1, %v1651_v2  ;;  %38 = vst.msk [vmem:[#allocation2 + $0x90] sm:$0xff] %vm19_vm1, %v1651_v2 }
  0x1e   :  { %39 = vst.msk [vmem:[#allocation2 + $0x98] sm:$0xff] %vm19_vm1, %v1651_v2  ;;  %40 = vst.msk [vmem:[#allocation2 + $0xa0] sm:$0xff] %vm19_vm1, %v1651_v2 }
  0x1f   :  { %1401 = vmatpush3.bf16.msra.mxu0 %v1584_v17  ;;  %1567 = vmatpush3.bf16.msra.mxu1 %v1584_v17  ;;  %41 = vst.msk [vmem:[#allocation2 + $0xa8] sm:$0xff] %vm19_vm1, %v1651_v2  ;;  %42 = vst.msk [vmem:[#allocation2 + $0xb0] sm:$0xff] %vm19_vm1, %v1651_v2 }
  0x20   :  { %1516 = vmatprep.subr.bf16.mxu1 %v1591_v18  ;;  %43 = vst.msk [vmem:[#allocation2 + $0xb8] sm:$0xff] %vm19_vm1, %v1651_v2  ;;  %44 = vst.msk [vmem:[#allocation2 + $0xc0] sm:$0xff] %vm19_vm1, %v1651_v2 }
  0x21   :  { %45 = vst.msk [vmem:[#allocation2 + $0xc8] sm:$0xff] %vm19_vm1, %v1651_v2  ;;  %46 = vst.msk [vmem:[#allocation2 + $0xd0] sm:$0xff] %vm19_vm1, %v1651_v2 }
  0x22   :  { %614 = vmatmul.mubr.bf16.vlgmr.msra.gmra.mxu0 %v1585_v19  ;;  %710 = vmatmul.mubr.bf16.vlgmr.msra.gmra.mxu1 %v1588_v20  ;;  %47 = vst.msk [vmem:[#allocation2 + $0xd8] sm:$0xff] %vm19_vm1, %v1651_v2  ;;  %48 = vst.msk [vmem:[#allocation2 + $0xe0] sm:$0xff] %vm19_vm1, %v1651_v2 }
  0x23   :  { %1517 = vmatpush3.bf16.msra.mxu1 %v1591_v18  ;;  %621 = vmatprep.mubr.bf16.mxu0 %v1592_v21  ;;  %49 = vst.msk [vmem:[#allocation2 + $0xe8] sm:$0xff] %vm19_vm1, %v1651_v2  ;;  %50 = vst.msk [vmem:[#allocation2 + $0xf0] sm:$0xff] %vm19_vm1, %v1651_v2 }
  0x24   :  { %717 = vmatprep.mubr.bf16.mxu1 %v1594_v22  ;;  %1518 = vmatprep.subr.bf16.mxu1 %v1604_v23  ;;  %51 = vst.msk [vmem:[#allocation2 + $0xf8] sm:$0xff] %vm19_vm1, %v1651_v2  ;;  %v58_v2 = vld [vmem:[#allocation2 + $0x30] sm:$0xff] }
  0x27   :  { %1519 = vmatpush3.bf16.msra.mxu1 %v1604_v23 }
  0x2a   :  { %622 = vmatmul.mubr.bf16.gmra.mxu0 %v1596_v24  ;;  %718 = vmatmul.mubr.bf16.gmra.mxu1 %v1597_v25 }
  0x2b   :  { %629 = vmatprep.mubr.bf16.mxu0 %v1598_v26  ;;  %725 = vmatprep.mubr.bf16.mxu1 %v1600_v27 }
  0x32   :  { %630 = vmatmul.mubr.bf16.gmra.mxu0 %v1602_v28  ;;  %726 = vmatmul.mubr.bf16.gmra.mxu1 %v1603_v29 }
  0x33   :  { %637 = vmatprep.mubr.bf16.mxu0 %v1605_v30  ;;  %733 = vmatprep.mubr.bf16.mxu1 %v1607_v31 }
  0x3a   :  { %638 = vmatmul.mubr.bf16.gmra.mxu0 %v1609_v32  ;;  %734 = vmatmul.mubr.bf16.gmra.mxu1 %v1610_v33 }
  0x3b   :  { %645 = vmatprep.mubr.bf16.mxu0 %v1611_v34  ;;  %1520 = vmatprep.mubr.msk.bf16.mxu1 %vm532_vm0, %v1613_v35 }
  0x42   :  { %646 = vmatmul.mubr.bf16.gmra.mxu0 %v1614_v36  ;;  %1521 = vmatmul.mubr.msk.bf16.vlgmr.msra.gmra.mxu1 %vm532_vm0, %v1615_v37 }
  0x43   :  { %653 = vmatprep.mubr.bf16.mxu0 %v1616_v38  ;;  %1524 = vmatprep.mubr.msk.bf16.mxu1 %vm532_vm0, %v1618_v39 }
  0x4a   :  { %654 = vmatmul.mubr.bf16.gmra.mxu0 %v1619_v40  ;;  %1525 = vmatmul.mubr.msk.bf16.gmra.mxu1 %vm532_vm0, %v1620_v41 }
  0x4b   :  { %661 = vmatprep.mubr.bf16.mxu0 %v1621_v42  ;;  %1528 = vmatprep.mubr.msk.bf16.mxu1 %vm532_vm0, %v1623_v43  ;;  %v54_v43 = vld [vmem:[#allocation2 + $0x10] sm:$0xff] }
  0x52   :  { %662 = vmatmul.mubr.bf16.gmra.mxu0 %v1624_v44  ;;  %1529 = vmatmul.mubr.msk.bf16.gmra.mxu1 %vm532_vm0, %v1625_v45 }
  0x53   :  { %669 = vmatprep.mubr.bf16.mxu0 %v1626_v46  ;;  %1532 = vmatprep.mubr.msk.bf16.mxu1 %vm532_vm0, %v1628_v47 }
  0x5a   :  { %670 = vmatmul.mubr.bf16.gmra.mxu0 %v1629_v48  ;;  %1533 = vmatmul.mubr.msk.bf16.gmra.mxu1 %vm532_vm0, %v1630_v49  ;;  %v52_v48 = vld [vmem:[#allocation2] sm:$0xff] }
  0x5b   :  { %677 = vmatprep.mubr.bf16.mxu0 %v1631_v50  ;;  %1536 = vmatprep.mubr.msk.bf16.mxu1 %vm532_vm0, %v1633_v51 }
  0x62   :  { %678 = vmatmul.mubr.bf16.gmra.mxu0 %v1634_v52  ;;  %1537 = vmatmul.mubr.msk.bf16.gmra.mxu1 %vm532_vm0, %v1635_v53 }
  0x63   :  { %685 = vmatprep.mubr.bf16.mxu0 %v1636_v54  ;;  %1540 = vmatprep.mubr.msk.bf16.mxu1 %vm532_vm0, %v1638_v55  ;;  %v55_v54 = vld [vmem:[#allocation2 + $0x18] sm:$0xff] }
  0x6a   :  { %686 = vmatmul.mubr.bf16.gmra.mxu0 %v1639_v56  ;;  %1541 = vmatmul.mubr.msk.bf16.gmra.mxu1 %vm532_vm0, %v1640_v57 }
  0x6b   :  { %693 = vmatprep.mubr.bf16.mxu0 %v1641_v58  ;;  %1544 = vmatprep.mubr.msk.bf16.mxu1 %vm532_vm0, %v1643_v59 }
  0x72   :  { %694 = vmatmul.mubr.bf16.gmra.mxu0 %v1644_v60  ;;  %1545 = vmatmul.mubr.msk.bf16.gmra.mxu1 %vm532_vm0, %v1645_v61  ;;  %v53_v60 = vld [vmem:[#allocation2 + $0x8] sm:$0xff] }
  0x73   :  { %701 = vmatprep.mubr.bf16.mxu0 %v1646_v62  ;;  %1548 = vmatprep.mubr.msk.bf16.mxu1 %vm532_vm0, %v1648_v63 }
  0x7a   :  { %702 = vmatmul.mubr.bf16.gmra.mxu0 %v1649_v0  ;;  %1549 = vmatmul.mubr.msk.bf16.gmra.mxu1 %vm532_vm0, %v1650_v1 }
  0xe2   :  { %v1402_v3 = vpop.f32.mrf.mxu0  ;;  %v1474_v4 = vpop.f32.mrf.mxu1 }
  0xe4   :  { %v1403_v5 = vpop.f32.mrf.mxu0  ;;  %v1475_v6 = vpop.f32.mrf.mxu1 }
  0xe5   :  { %v1918_v7 = vadd.f32 %v1475_v6, %v1474_v4  ;;  %v1404_v45 = vadd.f32 %v1403_v5, %v1402_v3 }
  0xe6   :  { %v1405_v8 = vpop.f32.mrf.mxu0  ;;  %v1477_v9 = vpop.f32.mrf.mxu1 }
  0xe8   :  { %v1406_v10 = vpop.f32.mrf.mxu0  ;;  %v1478_v11 = vpop.f32.mrf.mxu1 }
  0xe9   :  { %v1920_v12 = vadd.f32 %v1478_v11, %v1477_v9  ;;  %v1407_v56 = vadd.f32 %v1406_v10, %v1405_v8  ;;  %v1954_v8 = vld [vmem:[%s2168_s2] ss:$0 sm:$0xff] }
  0xea   :  { %v1408_v13 = vpop.f32.mrf.mxu0  ;;  %v1480_v14 = vpop.f32.mrf.mxu1  ;;  %v56_v10 = vld [vmem:[#allocation2 + $0x20] sm:$0xff] }
  0xec   :  { %v1409_v15 = vpop.f32.mrf.mxu0  ;;  %v1481_v16 = vpop.f32.mrf.mxu1 }
  0xed   :  { %v1922_v17 = vadd.f32 %v1481_v16, %v1480_v14  ;;  %v1410_v41 = vadd.f32 %v1409_v15, %v1408_v13 }
  0xee   :  { %v1411_v18 = vpop.f32.mrf.mxu0  ;;  %v1483_v19 = vpop.f32.mrf.mxu1 }
  0xf0   :  { %v1412_v20 = vpop.f32.mrf.mxu0  ;;  %v1484_v21 = vpop.f32.mrf.mxu1 }
  0xf1   :  { %v1924_v22 = vadd.f32 %v1484_v21, %v1483_v19  ;;  %v1413_v50 = vadd.f32 %v1412_v20, %v1411_v18  ;;  %v59_v19 = vld [vmem:[#allocation2 + $0x38] sm:$0xff] }
  0xf2   :  { %v1414_v23 = vpop.f32.mrf.mxu0  ;;  %v1486_v24 = vpop.f32.mrf.mxu1 }
  0xf4   :  { %v1415_v25 = vpop.f32.mrf.mxu0  ;;  %v1487_v26 = vpop.f32.mrf.mxu1 }
  0xf5   :  { %v1926_v27 = vadd.f32 %v1487_v26, %v1486_v24  ;;  %v1416_v4 = vadd.f32 %v1415_v25, %v1414_v23 }
  0xf6   :  { %v1928_v28 = vpop.f32.mrf.mxu0  ;;  %v1489_v29 = vpop.f32.mrf.mxu1 }
  0xf8   :  { %v1418_v30 = vpop.f32.mrf.mxu0  ;;  %v1490_v31 = vpop.f32.mrf.mxu1 }
  0xf9   :  { %v1930_v32 = vadd.f32 %v1490_v31, %v1489_v29  ;;  %v1419_v25 = vadd.f32 %v1418_v30, %v1928_v28 }
  0xfa   :  { %v1420_v33 = vpop.f32.mrf.mxu0  ;;  %v1932_v34 = vpop.f32.mrf.mxu1 }
  0xfc   :  { %v1421_v35 = vpop.f32.mrf.mxu0  ;;  %v1934_v36 = vpop.f32.mrf.mxu1 }
  0xfd   :  { %v1422_v62 = vadd.f32 %v1421_v35, %v1420_v33 }
  0xfe   :  { %v1423_v37 = vpop.f32.mrf.mxu0  ;;  %v1936_v38 = vpop.f32.mrf.mxu1 }
 0x100   :  { %v1424_v39 = vpop.f32.mrf.mxu0  ;;  %v1938_v40 = vpop.f32.mrf.mxu1 }
 0x101   :  { %v1425_v13 = vadd.f32 %v1424_v39, %v1423_v37 }
 0x102   :  { %v1940_v42 = vpop.f32.mrf.mxu0  ;;  %v1522_v44 = vpop.f32.mrf.mxu1 }
 0x103   :  { %v785_v46 = vadd.f32 %v1522_v44, %v1410_v41  ;;  %v57_v41 = vld [vmem:[#allocation2 + $0x28] sm:$0xff] }
 0x104   :  { %v1942_v47 = vpop.f32.mrf.mxu0  ;;  %v776_v49 = vpop.f32.mrf.mxu1 }
 0x105   :  { %v905_v51 = vadd.f32 %v785_v46, %v54_v43  ;;  %v777_v52 = vadd.f32 %v1404_v45, %v776_v49  ;;  %v62_v46 = vld [vmem:[#allocation2 + $0x50] sm:$0xff] }
 0x106   :  { %v1944_v53 = vpop.f32.mrf.mxu0  ;;  %v1523_v55 = vpop.f32.mrf.mxu1 }
 0x107   :  { %938 = vst.msk [vmem:[#allocation2 + $0x10] sm:$0xff] %vm19_vm1, %v905_v51  ;;  %v903_v57 = vadd.f32 %v777_v52, %v52_v48  ;;  %v788_v58 = vadd.f32 %v1523_v55, %v1413_v50  ;;  %v1428_v51 = vadd.f32 %v1942_v47, %v1940_v42 }
 0x108   :  { %v1947_v59 = vpop.f32.mrf.mxu0  ;;  %v779_v61 = vpop.f32.mrf.mxu1 }
 0x109   :  { %936 = vst.msk [vmem:[#allocation2] sm:$0xff] %vm19_vm1, %v903_v57  ;;  %v906_v63 = vadd.f32 %v788_v58, %v55_v54  ;;  %v780_v0 = vadd.f32 %v1407_v56, %v779_v61 }
 0x10a   :  { %v1432_v1 = vpop.f32.mrf.mxu0  ;;  %v1526_v3 = vpop.f32.mrf.mxu1 }
 0x10b   :  { %939 = vst.msk [vmem:[#allocation2 + $0x18] sm:$0xff] %vm19_vm1, %v906_v63  ;;  %v904_v5 = vadd.f32 %v780_v0, %v53_v60  ;;  %v801_v6 = vadd.f32 %v1526_v3, %v1422_v62  ;;  %v60_v63 = vld [vmem:[#allocation2 + $0x40] sm:$0xff] }
 0x10c   :  { %v1433_v9 = vpop.f32.mrf.mxu0  ;;  %v792_v11 = vpop.f32.mrf.mxu1 }
 0x10d   :  { %937 = vst.msk [vmem:[#allocation2 + $0x8] sm:$0xff] %vm19_vm1, %v904_v5  ;;  %v909_v14 = vadd.f32 %v801_v6, %v58_v2  ;;  %v793_v15 = vadd.f32 %v1416_v4, %v792_v11  ;;  %v1434_v37 = vadd.f32 %v1433_v9, %v1432_v1  ;;  %v63_v1 = vld [vmem:[#allocation2 + $0x58] sm:$0xff]  ;;  %v1431_v9 = vadd.f32 %v1947_v59, %v1944_v53 }
 0x10e   :  { %v973_v16 = vld [vmem:[#allocation2 + $0x10] sm:$0xff]  ;;  %v1435_v18 = vpop.f32.mrf.mxu0  ;;  %v1527_v20 = vpop.f32.mrf.mxu1 }
 0x10f   :  { %v1012_v21 = vadd.f32 %v1954_v8, %v973_v16  ;;  %942 = vst.msk [vmem:[#allocation2 + $0x30] sm:$0xff] %vm19_vm1, %v909_v14  ;;  %v907_v23 = vadd.f32 %v793_v15, %v56_v10  ;;  %v804_v24 = vadd.f32 %v1527_v20, %v1425_v13  ;;  %v61_v20 = vld [vmem:[#allocation2 + $0x48] sm:$0xff] }
 0x110   :  { %v971_v26 = vld [vmem:[#allocation2] sm:$0xff]  ;;  %v1436_v29 = vpop.f32.mrf.mxu0  ;;  %v795_v31 = vpop.f32.mrf.mxu1 }
 0x111   :  { %v1044_v33 = vmax.f32 %v1012_v21, 0.0  ;;  %v1010_v35 = vadd.f32 %v1954_v8, %v971_v26  ;;  %940 = vst.msk [vmem:[#allocation2 + $0x20] sm:$0xff] %vm19_vm1, %v907_v23  ;;  %v910_v39 = vadd.f32 %v804_v24, %v59_v19  ;;  %v796_v44 = vadd.f32 %v1419_v25, %v795_v31 }
 0x112   :  { %v974_v43 = vld [vmem:[#allocation2 + $0x18] sm:$0xff]  ;;  %v1438_v45 = vpop.f32.mrf.mxu0  ;;  %v1530_v48 = vpop.f32.mrf.mxu1  ;;  %v1437_v54 = vadd.f32 %v1436_v29, %v1435_v18 }
 0x113   :  { %v1356_v49 = vpack.c.bf16 %v1044_v33, %v1044_v33  ;;  %v1042_v50 = vmax.f32 %v1010_v35, 0.0  ;;  %v1013_v28 = vadd.f32 %v1954_v8, %v974_v43  ;;  %943 = vst.msk [vmem:[#allocation2 + $0x38] sm:$0xff] %vm19_vm1, %v910_v39  ;;  %v817_v30 = vadd.f32 %v1530_v48, %v1434_v37  ;;  %v64_v35 = vld [vmem:[#allocation2 + $0x60] sm:$0xff] }
 0x114   :  { %v972_v52 = vld [vmem:[#allocation2 + $0x8] sm:$0xff]  ;;  %v908_v55 = vadd.f32 %v796_v44, %v57_v41  ;;  %v1439_v56 = vpop.f32.mrf.mxu0  ;;  %v808_v57 = vpop.f32.mrf.mxu1 }
 0x115   :  { %1205 = vst.msk [vmem:[%s2169_s3 + $0x8] sm:$0xf] %vm1202_vm2, %v1356_v49  ;;  %v1354_v58 = vpack.c.bf16 %v1042_v50, %v1042_v50  ;;  %v1045_v60 = vmax.f32 %v1013_v28, 0.0  ;;  %v1011_v61 = vadd.f32 %v1954_v8, %v972_v52  ;;  %v913_v62 = vadd.f32 %v817_v30, %v62_v46  ;;  %v66_v50 = vld [vmem:[#allocation2 + $0x70] sm:$0xff] }
 0x116   :  { %v977_v0 = vld [vmem:[#allocation2 + $0x30] sm:$0xff]  ;;  %941 = vst.msk [vmem:[#allocation2 + $0x28] sm:$0xff] %vm19_vm1, %v908_v55  ;;  %v809_v42 = vadd.f32 %v1428_v51, %v808_v57  ;;  %v1441_v47 = vpop.f32.mrf.mxu0  ;;  %v1531_v2 = vpop.f32.mrf.mxu1  ;;  %v1440_v29 = vadd.f32 %v1439_v56, %v1438_v45 }
 0x117   :  { %1203 = vst.msk [vmem:[%s2169_s3] sm:$0xf] %vm1202_vm2, %v1354_v58  ;;  %v1357_v3 = vpack.c.bf16 %v1045_v60, %v1045_v60  ;;  %v1043_v4 = vmax.f32 %v1011_v61, 0.0  ;;  %v1016_v5 = vadd.f32 %v1954_v8, %v977_v0  ;;  %v820_v6 = vadd.f32 %v1531_v2, %v1437_v54  ;;  %v65_v58 = vld [vmem:[#allocation2 + $0x68] sm:$0xff] }
 0x118   :  { %946 = vst.msk [vmem:[#allocation2 + $0x50] sm:$0xff] %vm19_vm1, %v913_v62  ;;  %v975_v10 = vld [vmem:[#allocation2 + $0x20] sm:$0xff]  ;;  %v911_v11 = vadd.f32 %v809_v42, %v60_v63  ;;  %v1442_v13 = vpop.f32.mrf.mxu0  ;;  %v811_v14 = vpop.f32.mrf.mxu1 }
 0x119   :  { %1206 = vst.msk [vmem:[%s2169_s3 + $0xc] sm:$0xf] %vm1202_vm2, %v1357_v3  ;;  %v1355_v15 = vpack.c.bf16 %v1043_v4, %v1043_v4  ;;  %v1048_v16 = vmax.f32 %v1016_v5, 0.0  ;;  %v1014_v18 = vadd.f32 %v1954_v8, %v975_v10  ;;  %v914_v19 = vadd.f32 %v820_v6, %v63_v1  ;;  %v67_v3 = vld [vmem:[#allocation2 + $0x78] sm:$0xff] }
 0x11a   :  { %v978_v21 = vld [vmem:[#allocation2 + $0x38] sm:$0xff]  ;;  %944 = vst.msk [vmem:[#allocation2 + $0x40] sm:$0xff] %vm19_vm1, %v911_v11  ;;  %v812_v23 = vadd.f32 %v1431_v9, %v811_v14  ;;  %v1444_v53 = vpop.f32.mrf.mxu0  ;;  %v1534_v59 = vpop.f32.mrf.mxu1  ;;  %v1443_v45 = vadd.f32 %v1442_v13, %v1441_v47 }
 0x11b   :  { %1204 = vst.msk [vmem:[%s2169_s3 + $0x4] sm:$0xf] %vm1202_vm2, %v1355_v15  ;;  %v1360_v24 = vpack.c.bf16 %v1048_v16, %v1048_v16  ;;  %v1046_v25 = vmax.f32 %v1014_v18, 0.0  ;;  %v1017_v26 = vadd.f32 %v1954_v8, %v978_v21 }
 0x11c   :  { %947 = vst.msk [vmem:[#allocation2 + $0x58] sm:$0xff] %vm19_vm1, %v914_v19  ;;  %v912_v31 = vadd.f32 %v812_v23, %v61_v20  ;;  %v1445_v33 = vpop.f32.mrf.mxu0  ;;  %v824_v37 = vpop.f32.mrf.mxu1 }
 0x11d   :  { %1209 = vst.msk [vmem:[%s2169_s3 + $0x18] sm:$0xf] %vm1202_vm2, %v1360_v24  ;;  %v1358_v39 = vpack.c.bf16 %v1046_v25, %v1046_v25  ;;  %v1049_v41 = vmax.f32 %v1017_v26, 0.0  ;;  %v976_v43 = vld [vmem:[#allocation2 + $0x28] sm:$0xff]  ;;  %v1446_v44 = vadd.f32 %v1445_v33, %v1444_v53  ;;  %v825_v46 = vadd.f32 %v1440_v29, %v824_v37  ;;  %v68_v53 = vld [vmem:[#allocation2 + $0x80] sm:$0xff] }
 0x11e   :  { %v1015_v48 = vadd.f32 %v1954_v8, %v976_v43  ;;  %945 = vst.msk [vmem:[#allocation2 + $0x48] sm:$0xff] %vm19_vm1, %v912_v31  ;;  %v1447_v28 = vpop.f32.mrf.mxu0  ;;  %v1535_v30 = vpop.f32.mrf.mxu1 }
 0x11f   :  { %v981_v49 = vld [vmem:[#allocation2 + $0x50] sm:$0xff]  ;;  %1207 = vst.msk [vmem:[%s2169_s3 + $0x10] sm:$0xf] %vm1202_vm2, %v1358_v39  ;;  %v1361_v51 = vpack.c.bf16 %v1049_v41, %v1049_v41  ;;  %v833_v54 = vadd.f32 %v1534_v59, %v1446_v44  ;;  %v915_v55 = vadd.f32 %v825_v46, %v64_v35  ;;  %v69_v46 = vld [vmem:[#allocation2 + $0x88] sm:$0xff] }
 0x120   :  { %v1020_v52 = vadd.f32 %v1954_v8, %v981_v49  ;;  %v1047_v56 = vmax.f32 %v1015_v48, 0.0  ;;  %v1448_v57 = vpop.f32.mrf.mxu0  ;;  %v827_v60 = vpop.f32.mrf.mxu1 }
 0x121   :  { %1210 = vst.msk [vmem:[%s2169_s3 + $0x1c] sm:$0xf] %vm1202_vm2, %v1361_v51  ;;  %v979_v62 = vld [vmem:[#allocation2 + $0x40] sm:$0xff]  ;;  %v917_v63 = vadd.f32 %v833_v54, %v66_v50  ;;  %v1449_v0 = vadd.f32 %v1448_v57, %v1447_v28  ;;  %v828_v42 = vadd.f32 %v1443_v45, %v827_v60 }
 0x122   :  { %v1052_v61 = vmax.f32 %v1020_v52, 0.0  ;;  %948 = vst.msk [vmem:[#allocation2 + $0x60] sm:$0xff] %vm19_vm1, %v915_v55  ;;  %v1359_v47 = vpack.c.bf16 %v1047_v56, %v1047_v56  ;;  %v1018_v1 = vadd.f32 %v1954_v8, %v979_v62  ;;  %v1450_v4 = vpop.f32.mrf.mxu0  ;;  %v1538_v5 = vpop.f32.mrf.mxu1 }
 0x123   :  { %v982_v2 = vld [vmem:[#allocation2 + $0x58] sm:$0xff]  ;;  %950 = vst.msk [vmem:[#allocation2 + $0x70] sm:$0xff] %vm19_vm1, %v917_v63  ;;  %v836_v10 = vadd.f32 %v1535_v30, %v1449_v0  ;;  %v916_v11 = vadd.f32 %v828_v42, %v65_v58 }
 0x124   :  { %v1364_v6 = vpack.c.bf16 %v1052_v61, %v1052_v61  ;;  %v1021_v9 = vadd.f32 %v1954_v8, %v982_v2  ;;  %1208 = vst.msk [vmem:[%s2169_s3 + $0x14] sm:$0xf] %vm1202_vm2, %v1359_v47  ;;  %v1050_v13 = vmax.f32 %v1018_v1, 0.0  ;;  %v1451_v14 = vpop.f32.mrf.mxu0  ;;  %v840_v15 = vpop.f32.mrf.mxu1  ;;  %v70_v47 = vld [vmem:[#allocation2 + $0x90] sm:$0xff] }
 0x125   :  { %v980_v18 = vld [vmem:[#allocation2 + $0x48] sm:$0xff]  ;;  %v918_v19 = vadd.f32 %v836_v10, %v67_v3  ;;  %949 = vst.msk [vmem:[#allocation2 + $0x68] sm:$0xff] %vm19_vm1, %v916_v11  ;;  %v1452_v20 = vadd.f32 %v1451_v14, %v1450_v4 }
 0x126   :  { %1213 = vst.msk [vmem:[%s2169_s3 + $0x28] sm:$0xf] %vm1202_vm2, %v1364_v6  ;;  %v1053_v16 = vmax.f32 %v1021_v9, 0.0  ;;  %v1362_v21 = vpack.c.bf16 %v1050_v13, %v1050_v13  ;;  %v1019_v23 = vadd.f32 %v1954_v8, %v980_v18  ;;  %v1453_v59 = vpop.f32.mrf.mxu0  ;;  %v1539_v24 = vpop.f32.mrf.mxu1  ;;  %v71_v13 = vld [vmem:[#allocation2 + $0x98] sm:$0xff] }
 0x127   :  { %951 = vst.msk [vmem:[#allocation2 + $0x78] sm:$0xff] %vm19_vm1, %v918_v19  ;;  %v841_v26 = vadd.f32 %v1452_v20, %v840_v15  ;;  %v78_v15 = vld [vmem:[#allocation2 + $0xd0] sm:$0xff] }
 0x128   :  { %v1365_v25 = vpack.c.bf16 %v1053_v16, %v1053_v16  ;;  %1211 = vst.msk [vmem:[%s2169_s3 + $0x20] sm:$0xf] %vm1202_vm2, %v1362_v21  ;;  %v1051_v29 = vmax.f32 %v1019_v23, 0.0  ;;  %v1454_v33 = vpop.f32.mrf.mxu0  ;;  %v843_v35 = vpop.f32.mrf.mxu1 }
 0x129   :  { %v983_v31 = vld [vmem:[#allocation2 + $0x60] sm:$0xff]  ;;  %v919_v39 = vadd.f32 %v841_v26, %v68_v53  ;;  %v1455_v41 = vadd.f32 %v1454_v33, %v1453_v59 }
 0x12a   :  { %1214 = vst.msk [vmem:[%s2169_s3 + $0x2c] sm:$0xf] %vm1202_vm2, %v1365_v25  ;;  %v1022_v37 = vadd.f32 %v1954_v8, %v983_v31  ;;  %v1363_v43 = vpack.c.bf16 %v1051_v29, %v1051_v29  ;;  %v985_v44 = vld [vmem:[#allocation2 + $0x70] sm:$0xff]  ;;  %v1456_v48 = vpop.f32.mrf.mxu0  ;;  %v2031_v49 = vpop.f32.mrf.mxu1  ;;  %v76_v29 = vld [vmem:[#allocation2 + $0xc0] sm:$0xff] }
 0x12b   :  { %v1024_v45 = vadd.f32 %v1954_v8, %v985_v44  ;;  %952 = vst.msk [vmem:[#allocation2 + $0x80] sm:$0xff] %vm19_vm1, %v919_v39  ;;  %v844_v28 = vadd.f32 %v1455_v41, %v843_v35  ;;  %v72_v33 = vld [vmem:[#allocation2 + $0xa0] sm:$0xff] }
 0x12c   :  { %v1054_v50 = vmax.f32 %v1022_v37, 0.0  ;;  %1212 = vst.msk [vmem:[%s2169_s3 + $0x24] sm:$0xf] %vm1202_vm2, %v1363_v43  ;;  %v984_v30 = vld [vmem:[#allocation2 + $0x68] sm:$0xff]  ;;  %v1457_v51 = vpop.f32.mrf.mxu0  ;;  %v856_v52 = vpop.f32.mrf.mxu1 }
 0x12d   :  { %v1056_v54 = vmax.f32 %v1024_v45, 0.0  ;;  %v1023_v56 = vadd.f32 %v1954_v8, %v984_v30  ;;  %v920_v57 = vadd.f32 %v844_v28, %v69_v46  ;;  %v1458_v60 = vadd.f32 %v1457_v51, %v1456_v48 }
 0x12e   :  { %v1366_v55 = vpack.c.bf16 %v1054_v50, %v1054_v50  ;;  %v986_v58 = vld [vmem:[#allocation2 + $0x78] sm:$0xff]  ;;  %v1459_v61 = vpop.f32.mrf.mxu0  ;;  %v2040_v62 = vpop.f32.mrf.mxu1  ;;  %v1494_v46 = vadd.f32 %v1934_v36, %v1932_v34  ;;  %v82_v34 = vld [vmem:[#allocation2 + $0xf0] sm:$0xff] }
 0x12f   :  { %v1368_v63 = vpack.c.bf16 %v1056_v54, %v1056_v54  ;;  %v1025_v0 = vadd.f32 %v1954_v8, %v986_v58  ;;  %v1055_v42 = vmax.f32 %v1023_v56, 0.0  ;;  %953 = vst.msk [vmem:[#allocation2 + $0x88] sm:$0xff] %vm19_vm1, %v920_v57  ;;  %v849_v1 = vadd.f32 %v1538_v5, %v1458_v60  ;;  %v77_v54 = vld [vmem:[#allocation2 + $0xc8] sm:$0xff] }
 0x130   :  { %1215 = vst.msk [vmem:[%s2169_s3 + $0x30] sm:$0xf] %vm1202_vm2, %v1366_v55  ;;  %v1460_v2 = vpop.f32.mrf.mxu0  ;;  %v859_v3 = vpop.f32.mrf.mxu1 }
 0x131   :  { %1217 = vst.msk [vmem:[%s2169_s3 + $0x38] sm:$0xf] %vm1202_vm2, %v1368_v63  ;;  %v1057_v4 = vmax.f32 %v1025_v0, 0.0  ;;  %v1367_v6 = vpack.c.bf16 %v1055_v42, %v1055_v42  ;;  %v1461_v9 = vadd.f32 %v1460_v2, %v1459_v61  ;;  %v921_v11 = vadd.f32 %v849_v1, %v70_v47  ;;  %v80_v42 = vld [vmem:[#allocation2 + $0xe0] sm:$0xff] }
 0x132   :  { %v987_v10 = vld [vmem:[#allocation2 + $0x80] sm:$0xff]  ;;  %v1462_v14 = vpop.f32.mrf.mxu0  ;;  %v1546_v16 = vpop.f32.mrf.mxu1 }
 0x133   :  { %v1369_v18 = vpack.c.bf16 %v1057_v4, %v1057_v4  ;;  %1216 = vst.msk [vmem:[%s2169_s3 + $0x34] sm:$0xf] %vm1202_vm2, %v1367_v6  ;;  %v1026_v5 = vadd.f32 %v1954_v8, %v987_v10  ;;  %v852_v19 = vadd.f32 %v1539_v24, %v1461_v9  ;;  %v881_v20 = vadd.f32 %v1546_v16, %v1922_v17  ;;  %v79_v17 = vld [vmem:[#allocation2 + $0xd8] sm:$0xff] }
 0x134   :  { %954 = vst.msk [vmem:[#allocation2 + $0x90] sm:$0xff] %vm19_vm1, %v921_v11  ;;  %v1463_v21 = vpop.f32.mrf.mxu0  ;;  %v872_v23 = vpop.f32.mrf.mxu1  ;;  %v74_v11 = vld [vmem:[#allocation2 + $0xb0] sm:$0xff] }
 0x135   :  { %1218 = vst.msk [vmem:[%s2169_s3 + $0x3c] sm:$0xf] %vm1202_vm2, %v1369_v18  ;;  %v1058_v53 = vmax.f32 %v1026_v5, 0.0  ;;  %v922_v59 = vadd.f32 %v852_v19, %v71_v13  ;;  %v929_v25 = vadd.f32 %v881_v20, %v78_v15  ;;  %v1464_v26 = vadd.f32 %v1463_v21, %v1462_v14 }
 0x136   :  { %v988_v31 = vld [vmem:[#allocation2 + $0x88] sm:$0xff]  ;;  %v873_v24 = vadd.f32 %v1918_v7, %v872_v23  ;;  %v1465_v35 = vpop.f32.mrf.mxu0  ;;  %v1547_v37 = vpop.f32.mrf.mxu1 }
 0x137   :  { %v1370_v39 = vpack.c.bf16 %v1058_v53, %v1058_v53  ;;  %v1027_v41 = vadd.f32 %v1954_v8, %v988_v31  ;;  %955 = vst.msk [vmem:[#allocation2 + $0x98] sm:$0xff] %vm19_vm1, %v922_v59  ;;  %962 = vst.msk [vmem:[#allocation2 + $0xd0] sm:$0xff] %vm19_vm1, %v929_v25  ;;  %v857_v43 = vadd.f32 %v1464_v26, %v856_v52  ;;  %v73_v52 = vld [vmem:[#allocation2 + $0xa8] sm:$0xff] }
 0x138   :  { %v884_v44 = vadd.f32 %v1547_v37, %v1924_v22  ;;  %v927_v48 = vadd.f32 %v873_v24, %v76_v29  ;;  %v1466_v45 = vpop.f32.mrf.mxu0  ;;  %v875_v50 = vpop.f32.mrf.mxu1  ;;  %v81_v26 = vld [vmem:[#allocation2 + $0xe8] sm:$0xff] }
 0x139   :  { %1219 = vst.msk [vmem:[%s2169_s3 + $0x40] sm:$0xf] %vm1202_vm2, %v1370_v39  ;;  %v1059_v7 = vmax.f32 %v1027_v41, 0.0  ;;  %v923_v28 = vadd.f32 %v857_v43, %v72_v33  ;;  %v1467_v51 = vadd.f32 %v1466_v45, %v1465_v35  ;;  %v876_v22 = vadd.f32 %v1920_v12, %v875_v50  ;;  %v75_v41 = vld [vmem:[#allocation2 + $0xb8] sm:$0xff] }
 0x13a   :  { %v930_v30 = vadd.f32 %v884_v44, %v79_v17  ;;  %960 = vst.msk [vmem:[#allocation2 + $0xc0] sm:$0xff] %vm19_vm1, %v927_v48  ;;  %v1468_v55 = vpop.f32.mrf.mxu0  ;;  %v1550_v36 = vpop.f32.mrf.mxu1 }
 0x13b   :  { %v1371_v56 = vpack.c.bf16 %v1059_v7, %v1059_v7  ;;  %v989_v57 = vld [vmem:[#allocation2 + $0x90] sm:$0xff]  ;;  %956 = vst.msk [vmem:[#allocation2 + $0xa0] sm:$0xff] %vm19_vm1, %v923_v28  ;;  %v860_v58 = vadd.f32 %v1467_v51, %v859_v3  ;;  %v897_v60 = vadd.f32 %v1550_v36, %v1494_v46  ;;  %v928_v63 = vadd.f32 %v876_v22, %v77_v54 }
 0x13c   :  { %963 = vst.msk [vmem:[#allocation2 + $0xd8] sm:$0xff] %vm19_vm1, %v930_v30  ;;  %v1028_v61 = vadd.f32 %v1954_v8, %v989_v57  ;;  %v1469_v0 = vpop.f32.mrf.mxu0  ;;  %v888_v47 = vpop.f32.mrf.mxu1  ;;  %v1497_v3 = vadd.f32 %v1938_v40, %v1936_v38  ;;  %v83_v38 = vld [vmem:[#allocation2 + $0xf8] sm:$0xff] }
 0x13d   :  { %1220 = vst.msk [vmem:[%s2169_s3 + $0x44] sm:$0xf] %vm1202_vm2, %v1371_v56  ;;  %v924_v12 = vadd.f32 %v860_v58, %v73_v52  ;;  %v933_v1 = vadd.f32 %v897_v60, %v82_v34  ;;  %v1470_v2 = vadd.f32 %v1469_v0, %v1468_v55  ;;  %v889_v4 = vadd.f32 %v1926_v27, %v888_v47 }
 0x13e   :  { %v1060_v6 = vmax.f32 %v1028_v61, 0.0  ;;  %v990_v9 = vld [vmem:[#allocation2 + $0x98] sm:$0xff]  ;;  %v997_v10 = vld [vmem:[#allocation2 + $0xd0] sm:$0xff]  ;;  %961 = vst.msk [vmem:[#allocation2 + $0xc8] sm:$0xff] %vm19_vm1, %v928_v63  ;;  %v1471_v13 = vpop.f32.mrf.mxu0  ;;  %v1551_v14 = vpop.f32.mrf.mxu1 }
 0x13f   :  { %v1029_v15 = vadd.f32 %v1954_v8, %v990_v9  ;;  %v1036_v16 = vadd.f32 %v1954_v8, %v997_v10  ;;  %957 = vst.msk [vmem:[#allocation2 + $0xa8] sm:$0xff] %vm19_vm1, %v924_v12  ;;  %966 = vst.msk [vmem:[#allocation2 + $0xf0] sm:$0xff] %vm19_vm1, %v933_v1  ;;  %v865_v27 = vadd.f32 %v2031_v49, %v1470_v2 }
 0x140   :  { %v931_v18 = vadd.f32 %v889_v4, %v80_v42  ;;  %v1372_v40 = vpack.c.bf16 %v1060_v6, %v1060_v6  ;;  %v900_v5 = vadd.f32 %v1551_v14, %v1497_v3  ;;  %v1472_v19 = vpop.f32.mrf.mxu0  ;;  %v891_v20 = vpop.f32.mrf.mxu1 }
 0x141   :  { %v1061_v21 = vmax.f32 %v1029_v15, 0.0  ;;  %v1068_v23 = vmax.f32 %v1036_v16, 0.0  ;;  %v995_v53 = vld [vmem:[#allocation2 + $0xc0] sm:$0xff]  ;;  %v925_v59 = vadd.f32 %v865_v27, %v74_v11  ;;  %v1473_v25 = vadd.f32 %v1472_v19, %v1471_v13 }
 0x142   :  { %964 = vst.msk [vmem:[#allocation2 + $0xe0] sm:$0xff] %vm19_vm1, %v931_v18  ;;  %v991_v49 = vld [vmem:[#allocation2 + $0xa0] sm:$0xff]  ;;  %v1034_v29 = vadd.f32 %v1954_v8, %v995_v53  ;;  %v934_v33 = vadd.f32 %v900_v5, %v83_v38  ;;  %v892_v24 = vadd.f32 %v1930_v32, %v891_v20 }
 0x143   :  { %1221 = vst.msk [vmem:[%s2169_s3 + $0x48] sm:$0xf] %vm1202_vm2, %v1372_v40  ;;  %v998_v31 = vld [vmem:[#allocation2 + $0xd8] sm:$0xff]  ;;  %v1373_v35 = vpack.c.bf16 %v1061_v21, %v1061_v21  ;;  %v1380_v17 = vpack.c.bf16 %v1068_v23, %v1068_v23  ;;  %v1030_v37 = vadd.f32 %v1954_v8, %v991_v49  ;;  %v868_v44 = vadd.f32 %v2040_v62, %v1473_v25 }
 0x144   :  { %v1037_v39 = vadd.f32 %v1954_v8, %v998_v31  ;;  %958 = vst.msk [vmem:[#allocation2 + $0xb0] sm:$0xff] %vm19_vm1, %v925_v59  ;;  %v1066_v43 = vmax.f32 %v1034_v29, 0.0  ;;  %967 = vst.msk [vmem:[#allocation2 + $0xf8] sm:$0xff] %vm19_vm1, %v934_v33  ;;  %v932_v46 = vadd.f32 %v892_v24, %v81_v26 }
 0x145   :  { %1222 = vst.msk [vmem:[%s2169_s3 + $0x4c] sm:$0xf] %vm1202_vm2, %v1373_v35  ;;  %1229 = vst.msk [vmem:[%s2169_s3 + $0x68] sm:$0xf] %vm1202_vm2, %v1380_v17  ;;  %v1062_v32 = vmax.f32 %v1030_v37, 0.0  ;;  %v996_v45 = vld [vmem:[#allocation2 + $0xc8] sm:$0xff]  ;;  %v926_v62 = vadd.f32 %v868_v44, %v75_v41 }
 0x146   :  { %v1069_v48 = vmax.f32 %v1037_v39, 0.0  ;;  %v1378_v50 = vpack.c.bf16 %v1066_v43, %v1066_v43  ;;  %v992_v7 = vld [vmem:[#allocation2 + $0xa8] sm:$0xff]  ;;  %v1035_v28 = vadd.f32 %v1954_v8, %v996_v45  ;;  %v1001_v30 = vld [vmem:[#allocation2 + $0xf0] sm:$0xff]  ;;  %965 = vst.msk [vmem:[#allocation2 + $0xe8] sm:$0xff] %vm19_vm1, %v932_v46 }
 0x147   :  { %v1374_v51 = vpack.c.bf16 %v1062_v32, %v1062_v32  ;;  %v1031_v52 = vadd.f32 %v1954_v8, %v992_v7  ;;  %v1040_v22 = vadd.f32 %v1954_v8, %v1001_v30  ;;  %959 = vst.msk [vmem:[#allocation2 + $0xb8] sm:$0xff] %vm19_vm1, %v926_v62 }
 0x148   :  { %v1381_v54 = vpack.c.bf16 %v1069_v48, %v1069_v48  ;;  %1227 = vst.msk [vmem:[%s2169_s3 + $0x60] sm:$0xf] %vm1202_vm2, %v1378_v50  ;;  %v1067_v55 = vmax.f32 %v1035_v28, 0.0 }
 0x149   :  { %v999_v34 = vld [vmem:[#allocation2 + $0xe0] sm:$0xff]  ;;  %1223 = vst.msk [vmem:[%s2169_s3 + $0x50] sm:$0xf] %vm1202_vm2, %v1374_v51  ;;  %v1063_v36 = vmax.f32 %v1031_v52, 0.0  ;;  %v1072_v56 = vmax.f32 %v1040_v22, 0.0 }
 0x14a   :  { %1230 = vst.msk [vmem:[%s2169_s3 + $0x6c] sm:$0xf] %vm1202_vm2, %v1381_v54  ;;  %v1038_v57 = vadd.f32 %v1954_v8, %v999_v34  ;;  %v1379_v58 = vpack.c.bf16 %v1067_v55, %v1067_v55 }
 0x14b   :  { %v993_v60 = vld [vmem:[#allocation2 + $0xb0] sm:$0xff]  ;;  %v1375_v61 = vpack.c.bf16 %v1063_v36, %v1063_v36  ;;  %v1384_v63 = vpack.c.bf16 %v1072_v56, %v1072_v56  ;;  %v1002_v47 = vld [vmem:[#allocation2 + $0xf8] sm:$0xff] }
 0x14c   :  { %v1032_v0 = vadd.f32 %v1954_v8, %v993_v60  ;;  %v1070_v42 = vmax.f32 %v1038_v57, 0.0  ;;  %1228 = vst.msk [vmem:[%s2169_s3 + $0x64] sm:$0xf] %vm1202_vm2, %v1379_v58  ;;  %v1041_v12 = vadd.f32 %v1954_v8, %v1002_v47 }
 0x14d   :  { %1224 = vst.msk [vmem:[%s2169_s3 + $0x54] sm:$0xf] %vm1202_vm2, %v1375_v61  ;;  %1233 = vst.msk [vmem:[%s2169_s3 + $0x78] sm:$0xf] %vm1202_vm2, %v1384_v63  ;;  %v1000_v4 = vld [vmem:[#allocation2 + $0xe8] sm:$0xff] }
 0x14e   :  { %v1064_v1 = vmax.f32 %v1032_v0, 0.0  ;;  %v1382_v2 = vpack.c.bf16 %v1070_v42, %v1070_v42  ;;  %v1073_v3 = vmax.f32 %v1041_v12, 0.0  ;;  %v1039_v6 = vadd.f32 %v1954_v8, %v1000_v4  ;;  %v994_v10 = vld [vmem:[#allocation2 + $0xb8] sm:$0xff] }
 0x14f   :  { %v1033_v13 = vadd.f32 %v1954_v8, %v994_v10 }
 0x150   :  { %v1376_v9 = vpack.c.bf16 %v1064_v1, %v1064_v1  ;;  %1231 = vst.msk [vmem:[%s2169_s3 + $0x70] sm:$0xf] %vm1202_vm2, %v1382_v2  ;;  %v1385_v11 = vpack.c.bf16 %v1073_v3, %v1073_v3  ;;  %v1071_v14 = vmax.f32 %v1039_v6, 0.0 }
 0x151   :  { %v1065_v15 = vmax.f32 %v1033_v13, 0.0 }
 0x152   :  { %1225 = vst.msk [vmem:[%s2169_s3 + $0x58] sm:$0xf] %vm1202_vm2, %v1376_v9  ;;  %1234 = vst.msk [vmem:[%s2169_s3 + $0x7c] sm:$0xf] %vm1202_vm2, %v1385_v11  ;;  %v1383_v16 = vpack.c.bf16 %v1071_v14, %v1071_v14 }
 0x153   :  { %v1377_v27 = vpack.c.bf16 %v1065_v15, %v1065_v15 }
 0x154   :  { %1232 = vst.msk [vmem:[%s2169_s3 + $0x74] sm:$0xf] %vm1202_vm2, %v1383_v16 }
 0x155   :  { %1226 = vst.msk [vmem:[%s2169_s3 + $0x5c] sm:$0xf] %vm1202_vm2, %v1377_v27 }

// kernel: cnn_encoder_forward.8
= control target key start
LH: loop header
LB: loop body
LE: loop exit
PB: predicated region body
PF: predicated region fallthrough
CT: control target
= control target key end

     0   :  { %vm447_vm0 = vcmask 523264   ;;  %s1228_s1 = inlined_call_operand.vmem [shape: bf16[576,128], index: 1, kind: input, shape index: {}]   ;;  %s1229_s0 = inlined_call_operand.vmem [shape: bf16[64,576], index: 0, kind: input, shape index: {}]   ;;  %s1230_s2 = inlined_call_operand.vmem [shape: f32[1,128], index: 2, kind: input, shape index: {}]   ;;  %s1231_s3 = inlined_call_operand.vmem [shape: bf16[64,128], index: 3, kind: output, shape index: {}]  }
   0x1   :  { %v961_v0 = vld [vmem:[%s1228_s1 + $0x78] sm:$0xff]   ;;  %v965_v4 = vld [vmem:[%s1228_s1 + $0x70] sm:$0xff]   ;;  %v969_v8 = vld [vmem:[%s1228_s1 + $0x68] sm:$0xff]  }
   0x2   :  { %v962_v1 = vld [vmem:[%s1228_s1 + $0xf8] sm:$0xff]   ;;  %849 = vmatprep.subr.bf16.mxu0 %v961_v0  ;;  %v966_v5 = vld [vmem:[%s1228_s1 + $0xf0] sm:$0xff]   ;;  %v970_v9 = vld [vmem:[%s1228_s1 + $0xe8] sm:$0xff]  }
   0x3   :  { %v963_v2 = vld [vmem:[%s1228_s1 + $0x38] sm:$0xff]   ;;  %889 = vmatprep.subr.bf16.mxu1 %v962_v1  ;;  %v967_v6 = vld [vmem:[%s1228_s1 + $0x30] sm:$0xff]   ;;  %v971_v10 = vld [vmem:[%s1228_s1 + $0x28] sm:$0xff]  }
   0x4   :  { %v964_v3 = vld [vmem:[%s1228_s1 + $0xb8] sm:$0xff]   ;;  %850 = vmatpush3.bf16.msra.mxu0 %v963_v2  ;;  %v968_v7 = vld [vmem:[%s1228_s1 + $0xb0] sm:$0xff]   ;;  %v972_v11 = vld [vmem:[%s1228_s1 + $0xa8] sm:$0xff]  }
   0x5   :  { %890 = vmatpush3.bf16.msra.mxu1 %v964_v3  ;;  %851 = vmatprep.subr.bf16.mxu0 %v965_v4  ;;  %v973_v12 = vld [vmem:[%s1228_s1 + $0x60] sm:$0xff]   ;;  %v977_v16 = vld [vmem:[%s1228_s1 + $0x58] sm:$0xff]   ;;  %v981_v20 = vld [vmem:[%s1228_s1 + $0x50] sm:$0xff]  }
   0x6   :  { %891 = vmatprep.subr.bf16.mxu1 %v966_v5  ;;  %v974_v13 = vld [vmem:[%s1228_s1 + $0xe0] sm:$0xff]   ;;  %v978_v17 = vld [vmem:[%s1228_s1 + $0xd8] sm:$0xff]   ;;  %v982_v21 = vld [vmem:[%s1228_s1 + $0xd0] sm:$0xff]  }
   0x7   :  { %v975_v14 = vld [vmem:[%s1228_s1 + $0x20] sm:$0xff]   ;;  %v979_v18 = vld [vmem:[%s1228_s1 + $0x18] sm:$0xff]   ;;  %v983_v22 = vld [vmem:[%s1228_s1 + $0x10] sm:$0xff]  }
   0x8   :  { %852 = vmatpush3.bf16.msra.mxu0 %v967_v6  ;;  %v976_v15 = vld [vmem:[%s1228_s1 + $0xa0] sm:$0xff]   ;;  %v980_v19 = vld [vmem:[%s1228_s1 + $0x98] sm:$0xff]   ;;  %v984_v23 = vld [vmem:[%s1228_s1 + $0x90] sm:$0xff]  }
   0x9   :  { %892 = vmatpush3.bf16.msra.mxu1 %v968_v7  ;;  %853 = vmatprep.subr.bf16.mxu0 %v969_v8  ;;  %v985_v24 = vld [vmem:[%s1228_s1 + $0x48] sm:$0xff]   ;;  %v989_v28 = vld [vmem:[%s1228_s1 + $0x40] sm:$0xff]   ;;  %v999_v36 = vld [vmem:[%s1228_s1 + $0x118] sm:$0xff]  }
   0xa   :  { %893 = vmatprep.subr.bf16.mxu1 %v970_v9  ;;  %v986_v25 = vld [vmem:[%s1228_s1 + $0xc8] sm:$0xff]   ;;  %v990_v29 = vld [vmem:[%s1228_s1 + $0xc0] sm:$0xff]   ;;  %v1006_v39 = vld [vmem:[%s1228_s1 + $0x110] sm:$0xff]  }
   0xb   :  { %v987_v26 = vld [vmem:[%s1228_s1 + $0x8] sm:$0xff]   ;;  %v991_v30 = vld [vmem:[%s1228_s1] sm:$0xff]   ;;  %v1009_v43 = vld [vmem:[%s1229_s0 + $0x5c] ss:$20 sps:$4 sm:$0xff]  }
   0xc   :  { %854 = vmatpush3.bf16.msra.mxu0 %v971_v10  ;;  %v988_v27 = vld [vmem:[%s1228_s1 + $0x88] sm:$0xff]   ;;  %v992_v31 = vld [vmem:[%s1228_s1 + $0x80] sm:$0xff]   ;;  %v1014_v48 = vld [vmem:[%s1229_s0 + $0x7c] ss:$20 sps:$4 sm:$0xff]  }
   0xd   :  { %894 = vmatpush3.bf16.msra.mxu1 %v972_v11  ;;  %855 = vmatprep.subr.bf16.mxu0 %v973_v12  ;;  %v993_v32 = vld [vmem:[%s1229_s0] ss:$20 sps:$4 sm:$0xff]   ;;  %v995_v33 = vld [vmem:[%s1229_s0 + $0x4] ss:$20 sps:$4 sm:$0xff]   ;;  %v996_v34 = vld [vmem:[%s1229_s0 + $0x8] ss:$20 sps:$4 sm:$0xff]  }
   0xe   :  { %895 = vmatprep.subr.bf16.mxu1 %v974_v13  ;;  %v998_v35 = vld [vmem:[%s1229_s0 + $0xc] ss:$20 sps:$4 sm:$0xff]   ;;  %492 = vmatprep.mubr.bf16.mxu0 %v995_v33  ;;  %v1002_v38 = vld [vmem:[%s1229_s0 + $0x34] ss:$20 sps:$4 sm:$0xff]   ;;  %v1005_v41 = vld [vmem:[%s1229_s0 + $0x30] ss:$20 sps:$4 sm:$0xff]  }
   0xf   :  { %557 = vmatprep.mubr.bf16.mxu1 %v998_v35  ;;  %v1000_v37 = vld [vmem:[%s1229_s0 + $0x2c] ss:$20 sps:$4 sm:$0xff]   ;;  %v1004_v40 = vld [vmem:[%s1229_s0 + $0x28] ss:$20 sps:$4 sm:$0xff]   ;;  %v1011_v46 = vld [vmem:[%s1229_s0 + $0x50] ss:$20 sps:$4 sm:$0xff]  }
  0x10   :  { %856 = vmatpush3.bf16.msra.mxu0 %v975_v14  ;;  %v1007_v42 = vld [vmem:[%s1229_s0 + $0x54] ss:$20 sps:$4 sm:$0xff]   ;;  %v1020_v45 = vld [vmem:[%s1228_s1 + $0x100] sm:$0xff]   ;;  %v1012_v47 = vld [vmem:[%s1229_s0 + $0x58] ss:$20 sps:$4 sm:$0xff]  }
  0x11   :  { %896 = vmatpush3.bf16.msra.mxu1 %v976_v15  ;;  %857 = vmatprep.subr.bf16.mxu0 %v977_v16  ;;  %v1013_v44 = vld [vmem:[%s1228_s1 + $0x108] sm:$0xff]   ;;  %v1016_v49 = vld [vmem:[%s1229_s0 + $0x84] ss:$20 sps:$4 sm:$0xff]   ;;  %v1019_v51 = vld [vmem:[%s1229_s0 + $0x80] ss:$20 sps:$4 sm:$0xff]  }
  0x12   :  { %897 = vmatprep.subr.bf16.mxu1 %v978_v17  ;;  %v1018_v50 = vld [vmem:[%s1229_s0 + $0x78] ss:$20 sps:$4 sm:$0xff]   ;;  %v1021_v52 = vld [vmem:[%s1229_s0 + $0x10] ss:$20 sps:$4 sm:$0xff]   ;;  %v1022_v53 = vld [vmem:[%s1229_s0 + $0x60] ss:$20 sps:$4 sm:$0xff]  }
  0x13   :  { %v1023_v54 = vld [vmem:[%s1229_s0 + $0x38] ss:$20 sps:$4 sm:$0xff]   ;;  %v1024_v55 = vld [vmem:[%s1229_s0 + $0x88] ss:$20 sps:$4 sm:$0xff]  }
  0x14   :  { %858 = vmatpush3.bf16.msra.mxu0 %v979_v18 }
  0x15   :  { %898 = vmatpush3.bf16.msra.mxu1 %v980_v19  ;;  %859 = vmatprep.subr.bf16.mxu0 %v981_v20 }
  0x16   :  { %899 = vmatprep.subr.bf16.mxu1 %v982_v21 }
  0x18   :  { %860 = vmatpush3.bf16.msra.mxu0 %v983_v22 }
  0x19   :  { %900 = vmatpush3.bf16.msra.mxu1 %v984_v23  ;;  %861 = vmatprep.subr.bf16.mxu0 %v985_v24 }
  0x1a   :  { %901 = vmatprep.subr.bf16.mxu1 %v986_v25 }
  0x1c   :  { %862 = vmatpush3.bf16.msra.mxu0 %v987_v26 }
  0x1d   :  { %902 = vmatpush3.bf16.msra.mxu1 %v988_v27  ;;  %863 = vmatprep.subr.bf16.mxu0 %v989_v28 }
  0x1e   :  { %903 = vmatprep.subr.bf16.mxu1 %v990_v29 }
  0x20   :  { %864 = vmatpush3.bf16.msra.mxu0 %v991_v30 }
  0x21   :  { %904 = vmatpush3.bf16.msra.mxu1 %v992_v31  ;;  %937 = vmatprep.subr.bf16.mxu0 %v999_v36 }
  0x22   :  { %953 = vmatprep.subr.bf16.mxu1 %v999_v36 }
  0x23   :  { %493 = vmatmul.mubr.bf16.vlgmr.msra.gmra.mxu0 %v993_v32 }
  0x24   :  { %558 = vmatmul.mubr.bf16.vlgmr.msra.gmra.mxu1 %v996_v34  ;;  %938 = vmatpush3.bf16.msra.mxu0 %v999_v36 }
  0x25   :  { %957 = vmatpush3.bf16.msra.mxu1 %v999_v36  ;;  %500 = vmatprep.mubr.bf16.mxu0 %v1000_v37 }
  0x26   :  { %565 = vmatprep.mubr.bf16.mxu1 %v1002_v38  ;;  %939 = vmatprep.subr.bf16.mxu0 %v1006_v39 }
  0x27   :  { %954 = vmatprep.subr.bf16.mxu1 %v1006_v39 }
  0x28   :  { %940 = vmatpush3.bf16.msra.mxu0 %v1006_v39 }
  0x29   :  { %958 = vmatpush3.bf16.msra.mxu1 %v1006_v39  ;;  %941 = vmatprep.subr.bf16.mxu0 %v1013_v44 }
  0x2a   :  { %955 = vmatprep.subr.bf16.mxu1 %v1013_v44 }
  0x2b   :  { %501 = vmatmul.mubr.bf16.gmra.mxu0 %v1004_v40 }
  0x2c   :  { %566 = vmatmul.mubr.bf16.gmra.mxu1 %v1005_v41  ;;  %508 = vmatprep.mubr.bf16.mxu0 %v1007_v42 }
  0x2d   :  { %573 = vmatprep.mubr.bf16.mxu1 %v1009_v43  ;;  %942 = vmatpush3.bf16.msra.mxu0 %v1013_v44 }
  0x2e   :  { %959 = vmatpush3.bf16.msra.mxu1 %v1013_v44  ;;  %943 = vmatprep.subr.bf16.mxu0 %v1020_v45 }
  0x2f   :  { %956 = vmatprep.subr.bf16.mxu1 %v1020_v45 }
  0x31   :  { %944 = vmatpush3.bf16.msra.mxu0 %v1020_v45 }
  0x32   :  { %960 = vmatpush3.bf16.msra.mxu1 %v1020_v45 }
  0x33   :  { %509 = vmatmul.mubr.bf16.gmra.mxu0 %v1011_v46  ;;  %v809_v46 = vld [vmem:[%s1230_s2] ss:$0 sm:$0xff] }
  0x34   :  { %574 = vmatmul.mubr.bf16.gmra.mxu1 %v1012_v47  ;;  %516 = vmatprep.mubr.bf16.mxu0 %v1014_v48 }
  0x35   :  { %581 = vmatprep.mubr.bf16.mxu1 %v1016_v49 }
  0x3b   :  { %517 = vmatmul.mubr.bf16.gmra.mxu0 %v1018_v50 }
  0x3c   :  { %582 = vmatmul.mubr.bf16.gmra.mxu1 %v1019_v51  ;;  %945 = vmatprep.mubr.msk.bf16.mxu0 %vm447_vm0, %v1021_v52 }
  0x3d   :  { %949 = vmatprep.mubr.msk.bf16.mxu1 %vm447_vm0, %v1022_v53 }
  0x43   :  { %946 = vmatmul.mubr.msk.bf16.vlgmr.msra.gmra.mxu0 %vm447_vm0, %v1023_v54 }
  0x44   :  { %950 = vmatmul.mubr.msk.bf16.vlgmr.msra.gmra.mxu1 %vm447_vm0, %v1024_v55 }
  0xe3   :  { %v865_v56 = vpop.f32.mrf.mxu0 }
  0xe4   :  { %v905_v57 = vpop.f32.mrf.mxu1 }
  0xe5   :  { %v866_v58 = vpop.f32.mrf.mxu0 }
  0xe6   :  { %v906_v59 = vpop.f32.mrf.mxu1  ;;  %v867_v25 = vadd.f32 %v866_v58, %v865_v56 }
  0xe7   :  { %v868_v60 = vpop.f32.mrf.mxu0  ;;  %v907_v26 = vadd.f32 %v906_v59, %v905_v57 }
  0xe8   :  { %v908_v61 = vpop.f32.mrf.mxu1 }
  0xe9   :  { %v869_v62 = vpop.f32.mrf.mxu0  ;;  %v560_v43 = vadd.f32 %v907_v26, %v867_v25 }
  0xea   :  { %v909_v63 = vpop.f32.mrf.mxu1  ;;  %v870_v39 = vadd.f32 %v869_v62, %v868_v60 }
  0xeb   :  { %v871_v0 = vpop.f32.mrf.mxu0  ;;  %v910_v40 = vadd.f32 %v909_v63, %v908_v61 }
  0xec   :  { %v911_v1 = vpop.f32.mrf.mxu1 }
  0xed   :  { %v872_v2 = vpop.f32.mrf.mxu0  ;;  %v563_v59 = vadd.f32 %v910_v40, %v870_v39 }
  0xee   :  { %v912_v3 = vpop.f32.mrf.mxu1  ;;  %v873_v19 = vadd.f32 %v872_v2, %v871_v0 }
  0xef   :  { %v874_v4 = vpop.f32.mrf.mxu0  ;;  %v913_v20 = vadd.f32 %v912_v3, %v911_v1 }
  0xf0   :  { %v914_v5 = vpop.f32.mrf.mxu1 }
  0xf1   :  { %v875_v6 = vpop.f32.mrf.mxu0  ;;  %v568_v34 = vadd.f32 %v913_v20, %v873_v19 }
  0xf2   :  { %v915_v7 = vpop.f32.mrf.mxu1  ;;  %v876_v31 = vadd.f32 %v875_v6, %v874_v4 }
  0xf3   :  { %v877_v8 = vpop.f32.mrf.mxu0  ;;  %v916_v32 = vadd.f32 %v915_v7, %v914_v5 }
  0xf4   :  { %v917_v9 = vpop.f32.mrf.mxu1 }
  0xf5   :  { %v878_v10 = vpop.f32.mrf.mxu0  ;;  %v571_v52 = vadd.f32 %v916_v32, %v876_v31 }
  0xf6   :  { %v918_v11 = vpop.f32.mrf.mxu1  ;;  %v879_v28 = vadd.f32 %v878_v10, %v877_v8 }
  0xf7   :  { %v880_v12 = vpop.f32.mrf.mxu0  ;;  %v919_v29 = vadd.f32 %v918_v11, %v917_v9 }
  0xf8   :  { %v920_v13 = vpop.f32.mrf.mxu1 }
  0xf9   :  { %v881_v14 = vpop.f32.mrf.mxu0  ;;  %v576_v49 = vadd.f32 %v919_v29, %v879_v28 }
  0xfa   :  { %v921_v15 = vpop.f32.mrf.mxu1  ;;  %v882_v44 = vadd.f32 %v881_v14, %v880_v12 }
  0xfb   :  { %v883_v16 = vpop.f32.mrf.mxu0  ;;  %v922_v45 = vadd.f32 %v921_v15, %v920_v13 }
  0xfc   :  { %v923_v17 = vpop.f32.mrf.mxu1 }
  0xfd   :  { %v884_v18 = vpop.f32.mrf.mxu0  ;;  %v579_v63 = vadd.f32 %v922_v45, %v882_v44 }
  0xfe   :  { %v924_v21 = vpop.f32.mrf.mxu1  ;;  %v885_v22 = vadd.f32 %v884_v18, %v883_v16 }
  0xff   :  { %v925_v23 = vadd.f32 %v924_v21, %v923_v17  ;;  %v886_v24 = vpop.f32.mrf.mxu0 }
 0x100   :  { %v926_v27 = vpop.f32.mrf.mxu1 }
 0x101   :  { %v887_v30 = vpop.f32.mrf.mxu0  ;;  %v584_v38 = vadd.f32 %v925_v23, %v885_v22 }
 0x102   :  { %v927_v33 = vpop.f32.mrf.mxu1  ;;  %v888_v35 = vadd.f32 %v887_v30, %v886_v24 }
 0x103   :  { %v928_v36 = vadd.f32 %v927_v33, %v926_v27  ;;  %v947_v37 = vpop.f32.mrf.mxu0 }
 0x104   :  { %v633_v41 = vadd.f32 %v947_v37, %v568_v34  ;;  %v951_v42 = vpop.f32.mrf.mxu1 }
 0x105   :  { %v649_v47 = vadd.f32 %v951_v42, %v584_v38  ;;  %v624_v48 = vpop.f32.mrf.mxu0  ;;  %v587_v55 = vadd.f32 %v928_v36, %v888_v35 }
 0x106   :  { %v625_v50 = vadd.f32 %v624_v48, %v560_v43  ;;  %v640_v51 = vpop.f32.mrf.mxu1  ;;  %v691_v56 = vadd.f32 %v809_v46, %v633_v41 }
 0x107   :  { %v641_v53 = vadd.f32 %v640_v51, %v576_v49  ;;  %v948_v54 = vpop.f32.mrf.mxu0  ;;  %v695_v60 = vadd.f32 %v809_v46, %v649_v47 }
 0x108   :  { %v636_v57 = vadd.f32 %v948_v54, %v571_v52  ;;  %v952_v58 = vpop.f32.mrf.mxu1  ;;  %v689_v0 = vadd.f32 %v809_v46, %v625_v50  ;;  %v699_v7 = vmax.f32 %v691_v56, 0.0 }
 0x109   :  { %v652_v61 = vadd.f32 %v952_v58, %v587_v55  ;;  %v627_v62 = vpop.f32.mrf.mxu0  ;;  %v693_v4 = vadd.f32 %v809_v46, %v641_v53  ;;  %v703_v10 = vmax.f32 %v695_v60, 0.0 }
 0x10a   :  { %v692_v1 = vadd.f32 %v809_v46, %v636_v57  ;;  %v628_v2 = vadd.f32 %v627_v62, %v563_v59  ;;  %v643_v3 = vpop.f32.mrf.mxu1  ;;  %v697_v13 = vmax.f32 %v689_v0, 0.0 }
 0x10b   :  { %v696_v5 = vadd.f32 %v809_v46, %v652_v61  ;;  %v644_v6 = vadd.f32 %v643_v3, %v579_v63  ;;  %v701_v16 = vmax.f32 %v693_v4, 0.0 }
 0x10c   :  { %v700_v8 = vmax.f32 %v692_v1, 0.0  ;;  %v690_v9 = vadd.f32 %v809_v46, %v628_v2 }
 0x10d   :  { %v704_v11 = vmax.f32 %v696_v5, 0.0  ;;  %v694_v12 = vadd.f32 %v809_v46, %v644_v6 }
 0x10e   :  { %v834_v14 = vpack.c.bf16 %v700_v8, %v699_v7  ;;  %v698_v15 = vmax.f32 %v690_v9, 0.0 }
 0x10f   :  { %v844_v17 = vpack.c.bf16 %v704_v11, %v703_v10  ;;  %v702_v18 = vmax.f32 %v694_v12, 0.0 }
 0x110   :  { %846 = vst [vmem:[%s1231_s3 + $0x8] sm:$0xff] %v834_v14   ;;  %v829_v19 = vpack.c.bf16 %v698_v15, %v697_v13 }
 0x111   :  { %848 = vst [vmem:[%s1231_s3 + $0x18] sm:$0xff] %v844_v17   ;;  %v839_v20 = vpack.c.bf16 %v702_v18, %v701_v16 }
 0x112   :  { %830 = vst [vmem:[%s1231_s3] sm:$0xff] %v829_v19  }
 0x113   :  { %847 = vst [vmem:[%s1231_s3 + $0x10] sm:$0xff] %v839_v20  }

// kernel: cnn_encoder_forward.9
= control target key start
LH: loop header
LB: loop body
LE: loop exit
PB: predicated region body
PF: predicated region fallthrough
CT: control target
= control target key end

     0   :  { %s2091_s1 = inlined_call_operand.vmem [shape: bf16[1152,256], index: 1, kind: input, shape index: {}]   ;;  %s2092_s0 = inlined_call_operand.vmem [shape: bf16[16,1152], index: 0, kind: input, shape index: {}]   ;;  %s2093_s2 = inlined_call_operand.vmem [shape: f32[1,256], index: 2, kind: input, shape index: {}]   ;;  %s2094_s3 = inlined_call_operand.vmem [shape: bf16[16,256], index: 3, kind: output, shape index: {}]  }
   0x1   :  { %v1373_v0 = vld [vmem:[%s2091_s1 + $0x74] ss:$8 sps:$4 sm:$0xff]   ;;  %v1377_v2 = vld [vmem:[%s2091_s1 + $0x70] ss:$8 sps:$4 sm:$0xff]   ;;  %v1379_v4 = vld [vmem:[%s2091_s1 + $0x64] ss:$8 sps:$4 sm:$0xff]  }
   0x2   :  { %v1375_v1 = vld [vmem:[%s2091_s1 + $0x174] ss:$8 sps:$4 sm:$0xff]   ;;  %947 = vmatprep.subr.bf16.mxu0 %v1373_v0  ;;  %v1378_v3 = vld [vmem:[%s2091_s1 + $0x170] ss:$8 sps:$4 sm:$0xff]   ;;  %v1381_v5 = vld [vmem:[%s2091_s1 + $0x164] ss:$8 sps:$4 sm:$0xff]  }
   0x3   :  { %990 = vmatprep.subr.bf16.mxu1 %v1375_v1  ;;  %948 = vmatpush1.bf16.msra.mxu0 %v1377_v2  ;;  %v1383_v6 = vld [vmem:[%s2091_s1 + $0x60] ss:$8 sps:$4 sm:$0xff]   ;;  %v1385_v8 = vld [vmem:[%s2091_s1 + $0x54] ss:$8 sps:$4 sm:$0xff]   ;;  %v1389_v10 = vld [vmem:[%s2091_s1 + $0x50] ss:$8 sps:$4 sm:$0xff]  }
   0x4   :  { %991 = vmatpush1.bf16.msra.mxu1 %v1378_v3  ;;  %949 = vmatprep.subr.bf16.mxu0 %v1379_v4  ;;  %v1384_v7 = vld [vmem:[%s2091_s1 + $0x160] ss:$8 sps:$4 sm:$0xff]   ;;  %v1387_v9 = vld [vmem:[%s2091_s1 + $0x154] ss:$8 sps:$4 sm:$0xff]   ;;  %v1390_v11 = vld [vmem:[%s2091_s1 + $0x150] ss:$8 sps:$4 sm:$0xff]  }
   0x5   :  { %992 = vmatprep.subr.bf16.mxu1 %v1381_v5  ;;  %v1391_v12 = vld [vmem:[%s2091_s1 + $0x44] ss:$8 sps:$4 sm:$0xff]   ;;  %v1395_v14 = vld [vmem:[%s2091_s1 + $0x40] ss:$8 sps:$4 sm:$0xff]   ;;  %v1397_v16 = vld [vmem:[%s2091_s1 + $0x34] ss:$8 sps:$4 sm:$0xff]  }
   0x6   :  { %v1393_v13 = vld [vmem:[%s2091_s1 + $0x144] ss:$8 sps:$4 sm:$0xff]   ;;  %v1396_v15 = vld [vmem:[%s2091_s1 + $0x140] ss:$8 sps:$4 sm:$0xff]   ;;  %v1399_v17 = vld [vmem:[%s2091_s1 + $0x134] ss:$8 sps:$4 sm:$0xff]  }
   0x7   :  { %950 = vmatpush1.bf16.msra.mxu0 %v1383_v6  ;;  %v1401_v18 = vld [vmem:[%s2091_s1 + $0x30] ss:$8 sps:$4 sm:$0xff]   ;;  %v1403_v20 = vld [vmem:[%s2091_s1 + $0x24] ss:$8 sps:$4 sm:$0xff]   ;;  %v1407_v22 = vld [vmem:[%s2091_s1 + $0x20] ss:$8 sps:$4 sm:$0xff]  }
   0x8   :  { %993 = vmatpush1.bf16.msra.mxu1 %v1384_v7  ;;  %951 = vmatprep.subr.bf16.mxu0 %v1385_v8  ;;  %v1402_v19 = vld [vmem:[%s2091_s1 + $0x130] ss:$8 sps:$4 sm:$0xff]   ;;  %v1405_v21 = vld [vmem:[%s2091_s1 + $0x124] ss:$8 sps:$4 sm:$0xff]   ;;  %v1408_v23 = vld [vmem:[%s2091_s1 + $0x120] ss:$8 sps:$4 sm:$0xff]  }
   0x9   :  { %994 = vmatprep.subr.bf16.mxu1 %v1387_v9  ;;  %v1409_v24 = vld [vmem:[%s2091_s1 + $0x14] ss:$8 sps:$4 sm:$0xff]   ;;  %v1413_v26 = vld [vmem:[%s2091_s1 + $0x10] ss:$8 sps:$4 sm:$0xff]   ;;  %v1415_v28 = vld [vmem:[%s2091_s1 + $0x4] ss:$8 sps:$4 sm:$0xff]  }
   0xa   :  { %v1411_v25 = vld [vmem:[%s2091_s1 + $0x114] ss:$8 sps:$4 sm:$0xff]   ;;  %v1414_v27 = vld [vmem:[%s2091_s1 + $0x110] ss:$8 sps:$4 sm:$0xff]   ;;  %v1417_v29 = vld [vmem:[%s2091_s1 + $0x104] ss:$8 sps:$4 sm:$0xff]  }
   0xb   :  { %952 = vmatpush1.bf16.msra.mxu0 %v1389_v10  ;;  %v1419_v30 = vld [vmem:[%s2091_s1] ss:$8 sps:$4 sm:$0xff]   ;;  %v1421_v32 = vld [vmem:[%s2091_s1 + $0xf4] ss:$8 sps:$4 sm:$0xff]   ;;  %v1425_v34 = vld [vmem:[%s2091_s1 + $0xf0] ss:$8 sps:$4 sm:$0xff]  }
   0xc   :  { %995 = vmatpush1.bf16.msra.mxu1 %v1390_v11  ;;  %953 = vmatprep.subr.bf16.mxu0 %v1391_v12  ;;  %v1420_v31 = vld [vmem:[%s2091_s1 + $0x100] ss:$8 sps:$4 sm:$0xff]   ;;  %v1423_v33 = vld [vmem:[%s2091_s1 + $0x1f4] ss:$8 sps:$4 sm:$0xff]   ;;  %v1426_v35 = vld [vmem:[%s2091_s1 + $0x1f0] ss:$8 sps:$4 sm:$0xff]  }
   0xd   :  { %996 = vmatprep.subr.bf16.mxu1 %v1393_v13  ;;  %v1427_v36 = vld [vmem:[%s2091_s1 + $0xe4] ss:$8 sps:$4 sm:$0xff]   ;;  %v1431_v38 = vld [vmem:[%s2091_s1 + $0xe0] ss:$8 sps:$4 sm:$0xff]   ;;  %v1433_v40 = vld [vmem:[%s2091_s1 + $0xd4] ss:$8 sps:$4 sm:$0xff]  }
   0xe   :  { %v1429_v37 = vld [vmem:[%s2091_s1 + $0x1e4] ss:$8 sps:$4 sm:$0xff]   ;;  %v1432_v39 = vld [vmem:[%s2091_s1 + $0x1e0] ss:$8 sps:$4 sm:$0xff]   ;;  %v1435_v41 = vld [vmem:[%s2091_s1 + $0x1d4] ss:$8 sps:$4 sm:$0xff]  }
   0xf   :  { %954 = vmatpush1.bf16.msra.mxu0 %v1395_v14  ;;  %v1437_v42 = vld [vmem:[%s2091_s1 + $0xd0] ss:$8 sps:$4 sm:$0xff]   ;;  %v1439_v44 = vld [vmem:[%s2091_s1 + $0xc4] ss:$8 sps:$4 sm:$0xff]   ;;  %v1443_v46 = vld [vmem:[%s2091_s1 + $0xc0] ss:$8 sps:$4 sm:$0xff]  }
  0x10   :  { %997 = vmatpush1.bf16.msra.mxu1 %v1396_v15  ;;  %955 = vmatprep.subr.bf16.mxu0 %v1397_v16  ;;  %v1438_v43 = vld [vmem:[%s2091_s1 + $0x1d0] ss:$8 sps:$4 sm:$0xff]   ;;  %v1441_v45 = vld [vmem:[%s2091_s1 + $0x1c4] ss:$8 sps:$4 sm:$0xff]   ;;  %v1444_v47 = vld [vmem:[%s2091_s1 + $0x1c0] ss:$8 sps:$4 sm:$0xff]  }
  0x11   :  { %998 = vmatprep.subr.bf16.mxu1 %v1399_v17  ;;  %v1445_v48 = vld [vmem:[%s2091_s1 + $0xb4] ss:$8 sps:$4 sm:$0xff]   ;;  %v1471_v49 = vld [vmem:[%s2092_s0 + $0x4] ss:$36 sps:$4 sm:$0xff]   ;;  %v1474_v51 = vld [vmem:[%s2092_s0 + $0xc] ss:$36 sps:$4 sm:$0xff]  }
  0x12   :  { %v1447_v50 = vld [vmem:[%s2091_s1 + $0x1b4] ss:$8 sps:$4 sm:$0xff]   ;;  %979 = vmatprep.mubr.bf16.mxu0 %v1471_v49  ;;  %v1449_v52 = vld [vmem:[%s2091_s1 + $0xb0] ss:$8 sps:$4 sm:$0xff]   ;;  %1022 = vmatprep.mubr.bf16.mxu1 %v1474_v51  ;;  %v1451_v54 = vld [vmem:[%s2091_s1 + $0xa4] ss:$8 sps:$4 sm:$0xff]  }
  0x13   :  { %956 = vmatpush1.bf16.msra.mxu0 %v1401_v18  ;;  %v1450_v53 = vld [vmem:[%s2091_s1 + $0x1b0] ss:$8 sps:$4 sm:$0xff]   ;;  %v1453_v55 = vld [vmem:[%s2091_s1 + $0x1a4] ss:$8 sps:$4 sm:$0xff]   ;;  %v1455_v56 = vld [vmem:[%s2091_s1 + $0xa0] ss:$8 sps:$4 sm:$0xff]  }
  0x14   :  { %999 = vmatpush1.bf16.msra.mxu1 %v1402_v19  ;;  %957 = vmatprep.subr.bf16.mxu0 %v1403_v20  ;;  %v1456_v57 = vld [vmem:[%s2091_s1 + $0x1a0] ss:$8 sps:$4 sm:$0xff]   ;;  %v1457_v58 = vld [vmem:[%s2091_s1 + $0x94] ss:$8 sps:$4 sm:$0xff]   ;;  %v1461_v60 = vld [vmem:[%s2091_s1 + $0x90] ss:$8 sps:$4 sm:$0xff]  }
  0x15   :  { %1000 = vmatprep.subr.bf16.mxu1 %v1405_v21  ;;  %v1459_v59 = vld [vmem:[%s2091_s1 + $0x194] ss:$8 sps:$4 sm:$0xff]   ;;  %v1462_v61 = vld [vmem:[%s2091_s1 + $0x190] ss:$8 sps:$4 sm:$0xff]   ;;  %v1463_v62 = vld [vmem:[%s2091_s1 + $0x84] ss:$8 sps:$4 sm:$0xff]  }
  0x16   :  { %v1465_v63 = vld [vmem:[%s2091_s1 + $0x184] ss:$8 sps:$4 sm:$0xff]   ;;  %v1467_v0 = vld [vmem:[%s2091_s1 + $0x80] ss:$8 sps:$4 sm:$0xff]   ;;  %v1477_v2 = vld [vmem:[%s2091_s1 + $0x274] ss:$8 sps:$4 sm:$0xff]  }
  0x17   :  { %958 = vmatpush1.bf16.msra.mxu0 %v1407_v22  ;;  %v1468_v1 = vld [vmem:[%s2091_s1 + $0x180] ss:$8 sps:$4 sm:$0xff]   ;;  %v1480_v3 = vld [vmem:[%s2091_s1 + $0x374] ss:$8 sps:$4 sm:$0xff]   ;;  %v1475_v6 = vld [vmem:[%s2091_s1 + $0x270] ss:$8 sps:$4 sm:$0xff]  }
  0x18   :  { %1001 = vmatpush1.bf16.msra.mxu1 %v1408_v23  ;;  %959 = vmatprep.subr.bf16.mxu0 %v1409_v24  ;;  %v1469_v4 = vld [vmem:[%s2092_s0] ss:$36 sps:$4 sm:$0xff]   ;;  %v1472_v5 = vld [vmem:[%s2092_s0 + $0x8] ss:$36 sps:$4 sm:$0xff]   ;;  %v1478_v7 = vld [vmem:[%s2091_s1 + $0x370] ss:$8 sps:$4 sm:$0xff]  }
  0x19   :  { %1002 = vmatprep.subr.bf16.mxu1 %v1411_v25  ;;  %v1483_v8 = vld [vmem:[%s2091_s1 + $0x264] ss:$8 sps:$4 sm:$0xff]   ;;  %v1481_v10 = vld [vmem:[%s2091_s1 + $0x260] ss:$8 sps:$4 sm:$0xff]   ;;  %v1489_v12 = vld [vmem:[%s2091_s1 + $0x254] ss:$8 sps:$4 sm:$0xff]  }
  0x1a   :  { %v1486_v9 = vld [vmem:[%s2091_s1 + $0x364] ss:$8 sps:$4 sm:$0xff]   ;;  %v1484_v11 = vld [vmem:[%s2091_s1 + $0x360] ss:$8 sps:$4 sm:$0xff]   ;;  %v1492_v13 = vld [vmem:[%s2091_s1 + $0x354] ss:$8 sps:$4 sm:$0xff]  }
  0x1b   :  { %960 = vmatpush1.bf16.msra.mxu0 %v1413_v26  ;;  %v1487_v14 = vld [vmem:[%s2091_s1 + $0x250] ss:$8 sps:$4 sm:$0xff]   ;;  %v1495_v16 = vld [vmem:[%s2091_s1 + $0x244] ss:$8 sps:$4 sm:$0xff]   ;;  %v1493_v18 = vld [vmem:[%s2091_s1 + $0x240] ss:$8 sps:$4 sm:$0xff]  }
  0x1c   :  { %1003 = vmatpush1.bf16.msra.mxu1 %v1414_v27  ;;  %961 = vmatprep.subr.bf16.mxu0 %v1415_v28  ;;  %v1490_v15 = vld [vmem:[%s2091_s1 + $0x350] ss:$8 sps:$4 sm:$0xff]   ;;  %v1498_v17 = vld [vmem:[%s2091_s1 + $0x344] ss:$8 sps:$4 sm:$0xff]   ;;  %v1496_v19 = vld [vmem:[%s2091_s1 + $0x340] ss:$8 sps:$4 sm:$0xff]  }
  0x1d   :  { %1004 = vmatprep.subr.bf16.mxu1 %v1417_v29  ;;  %v1501_v20 = vld [vmem:[%s2091_s1 + $0x234] ss:$8 sps:$4 sm:$0xff]   ;;  %v1499_v22 = vld [vmem:[%s2091_s1 + $0x230] ss:$8 sps:$4 sm:$0xff]   ;;  %v1507_v24 = vld [vmem:[%s2091_s1 + $0x224] ss:$8 sps:$4 sm:$0xff]  }
  0x1e   :  { %v1504_v21 = vld [vmem:[%s2091_s1 + $0x334] ss:$8 sps:$4 sm:$0xff]   ;;  %v1502_v23 = vld [vmem:[%s2091_s1 + $0x330] ss:$8 sps:$4 sm:$0xff]   ;;  %v1510_v25 = vld [vmem:[%s2091_s1 + $0x324] ss:$8 sps:$4 sm:$0xff]  }
  0x1f   :  { %962 = vmatpush1.bf16.msra.mxu0 %v1419_v30  ;;  %v1505_v26 = vld [vmem:[%s2091_s1 + $0x220] ss:$8 sps:$4 sm:$0xff]   ;;  %v1513_v28 = vld [vmem:[%s2091_s1 + $0x214] ss:$8 sps:$4 sm:$0xff]   ;;  %v1511_v30 = vld [vmem:[%s2091_s1 + $0x210] ss:$8 sps:$4 sm:$0xff]  }
  0x20   :  { %1005 = vmatpush1.bf16.msra.mxu1 %v1420_v31  ;;  %963 = vmatprep.subr.bf16.mxu0 %v1421_v32  ;;  %v1508_v27 = vld [vmem:[%s2091_s1 + $0x320] ss:$8 sps:$4 sm:$0xff]   ;;  %v1516_v29 = vld [vmem:[%s2091_s1 + $0x314] ss:$8 sps:$4 sm:$0xff]   ;;  %v1514_v31 = vld [vmem:[%s2091_s1 + $0x310] ss:$8 sps:$4 sm:$0xff]  }
  0x21   :  { %1006 = vmatprep.subr.bf16.mxu1 %v1423_v33  ;;  %v1519_v32 = vld [vmem:[%s2091_s1 + $0x204] ss:$8 sps:$4 sm:$0xff]   ;;  %v1538_v49 = vld [vmem:[%s2091_s1 + $0x3d0] ss:$8 sps:$4 sm:$0xff]  }
  0x22   :  { %v1522_v33 = vld [vmem:[%s2091_s1 + $0x304] ss:$8 sps:$4 sm:$0xff]  }
  0x23   :  { %964 = vmatpush2.bf16.msra.mxu0 %v1425_v34  ;;  %v1573_v34 = vld [vmem:[%s2092_s0 + $0x14] ss:$36 sps:$4 sm:$0xff]   ;;  %v1546_v51 = vld [vmem:[%s2091_s1 + $0x3c4] ss:$8 sps:$4 sm:$0xff]  }
  0x24   :  { %1007 = vmatpush2.bf16.msra.mxu1 %v1426_v35  ;;  %965 = vmatprep.subr.bf16.mxu0 %v1427_v36  ;;  %v1517_v35 = vld [vmem:[%s2091_s1 + $0x200] ss:$8 sps:$4 sm:$0xff]  }
  0x25   :  { %1008 = vmatprep.subr.bf16.mxu1 %v1429_v37  ;;  %v1520_v36 = vld [vmem:[%s2091_s1 + $0x300] ss:$8 sps:$4 sm:$0xff]  }
  0x26   :  { %v1579_v37 = vld [vmem:[%s2092_s0 + $0x1c] ss:$36 sps:$4 sm:$0xff]  }
  0x27   :  { %966 = vmatpush2.bf16.msra.mxu0 %v1431_v38  ;;  %v1525_v38 = vld [vmem:[%s2091_s1 + $0x2f4] ss:$8 sps:$4 sm:$0xff]  }
  0x28   :  { %1009 = vmatpush2.bf16.msra.mxu1 %v1432_v39  ;;  %967 = vmatprep.subr.bf16.mxu0 %v1433_v40  ;;  %v1528_v39 = vld [vmem:[%s2091_s1 + $0x3f4] ss:$8 sps:$4 sm:$0xff]   ;;  %v1523_v40 = vld [vmem:[%s2091_s1 + $0x2f0] ss:$8 sps:$4 sm:$0xff]  }
  0x29   :  { %1010 = vmatprep.subr.bf16.mxu1 %v1435_v41  ;;  %v1526_v41 = vld [vmem:[%s2091_s1 + $0x3f0] ss:$8 sps:$4 sm:$0xff]  }
  0x2b   :  { %968 = vmatpush2.bf16.msra.mxu0 %v1437_v42  ;;  %v1531_v42 = vld [vmem:[%s2091_s1 + $0x2e4] ss:$8 sps:$4 sm:$0xff]  }
  0x2c   :  { %1011 = vmatpush2.bf16.msra.mxu1 %v1438_v43  ;;  %969 = vmatprep.subr.bf16.mxu0 %v1439_v44  ;;  %v1534_v43 = vld [vmem:[%s2091_s1 + $0x3e4] ss:$8 sps:$4 sm:$0xff]   ;;  %v1529_v44 = vld [vmem:[%s2091_s1 + $0x2e0] ss:$8 sps:$4 sm:$0xff]  }
  0x2d   :  { %1012 = vmatprep.subr.bf16.mxu1 %v1441_v45  ;;  %v1532_v45 = vld [vmem:[%s2091_s1 + $0x3e0] ss:$8 sps:$4 sm:$0xff]  }
  0x2f   :  { %970 = vmatpush2.bf16.msra.mxu0 %v1443_v46  ;;  %v1537_v46 = vld [vmem:[%s2091_s1 + $0x2d4] ss:$8 sps:$4 sm:$0xff]  }
  0x30   :  { %1013 = vmatpush2.bf16.msra.mxu1 %v1444_v47  ;;  %971 = vmatprep.subr.bf16.mxu0 %v1445_v48  ;;  %v1540_v47 = vld [vmem:[%s2091_s1 + $0x3d4] ss:$8 sps:$4 sm:$0xff]   ;;  %v1535_v48 = vld [vmem:[%s2091_s1 + $0x2d0] ss:$8 sps:$4 sm:$0xff]  }
  0x31   :  { %1014 = vmatprep.subr.bf16.mxu1 %v1447_v50  ;;  %v1543_v50 = vld [vmem:[%s2091_s1 + $0x2c4] ss:$8 sps:$4 sm:$0xff]  }
  0x33   :  { %972 = vmatpush2.bf16.msra.mxu0 %v1449_v52  ;;  %v1541_v52 = vld [vmem:[%s2091_s1 + $0x2c0] ss:$8 sps:$4 sm:$0xff]  }
  0x34   :  { %1015 = vmatpush2.bf16.msra.mxu1 %v1450_v53  ;;  %973 = vmatprep.subr.bf16.mxu0 %v1451_v54  ;;  %v1544_v53 = vld [vmem:[%s2091_s1 + $0x3c0] ss:$8 sps:$4 sm:$0xff]   ;;  %v1549_v54 = vld [vmem:[%s2091_s1 + $0x2b4] ss:$8 sps:$4 sm:$0xff]  }
  0x35   :  { %1016 = vmatprep.subr.bf16.mxu1 %v1453_v55  ;;  %v1552_v55 = vld [vmem:[%s2091_s1 + $0x3b4] ss:$8 sps:$4 sm:$0xff]  }
  0x37   :  { %974 = vmatpush2.bf16.msra.mxu0 %v1455_v56  ;;  %v1547_v56 = vld [vmem:[%s2091_s1 + $0x2b0] ss:$8 sps:$4 sm:$0xff]  }
  0x38   :  { %1017 = vmatpush2.bf16.msra.mxu1 %v1456_v57  ;;  %975 = vmatprep.subr.bf16.mxu0 %v1457_v58  ;;  %v1550_v57 = vld [vmem:[%s2091_s1 + $0x3b0] ss:$8 sps:$4 sm:$0xff]   ;;  %v1555_v58 = vld [vmem:[%s2091_s1 + $0x2a4] ss:$8 sps:$4 sm:$0xff]  }
  0x39   :  { %1018 = vmatprep.subr.bf16.mxu1 %v1459_v59  ;;  %v1558_v59 = vld [vmem:[%s2091_s1 + $0x3a4] ss:$8 sps:$4 sm:$0xff]  }
  0x3b   :  { %976 = vmatpush2.bf16.msra.mxu0 %v1461_v60  ;;  %v1553_v60 = vld [vmem:[%s2091_s1 + $0x2a0] ss:$8 sps:$4 sm:$0xff]  }
  0x3c   :  { %1019 = vmatpush2.bf16.msra.mxu1 %v1462_v61  ;;  %977 = vmatprep.subr.bf16.mxu0 %v1463_v62  ;;  %v1556_v61 = vld [vmem:[%s2091_s1 + $0x3a0] ss:$8 sps:$4 sm:$0xff]   ;;  %v1561_v62 = vld [vmem:[%s2091_s1 + $0x294] ss:$8 sps:$4 sm:$0xff]  }
  0x3d   :  { %1020 = vmatprep.subr.bf16.mxu1 %v1465_v63  ;;  %v1564_v63 = vld [vmem:[%s2091_s1 + $0x394] ss:$8 sps:$4 sm:$0xff]  }
  0x3f   :  { %978 = vmatpush2.bf16.msra.mxu0 %v1467_v0  ;;  %v1559_v0 = vld [vmem:[%s2091_s1 + $0x290] ss:$8 sps:$4 sm:$0xff]  }
  0x40   :  { %1021 = vmatpush2.bf16.msra.mxu1 %v1468_v1  ;;  %1033 = vmatprep.subr.bf16.mxu0 %v1477_v2  ;;  %v1562_v1 = vld [vmem:[%s2091_s1 + $0x390] ss:$8 sps:$4 sm:$0xff]   ;;  %v1567_v2 = vld [vmem:[%s2091_s1 + $0x284] ss:$8 sps:$4 sm:$0xff]  }
  0x41   :  { %1076 = vmatprep.subr.bf16.mxu1 %v1480_v3  ;;  %v1570_v3 = vld [vmem:[%s2091_s1 + $0x384] ss:$8 sps:$4 sm:$0xff]  }
  0x42   :  { %980 = vmatmul.mubr.bf16.vlgmr.msra.gmra.mxu0 %v1469_v4  ;;  %v1565_v4 = vld [vmem:[%s2091_s1 + $0x280] ss:$8 sps:$4 sm:$0xff]  }
  0x43   :  { %1023 = vmatmul.mubr.bf16.vlgmr.msra.gmra.mxu1 %v1472_v5  ;;  %1034 = vmatpush1.bf16.msra.mxu0 %v1475_v6  ;;  %v1568_v5 = vld [vmem:[%s2091_s1 + $0x380] ss:$8 sps:$4 sm:$0xff]   ;;  %v1576_v6 = vld [vmem:[%s2091_s1 + $0x474] ss:$8 sps:$4 sm:$0xff]  }
  0x44   :  { %1077 = vmatpush1.bf16.msra.mxu1 %v1478_v7  ;;  %1035 = vmatprep.subr.bf16.mxu0 %v1483_v8  ;;  %v1571_v7 = vld [vmem:[%s2092_s0 + $0x10] ss:$36 sps:$4 sm:$0xff]   ;;  %v1577_v8 = vld [vmem:[%s2092_s0 + $0x18] ss:$36 sps:$4 sm:$0xff]  }
  0x45   :  { %1078 = vmatprep.subr.bf16.mxu1 %v1486_v9  ;;  %1065 = vmatprep.mubr.bf16.mxu0 %v1573_v34  ;;  %v1574_v9 = vld [vmem:[%s2091_s1 + $0x470] ss:$8 sps:$4 sm:$0xff]   ;;  %v1179_v34 = vlaneseq }
  0x46   :  { %1108 = vmatprep.mubr.bf16.mxu1 %v1579_v37 }
  0x47   :  { %1036 = vmatpush1.bf16.msra.mxu0 %v1481_v10  ;;  %v1582_v10 = vld [vmem:[%s2091_s1 + $0x464] ss:$8 sps:$4 sm:$0xff]  }
  0x48   :  { %1079 = vmatpush1.bf16.msra.mxu1 %v1484_v11  ;;  %1037 = vmatprep.subr.bf16.mxu0 %v1489_v12  ;;  %v1580_v11 = vld [vmem:[%s2091_s1 + $0x460] ss:$8 sps:$4 sm:$0xff]   ;;  %v1602_v12 = vmov 0  }
  0x49   :  { %1080 = vmatprep.subr.bf16.mxu1 %v1492_v13  ;;  %v1585_v13 = vld [vmem:[%s2091_s1 + $0x454] ss:$8 sps:$4 sm:$0xff]  }
  0x4b   :  { %1038 = vmatpush1.bf16.msra.mxu0 %v1487_v14  ;;  %v1583_v14 = vld [vmem:[%s2091_s1 + $0x450] ss:$8 sps:$4 sm:$0xff]  }
  0x4c   :  { %1081 = vmatpush1.bf16.msra.mxu1 %v1490_v15  ;;  %1039 = vmatprep.subr.bf16.mxu0 %v1495_v16  ;;  %v1588_v15 = vld [vmem:[%s2091_s1 + $0x444] ss:$8 sps:$4 sm:$0xff]   ;;  %v1586_v16 = vld [vmem:[%s2091_s1 + $0x440] ss:$8 sps:$4 sm:$0xff]  }
  0x4d   :  { %1082 = vmatprep.subr.bf16.mxu1 %v1498_v17  ;;  %v1591_v17 = vld [vmem:[%s2091_s1 + $0x434] ss:$8 sps:$4 sm:$0xff]  }
  0x4f   :  { %1040 = vmatpush1.bf16.msra.mxu0 %v1493_v18  ;;  %v1589_v18 = vld [vmem:[%s2091_s1 + $0x430] ss:$8 sps:$4 sm:$0xff]  }
  0x50   :  { %1083 = vmatpush1.bf16.msra.mxu1 %v1496_v19  ;;  %1041 = vmatprep.subr.bf16.mxu0 %v1501_v20  ;;  %v1594_v19 = vld [vmem:[%s2091_s1 + $0x424] ss:$8 sps:$4 sm:$0xff]   ;;  %v1592_v20 = vld [vmem:[%s2091_s1 + $0x420] ss:$8 sps:$4 sm:$0xff]  }
  0x51   :  { %1084 = vmatprep.subr.bf16.mxu1 %v1504_v21  ;;  %v1597_v21 = vld [vmem:[%s2091_s1 + $0x414] ss:$8 sps:$4 sm:$0xff]  }
  0x53   :  { %1042 = vmatpush1.bf16.msra.mxu0 %v1499_v22  ;;  %v1595_v22 = vld [vmem:[%s2091_s1 + $0x410] ss:$8 sps:$4 sm:$0xff]  }
  0x54   :  { %1085 = vmatpush1.bf16.msra.mxu1 %v1502_v23  ;;  %1043 = vmatprep.subr.bf16.mxu0 %v1507_v24  ;;  %v1600_v23 = vld [vmem:[%s2091_s1 + $0x404] ss:$8 sps:$4 sm:$0xff]   ;;  %v1598_v24 = vld [vmem:[%s2091_s1 + $0x400] ss:$8 sps:$4 sm:$0xff]  }
  0x55   :  { %1086 = vmatprep.subr.bf16.mxu1 %v1510_v25  ;;  %v1601_v25 = vld [vmem:[%s2092_s0 + $0x20] ss:$36 sps:$4 sm:$0xff]  }
  0x57   :  { %1044 = vmatpush1.bf16.msra.mxu0 %v1505_v26 }
  0x58   :  { %1087 = vmatpush1.bf16.msra.mxu1 %v1508_v27  ;;  %1045 = vmatprep.subr.bf16.mxu0 %v1513_v28 }
  0x59   :  { %1088 = vmatprep.subr.bf16.mxu1 %v1516_v29 }
  0x5b   :  { %1046 = vmatpush1.bf16.msra.mxu0 %v1511_v30 }
  0x5c   :  { %1089 = vmatpush1.bf16.msra.mxu1 %v1514_v31  ;;  %1047 = vmatprep.subr.bf16.mxu0 %v1519_v32 }
  0x5d   :  { %1090 = vmatprep.subr.bf16.mxu1 %v1522_v33 }
  0x5f   :  { %1048 = vmatpush1.bf16.msra.mxu0 %v1517_v35 }
  0x60   :  { %1091 = vmatpush1.bf16.msra.mxu1 %v1520_v36  ;;  %1049 = vmatprep.subr.bf16.mxu0 %v1525_v38  ;;  %v1180_v38 = vshrl.u32 %v1179_v34, 7 }
  0x61   :  { %1092 = vmatprep.subr.bf16.mxu1 %v1528_v39 }
  0x63   :  { %1050 = vmatpush2.bf16.msra.mxu0 %v1523_v40 }
  0x64   :  { %1093 = vmatpush2.bf16.msra.mxu1 %v1526_v41  ;;  %1051 = vmatprep.subr.bf16.mxu0 %v1531_v42 }
  0x65   :  { %1094 = vmatprep.subr.bf16.mxu1 %v1534_v43 }
  0x67   :  { %1052 = vmatpush2.bf16.msra.mxu0 %v1529_v44  ;;  %v1181_v44 = vsub.s32 0, %v1180_v38 }
  0x68   :  { %1095 = vmatpush2.bf16.msra.mxu1 %v1532_v45  ;;  %1053 = vmatprep.subr.bf16.mxu0 %v1537_v46  ;;  %v1177_v45 = vld [vmem:[%s2093_s2] sm:$0x3] }
  0x69   :  { %1096 = vmatprep.subr.bf16.mxu1 %v1540_v47 }
  0x6b   :  { %1054 = vmatpush2.bf16.msra.mxu0 %v1535_v48  ;;  %v1185_v48 = vsub.s32 1, %v1180_v38 }
  0x6c   :  { %1097 = vmatpush2.bf16.msra.mxu1 %v1538_v49  ;;  %1055 = vmatprep.subr.bf16.mxu0 %v1543_v50 }
  0x6d   :  { %1098 = vmatprep.subr.bf16.mxu1 %v1546_v51 }
  0x6f   :  { %1056 = vmatpush2.bf16.msra.mxu0 %v1541_v52 }
  0x70   :  { %1099 = vmatpush2.bf16.msra.mxu1 %v1544_v53  ;;  %1057 = vmatprep.subr.bf16.mxu0 %v1549_v54  ;;  %v1182_v54 = vrot.slane %v1177_v45, %v1181_v44 }
  0x71   :  { %1100 = vmatprep.subr.bf16.mxu1 %v1552_v55 }
  0x73   :  { %1058 = vmatpush2.bf16.msra.mxu0 %v1547_v56 }
  0x74   :  { %1101 = vmatpush2.bf16.msra.mxu1 %v1550_v57  ;;  %1059 = vmatprep.subr.bf16.mxu0 %v1555_v58 }
  0x75   :  { %1102 = vmatprep.subr.bf16.mxu1 %v1558_v59  ;;  %v1186_v59 = vrot.slane %v1177_v45, %v1185_v48 }
  0x77   :  { %1060 = vmatpush2.bf16.msra.mxu0 %v1553_v60 }
  0x78   :  { %1103 = vmatpush2.bf16.msra.mxu1 %v1556_v61  ;;  %1061 = vmatprep.subr.bf16.mxu0 %v1561_v62 }
  0x79   :  { %1104 = vmatprep.subr.bf16.mxu1 %v1564_v63 }
  0x7b   :  { %1062 = vmatpush2.bf16.msra.mxu0 %v1559_v0 }
  0x7c   :  { %1105 = vmatpush2.bf16.msra.mxu1 %v1562_v1  ;;  %1063 = vmatprep.subr.bf16.mxu0 %v1567_v2 }
  0x7d   :  { %1106 = vmatprep.subr.bf16.mxu1 %v1570_v3 }
  0x7f   :  { %1064 = vmatpush2.bf16.msra.mxu0 %v1565_v4 }
  0x80   :  { %1107 = vmatpush2.bf16.msra.mxu1 %v1568_v5  ;;  %1119 = vmatprep.subr.bf16.mxu0 %v1576_v6 }
  0x82   :  { %1066 = vmatmul.mubr.bf16.vlgmr.msra.gmra.mxu0 %v1571_v7 }
  0x83   :  { %1109 = vmatmul.mubr.bf16.vlgmr.msra.gmra.mxu1 %v1577_v8  ;;  %1120 = vmatpush1.bf16.msra.mxu0 %v1574_v9 }
  0x84   :  { %1151 = vmatprep.mubr.bf16.mxu0 %v1602_v12  ;;  %1121 = vmatprep.subr.bf16.mxu0 %v1582_v10 }
  0x87   :  { %1122 = vmatpush1.bf16.msra.mxu0 %v1580_v11 }
  0x88   :  { %1123 = vmatprep.subr.bf16.mxu0 %v1585_v13 }
  0x8b   :  { %1124 = vmatpush1.bf16.msra.mxu0 %v1583_v14 }
  0x8c   :  { %1125 = vmatprep.subr.bf16.mxu0 %v1588_v15 }
  0x8f   :  { %1126 = vmatpush1.bf16.msra.mxu0 %v1586_v16 }
  0x90   :  { %1127 = vmatprep.subr.bf16.mxu0 %v1591_v17 }
  0x93   :  { %1128 = vmatpush1.bf16.msra.mxu0 %v1589_v18 }
  0x94   :  { %1129 = vmatprep.subr.bf16.mxu0 %v1594_v19 }
  0x97   :  { %1130 = vmatpush1.bf16.msra.mxu0 %v1592_v20 }
  0x98   :  { %1131 = vmatprep.subr.bf16.mxu0 %v1597_v21 }
  0x9b   :  { %1132 = vmatpush1.bf16.msra.mxu0 %v1595_v22 }
  0x9c   :  { %1133 = vmatprep.subr.bf16.mxu0 %v1600_v23 }
  0x9f   :  { %1134 = vmatpush1.bf16.msra.mxu0 %v1598_v24 }
  0xa2   :  { %1152 = vmatmul.mubr.bf16.vlgmr.msra.gmra.mxu0 %v1601_v25 }
 0x102   :  { %v981_v26 = vpop.f32.mrf.mxu0 }
 0x103   :  { %v1024_v27 = vpop.f32.mrf.mxu1 }
 0x104   :  { %v983_v28 = vpop.f32.mrf.mxu0  ;;  %v1025_v39 = vadd.f32 %v1024_v27, %v981_v26 }
 0x105   :  { %v1026_v29 = vpop.f32.mrf.mxu1 }
 0x106   :  { %v985_v30 = vpop.f32.mrf.mxu0  ;;  %v1027_v42 = vadd.f32 %v1026_v29, %v983_v28 }
 0x107   :  { %v1028_v31 = vpop.f32.mrf.mxu1 }
 0x108   :  { %v987_v32 = vpop.f32.mrf.mxu0  ;;  %v1029_v46 = vadd.f32 %v1028_v31, %v985_v30 }
 0x109   :  { %v1030_v35 = vpop.f32.mrf.mxu1 }
 0x10a   :  { %v1031_v51 = vadd.f32 %v1030_v35, %v987_v32 }
 0x142   :  { %v1067_v33 = vpop.f32.mrf.mxu0 }
 0x143   :  { %v1110_v37 = vpop.f32.mrf.mxu1  ;;  %v1068_v43 = vadd.f32 %v1067_v33, %v1025_v39 }
 0x144   :  { %v1069_v36 = vpop.f32.mrf.mxu0 }
 0x145   :  { %v1112_v41 = vpop.f32.mrf.mxu1  ;;  %v1070_v47 = vadd.f32 %v1069_v36, %v1027_v42  ;;  %v1111_v52 = vadd.f32 %v1110_v37, %v1068_v43 }
 0x146   :  { %v1071_v40 = vpop.f32.mrf.mxu0 }
 0x147   :  { %v1114_v50 = vpop.f32.mrf.mxu1  ;;  %v1072_v53 = vadd.f32 %v1071_v40, %v1029_v46  ;;  %v1113_v56 = vadd.f32 %v1112_v41, %v1070_v47 }
 0x148   :  { %v1073_v49 = vpop.f32.mrf.mxu0 }
 0x149   :  { %v1074_v57 = vadd.f32 %v1073_v49, %v1031_v51  ;;  %v1116_v60 = vpop.f32.mrf.mxu1  ;;  %v1115_v62 = vadd.f32 %v1114_v50, %v1072_v53 }
 0x14b   :  { %v1117_v2 = vadd.f32 %v1116_v60, %v1074_v57 }
 0x162   :  { %v1153_v55 = vpop.f32.mrf.mxu0 }
 0x163   :  { %v1154_v58 = vadd.f32 %v1153_v55, %v1111_v52 }
 0x164   :  { %v1155_v61 = vpop.f32.mrf.mxu0 }
 0x165   :  { %v1189_v63 = vadd.f32 %v1182_v54, %v1154_v58  ;;  %v1156_v0 = vadd.f32 %v1155_v61, %v1113_v56 }
 0x166   :  { %v1157_v1 = vpop.f32.mrf.mxu0 }
 0x167   :  { %v1190_v3 = vadd.f32 %v1186_v59, %v1156_v0  ;;  %v1158_v4 = vadd.f32 %v1157_v1, %v1115_v62  ;;  %v1193_v6 = vmax.f32 %v1189_v63, 0.0 }
 0x168   :  { %v1159_v5 = vpop.f32.mrf.mxu0 }
 0x169   :  { %v1194_v7 = vmax.f32 %v1190_v3, 0.0  ;;  %v1191_v8 = vadd.f32 %v1182_v54, %v1158_v4  ;;  %v1160_v9 = vadd.f32 %v1159_v5, %v1117_v2 }
 0x16b   :  { %v1370_v10 = vpack.c.bf16 %v1194_v7, %v1193_v6  ;;  %v1192_v11 = vadd.f32 %v1186_v59, %v1160_v9  ;;  %v1195_v12 = vmax.f32 %v1191_v8, 0.0 }
 0x16d   :  { %1209 = vst [vmem:[%s2094_s3] sm:$0xff] %v1370_v10  ;;  %v1196_v13 = vmax.f32 %v1192_v11, 0.0 }
 0x16f   :  { %v1371_v14 = vpack.c.bf16 %v1196_v13, %v1195_v12 }
 0x171   :  { %1210 = vst [vmem:[%s2094_s3 + $0x8] sm:$0xff] %v1371_v14 }

// kernel: cnn_encoder_forward.11
= control target key start
LH: loop header
LB: loop body
LE: loop exit
PB: predicated region body
PF: predicated region fallthrough
CT: control target
= control target key end

     0   :  { %s396_s0 = inlined_call_operand.vmem [shape: bf16[4,256], index: 0, kind: input, shape index: {}]   ;;  %s397_s1 = inlined_call_operand.vmem [shape: bf16[256,32], index: 1, kind: input, shape index: {}]   ;;  %s398_s2 = inlined_call_operand.vmem [shape: f32[1,32], index: 2, kind: input, shape index: {}]   ;;  %s399_s3 = inlined_call_operand.hbm [shape: f32[4,32], index: 3, kind: output, shape index: {}]  }
   0x1   :  { %v276_v0 = vld [vmem:[%s397_s1 + $0x78] sm:$0xff]   ;;  %v278_v2 = vld [vmem:[%s397_s1 + $0x70] sm:$0xff]   ;;  %v280_v4 = vld [vmem:[%s397_s1 + $0x68] sm:$0xff]  }
   0x2   :  { %v277_v1 = vld [vmem:[%s397_s1 + $0x38] sm:$0xff]   ;;  %252 = vmatprep.subr.bf16.mxu0 %v276_v0  ;;  %v279_v3 = vld [vmem:[%s397_s1 + $0x30] sm:$0xff]   ;;  %v281_v5 = vld [vmem:[%s397_s1 + $0x28] sm:$0xff]  }
   0x3   :  { %253 = vmatpush3.bf16.msra.mxu0 %v277_v1  ;;  %v282_v6 = vld [vmem:[%s397_s1 + $0x60] sm:$0xff]   ;;  %v284_v8 = vld [vmem:[%s397_s1 + $0x58] sm:$0xff]   ;;  %v286_v10 = vld [vmem:[%s397_s1 + $0x50] sm:$0xff]  }
   0x4   :  { %254 = vmatprep.subr.bf16.mxu0 %v278_v2  ;;  %v283_v7 = vld [vmem:[%s397_s1 + $0x20] sm:$0xff]   ;;  %v285_v9 = vld [vmem:[%s397_s1 + $0x18] sm:$0xff]  }
   0x5   :  { %v234_v11 = vld.sshfl [vmem:[%s396_s0] sm:$0x33 pattern:$0x76325410] }
   0x7   :  { %255 = vmatpush3.bf16.msra.mxu0 %v279_v3 }
   0x8   :  { %256 = vmatprep.subr.bf16.mxu0 %v280_v4 }
   0xb   :  { %257 = vmatpush3.bf16.msra.mxu0 %v281_v5 }
   0xc   :  { %258 = vmatprep.subr.bf16.mxu0 %v282_v6 }
   0xf   :  { %259 = vmatpush3.bf16.msra.mxu0 %v283_v7 }
  0x10   :  { %260 = vmatprep.subr.bf16.mxu0 %v284_v8 }
  0x11   :  { %8 = vsyncpa [#allocation4], 0  ;;  %v64_v12 = vcombine.high %v234_v11, %v234_v11  ;;  %v287_v13 = vld [vmem:[%s397_s1 + $0x10] sm:$0xff]   ;;  %v288_v14 = vld [vmem:[%s397_s1 + $0x48] sm:$0xff]   ;;  %vm20_vm0 = vcmask 257024   ;;  %v314_v18 = vmov 0.0  }
  0x12   :  { %v289_v15 = vld [vmem:[%s397_s1 + $0x8] sm:$0xff]   ;;  %v290_v16 = vld [vmem:[%s397_s1 + $0x40] sm:$0xff]   ;;  %21 = vst.msk [vmem:[#allocation2] sm:$0xf] %vm20_vm0, %v314_v18 }
  0x13   :  { %261 = vmatpush3.bf16.msra.mxu0 %v285_v9  ;;  %195 = vmatprep.mubr.bf16.mxu0 %v64_v12  ;;  %v291_v17 = vld [vmem:[%s397_s1] sm:$0xff]   ;;  %s315_s1 = smov [#allocation3]  }
  0x14   :  { %262 = vmatprep.subr.bf16.mxu0 %v286_v10  ;;  %v251_v26 = vld [vmem:[%s398_s2] ss:$0 sm:$0xff]  ;;  %s226_s20 = sshll.u32 %s315_s1, 4  ;;  %s227_s20 = int_to_ptr.vmem [resolvable:$true] %s226_s20 }
  0x15   :  { %s292_s21 = scalar_lea.vmem %s227_s20, 64  ;;  %p297_p1 = scmp.lt.s32.totalorder %s227_s20, %s227_s20 }
  0x16   :  { %p293_p0 = scmp.ne.s32.totalorder %s227_s20, %s292_s21  ;;  %p298_p2 = scmp.lt.s32.totalorder %s292_s21, %s292_s21 }
  0x17   :  { %263 = vmatpush3.bf16.msra.mxu0 %v287_v13 }
  0x18   :  { %264 = vmatprep.subr.bf16.mxu0 %v288_v14  ;;  %p299_p3 = por %p298_p2, %p297_p1 }
  0x19   :  { %v22_v20 = vld [vmem:[#allocation2] sm:$0xf] }
  0x1a   :  { %p300_p4 = pnand %p299_p3, %p293_p0 }
  0x1b   :  { %265 = vmatpush3.bf16.msra.mxu0 %v289_v15 }
  0x1c   :  { %266 = vmatprep.subr.bf16.mxu0 %v290_v16 }
  0x1f   :  { %267 = vmatpush3.bf16.msra.mxu0 %v291_v17 }
  0x22   :  { %196 = vmatmul.mubr.bf16.vlgmr.msra.gmra.mxu0 %v234_v11 }
  0xe2   :  { %v268_v19 = vpop.f32.mrf.mxu0 }
  0xe4   :  { %v269_v21 = vpop.f32.mrf.mxu0 }
  0xe5   :  { %v270_v22 = vadd.f32 %v269_v21, %v268_v19 }
  0xe6   :  { %v271_v23 = vpop.f32.mrf.mxu0 }
  0xe7   :  { %v203_v24 = vadd.f32 %v270_v22, %v22_v20 }
  0xe8   :  { %v272_v25 = vpop.f32.mrf.mxu0 }
  0xe9   :  { %205 = vst.msk [vmem:[#allocation2] sm:$0xf] %vm20_vm0, %v203_v24 }
  0xf0   :  { %v209_v27 = vld [vmem:[#allocation2] sm:$0xf] }
  0xf1   :  { %v217_v28 = vadd.f32 %v251_v26, %v209_v27 }
  0xf3   :  { %v218_v29 = vmax.f32 %v217_v28, 0.0 }
  0xf5   :  { %219 = vst.msk [vmem:[#allocation3] sm:$0xf] %vm20_vm0, %v218_v29 }
  0xf6   :  { %303 = shalt.err (!%p300_p4)
}
  0xf7   :  { %229 = dma.vmem_to_hbm [thread:$0]  %s227_s20, 64, %s399_s3, [#allocation4]  }
  0xf8   :  { %312 = dma.done.wait [#allocation4], 64  }
  0xf9   :  { %313 = vsyncadd [#allocation4], 4294967232 }
  0xfa   :  { %233 = vsyncpa [#allocation4], 1 }

// kernel: cnn_encoder_forward.10
= control target key start
LH: loop header
LB: loop body
LE: loop exit
PB: predicated region body
PF: predicated region fallthrough
CT: control target
= control target key end

     0   :  { %v2994_v36 = vmov 1983009808   ;;  %v322_v38 = vlaneseq  ;;  %s3956_s1 = inlined_call_operand.vmem [shape: bf16[2304,256], index: 1, kind: input, shape index: {}]   ;;  %s3957_s0 = inlined_call_operand.vmem [shape: bf16[4,2304], index: 0, kind: input, shape index: {}]   ;;  %s3958_s2 = inlined_call_operand.vmem [shape: f32[1,256], index: 2, kind: input, shape index: {}]   ;;  %s3959_s3 = inlined_call_operand.vmem [shape: bf16[4,256], index: 3, kind: output, shape index: {}]  }
   0x1   :  { %v2558_v0 = vld [vmem:[%s3956_s1 + $0x74] ss:$8 sps:$4 sm:$0xff]   ;;  %v2562_v2 = vld [vmem:[%s3956_s1 + $0x70] ss:$8 sps:$4 sm:$0xff]   ;;  %v2564_v4 = vld [vmem:[%s3956_s1 + $0x64] ss:$8 sps:$4 sm:$0xff]   ;;  %v320_v37 = vunpack.c.l.s4 %v2994_v36 }
   0x2   :  { %v2560_v1 = vld [vmem:[%s3956_s1 + $0x174] ss:$8 sps:$4 sm:$0xff]   ;;  %1852 = vmatprep.subr.bf16.mxu0 %v2558_v0  ;;  %v2563_v3 = vld [vmem:[%s3956_s1 + $0x170] ss:$8 sps:$4 sm:$0xff]   ;;  %v2566_v5 = vld [vmem:[%s3956_s1 + $0x164] ss:$8 sps:$4 sm:$0xff]  }
   0x3   :  { %1893 = vmatprep.subr.bf16.mxu1 %v2560_v1  ;;  %1853 = vmatpush1.bf16.msra.mxu0 %v2562_v2  ;;  %v2568_v6 = vld [vmem:[%s3956_s1 + $0x60] ss:$8 sps:$4 sm:$0xff]   ;;  %v2570_v8 = vld [vmem:[%s3956_s1 + $0x54] ss:$8 sps:$4 sm:$0xff]   ;;  %v2574_v10 = vld [vmem:[%s3956_s1 + $0x50] ss:$8 sps:$4 sm:$0xff]   ;;  %v321_v42 = vunpack.c.0.s8 %v320_v37 }
   0x4   :  { %1894 = vmatpush1.bf16.msra.mxu1 %v2563_v3  ;;  %1854 = vmatprep.subr.bf16.mxu0 %v2564_v4  ;;  %v2569_v7 = vld [vmem:[%s3956_s1 + $0x160] ss:$8 sps:$4 sm:$0xff]   ;;  %v2572_v9 = vld [vmem:[%s3956_s1 + $0x154] ss:$8 sps:$4 sm:$0xff]   ;;  %v2575_v11 = vld [vmem:[%s3956_s1 + $0x150] ss:$8 sps:$4 sm:$0xff]  }
   0x5   :  { %1895 = vmatprep.subr.bf16.mxu1 %v2566_v5  ;;  %v2576_v12 = vld [vmem:[%s3956_s1 + $0x44] ss:$8 sps:$4 sm:$0xff]   ;;  %v2580_v14 = vld [vmem:[%s3956_s1 + $0x40] ss:$8 sps:$4 sm:$0xff]   ;;  %v2582_v16 = vld [vmem:[%s3956_s1 + $0x34] ss:$8 sps:$4 sm:$0xff]  }
   0x6   :  { %v2578_v13 = vld [vmem:[%s3956_s1 + $0x144] ss:$8 sps:$4 sm:$0xff]   ;;  %v2581_v15 = vld [vmem:[%s3956_s1 + $0x140] ss:$8 sps:$4 sm:$0xff]   ;;  %v2584_v17 = vld [vmem:[%s3956_s1 + $0x134] ss:$8 sps:$4 sm:$0xff]  }
   0x7   :  { %1855 = vmatpush1.bf16.msra.mxu0 %v2568_v6  ;;  %v2586_v18 = vld [vmem:[%s3956_s1 + $0x30] ss:$8 sps:$4 sm:$0xff]   ;;  %v2588_v20 = vld [vmem:[%s3956_s1 + $0x24] ss:$8 sps:$4 sm:$0xff]   ;;  %v2592_v22 = vld [vmem:[%s3956_s1 + $0x20] ss:$8 sps:$4 sm:$0xff]  }
   0x8   :  { %1896 = vmatpush1.bf16.msra.mxu1 %v2569_v7  ;;  %1856 = vmatprep.subr.bf16.mxu0 %v2570_v8  ;;  %v2587_v19 = vld [vmem:[%s3956_s1 + $0x130] ss:$8 sps:$4 sm:$0xff]   ;;  %v2590_v21 = vld [vmem:[%s3956_s1 + $0x124] ss:$8 sps:$4 sm:$0xff]   ;;  %v2593_v23 = vld [vmem:[%s3956_s1 + $0x120] ss:$8 sps:$4 sm:$0xff]  }
   0x9   :  { %1897 = vmatprep.subr.bf16.mxu1 %v2572_v9  ;;  %v2594_v24 = vld [vmem:[%s3956_s1 + $0x14] ss:$8 sps:$4 sm:$0xff]   ;;  %v2598_v26 = vld [vmem:[%s3956_s1 + $0x10] ss:$8 sps:$4 sm:$0xff]   ;;  %v2600_v28 = vld [vmem:[%s3956_s1 + $0x4] ss:$8 sps:$4 sm:$0xff]  }
   0xa   :  { %v2596_v25 = vld [vmem:[%s3956_s1 + $0x114] ss:$8 sps:$4 sm:$0xff]   ;;  %v2599_v27 = vld [vmem:[%s3956_s1 + $0x110] ss:$8 sps:$4 sm:$0xff]   ;;  %v2602_v29 = vld [vmem:[%s3956_s1 + $0x104] ss:$8 sps:$4 sm:$0xff]  }
   0xb   :  { %1857 = vmatpush1.bf16.msra.mxu0 %v2574_v10  ;;  %v2604_v30 = vld [vmem:[%s3956_s1] ss:$8 sps:$4 sm:$0xff]   ;;  %v2606_v32 = vld [vmem:[%s3956_s1 + $0xf4] ss:$8 sps:$4 sm:$0xff]   ;;  %v2610_v34 = vld [vmem:[%s3956_s1 + $0xf0] ss:$8 sps:$4 sm:$0xff]  }
   0xc   :  { %1898 = vmatpush1.bf16.msra.mxu1 %v2575_v11  ;;  %1858 = vmatprep.subr.bf16.mxu0 %v2576_v12  ;;  %v2605_v31 = vld [vmem:[%s3956_s1 + $0x100] ss:$8 sps:$4 sm:$0xff]   ;;  %v2608_v33 = vld [vmem:[%s3956_s1 + $0x1f4] ss:$8 sps:$4 sm:$0xff]   ;;  %v2611_v35 = vld [vmem:[%s3956_s1 + $0x1f0] ss:$8 sps:$4 sm:$0xff]  }
   0xd   :  { %1899 = vmatprep.subr.bf16.mxu1 %v2578_v13  ;;  %v2612_v39 = vld [vmem:[%s3956_s1 + $0xe4] ss:$8 sps:$4 sm:$0xff]   ;;  %v2616_v41 = vld [vmem:[%s3956_s1 + $0xe0] ss:$8 sps:$4 sm:$0xff]   ;;  %v3132_v43 = vshrl.u32 %v322_v38, 7 }
   0xe   :  { %v2614_v40 = vld [vmem:[%s3956_s1 + $0x1e4] ss:$8 sps:$4 sm:$0xff]   ;;  %v2617_v44 = vld [vmem:[%s3956_s1 + $0x1e0] ss:$8 sps:$4 sm:$0xff]   ;;  %v2618_v45 = vld [vmem:[%s3956_s1 + $0xd4] ss:$8 sps:$4 sm:$0xff]  }
   0xf   :  { %1859 = vmatpush1.bf16.msra.mxu0 %v2580_v14  ;;  %v2620_v46 = vld [vmem:[%s3956_s1 + $0x1d4] ss:$8 sps:$4 sm:$0xff]   ;;  %v2622_v47 = vld [vmem:[%s3956_s1 + $0xd0] ss:$8 sps:$4 sm:$0xff]   ;;  %v3150_v49 = vsub.s32 %v321_v42, %v3132_v43  ;;  %v2624_v50 = vld [vmem:[%s3956_s1 + $0xc4] ss:$8 sps:$4 sm:$0xff]  }
  0x10   :  { %1900 = vmatpush1.bf16.msra.mxu1 %v2581_v15  ;;  %1860 = vmatprep.subr.bf16.mxu0 %v2582_v16  ;;  %v2623_v48 = vld [vmem:[%s3956_s1 + $0x1d0] ss:$8 sps:$4 sm:$0xff]   ;;  %v2626_v51 = vld [vmem:[%s3956_s1 + $0x1c4] ss:$8 sps:$4 sm:$0xff]   ;;  %v2628_v53 = vld [vmem:[%s3956_s1 + $0xc0] ss:$8 sps:$4 sm:$0xff]  }
  0x11   :  { %1901 = vmatprep.subr.bf16.mxu1 %v2584_v17  ;;  %v20_v52 = vld [vmem:[%s3957_s0] sm:$0xff]  ;;  %v2630_v57 = vld [vmem:[%s3956_s1 + $0xb4] ss:$8 sps:$4 sm:$0xff]   ;;  %v2634_v61 = vld [vmem:[%s3956_s1 + $0xb0] ss:$8 sps:$4 sm:$0xff]  }
  0x12   :  { %v325_v54 = vrot.slane %v20_v52, %v3150_v49  ;;  %v318_v55 = vcombine.high %v20_v52, %v20_v52  ;;  %v2629_v56 = vld [vmem:[%s3956_s1 + $0x1c0] ss:$8 sps:$4 sm:$0xff]   ;;  %v2632_v58 = vld [vmem:[%s3956_s1 + $0x1b4] ss:$8 sps:$4 sm:$0xff]   ;;  %v2635_v63 = vld [vmem:[%s3956_s1 + $0x1b0] ss:$8 sps:$4 sm:$0xff]  }
  0x13   :  { %1861 = vmatpush1.bf16.msra.mxu0 %v2586_v18  ;;  %v2636_v0 = vld [vmem:[%s3956_s1 + $0xa4] ss:$8 sps:$4 sm:$0xff]   ;;  %v2640_v2 = vld [vmem:[%s3956_s1 + $0xa0] ss:$8 sps:$4 sm:$0xff]   ;;  %v2642_v4 = vld [vmem:[%s3956_s1 + $0x94] ss:$8 sps:$4 sm:$0xff]  }
  0x14   :  { %1902 = vmatpush1.bf16.msra.mxu1 %v2587_v19  ;;  %1862 = vmatprep.subr.bf16.mxu0 %v2588_v20  ;;  %v333_v59 = vcombine.high %v325_v54, %v325_v54  ;;  %v332_v60 = vrot.slane %v318_v55, %v3150_v49  ;;  %v2638_v1 = vld [vmem:[%s3956_s1 + $0x1a4] ss:$8 sps:$4 sm:$0xff]   ;;  %v2641_v3 = vld [vmem:[%s3956_s1 + $0x1a0] ss:$8 sps:$4 sm:$0xff]   ;;  %v2644_v5 = vld [vmem:[%s3956_s1 + $0x194] ss:$8 sps:$4 sm:$0xff]  }
  0x15   :  { %1903 = vmatprep.subr.bf16.mxu1 %v2590_v21  ;;  %v2646_v6 = vld [vmem:[%s3956_s1 + $0x90] ss:$8 sps:$4 sm:$0xff]   ;;  %v2648_v8 = vld [vmem:[%s3956_s1 + $0x84] ss:$8 sps:$4 sm:$0xff]   ;;  %v2652_v10 = vld [vmem:[%s3956_s1 + $0x80] ss:$8 sps:$4 sm:$0xff]  }
  0x16   :  { %1884 = vmatprep.mubr.bf16.mxu0 %v333_v59  ;;  %v334_v62 = vcombine.high %v332_v60, %v332_v60  ;;  %v2647_v7 = vld [vmem:[%s3956_s1 + $0x190] ss:$8 sps:$4 sm:$0xff]   ;;  %v2650_v9 = vld [vmem:[%s3956_s1 + $0x184] ss:$8 sps:$4 sm:$0xff]   ;;  %v2653_v11 = vld [vmem:[%s3956_s1 + $0x180] ss:$8 sps:$4 sm:$0xff]  }
  0x17   :  { %1863 = vmatpush1.bf16.msra.mxu0 %v2592_v22  ;;  %v2657_v12 = vld [vmem:[%s3956_s1 + $0x274] ss:$8 sps:$4 sm:$0xff]   ;;  %v2655_v14 = vld [vmem:[%s3956_s1 + $0x270] ss:$8 sps:$4 sm:$0xff]   ;;  %v2663_v16 = vld [vmem:[%s3956_s1 + $0x264] ss:$8 sps:$4 sm:$0xff]  }
  0x18   :  { %1904 = vmatpush1.bf16.msra.mxu1 %v2593_v23  ;;  %1864 = vmatprep.subr.bf16.mxu0 %v2594_v24  ;;  %v2660_v13 = vld [vmem:[%s3956_s1 + $0x374] ss:$8 sps:$4 sm:$0xff]   ;;  %v2658_v15 = vld [vmem:[%s3956_s1 + $0x370] ss:$8 sps:$4 sm:$0xff]   ;;  %v2666_v17 = vld [vmem:[%s3956_s1 + $0x364] ss:$8 sps:$4 sm:$0xff]  }
  0x19   :  { %1905 = vmatprep.subr.bf16.mxu1 %v2596_v25  ;;  %1925 = vmatprep.mubr.bf16.mxu1 %v334_v62  ;;  %v2661_v18 = vld [vmem:[%s3956_s1 + $0x260] ss:$8 sps:$4 sm:$0xff]   ;;  %v2669_v20 = vld [vmem:[%s3956_s1 + $0x254] ss:$8 sps:$4 sm:$0xff]   ;;  %v2667_v22 = vld [vmem:[%s3956_s1 + $0x250] ss:$8 sps:$4 sm:$0xff]  }
  0x1a   :  { %v2664_v19 = vld [vmem:[%s3956_s1 + $0x360] ss:$8 sps:$4 sm:$0xff]   ;;  %v2672_v21 = vld [vmem:[%s3956_s1 + $0x354] ss:$8 sps:$4 sm:$0xff]   ;;  %v2670_v23 = vld [vmem:[%s3956_s1 + $0x350] ss:$8 sps:$4 sm:$0xff]  }
  0x1b   :  { %1865 = vmatpush1.bf16.msra.mxu0 %v2598_v26  ;;  %v2675_v24 = vld [vmem:[%s3956_s1 + $0x244] ss:$8 sps:$4 sm:$0xff]   ;;  %v2673_v26 = vld [vmem:[%s3956_s1 + $0x240] ss:$8 sps:$4 sm:$0xff]   ;;  %v2693_v36 = vld [vmem:[%s3956_s1 + $0x214] ss:$8 sps:$4 sm:$0xff]  }
  0x1c   :  { %1906 = vmatpush1.bf16.msra.mxu1 %v2599_v27  ;;  %1866 = vmatprep.subr.bf16.mxu0 %v2600_v28  ;;  %v2678_v25 = vld [vmem:[%s3956_s1 + $0x344] ss:$8 sps:$4 sm:$0xff]   ;;  %v2676_v27 = vld [vmem:[%s3956_s1 + $0x340] ss:$8 sps:$4 sm:$0xff]   ;;  %v2681_v28 = vld [vmem:[%s3956_s1 + $0x234] ss:$8 sps:$4 sm:$0xff]  }
  0x1d   :  { %1907 = vmatprep.subr.bf16.mxu1 %v2602_v29  ;;  %v2684_v29 = vld [vmem:[%s3956_s1 + $0x334] ss:$8 sps:$4 sm:$0xff]   ;;  %v21_v38 = vld [vmem:[%s3957_s0 + $0x8] sm:$0xff]  ;;  %v2694_v42 = vld [vmem:[%s3956_s1 + $0x310] ss:$8 sps:$4 sm:$0xff]  }
  0x1e   :  { %v2696_v37 = vld [vmem:[%s3956_s1 + $0x314] ss:$8 sps:$4 sm:$0xff]   ;;  %v2706_v55 = vld [vmem:[%s3956_s1 + $0x3f0] ss:$8 sps:$4 sm:$0xff]   ;;  %v2712_v59 = vld [vmem:[%s3956_s1 + $0x3e0] ss:$8 sps:$4 sm:$0xff]  }
  0x1f   :  { %1867 = vmatpush1.bf16.msra.mxu0 %v2604_v30  ;;  %v2679_v30 = vld [vmem:[%s3956_s1 + $0x230] ss:$8 sps:$4 sm:$0xff]   ;;  %v2705_v52 = vld [vmem:[%s3956_s1 + $0x2f4] ss:$8 sps:$4 sm:$0xff]  }
  0x20   :  { %1908 = vmatpush1.bf16.msra.mxu1 %v2605_v31  ;;  %1868 = vmatprep.subr.bf16.mxu0 %v2606_v32  ;;  %v2682_v31 = vld [vmem:[%s3956_s1 + $0x330] ss:$8 sps:$4 sm:$0xff]   ;;  %v2687_v32 = vld [vmem:[%s3956_s1 + $0x224] ss:$8 sps:$4 sm:$0xff]  }
  0x21   :  { %1909 = vmatprep.subr.bf16.mxu1 %v2608_v33  ;;  %v2690_v33 = vld [vmem:[%s3956_s1 + $0x324] ss:$8 sps:$4 sm:$0xff]   ;;  %v2715_v62 = vld [vmem:[%s3956_s1 + $0x2d0] ss:$8 sps:$4 sm:$0xff]  }
  0x23   :  { %1869 = vmatpush2.bf16.msra.mxu0 %v2610_v34  ;;  %v2685_v34 = vld [vmem:[%s3956_s1 + $0x220] ss:$8 sps:$4 sm:$0xff]  }
  0x24   :  { %1910 = vmatpush2.bf16.msra.mxu1 %v2611_v35  ;;  %1870 = vmatprep.subr.bf16.mxu0 %v2612_v39  ;;  %v2688_v35 = vld [vmem:[%s3956_s1 + $0x320] ss:$8 sps:$4 sm:$0xff]   ;;  %v3299_v39 = vrot.slane %v21_v38, %v3150_v49 }
  0x25   :  { %1911 = vmatprep.subr.bf16.mxu1 %v2614_v40  ;;  %v335_v40 = vcombine.high %v21_v38, %v21_v38  ;;  %v2772_v38 = vld [vmem:[%s3956_s1 + $0x444] ss:$8 sps:$4 sm:$0xff]  }
  0x27   :  { %1871 = vmatpush2.bf16.msra.mxu0 %v2616_v41  ;;  %v2691_v41 = vld [vmem:[%s3956_s1 + $0x210] ss:$8 sps:$4 sm:$0xff]  }
  0x28   :  { %1912 = vmatpush2.bf16.msra.mxu1 %v2617_v44  ;;  %1872 = vmatprep.subr.bf16.mxu0 %v2618_v45  ;;  %v350_v44 = vcombine.high %v3299_v39, %v3299_v39  ;;  %v3310_v45 = vrot.slane %v335_v40, %v3150_v49  ;;  %v2770_v40 = vld [vmem:[%s3956_s1 + $0x440] ss:$8 sps:$4 sm:$0xff]  }
  0x29   :  { %1913 = vmatprep.subr.bf16.mxu1 %v2620_v46  ;;  %v2699_v46 = vld [vmem:[%s3956_s1 + $0x204] ss:$8 sps:$4 sm:$0xff]  }
  0x2b   :  { %1873 = vmatpush2.bf16.msra.mxu0 %v2622_v47  ;;  %v2702_v47 = vld [vmem:[%s3956_s1 + $0x304] ss:$8 sps:$4 sm:$0xff]  }
  0x2c   :  { %1914 = vmatpush2.bf16.msra.mxu1 %v2623_v48  ;;  %1874 = vmatprep.subr.bf16.mxu0 %v2624_v50  ;;  %v351_v48 = vcombine.high %v3310_v45, %v3310_v45  ;;  %v2697_v50 = vld [vmem:[%s3956_s1 + $0x200] ss:$8 sps:$4 sm:$0xff]  }
  0x2d   :  { %1915 = vmatprep.subr.bf16.mxu1 %v2626_v51  ;;  %v2700_v51 = vld [vmem:[%s3956_s1 + $0x300] ss:$8 sps:$4 sm:$0xff]  }
  0x2f   :  { %1875 = vmatpush2.bf16.msra.mxu0 %v2628_v53  ;;  %v2708_v53 = vld [vmem:[%s3956_s1 + $0x3f4] ss:$8 sps:$4 sm:$0xff]  }
  0x30   :  { %1916 = vmatpush2.bf16.msra.mxu1 %v2629_v56  ;;  %1876 = vmatprep.subr.bf16.mxu0 %v2630_v57  ;;  %v2711_v56 = vld [vmem:[%s3956_s1 + $0x2e4] ss:$8 sps:$4 sm:$0xff]  }
  0x31   :  { %1917 = vmatprep.subr.bf16.mxu1 %v2632_v58  ;;  %v2714_v57 = vld [vmem:[%s3956_s1 + $0x3e4] ss:$8 sps:$4 sm:$0xff]   ;;  %v2709_v58 = vld [vmem:[%s3956_s1 + $0x2e0] ss:$8 sps:$4 sm:$0xff]  }
  0x33   :  { %1877 = vmatpush2.bf16.msra.mxu0 %v2634_v61  ;;  %v2720_v61 = vld [vmem:[%s3956_s1 + $0x3d4] ss:$8 sps:$4 sm:$0xff]  }
  0x34   :  { %1918 = vmatpush2.bf16.msra.mxu1 %v2635_v63  ;;  %1878 = vmatprep.subr.bf16.mxu0 %v2636_v0  ;;  %v2718_v63 = vld [vmem:[%s3956_s1 + $0x3d0] ss:$8 sps:$4 sm:$0xff]   ;;  %v2723_v0 = vld [vmem:[%s3956_s1 + $0x2c4] ss:$8 sps:$4 sm:$0xff]  }
  0x35   :  { %1919 = vmatprep.subr.bf16.mxu1 %v2638_v1  ;;  %v2726_v1 = vld [vmem:[%s3956_s1 + $0x3c4] ss:$8 sps:$4 sm:$0xff]  }
  0x37   :  { %1879 = vmatpush2.bf16.msra.mxu0 %v2640_v2  ;;  %v2721_v2 = vld [vmem:[%s3956_s1 + $0x2c0] ss:$8 sps:$4 sm:$0xff]  }
  0x38   :  { %1920 = vmatpush2.bf16.msra.mxu1 %v2641_v3  ;;  %1880 = vmatprep.subr.bf16.mxu0 %v2642_v4  ;;  %v2724_v3 = vld [vmem:[%s3956_s1 + $0x3c0] ss:$8 sps:$4 sm:$0xff]   ;;  %v2729_v4 = vld [vmem:[%s3956_s1 + $0x2b4] ss:$8 sps:$4 sm:$0xff]  }
  0x39   :  { %1921 = vmatprep.subr.bf16.mxu1 %v2644_v5  ;;  %v2732_v5 = vld [vmem:[%s3956_s1 + $0x3b4] ss:$8 sps:$4 sm:$0xff]  }
  0x3b   :  { %1881 = vmatpush2.bf16.msra.mxu0 %v2646_v6  ;;  %v2727_v6 = vld [vmem:[%s3956_s1 + $0x2b0] ss:$8 sps:$4 sm:$0xff]  }
  0x3c   :  { %1922 = vmatpush2.bf16.msra.mxu1 %v2647_v7  ;;  %1882 = vmatprep.subr.bf16.mxu0 %v2648_v8  ;;  %v2730_v7 = vld [vmem:[%s3956_s1 + $0x3b0] ss:$8 sps:$4 sm:$0xff]   ;;  %v2735_v8 = vld [vmem:[%s3956_s1 + $0x2a4] ss:$8 sps:$4 sm:$0xff]  }
  0x3d   :  { %1923 = vmatprep.subr.bf16.mxu1 %v2650_v9  ;;  %v2738_v9 = vld [vmem:[%s3956_s1 + $0x3a4] ss:$8 sps:$4 sm:$0xff]  }
  0x3f   :  { %1883 = vmatpush2.bf16.msra.mxu0 %v2652_v10  ;;  %v2733_v10 = vld [vmem:[%s3956_s1 + $0x2a0] ss:$8 sps:$4 sm:$0xff]  }
  0x40   :  { %1924 = vmatpush2.bf16.msra.mxu1 %v2653_v11  ;;  %1934 = vmatprep.subr.bf16.mxu0 %v2657_v12  ;;  %v2736_v11 = vld [vmem:[%s3956_s1 + $0x3a0] ss:$8 sps:$4 sm:$0xff]   ;;  %v2741_v12 = vld [vmem:[%s3956_s1 + $0x294] ss:$8 sps:$4 sm:$0xff]  }
  0x41   :  { %1975 = vmatprep.subr.bf16.mxu1 %v2660_v13  ;;  %v2744_v13 = vld [vmem:[%s3956_s1 + $0x394] ss:$8 sps:$4 sm:$0xff]  }
  0x42   :  { %1885 = vmatmul.mubr.bf16.vlgmr.msra.gmra.mxu0 %v325_v54  ;;  %v2703_v54 = vld [vmem:[%s3956_s1 + $0x2f0] ss:$8 sps:$4 sm:$0xff]  }
  0x43   :  { %1926 = vmatmul.mubr.bf16.vlgmr.msra.gmra.mxu1 %v332_v60  ;;  %1935 = vmatpush1.bf16.msra.mxu0 %v2655_v14  ;;  %v2717_v60 = vld [vmem:[%s3956_s1 + $0x2d4] ss:$8 sps:$4 sm:$0xff]   ;;  %v2739_v14 = vld [vmem:[%s3956_s1 + $0x290] ss:$8 sps:$4 sm:$0xff]  }
  0x44   :  { %1976 = vmatpush1.bf16.msra.mxu1 %v2658_v15  ;;  %1936 = vmatprep.subr.bf16.mxu0 %v2663_v16  ;;  %v2742_v15 = vld [vmem:[%s3956_s1 + $0x390] ss:$8 sps:$4 sm:$0xff]   ;;  %v2747_v16 = vld [vmem:[%s3956_s1 + $0x284] ss:$8 sps:$4 sm:$0xff]  }
  0x45   :  { %1977 = vmatprep.subr.bf16.mxu1 %v2666_v17  ;;  %1966 = vmatprep.mubr.bf16.mxu0 %v350_v44  ;;  %v2750_v17 = vld [vmem:[%s3956_s1 + $0x384] ss:$8 sps:$4 sm:$0xff]   ;;  %v2781_v44 = vld [vmem:[%s3956_s1 + $0x534] ss:$8 sps:$4 sm:$0xff]  }
  0x46   :  { %2007 = vmatprep.mubr.bf16.mxu1 %v351_v48  ;;  %v2787_v48 = vld [vmem:[%s3956_s1 + $0x524] ss:$8 sps:$4 sm:$0xff]  }
  0x47   :  { %1937 = vmatpush1.bf16.msra.mxu0 %v2661_v18  ;;  %v2745_v18 = vld [vmem:[%s3956_s1 + $0x280] ss:$8 sps:$4 sm:$0xff]  }
  0x48   :  { %1978 = vmatpush1.bf16.msra.mxu1 %v2664_v19  ;;  %1938 = vmatprep.subr.bf16.mxu0 %v2669_v20  ;;  %v2748_v19 = vld [vmem:[%s3956_s1 + $0x380] ss:$8 sps:$4 sm:$0xff]   ;;  %v2753_v20 = vld [vmem:[%s3956_s1 + $0x474] ss:$8 sps:$4 sm:$0xff]  }
  0x49   :  { %1979 = vmatprep.subr.bf16.mxu1 %v2672_v21  ;;  %v2757_v21 = vld [vmem:[%s3956_s1 + $0x574] ss:$8 sps:$4 sm:$0xff]  }
  0x4b   :  { %1939 = vmatpush1.bf16.msra.mxu0 %v2667_v22  ;;  %v2751_v22 = vld [vmem:[%s3956_s1 + $0x470] ss:$8 sps:$4 sm:$0xff]  }
  0x4c   :  { %1980 = vmatpush1.bf16.msra.mxu1 %v2670_v23  ;;  %1940 = vmatprep.subr.bf16.mxu0 %v2675_v24  ;;  %v2755_v23 = vld [vmem:[%s3956_s1 + $0x570] ss:$8 sps:$4 sm:$0xff]   ;;  %v2760_v24 = vld [vmem:[%s3956_s1 + $0x464] ss:$8 sps:$4 sm:$0xff]  }
  0x4d   :  { %1981 = vmatprep.subr.bf16.mxu1 %v2678_v25  ;;  %v22_v25 = vld [vmem:[%s3957_s0 + $0x10] sm:$0xff] }
  0x4f   :  { %1941 = vmatpush1.bf16.msra.mxu0 %v2673_v26  ;;  %v2763_v26 = vld [vmem:[%s3956_s1 + $0x564] ss:$8 sps:$4 sm:$0xff]  }
  0x50   :  { %1982 = vmatpush1.bf16.msra.mxu1 %v2676_v27  ;;  %1942 = vmatprep.subr.bf16.mxu0 %v2681_v28  ;;  %v3444_v27 = vrot.slane %v22_v25, %v3150_v49  ;;  %v352_v28 = vcombine.high %v22_v25, %v22_v25  ;;  %v2844_v25 = vld [vmem:[%s3956_s1 + $0x484] ss:$8 sps:$4 sm:$0xff]  }
  0x51   :  { %1983 = vmatprep.subr.bf16.mxu1 %v2684_v29  ;;  %v2758_v29 = vld [vmem:[%s3956_s1 + $0x460] ss:$8 sps:$4 sm:$0xff]  }
  0x53   :  { %1943 = vmatpush1.bf16.msra.mxu0 %v2679_v30  ;;  %v367_v30 = vcombine.high %v3444_v27, %v3444_v27 }
  0x54   :  { %1984 = vmatpush1.bf16.msra.mxu1 %v2682_v31  ;;  %1944 = vmatprep.subr.bf16.mxu0 %v2687_v32  ;;  %v3454_v31 = vrot.slane %v352_v28, %v3150_v49  ;;  %v2761_v32 = vld [vmem:[%s3956_s1 + $0x560] ss:$8 sps:$4 sm:$0xff]  }
  0x55   :  { %1985 = vmatprep.subr.bf16.mxu1 %v2690_v33  ;;  %v2766_v33 = vld [vmem:[%s3956_s1 + $0x454] ss:$8 sps:$4 sm:$0xff]  }
  0x57   :  { %1945 = vmatpush1.bf16.msra.mxu0 %v2685_v34  ;;  %v2769_v34 = vld [vmem:[%s3956_s1 + $0x554] ss:$8 sps:$4 sm:$0xff]  }
  0x58   :  { %1986 = vmatpush1.bf16.msra.mxu1 %v2688_v35  ;;  %1946 = vmatprep.subr.bf16.mxu0 %v2693_v36  ;;  %v368_v35 = vcombine.high %v3454_v31, %v3454_v31  ;;  %v2764_v36 = vld [vmem:[%s3956_s1 + $0x450] ss:$8 sps:$4 sm:$0xff]  }
  0x59   :  { %1987 = vmatprep.subr.bf16.mxu1 %v2696_v37  ;;  %v2767_v37 = vld [vmem:[%s3956_s1 + $0x550] ss:$8 sps:$4 sm:$0xff]  }
  0x5b   :  { %1947 = vmatpush1.bf16.msra.mxu0 %v2691_v41  ;;  %v2773_v41 = vld [vmem:[%s3956_s1 + $0x540] ss:$8 sps:$4 sm:$0xff]  }
  0x5c   :  { %1988 = vmatpush1.bf16.msra.mxu1 %v2694_v42  ;;  %1948 = vmatprep.subr.bf16.mxu0 %v2699_v46  ;;  %v2778_v42 = vld [vmem:[%s3956_s1 + $0x434] ss:$8 sps:$4 sm:$0xff]   ;;  %v2779_v46 = vld [vmem:[%s3956_s1 + $0x530] ss:$8 sps:$4 sm:$0xff]  }
  0x5d   :  { %1989 = vmatprep.subr.bf16.mxu1 %v2702_v47  ;;  %v2784_v47 = vld [vmem:[%s3956_s1 + $0x424] ss:$8 sps:$4 sm:$0xff]  }
  0x5f   :  { %1949 = vmatpush1.bf16.msra.mxu0 %v2697_v50  ;;  %v2782_v50 = vld [vmem:[%s3956_s1 + $0x420] ss:$8 sps:$4 sm:$0xff]  }
  0x60   :  { %1990 = vmatpush1.bf16.msra.mxu1 %v2700_v51  ;;  %1950 = vmatprep.subr.bf16.mxu0 %v2705_v52  ;;  %v2785_v51 = vld [vmem:[%s3956_s1 + $0x520] ss:$8 sps:$4 sm:$0xff]   ;;  %v2790_v52 = vld [vmem:[%s3956_s1 + $0x414] ss:$8 sps:$4 sm:$0xff]  }
  0x61   :  { %1991 = vmatprep.subr.bf16.mxu1 %v2708_v53  ;;  %v2793_v53 = vld [vmem:[%s3956_s1 + $0x514] ss:$8 sps:$4 sm:$0xff]  }
  0x63   :  { %1951 = vmatpush2.bf16.msra.mxu0 %v2703_v54  ;;  %v2788_v54 = vld [vmem:[%s3956_s1 + $0x410] ss:$8 sps:$4 sm:$0xff]  }
  0x64   :  { %1992 = vmatpush2.bf16.msra.mxu1 %v2706_v55  ;;  %1952 = vmatprep.subr.bf16.mxu0 %v2711_v56  ;;  %v2791_v55 = vld [vmem:[%s3956_s1 + $0x510] ss:$8 sps:$4 sm:$0xff]   ;;  %v2796_v56 = vld [vmem:[%s3956_s1 + $0x404] ss:$8 sps:$4 sm:$0xff]  }
  0x65   :  { %1993 = vmatprep.subr.bf16.mxu1 %v2714_v57  ;;  %v2799_v57 = vld [vmem:[%s3956_s1 + $0x504] ss:$8 sps:$4 sm:$0xff]  }
  0x67   :  { %1953 = vmatpush2.bf16.msra.mxu0 %v2709_v58  ;;  %v2794_v58 = vld [vmem:[%s3956_s1 + $0x400] ss:$8 sps:$4 sm:$0xff]  }
  0x68   :  { %1994 = vmatpush2.bf16.msra.mxu1 %v2712_v59  ;;  %1954 = vmatprep.subr.bf16.mxu0 %v2717_v60  ;;  %v2797_v59 = vld [vmem:[%s3956_s1 + $0x500] ss:$8 sps:$4 sm:$0xff]   ;;  %v2802_v60 = vld [vmem:[%s3956_s1 + $0x4f4] ss:$8 sps:$4 sm:$0xff]  }
  0x69   :  { %1995 = vmatprep.subr.bf16.mxu1 %v2720_v61  ;;  %v2805_v61 = vld [vmem:[%s3956_s1 + $0x5f4] ss:$8 sps:$4 sm:$0xff]  }
  0x6b   :  { %1955 = vmatpush2.bf16.msra.mxu0 %v2715_v62  ;;  %v2800_v62 = vld [vmem:[%s3956_s1 + $0x4f0] ss:$8 sps:$4 sm:$0xff]  }
  0x6c   :  { %1996 = vmatpush2.bf16.msra.mxu1 %v2718_v63  ;;  %1956 = vmatprep.subr.bf16.mxu0 %v2723_v0  ;;  %v2803_v63 = vld [vmem:[%s3956_s1 + $0x5f0] ss:$8 sps:$4 sm:$0xff]   ;;  %v2808_v0 = vld [vmem:[%s3956_s1 + $0x4e4] ss:$8 sps:$4 sm:$0xff]  }
  0x6d   :  { %1997 = vmatprep.subr.bf16.mxu1 %v2726_v1  ;;  %v2811_v1 = vld [vmem:[%s3956_s1 + $0x5e4] ss:$8 sps:$4 sm:$0xff]  }
  0x6f   :  { %1957 = vmatpush2.bf16.msra.mxu0 %v2721_v2  ;;  %v2806_v2 = vld [vmem:[%s3956_s1 + $0x4e0] ss:$8 sps:$4 sm:$0xff]  }
  0x70   :  { %1998 = vmatpush2.bf16.msra.mxu1 %v2724_v3  ;;  %1958 = vmatprep.subr.bf16.mxu0 %v2729_v4  ;;  %v2809_v3 = vld [vmem:[%s3956_s1 + $0x5e0] ss:$8 sps:$4 sm:$0xff]   ;;  %v2814_v4 = vld [vmem:[%s3956_s1 + $0x4d4] ss:$8 sps:$4 sm:$0xff]  }
  0x71   :  { %1999 = vmatprep.subr.bf16.mxu1 %v2732_v5  ;;  %v2817_v5 = vld [vmem:[%s3956_s1 + $0x5d4] ss:$8 sps:$4 sm:$0xff]  }
  0x73   :  { %1959 = vmatpush2.bf16.msra.mxu0 %v2727_v6  ;;  %v2812_v6 = vld [vmem:[%s3956_s1 + $0x4d0] ss:$8 sps:$4 sm:$0xff]  }
  0x74   :  { %2000 = vmatpush2.bf16.msra.mxu1 %v2730_v7  ;;  %1960 = vmatprep.subr.bf16.mxu0 %v2735_v8  ;;  %v2815_v7 = vld [vmem:[%s3956_s1 + $0x5d0] ss:$8 sps:$4 sm:$0xff]   ;;  %v2820_v8 = vld [vmem:[%s3956_s1 + $0x4c4] ss:$8 sps:$4 sm:$0xff]  }
  0x75   :  { %2001 = vmatprep.subr.bf16.mxu1 %v2738_v9  ;;  %v2823_v9 = vld [vmem:[%s3956_s1 + $0x5c4] ss:$8 sps:$4 sm:$0xff]  }
  0x77   :  { %1961 = vmatpush2.bf16.msra.mxu0 %v2733_v10  ;;  %v2818_v10 = vld [vmem:[%s3956_s1 + $0x4c0] ss:$8 sps:$4 sm:$0xff]  }
  0x78   :  { %2002 = vmatpush2.bf16.msra.mxu1 %v2736_v11  ;;  %1962 = vmatprep.subr.bf16.mxu0 %v2741_v12  ;;  %v2821_v11 = vld [vmem:[%s3956_s1 + $0x5c0] ss:$8 sps:$4 sm:$0xff]   ;;  %v2826_v12 = vld [vmem:[%s3956_s1 + $0x4b4] ss:$8 sps:$4 sm:$0xff]  }
  0x79   :  { %2003 = vmatprep.subr.bf16.mxu1 %v2744_v13  ;;  %v2829_v13 = vld [vmem:[%s3956_s1 + $0x5b4] ss:$8 sps:$4 sm:$0xff]  }
  0x7b   :  { %1963 = vmatpush2.bf16.msra.mxu0 %v2739_v14  ;;  %v2824_v14 = vld [vmem:[%s3956_s1 + $0x4b0] ss:$8 sps:$4 sm:$0xff]  }
  0x7c   :  { %2004 = vmatpush2.bf16.msra.mxu1 %v2742_v15  ;;  %1964 = vmatprep.subr.bf16.mxu0 %v2747_v16  ;;  %v2827_v15 = vld [vmem:[%s3956_s1 + $0x5b0] ss:$8 sps:$4 sm:$0xff]   ;;  %v2832_v16 = vld [vmem:[%s3956_s1 + $0x4a4] ss:$8 sps:$4 sm:$0xff]  }
  0x7d   :  { %2005 = vmatprep.subr.bf16.mxu1 %v2750_v17  ;;  %v2835_v17 = vld [vmem:[%s3956_s1 + $0x5a4] ss:$8 sps:$4 sm:$0xff]  }
  0x7f   :  { %1965 = vmatpush2.bf16.msra.mxu0 %v2745_v18  ;;  %v2830_v18 = vld [vmem:[%s3956_s1 + $0x4a0] ss:$8 sps:$4 sm:$0xff]  }
  0x80   :  { %2006 = vmatpush2.bf16.msra.mxu1 %v2748_v19  ;;  %2016 = vmatprep.subr.bf16.mxu0 %v2753_v20  ;;  %v2833_v19 = vld [vmem:[%s3956_s1 + $0x5a0] ss:$8 sps:$4 sm:$0xff]   ;;  %v2838_v20 = vld [vmem:[%s3956_s1 + $0x494] ss:$8 sps:$4 sm:$0xff]  }
  0x81   :  { %2057 = vmatprep.subr.bf16.mxu1 %v2757_v21  ;;  %v2841_v21 = vld [vmem:[%s3956_s1 + $0x594] ss:$8 sps:$4 sm:$0xff]  }
  0x82   :  { %1967 = vmatmul.mubr.bf16.vlgmr.msra.gmra.mxu0 %v3299_v39  ;;  %v2775_v39 = vld [vmem:[%s3956_s1 + $0x544] ss:$8 sps:$4 sm:$0xff]  }
  0x83   :  { %2008 = vmatmul.mubr.bf16.vlgmr.msra.gmra.mxu1 %v3310_v45  ;;  %2017 = vmatpush1.bf16.msra.mxu0 %v2751_v22  ;;  %v2776_v45 = vld [vmem:[%s3956_s1 + $0x430] ss:$8 sps:$4 sm:$0xff]  }
  0x84   :  { %2058 = vmatpush1.bf16.msra.mxu1 %v2755_v23  ;;  %2018 = vmatprep.subr.bf16.mxu0 %v2760_v24  ;;  %v2836_v22 = vld [vmem:[%s3956_s1 + $0x490] ss:$8 sps:$4 sm:$0xff]  }
  0x85   :  { %2059 = vmatprep.subr.bf16.mxu1 %v2763_v26  ;;  %2048 = vmatprep.mubr.bf16.mxu0 %v367_v30  ;;  %v2839_v23 = vld [vmem:[%s3956_s1 + $0x590] ss:$8 sps:$4 sm:$0xff]   ;;  %v2847_v26 = vld [vmem:[%s3956_s1 + $0x584] ss:$8 sps:$4 sm:$0xff]   ;;  %v2845_v30 = vld [vmem:[%s3956_s1 + $0x580] ss:$8 sps:$4 sm:$0xff]  }
  0x86   :  { %2089 = vmatprep.mubr.bf16.mxu1 %v368_v35  ;;  %v23_v24 = vld [vmem:[%s3957_s0 + $0x18] sm:$0xff] }
  0x87   :  { %2019 = vmatpush1.bf16.msra.mxu0 %v2758_v29  ;;  %v369_v28 = vcombine.high %v23_v24, %v23_v24  ;;  %v2842_v29 = vld [vmem:[%s3956_s1 + $0x480] ss:$8 sps:$4 sm:$0xff]  }
  0x88   :  { %2060 = vmatpush1.bf16.msra.mxu1 %v2761_v32  ;;  %2020 = vmatprep.subr.bf16.mxu0 %v2766_v33  ;;  %v2850_v32 = vld [vmem:[%s3956_s1 + $0x674] ss:$8 sps:$4 sm:$0xff]  }
  0x89   :  { %2061 = vmatprep.subr.bf16.mxu1 %v2769_v34  ;;  %v2854_v33 = vld [vmem:[%s3956_s1 + $0x774] ss:$8 sps:$4 sm:$0xff]   ;;  %v3639_v34 = vrot.slane %v23_v24, %v3150_v49  ;;  %v3642_v35 = vrot.slane %v369_v28, %v3150_v49  ;;  %v2860_v49 = vld [vmem:[%s3956_s1 + $0x764] ss:$8 sps:$4 sm:$0xff]  }
  0x8a   :  { %v2932_v24 = vld [vmem:[%s3956_s1 + $0x7a4] ss:$8 sps:$4 sm:$0xff]   ;;  %v2935_v28 = vld [vmem:[%s3956_s1 + $0x694] ss:$8 sps:$4 sm:$0xff]  }
  0x8b   :  { %2021 = vmatpush1.bf16.msra.mxu0 %v2764_v36  ;;  %v2848_v36 = vld [vmem:[%s3956_s1 + $0x670] ss:$8 sps:$4 sm:$0xff]  }
  0x8c   :  { %2062 = vmatpush1.bf16.msra.mxu1 %v2767_v37  ;;  %2022 = vmatprep.subr.bf16.mxu0 %v2772_v38  ;;  %v2852_v37 = vld [vmem:[%s3956_s1 + $0x770] ss:$8 sps:$4 sm:$0xff]   ;;  %v2857_v38 = vld [vmem:[%s3956_s1 + $0x664] ss:$8 sps:$4 sm:$0xff]  }
  0x8d   :  { %2063 = vmatprep.subr.bf16.mxu1 %v2775_v39  ;;  %v384_v39 = vcombine.high %v3639_v34, %v3639_v34 }
  0x8f   :  { %2023 = vmatpush1.bf16.msra.mxu0 %v2770_v40  ;;  %v385_v40 = vcombine.high %v3642_v35, %v3642_v35 }
  0x90   :  { %2064 = vmatpush1.bf16.msra.mxu1 %v2773_v41  ;;  %2024 = vmatprep.subr.bf16.mxu0 %v2778_v42  ;;  %v2855_v41 = vld [vmem:[%s3956_s1 + $0x660] ss:$8 sps:$4 sm:$0xff]  }
  0x91   :  { %2065 = vmatprep.subr.bf16.mxu1 %v2781_v44  ;;  %v2858_v42 = vld [vmem:[%s3956_s1 + $0x760] ss:$8 sps:$4 sm:$0xff]   ;;  %v2863_v44 = vld [vmem:[%s3956_s1 + $0x654] ss:$8 sps:$4 sm:$0xff]  }
  0x93   :  { %2025 = vmatpush1.bf16.msra.mxu0 %v2776_v45  ;;  %v2864_v45 = vld [vmem:[%s3956_s1 + $0x750] ss:$8 sps:$4 sm:$0xff]  }
  0x94   :  { %2066 = vmatpush1.bf16.msra.mxu1 %v2779_v46  ;;  %2026 = vmatprep.subr.bf16.mxu0 %v2784_v47  ;;  %v2869_v46 = vld [vmem:[%s3956_s1 + $0x644] ss:$8 sps:$4 sm:$0xff]  }
  0x95   :  { %2067 = vmatprep.subr.bf16.mxu1 %v2787_v48  ;;  %v2872_v47 = vld [vmem:[%s3956_s1 + $0x744] ss:$8 sps:$4 sm:$0xff]   ;;  %v2867_v48 = vld [vmem:[%s3956_s1 + $0x640] ss:$8 sps:$4 sm:$0xff]  }
  0x97   :  { %2027 = vmatpush1.bf16.msra.mxu0 %v2782_v50  ;;  %v2870_v50 = vld [vmem:[%s3956_s1 + $0x740] ss:$8 sps:$4 sm:$0xff]  }
  0x98   :  { %2068 = vmatpush1.bf16.msra.mxu1 %v2785_v51  ;;  %2028 = vmatprep.subr.bf16.mxu0 %v2790_v52  ;;  %v2875_v51 = vld [vmem:[%s3956_s1 + $0x634] ss:$8 sps:$4 sm:$0xff]  }
  0x99   :  { %2069 = vmatprep.subr.bf16.mxu1 %v2793_v53  ;;  %v2878_v52 = vld [vmem:[%s3956_s1 + $0x734] ss:$8 sps:$4 sm:$0xff]   ;;  %v2873_v53 = vld [vmem:[%s3956_s1 + $0x630] ss:$8 sps:$4 sm:$0xff]  }
  0x9b   :  { %2029 = vmatpush1.bf16.msra.mxu0 %v2788_v54  ;;  %v2876_v54 = vld [vmem:[%s3956_s1 + $0x730] ss:$8 sps:$4 sm:$0xff]  }
  0x9c   :  { %2070 = vmatpush1.bf16.msra.mxu1 %v2791_v55  ;;  %2030 = vmatprep.subr.bf16.mxu0 %v2796_v56  ;;  %v2881_v55 = vld [vmem:[%s3956_s1 + $0x624] ss:$8 sps:$4 sm:$0xff]  }
  0x9d   :  { %2071 = vmatprep.subr.bf16.mxu1 %v2799_v57  ;;  %v2884_v56 = vld [vmem:[%s3956_s1 + $0x724] ss:$8 sps:$4 sm:$0xff]   ;;  %v2879_v57 = vld [vmem:[%s3956_s1 + $0x620] ss:$8 sps:$4 sm:$0xff]  }
  0x9f   :  { %2031 = vmatpush1.bf16.msra.mxu0 %v2794_v58  ;;  %v2882_v58 = vld [vmem:[%s3956_s1 + $0x720] ss:$8 sps:$4 sm:$0xff]  }
  0xa0   :  { %2072 = vmatpush1.bf16.msra.mxu1 %v2797_v59  ;;  %2032 = vmatprep.subr.bf16.mxu0 %v2802_v60  ;;  %v2887_v59 = vld [vmem:[%s3956_s1 + $0x614] ss:$8 sps:$4 sm:$0xff]  }
  0xa1   :  { %2073 = vmatprep.subr.bf16.mxu1 %v2805_v61  ;;  %v2890_v60 = vld [vmem:[%s3956_s1 + $0x714] ss:$8 sps:$4 sm:$0xff]   ;;  %v2885_v61 = vld [vmem:[%s3956_s1 + $0x610] ss:$8 sps:$4 sm:$0xff]  }
  0xa3   :  { %2033 = vmatpush2.bf16.msra.mxu0 %v2800_v62  ;;  %v2888_v62 = vld [vmem:[%s3956_s1 + $0x710] ss:$8 sps:$4 sm:$0xff]  }
  0xa4   :  { %2074 = vmatpush2.bf16.msra.mxu1 %v2803_v63  ;;  %2034 = vmatprep.subr.bf16.mxu0 %v2808_v0  ;;  %v2893_v63 = vld [vmem:[%s3956_s1 + $0x604] ss:$8 sps:$4 sm:$0xff]  }
  0xa5   :  { %2075 = vmatprep.subr.bf16.mxu1 %v2811_v1  ;;  %v2896_v0 = vld [vmem:[%s3956_s1 + $0x704] ss:$8 sps:$4 sm:$0xff]   ;;  %v2891_v1 = vld [vmem:[%s3956_s1 + $0x600] ss:$8 sps:$4 sm:$0xff]  }
  0xa7   :  { %2035 = vmatpush2.bf16.msra.mxu0 %v2806_v2  ;;  %v2894_v2 = vld [vmem:[%s3956_s1 + $0x700] ss:$8 sps:$4 sm:$0xff]  }
  0xa8   :  { %2076 = vmatpush2.bf16.msra.mxu1 %v2809_v3  ;;  %2036 = vmatprep.subr.bf16.mxu0 %v2814_v4  ;;  %v2899_v3 = vld [vmem:[%s3956_s1 + $0x6f4] ss:$8 sps:$4 sm:$0xff]  }
  0xa9   :  { %2077 = vmatprep.subr.bf16.mxu1 %v2817_v5  ;;  %v2902_v4 = vld [vmem:[%s3956_s1 + $0x7f4] ss:$8 sps:$4 sm:$0xff]   ;;  %v2897_v5 = vld [vmem:[%s3956_s1 + $0x6f0] ss:$8 sps:$4 sm:$0xff]  }
  0xab   :  { %2037 = vmatpush2.bf16.msra.mxu0 %v2812_v6  ;;  %v2900_v6 = vld [vmem:[%s3956_s1 + $0x7f0] ss:$8 sps:$4 sm:$0xff]  }
  0xac   :  { %2078 = vmatpush2.bf16.msra.mxu1 %v2815_v7  ;;  %2038 = vmatprep.subr.bf16.mxu0 %v2820_v8  ;;  %v2905_v7 = vld [vmem:[%s3956_s1 + $0x6e4] ss:$8 sps:$4 sm:$0xff]  }
  0xad   :  { %2079 = vmatprep.subr.bf16.mxu1 %v2823_v9  ;;  %v2908_v8 = vld [vmem:[%s3956_s1 + $0x7e4] ss:$8 sps:$4 sm:$0xff]   ;;  %v2903_v9 = vld [vmem:[%s3956_s1 + $0x6e0] ss:$8 sps:$4 sm:$0xff]  }
  0xaf   :  { %2039 = vmatpush2.bf16.msra.mxu0 %v2818_v10  ;;  %v2906_v10 = vld [vmem:[%s3956_s1 + $0x7e0] ss:$8 sps:$4 sm:$0xff]  }
  0xb0   :  { %2080 = vmatpush2.bf16.msra.mxu1 %v2821_v11  ;;  %2040 = vmatprep.subr.bf16.mxu0 %v2826_v12  ;;  %v2911_v11 = vld [vmem:[%s3956_s1 + $0x6d4] ss:$8 sps:$4 sm:$0xff]  }
  0xb1   :  { %2081 = vmatprep.subr.bf16.mxu1 %v2829_v13  ;;  %v2914_v12 = vld [vmem:[%s3956_s1 + $0x7d4] ss:$8 sps:$4 sm:$0xff]   ;;  %v2909_v13 = vld [vmem:[%s3956_s1 + $0x6d0] ss:$8 sps:$4 sm:$0xff]  }
  0xb3   :  { %2041 = vmatpush2.bf16.msra.mxu0 %v2824_v14  ;;  %v2912_v14 = vld [vmem:[%s3956_s1 + $0x7d0] ss:$8 sps:$4 sm:$0xff]  }
  0xb4   :  { %2082 = vmatpush2.bf16.msra.mxu1 %v2827_v15  ;;  %2042 = vmatprep.subr.bf16.mxu0 %v2832_v16  ;;  %v2917_v15 = vld [vmem:[%s3956_s1 + $0x6c4] ss:$8 sps:$4 sm:$0xff]  }
  0xb5   :  { %2083 = vmatprep.subr.bf16.mxu1 %v2835_v17  ;;  %v2920_v16 = vld [vmem:[%s3956_s1 + $0x7c4] ss:$8 sps:$4 sm:$0xff]   ;;  %v2915_v17 = vld [vmem:[%s3956_s1 + $0x6c0] ss:$8 sps:$4 sm:$0xff]  }
  0xb7   :  { %2043 = vmatpush2.bf16.msra.mxu0 %v2830_v18  ;;  %v2918_v18 = vld [vmem:[%s3956_s1 + $0x7c0] ss:$8 sps:$4 sm:$0xff]  }
  0xb8   :  { %2084 = vmatpush2.bf16.msra.mxu1 %v2833_v19  ;;  %2044 = vmatprep.subr.bf16.mxu0 %v2838_v20  ;;  %v2923_v19 = vld [vmem:[%s3956_s1 + $0x6b4] ss:$8 sps:$4 sm:$0xff]  }
  0xb9   :  { %2085 = vmatprep.subr.bf16.mxu1 %v2841_v21  ;;  %v2926_v20 = vld [vmem:[%s3956_s1 + $0x7b4] ss:$8 sps:$4 sm:$0xff]   ;;  %v2921_v21 = vld [vmem:[%s3956_s1 + $0x6b0] ss:$8 sps:$4 sm:$0xff]  }
  0xbb   :  { %2045 = vmatpush2.bf16.msra.mxu0 %v2836_v22  ;;  %v2924_v22 = vld [vmem:[%s3956_s1 + $0x7b0] ss:$8 sps:$4 sm:$0xff]  }
  0xbc   :  { %2086 = vmatpush2.bf16.msra.mxu1 %v2839_v23  ;;  %2046 = vmatprep.subr.bf16.mxu0 %v2844_v25  ;;  %v2929_v23 = vld [vmem:[%s3956_s1 + $0x6a4] ss:$8 sps:$4 sm:$0xff]   ;;  %v2927_v25 = vld [vmem:[%s3956_s1 + $0x6a0] ss:$8 sps:$4 sm:$0xff]  }
  0xbd   :  { %2087 = vmatprep.subr.bf16.mxu1 %v2847_v26  ;;  %v2930_v26 = vld [vmem:[%s3956_s1 + $0x7a0] ss:$8 sps:$4 sm:$0xff]  }
  0xbf   :  { %2047 = vmatpush2.bf16.msra.mxu0 %v2842_v29  ;;  %v2938_v29 = vld [vmem:[%s3956_s1 + $0x794] ss:$8 sps:$4 sm:$0xff]  }
  0xc0   :  { %2088 = vmatpush2.bf16.msra.mxu1 %v2845_v30  ;;  %2098 = vmatprep.subr.bf16.mxu0 %v2850_v32  ;;  %v2933_v30 = vld [vmem:[%s3956_s1 + $0x690] ss:$8 sps:$4 sm:$0xff]  }
  0xc1   :  { %2139 = vmatprep.subr.bf16.mxu1 %v2854_v33  ;;  %v2936_v32 = vld [vmem:[%s3956_s1 + $0x790] ss:$8 sps:$4 sm:$0xff]   ;;  %v2941_v33 = vld [vmem:[%s3956_s1 + $0x684] ss:$8 sps:$4 sm:$0xff]  }
  0xc2   :  { %2049 = vmatmul.mubr.bf16.vlgmr.msra.gmra.mxu0 %v3444_v27  ;;  %v2866_v27 = vld [vmem:[%s3956_s1 + $0x754] ss:$8 sps:$4 sm:$0xff]  }
  0xc3   :  { %2090 = vmatmul.mubr.bf16.vlgmr.msra.gmra.mxu1 %v3454_v31  ;;  %2099 = vmatpush1.bf16.msra.mxu0 %v2848_v36  ;;  %v2861_v31 = vld [vmem:[%s3956_s1 + $0x650] ss:$8 sps:$4 sm:$0xff]   ;;  %v2944_v36 = vld [vmem:[%s3956_s1 + $0x784] ss:$8 sps:$4 sm:$0xff]  }
  0xc4   :  { %2140 = vmatpush1.bf16.msra.mxu1 %v2852_v37  ;;  %2100 = vmatprep.subr.bf16.mxu0 %v2857_v38  ;;  %v2939_v37 = vld [vmem:[%s3956_s1 + $0x680] ss:$8 sps:$4 sm:$0xff]  }
  0xc5   :  { %2141 = vmatprep.subr.bf16.mxu1 %v2860_v49  ;;  %2130 = vmatprep.mubr.bf16.mxu0 %v384_v39  ;;  %v2942_v38 = vld [vmem:[%s3956_s1 + $0x780] ss:$8 sps:$4 sm:$0xff]   ;;  %v2947_v49 = vld [vmem:[%s3956_s1 + $0x874] ss:$8 sps:$4 sm:$0xff]  }
  0xc6   :  { %2171 = vmatprep.mubr.bf16.mxu1 %v385_v40  ;;  %v3842_v39 = vld.sshfl [vmem:[%s3957_s0 + $0x20] sm:$0x33 pattern:$0x76325410]  ;;  %v2945_v40 = vld [vmem:[%s3956_s1 + $0x870] ss:$8 sps:$4 sm:$0xff]  }
  0xc7   :  { %2101 = vmatpush1.bf16.msra.mxu0 %v2855_v41  ;;  %v393_v41 = vcombine.high %v3842_v39, %v3842_v39 }
  0xc8   :  { %2142 = vmatpush1.bf16.msra.mxu1 %v2858_v42  ;;  %2102 = vmatprep.subr.bf16.mxu0 %v2863_v44  ;;  %v2951_v42 = vld [vmem:[%s3956_s1 + $0x864] ss:$8 sps:$4 sm:$0xff]  }
  0xc9   :  { %2143 = vmatprep.subr.bf16.mxu1 %v2866_v27 }
  0xcb   :  { %2103 = vmatpush1.bf16.msra.mxu0 %v2861_v31 }
  0xcc   :  { %2144 = vmatpush1.bf16.msra.mxu1 %v2864_v45  ;;  %2104 = vmatprep.subr.bf16.mxu0 %v2869_v46  ;;  %v2949_v45 = vld [vmem:[%s3956_s1 + $0x860] ss:$8 sps:$4 sm:$0xff]  }
  0xcd   :  { %2145 = vmatprep.subr.bf16.mxu1 %v2872_v47 }
  0xcf   :  { %2105 = vmatpush1.bf16.msra.mxu0 %v2867_v48  ;;  %v2954_v48 = vld [vmem:[%s3956_s1 + $0x854] ss:$8 sps:$4 sm:$0xff]  }
  0xd0   :  { %2146 = vmatpush1.bf16.msra.mxu1 %v2870_v50  ;;  %2106 = vmatprep.subr.bf16.mxu0 %v2875_v51 }
  0xd1   :  { %2147 = vmatprep.subr.bf16.mxu1 %v2878_v52 }
  0xd3   :  { %2107 = vmatpush1.bf16.msra.mxu0 %v2873_v53  ;;  %v2957_v53 = vld [vmem:[%s3956_s1 + $0x844] ss:$8 sps:$4 sm:$0xff]  }
  0xd4   :  { %2148 = vmatpush1.bf16.msra.mxu1 %v2876_v54  ;;  %2108 = vmatprep.subr.bf16.mxu0 %v2881_v55  ;;  %v2955_v55 = vld [vmem:[%s3956_s1 + $0x840] ss:$8 sps:$4 sm:$0xff]  }
  0xd5   :  { %2149 = vmatprep.subr.bf16.mxu1 %v2884_v56  ;;  %v2960_v56 = vld [vmem:[%s3956_s1 + $0x834] ss:$8 sps:$4 sm:$0xff]  }
  0xd7   :  { %2109 = vmatpush1.bf16.msra.mxu0 %v2879_v57  ;;  %v2958_v57 = vld [vmem:[%s3956_s1 + $0x830] ss:$8 sps:$4 sm:$0xff]  }
  0xd8   :  { %2150 = vmatpush1.bf16.msra.mxu1 %v2882_v58  ;;  %2110 = vmatprep.subr.bf16.mxu0 %v2887_v59  ;;  %v2963_v58 = vld [vmem:[%s3956_s1 + $0x824] ss:$8 sps:$4 sm:$0xff]   ;;  %v2961_v59 = vld [vmem:[%s3956_s1 + $0x820] ss:$8 sps:$4 sm:$0xff]  }
  0xd9   :  { %2151 = vmatprep.subr.bf16.mxu1 %v2890_v60  ;;  %v2966_v60 = vld [vmem:[%s3956_s1 + $0x814] ss:$8 sps:$4 sm:$0xff]  }
  0xdb   :  { %2111 = vmatpush1.bf16.msra.mxu0 %v2885_v61  ;;  %v2964_v61 = vld [vmem:[%s3956_s1 + $0x810] ss:$8 sps:$4 sm:$0xff]  }
  0xdc   :  { %2152 = vmatpush1.bf16.msra.mxu1 %v2888_v62  ;;  %2112 = vmatprep.subr.bf16.mxu0 %v2893_v63  ;;  %v2969_v62 = vld [vmem:[%s3956_s1 + $0x804] ss:$8 sps:$4 sm:$0xff]   ;;  %v2967_v63 = vld [vmem:[%s3956_s1 + $0x800] ss:$8 sps:$4 sm:$0xff]  }
  0xdd   :  { %2153 = vmatprep.subr.bf16.mxu1 %v2896_v0  ;;  %v2972_v0 = vld [vmem:[%s3956_s1 + $0x8f4] ss:$8 sps:$4 sm:$0xff]  }
  0xdf   :  { %2113 = vmatpush1.bf16.msra.mxu0 %v2891_v1  ;;  %v2970_v1 = vld [vmem:[%s3956_s1 + $0x8f0] ss:$8 sps:$4 sm:$0xff]  }
  0xe0   :  { %2154 = vmatpush1.bf16.msra.mxu1 %v2894_v2  ;;  %2114 = vmatprep.subr.bf16.mxu0 %v2899_v3  ;;  %v2975_v2 = vld [vmem:[%s3956_s1 + $0x8e4] ss:$8 sps:$4 sm:$0xff]   ;;  %v2973_v3 = vld [vmem:[%s3956_s1 + $0x8e0] ss:$8 sps:$4 sm:$0xff]  }
  0xe1   :  { %2155 = vmatprep.subr.bf16.mxu1 %v2902_v4  ;;  %v2978_v4 = vld [vmem:[%s3956_s1 + $0x8d4] ss:$8 sps:$4 sm:$0xff]  }
  0xe3   :  { %2115 = vmatpush2.bf16.msra.mxu0 %v2897_v5  ;;  %v2976_v5 = vld [vmem:[%s3956_s1 + $0x8d0] ss:$8 sps:$4 sm:$0xff]  }
  0xe4   :  { %2156 = vmatpush2.bf16.msra.mxu1 %v2900_v6  ;;  %2116 = vmatprep.subr.bf16.mxu0 %v2905_v7  ;;  %v2981_v6 = vld [vmem:[%s3956_s1 + $0x8c4] ss:$8 sps:$4 sm:$0xff]   ;;  %v2979_v7 = vld [vmem:[%s3956_s1 + $0x8c0] ss:$8 sps:$4 sm:$0xff]  }
  0xe5   :  { %2157 = vmatprep.subr.bf16.mxu1 %v2908_v8  ;;  %v2984_v8 = vld [vmem:[%s3956_s1 + $0x8b4] ss:$8 sps:$4 sm:$0xff]  }
  0xe7   :  { %2117 = vmatpush2.bf16.msra.mxu0 %v2903_v9  ;;  %v2982_v9 = vld [vmem:[%s3956_s1 + $0x8b0] ss:$8 sps:$4 sm:$0xff]  }
  0xe8   :  { %2158 = vmatpush2.bf16.msra.mxu1 %v2906_v10  ;;  %2118 = vmatprep.subr.bf16.mxu0 %v2911_v11  ;;  %v2987_v10 = vld [vmem:[%s3956_s1 + $0x8a4] ss:$8 sps:$4 sm:$0xff]   ;;  %v2985_v11 = vld [vmem:[%s3956_s1 + $0x8a0] ss:$8 sps:$4 sm:$0xff]  }
  0xe9   :  { %2159 = vmatprep.subr.bf16.mxu1 %v2914_v12  ;;  %v2990_v12 = vld [vmem:[%s3956_s1 + $0x894] ss:$8 sps:$4 sm:$0xff]  }
  0xeb   :  { %2119 = vmatpush2.bf16.msra.mxu0 %v2909_v13  ;;  %v2988_v13 = vld [vmem:[%s3956_s1 + $0x890] ss:$8 sps:$4 sm:$0xff]  }
  0xec   :  { %2160 = vmatpush2.bf16.msra.mxu1 %v2912_v14  ;;  %2120 = vmatprep.subr.bf16.mxu0 %v2917_v15  ;;  %v2993_v14 = vld [vmem:[%s3956_s1 + $0x884] ss:$8 sps:$4 sm:$0xff]   ;;  %v2991_v15 = vld [vmem:[%s3956_s1 + $0x880] ss:$8 sps:$4 sm:$0xff]  }
  0xed   :  { %2161 = vmatprep.subr.bf16.mxu1 %v2920_v16 }
  0xef   :  { %2121 = vmatpush2.bf16.msra.mxu0 %v2915_v17 }
  0xf0   :  { %2162 = vmatpush2.bf16.msra.mxu1 %v2918_v18  ;;  %2122 = vmatprep.subr.bf16.mxu0 %v2923_v19 }
  0xf1   :  { %2163 = vmatprep.subr.bf16.mxu1 %v2926_v20 }
  0xf3   :  { %2123 = vmatpush2.bf16.msra.mxu0 %v2921_v21 }
  0xf4   :  { %2164 = vmatpush2.bf16.msra.mxu1 %v2924_v22  ;;  %2124 = vmatprep.subr.bf16.mxu0 %v2929_v23 }
  0xf5   :  { %2165 = vmatprep.subr.bf16.mxu1 %v2932_v24 }
  0xf7   :  { %2125 = vmatpush2.bf16.msra.mxu0 %v2927_v25 }
  0xf8   :  { %2166 = vmatpush2.bf16.msra.mxu1 %v2930_v26  ;;  %2126 = vmatprep.subr.bf16.mxu0 %v2935_v28 }
  0xf9   :  { %2167 = vmatprep.subr.bf16.mxu1 %v2938_v29 }
  0xfb   :  { %2127 = vmatpush2.bf16.msra.mxu0 %v2933_v30 }
  0xfc   :  { %2168 = vmatpush2.bf16.msra.mxu1 %v2936_v32  ;;  %2128 = vmatprep.subr.bf16.mxu0 %v2941_v33 }
  0xfd   :  { %2169 = vmatprep.subr.bf16.mxu1 %v2944_v36 }
  0xff   :  { %2129 = vmatpush2.bf16.msra.mxu0 %v2939_v37 }
 0x100   :  { %2170 = vmatpush2.bf16.msra.mxu1 %v2942_v38  ;;  %2180 = vmatprep.subr.bf16.mxu0 %v2947_v49 }
 0x102   :  { %v1886_v44 = vpop.f32.mrf.mxu0  ;;  %2131 = vmatmul.mubr.bf16.vlgmr.msra.gmra.mxu0 %v3639_v34 }
 0x103   :  { %v1927_v27 = vpop.f32.mrf.mxu1  ;;  %2172 = vmatmul.mubr.bf16.vlgmr.msra.gmra.mxu1 %v3642_v35  ;;  %2181 = vmatpush1.bf16.msra.mxu0 %v2945_v40  ;;  %v2952_v35 = vld [vmem:[%s3956_s1 + $0x850] ss:$8 sps:$4 sm:$0xff]  }
 0x104   :  { %v3854_v31 = vadd.f32 %v1927_v27, %v1886_v44  ;;  %2212 = vmatprep.mubr.bf16.mxu0 %v393_v41  ;;  %v1888_v46 = vpop.f32.mrf.mxu0  ;;  %2182 = vmatprep.subr.bf16.mxu0 %v2951_v42 }
 0x105   :  { %v1929_v47 = vpop.f32.mrf.mxu1 }
 0x106   :  { %v3862_v50 = vadd.f32 %v1929_v47, %v1888_v46  ;;  %v1890_v34 = vpop.f32.mrf.mxu0 }
 0x107   :  { %v1931_v51 = vpop.f32.mrf.mxu1  ;;  %2183 = vmatpush1.bf16.msra.mxu0 %v2949_v45 }
 0x108   :  { %v1891_v52 = vpop.f32.mrf.mxu0  ;;  %2184 = vmatprep.subr.bf16.mxu0 %v2954_v48 }
 0x109   :  { %v1932_v54 = vpop.f32.mrf.mxu1  ;;  %v2239_v52 = vsub.s32 1, %v3132_v43 }
 0x10b   :  { %2185 = vmatpush1.bf16.msra.mxu0 %v2952_v35  ;;  %v2235_v35 = vsub.s32 0, %v3132_v43 }
 0x10c   :  { %2186 = vmatprep.subr.bf16.mxu0 %v2957_v53  ;;  %v2231_v53 = vld [vmem:[%s3958_s2] sm:$0x3] }
 0x10f   :  { %2187 = vmatpush1.bf16.msra.mxu0 %v2955_v55  ;;  %v2236_v55 = vrot.slane %v2231_v53, %v2235_v35 }
 0x110   :  { %2188 = vmatprep.subr.bf16.mxu0 %v2960_v56  ;;  %v2240_v56 = vrot.slane %v2231_v53, %v2239_v52 }
 0x113   :  { %2189 = vmatpush1.bf16.msra.mxu0 %v2958_v57 }
 0x114   :  { %2190 = vmatprep.subr.bf16.mxu0 %v2963_v58 }
 0x117   :  { %2191 = vmatpush1.bf16.msra.mxu0 %v2961_v59 }
 0x118   :  { %2192 = vmatprep.subr.bf16.mxu0 %v2966_v60 }
 0x11b   :  { %2193 = vmatpush1.bf16.msra.mxu0 %v2964_v61 }
 0x11c   :  { %2194 = vmatprep.subr.bf16.mxu0 %v2969_v62  ;;  %v2241_v62 = vcombine.low %v2236_v55, %v2240_v56 }
 0x11f   :  { %2195 = vmatpush1.bf16.msra.mxu0 %v2967_v63 }
 0x120   :  { %2196 = vmatprep.subr.bf16.mxu0 %v2972_v0 }
 0x123   :  { %2197 = vmatpush2.bf16.msra.mxu0 %v2970_v1 }
 0x124   :  { %2198 = vmatprep.subr.bf16.mxu0 %v2975_v2 }
 0x127   :  { %2199 = vmatpush2.bf16.msra.mxu0 %v2973_v3 }
 0x128   :  { %2200 = vmatprep.subr.bf16.mxu0 %v2978_v4 }
 0x12b   :  { %2201 = vmatpush2.bf16.msra.mxu0 %v2976_v5 }
 0x12c   :  { %2202 = vmatprep.subr.bf16.mxu0 %v2981_v6 }
 0x12f   :  { %2203 = vmatpush2.bf16.msra.mxu0 %v2979_v7 }
 0x130   :  { %2204 = vmatprep.subr.bf16.mxu0 %v2984_v8 }
 0x133   :  { %2205 = vmatpush2.bf16.msra.mxu0 %v2982_v9 }
 0x134   :  { %2206 = vmatprep.subr.bf16.mxu0 %v2987_v10 }
 0x137   :  { %2207 = vmatpush2.bf16.msra.mxu0 %v2985_v11 }
 0x138   :  { %2208 = vmatprep.subr.bf16.mxu0 %v2990_v12 }
 0x13b   :  { %2209 = vmatpush2.bf16.msra.mxu0 %v2988_v13 }
 0x13c   :  { %2210 = vmatprep.subr.bf16.mxu0 %v2993_v14 }
 0x13f   :  { %2211 = vmatpush2.bf16.msra.mxu0 %v2991_v15 }
 0x142   :  { %v1968_v16 = vpop.f32.mrf.mxu0  ;;  %2213 = vmatmul.mubr.bf16.vlgmr.msra.gmra.mxu0 %v3842_v39 }
 0x143   :  { %v2009_v17 = vpop.f32.mrf.mxu1  ;;  %v1969_v18 = vadd.f32 %v1968_v16, %v3854_v31 }
 0x144   :  { %v1970_v19 = vpop.f32.mrf.mxu0 }
 0x145   :  { %v2011_v20 = vpop.f32.mrf.mxu1  ;;  %v1971_v21 = vadd.f32 %v1970_v19, %v3862_v50  ;;  %v2010_v22 = vadd.f32 %v2009_v17, %v1969_v18 }
 0x146   :  { %v1972_v23 = vpop.f32.mrf.mxu0 }
 0x147   :  { %v2013_v24 = vpop.f32.mrf.mxu1  ;;  %v2012_v25 = vadd.f32 %v2011_v20, %v1971_v21 }
 0x148   :  { %v1973_v26 = vpop.f32.mrf.mxu0 }
 0x149   :  { %v2014_v28 = vpop.f32.mrf.mxu1 }
 0x182   :  { %v2050_v29 = vpop.f32.mrf.mxu0 }
 0x183   :  { %v2091_v30 = vpop.f32.mrf.mxu1  ;;  %v2051_v32 = vadd.f32 %v2050_v29, %v2010_v22 }
 0x184   :  { %v2052_v33 = vpop.f32.mrf.mxu0 }
 0x185   :  { %v2093_v36 = vpop.f32.mrf.mxu1  ;;  %v2053_v37 = vadd.f32 %v2052_v33, %v2012_v25  ;;  %v2092_v38 = vadd.f32 %v2091_v30, %v2051_v32 }
 0x186   :  { %v2054_v49 = vpop.f32.mrf.mxu0 }
 0x187   :  { %v2095_v39 = vpop.f32.mrf.mxu1  ;;  %v2094_v40 = vadd.f32 %v2093_v36, %v2053_v37 }
 0x188   :  { %v2055_v41 = vpop.f32.mrf.mxu0 }
 0x189   :  { %v2096_v42 = vpop.f32.mrf.mxu1 }
 0x1c2   :  { %v2132_v44 = vpop.f32.mrf.mxu0 }
 0x1c3   :  { %v2173_v27 = vpop.f32.mrf.mxu1  ;;  %v2133_v31 = vadd.f32 %v2132_v44, %v2092_v38 }
 0x1c4   :  { %v2134_v45 = vpop.f32.mrf.mxu0 }
 0x1c5   :  { %v2175_v46 = vpop.f32.mrf.mxu1  ;;  %v2174_v47 = vadd.f32 %v2173_v27, %v2133_v31  ;;  %v2135_v54 = vadd.f32 %v2134_v45, %v2094_v40 }
 0x1c6   :  { %v2136_v48 = vpop.f32.mrf.mxu0 }
 0x1c7   :  { %v2177_v50 = vpop.f32.mrf.mxu1  ;;  %v2176_v58 = vadd.f32 %v2175_v46, %v2135_v54 }
 0x1c8   :  { %v2137_v34 = vpop.f32.mrf.mxu0 }
 0x1c9   :  { %v2178_v51 = vpop.f32.mrf.mxu1 }
 0x202   :  { %v2214_v57 = vpop.f32.mrf.mxu0 }
 0x203   :  { %v2215_v60 = vadd.f32 %v2214_v57, %v2174_v47 }
 0x204   :  { %v2216_v59 = vpop.f32.mrf.mxu0 }
 0x205   :  { %v2217_v61 = vadd.f32 %v2216_v59, %v2176_v58 }
 0x206   :  { %v2218_v63 = vpop.f32.mrf.mxu0 }
 0x207   :  { %v2223_v0 = vcombine.low %v2215_v60, %v2217_v61 }
 0x208   :  { %v2219_v1 = vpop.f32.mrf.mxu0 }
 0x209   :  { %v2243_v2 = vadd.f32 %v2241_v62, %v2223_v0 }
 0x20b   :  { %v2244_v3 = vmax.f32 %v2243_v2, 0.0 }
 0x20d   :  { %v2246_v4 = vcombine.high %v2244_v3, %v2244_v3 }
 0x20f   :  { %v2555_v43 = vpack.c.bf16 %v2246_v4, %v2244_v3 }
 0x211   :  { %2556 = vst.sshfl [vmem:[%s3959_s3] sm:$0x33 pattern:$0x76325410] %v2555_v43 }

</bundles_post_ra>
